<compile_context>
chip_gen: v7x
topology: tpu7x:2x2x1
jax: 0.10.0
libtpu: 0.0.40
codegen_flags: <defaults>
</compile_context>

<pallas_src>
import functools

import numpy as np

import jax
import jax.numpy as jnp
from jax.experimental import pallas as pl
from jax.experimental.pallas import tpu as pltpu

K_SIZE = 4        # all convs are 4x4
STRIDE = 2        # stride-2 down / up sampling
PAD = 1           # padding 1
EPS = 1e-5        # BatchNorm eps
LRELU_SLOPE = 0.2
NTAPS = K_SIZE * K_SIZE

INPUT_NC = 3
OUTPUT_NC = 3
NGF = 8           # small ngf for the demo (64 in the reference module)
NUM_DOWNS = 5     # 32x32 input -> 1x1 bottleneck

CPAD = 128        # channel axis padded to one full 128-lane vreg
CIN0_PAD = 8      # layer-0 input channels padded 3 -> 8 so K0 = 16*8 = 128

# (kind, in_c, out_c, use_bn, trailing activation) -- executed forward prefix
LAYER_SPECS = (
    ("down", INPUT_NC, NGF,     False, "lrelu"),   # outermost downconv + LeakyReLU
    ("down", NGF,      NGF * 2, True,  "lrelu"),   # down block A
    ("down", NGF * 2,  NGF * 4, True,  "lrelu"),   # down block B
    ("down", NGF * 4,  NGF * 8, True,  "lrelu"),   # down block C
    ("down", NGF * 8,  NGF * 8, False, "relu"),    # innermost downconv + ReLU
    ("up",   NGF * 8,  NGF * 8, True,  "relu"),    # innermost upconv + BN + ReLU
    ("up",   NGF * 8,  NGF * 4, False, "none"),    # block-C upconv (forward stops here)
)


# ----------------------------------------------------------------------------
# small shared helpers
# ----------------------------------------------------------------------------
def _apply_act(y, act):
    if act == "lrelu":
        return jnp.where(y >= 0.0, y, LRELU_SLOPE * y)
    if act == "relu":
        return jnp.maximum(y, 0.0)
    if act == "tanh":
        return jnp.tanh(y)
    return y


def _pad_rows(n):
    """Pad row counts to a multiple of 16 (full bf16 vreg sublane packing)."""
    return max(16, -(-n // 16) * 16)


def _full_spec(shape):
    return pl.BlockSpec(tuple(shape), lambda *_: (0,) * len(shape))


# ----------------------------------------------------------------------------
# host-side one-time packing: weights, BN params, tap selection matrices
# ----------------------------------------------------------------------------
def _tap_positions(kind, N, Hi, Wi):
    """For each of the 16 kernel taps, list (out_row, in_row) pairs.

    Rows are ordered (n, h, w).  Down conv: hi = 2*ho + kh - 1.
    Transposed conv: ho = 2*hi - 1 + kh (PyTorch (Cin,Cout,kH,kW) weight
    permuted to HWIO; no spatial flip).
    """
    if kind == "down":
        Ho, Wo = Hi // STRIDE, Wi // STRIDE
    else:
        Ho, Wo = Hi * STRIDE, Wi * STRIDE
    taps = []
    for kh in range(K_SIZE):
        for kw in range(K_SIZE):
            pairs = []
            for n in range(N):
                if kind == "down":
                    for ho in range(Ho):
                        hi = STRIDE * ho + kh - PAD
                        if not 0 <= hi < Hi:
                            continue
                        for wo in range(Wo):
                            wi = STRIDE * wo + kw - PAD
                            if not 0 <= wi < Wi:
                                continue
                            pairs.append((n * Ho * Wo + ho * Wo + wo,
                                          n * Hi * Wi + hi * Wi + wi))
                else:
                    for hi in range(Hi):
                        ho = STRIDE * hi - PAD + kh
                        if not 0 <= ho < Ho:
                            continue
                        for wi in range(Wi):
                            wo = STRIDE * wi - PAD + kw
                            if not 0 <= wo < Wo:
                                continue
                            pairs.append((n * Ho * Wo + ho * Wo + wo,
                                          n * Hi * Wi + hi * Wi + wi))
            taps.append(pairs)
    return Ho, Wo, taps


def pack_params(params, *, N, H, W):
    """One-time packing of all weights / BN params / selection matrices."""
    # ---- layer 0: im2col weight, K axis ordered (kh, kw, cin_pad8) ----------
    w0_np = np.asarray(params[0]["w"], np.float32)          # (4,4,3,ngf)
    cin0, cout0 = w0_np.shape[2], w0_np.shape[3]
    w0_pad = np.zeros((K_SIZE * K_SIZE * CIN0_PAD, CPAD), np.float32)
    for kh in range(K_SIZE):
        for kw in range(K_SIZE):
            base = (kh * K_SIZE + kw) * CIN0_PAD
            w0_pad[base:base + cin0, :cout0] = w0_np[kh, kw]

    arrays = {"w0": jnp.asarray(w0_pad, jnp.bfloat16), "s": [], "wt": []}

    Hi, Wi = H // STRIDE, W // STRIDE        # spatial after layer 0
    mi_pad = N * Hi * Wi                      # layer-0 output rows (512)
    meta, gammas, betas = [], [], []
    bn_idx = 0
    for (kind, cin, cout, use_bn, act), p in zip(LAYER_SPECS[1:], params[1:]):
        Ho, Wo, taps = _tap_positions(kind, N, Hi, Wi)
        mo_valid = N * Ho * Wo
        mo_pad = _pad_rows(mo_valid)

        # tap-major 0/1 row-selection matrix (16*mo_pad, mi_pad)
        s_cat = np.zeros((NTAPS * mo_pad, mi_pad), np.float32)
        for t, pairs in enumerate(taps):
            for orow, irow in pairs:
                s_cat[t * mo_pad + orow, irow] = 1.0
        arrays["s"].append(jnp.asarray(s_cat, jnp.bfloat16))

        # per-tap weight stack (16, 128, 128), zero-padded channels
        w_np = np.asarray(p["w"], np.float32)                # (4,4,cin,cout)
        wt = np.zeros((NTAPS, CPAD, CPAD), np.float32)
        for kh in range(K_SIZE):
            for kw in range(K_SIZE):
                wt[kh * K_SIZE + kw, :cin, :cout] = w_np[kh, kw]
        arrays["wt"].append(jnp.asarray(wt, jnp.bfloat16))

        if use_bn:
            g = np.ones((CPAD,), np.float32)
            g[:cout] = np.asarray(p["gamma"][0], np.float32)
            b = np.zeros((CPAD,), np.float32)
            b[:cout] = np.asarray(p["beta"][0], np.float32)
            gammas.append(g)
            betas.append(b)

        meta.append(dict(mo_pad=mo_pad, m_valid=mo_valid, use_bn=use_bn,
                         act=act, bn_idx=bn_idx if use_bn else -1))
        if use_bn:
            bn_idx += 1
        Hi, Wi, mi_pad = Ho, Wo, mo_pad

    arrays["gamma"] = jnp.asarray(np.stack(gammas, 0))        # (n_bn, 128) f32
    arrays["beta"] = jnp.asarray(np.stack(betas, 0))
    out_info = dict(N=N, H=Hi, W=Wi, cout=LAYER_SPECS[-1][2])
    return arrays, tuple(meta), out_info


# ----------------------------------------------------------------------------
# the single fused Pallas kernel (whole executed prefix, VMEM resident)
# ----------------------------------------------------------------------------
def _unet_prefix_kernel(*refs, meta):
    nl = len(meta)
    p0_ref, w0_ref = refs[0], refs[1]
    s_refs = refs[2:2 + nl]
    w_refs = refs[2 + nl:2 + 2 * nl]
    g_ref, b_ref, o_ref = refs[2 + 2 * nl:]

    # ---- layer 0: lane-dense (M0,128)@(128,128) MXU pass + LeakyReLU -------
    y = jnp.dot(p0_ref[...], w0_ref[...], preferred_element_type=jnp.float32)
    y = _apply_act(y, "lrelu")
    a = y.astype(jnp.bfloat16)

    # ---- layers 1..6: tap-sum (de)convs, two MXU stages per layer ----------
    for li, m in enumerate(meta):
        mo_pad, m_valid = m["mo_pad"], m["m_valid"]
        # stage 1: ONE tall row-gather matmul  (16*Mo, Mi) @ (Mi, 128)
        rg = jnp.dot(s_refs[li][...], a, preferred_element_type=jnp.float32)
        # leading-dim split only (mo_pad % 8 == 0): no lane/sublane relayout
        rg3 = rg.astype(jnp.bfloat16).reshape(NTAPS, mo_pad, CPAD)
        # stage 2: batched per-tap matmul, reduced over taps on the VPU
        y = jnp.einsum("tmk,tkn->tmn", rg3, w_refs[li][...],
                       preferred_element_type=jnp.float32).sum(axis=0)
        if m["use_bn"]:
            # training-mode batch stats over the valid (n, h, w) rows only
            yv = y[:m_valid]
            mu = jnp.mean(yv, axis=0, keepdims=True)
            var = jnp.mean(jnp.square(yv - mu), axis=0, keepdims=True)
            bi = m["bn_idx"]
            y = (y - mu) * jax.lax.rsqrt(var + EPS)
            y = y * g_ref[bi:bi + 1, :] + b_ref[bi:bi + 1, :]
        y = _apply_act(y, m["act"])
        if mo_pad > m_valid:
            # keep padding rows exactly zero so downstream gathers / BN stats
            # can never see junk
            rid = jax.lax.broadcasted_iota(jnp.int32, (mo_pad, 1), 0)
            y = jnp.where(rid < m_valid, y, 0.0)
        a = y.astype(jnp.bfloat16)

    o_ref[...] = y.astype(o_ref.dtype)


# ----------------------------------------------------------------------------
# wrapper: im2col for layer 0 (XLA, tiny) + one pallas_call for everything
# ----------------------------------------------------------------------------
def _im2col_layer0(x_nhwc):
    """(N,H,W,3) f32 -> (N*Ho*Wo, 16*8=128) bf16 patches, K = (kh, kw, c_pad8)."""
    N, H, W, C = x_nhwc.shape
    Ho, Wo = H // STRIDE, W // STRIDE
    xp = jnp.pad(x_nhwc, ((0, 0), (PAD, PAD), (PAD, PAD), (0, CIN0_PAD - C)))
    cols = []
    for kh in range(K_SIZE):
        for kw in range(K_SIZE):
            sl = jax.lax.slice(
                xp,
                (0, kh, kw, 0),
                (N, kh + STRIDE * (Ho - 1) + 1, kw + STRIDE * (Wo - 1) + 1,
                 CIN0_PAD),
                (1, STRIDE, STRIDE, 1),
            )
            cols.append(sl)                               # (N, Ho, Wo, 8)
    patches = jnp.concatenate(cols, axis=-1)              # (N, Ho, Wo, 128)
    return patches.reshape(N * Ho * Wo,
                           K_SIZE * K_SIZE * CIN0_PAD).astype(jnp.bfloat16)


def unet_forward(arrays, x_nchw, *, meta, out_info):
    x = jnp.transpose(x_nchw, (0, 2, 3, 1))               # NCHW -> NHWC
    patches = _im2col_layer0(x)

    args = (patches, arrays["w0"], *arrays["s"], *arrays["wt"],
            arrays["gamma"], arrays["beta"])
    out_rows = meta[-1]["mo_pad"]

    y = pl.pallas_call(
        functools.partial(_unet_prefix_kernel, meta=meta),
        grid=(1,),
        in_specs=[_full_spec(a.shape) for a in args],
        out_specs=_full_spec((out_rows, CPAD)),
        out_shape=jax.ShapeDtypeStruct((out_rows, CPAD), jnp.float32),
        compiler_params=pltpu.CompilerParams(
            dimension_semantics=("arbitrary",),
            vmem_limit_bytes=32 * 1024 * 1024),
    )(*args)

    N, Ho, Wo, cout = out_info["N"], out_info["H"], out_info["W"], out_info["cout"]
    y = y[:N * Ho * Wo, :cout].reshape(N, Ho, Wo, cout)
    return jnp.transpose(y, (0, 3, 1, 2)).astype(jnp.float32)   # NHWC -> NCHW


# ----------------------------------------------------------------------------
# synthetic parameters (pix2pix-style N(0, 0.02) init, HWIO weights)
# ----------------------------------------------------------------------------
def init_params(key):
    params = []
    for (_, cin, cout, _, _) in LAYER_SPECS:
        key, wk = jax.random.split(key)
        w = 0.02 * jax.random.normal(wk, (K_SIZE, K_SIZE, cin, cout), jnp.float32)
        params.append({
            "w": w,
            "gamma": jnp.ones((1, cout), jnp.float32),
            "beta": jnp.zeros((1, cout), jnp.float32),
        })
    return params


if __name__ == "__main__":
    key = jax.random.PRNGKey(0)
    kx, kp = jax.random.split(key)
    # spatial must be >= 2**NUM_DOWNS so the bottleneck reaches 1x1
    N, H, W = 2, 32, 32
    x = jax.random.normal(kx, (N, INPUT_NC, H, W), jnp.float32)
    params = init_params(kp)

    # one-time host-side packing (hoisted out of the jitted forward)
    arrays, meta, out_info = pack_params(params, N=N, H=H, W=W)
    fwd = jax.jit(functools.partial(unet_forward, meta=meta, out_info=out_info))

    out = jax.block_until_ready(fwd(arrays, x))

    assert out.shape == (N, NGF * 4, 4, 4), out.shape
    assert bool(jnp.all(jnp.isfinite(out)))
    print("KERNEL_OK")
</pallas_src>

<mosaic_0001>
module attributes {stable_mosaic.version = 11 : i64} {
  func.func @_unet_prefix_kernel(%arg0: i32, %arg1: memref<512x128xbf16, #tpu.memory_space<vmem>>, %arg2: memref<128x128xbf16, #tpu.memory_space<vmem>>, %arg3: memref<2048x512xbf16, #tpu.memory_space<vmem>>, %arg4: memref<512x128xbf16, #tpu.memory_space<vmem>>, %arg5: memref<256x32xbf16, #tpu.memory_space<vmem>>, %arg6: memref<256x16xbf16, #tpu.memory_space<vmem>>, %arg7: memref<256x16xbf16, #tpu.memory_space<vmem>>, %arg8: memref<512x16xbf16, #tpu.memory_space<vmem>>, %arg9: memref<16x128x128xbf16, #tpu.memory_space<vmem>>, %arg10: memref<16x128x128xbf16, #tpu.memory_space<vmem>>, %arg11: memref<16x128x128xbf16, #tpu.memory_space<vmem>>, %arg12: memref<16x128x128xbf16, #tpu.memory_space<vmem>>, %arg13: memref<16x128x128xbf16, #tpu.memory_space<vmem>>, %arg14: memref<16x128x128xbf16, #tpu.memory_space<vmem>>, %arg15: memref<4x128xf32, #tpu.memory_space<vmem>>, %arg16: memref<4x128xf32, #tpu.memory_space<vmem>>, %arg17: memref<32x128xf32, #tpu.memory_space<vmem>>) attributes {dimension_semantics = [#tpu.dimension_semantics<arbitrary>], iteration_bounds = array<i64: 1>, scalar_prefetch = 0 : i64, scratch_operands = 0 : i64, tpu.core_type = #tpu.core_type<tc>, window_params = [{pipeline_mode = #tpu.pipeline_mode<synchronous>, transform_indices = @transform_0, window_bounds = array<i64: 512, 128>}, {pipeline_mode = #tpu.pipeline_mode<synchronous>, transform_indices = @transform_1, window_bounds = array<i64: 128, 128>}, {pipeline_mode = #tpu.pipeline_mode<synchronous>, transform_indices = @transform_2, window_bounds = array<i64: 2048, 512>}, {pipeline_mode = #tpu.pipeline_mode<synchronous>, transform_indices = @transform_3, window_bounds = array<i64: 512, 128>}, {pipeline_mode = #tpu.pipeline_mode<synchronous>, transform_indices = @transform_4, window_bounds = array<i64: 256, 32>}, {pipeline_mode = #tpu.pipeline_mode<synchronous>, transform_indices = @transform_5, window_bounds = array<i64: 256, 16>}, {pipeline_mode = #tpu.pipeline_mode<synchronous>, transform_indices = @transform_6, window_bounds = array<i64: 256, 16>}, {pipeline_mode = #tpu.pipeline_mode<synchronous>, transform_indices = @transform_7, window_bounds = array<i64: 512, 16>}, {pipeline_mode = #tpu.pipeline_mode<synchronous>, transform_indices = @transform_8, window_bounds = array<i64: 16, 128, 128>}, {pipeline_mode = #tpu.pipeline_mode<synchronous>, transform_indices = @transform_9, window_bounds = array<i64: 16, 128, 128>}, {pipeline_mode = #tpu.pipeline_mode<synchronous>, transform_indices = @transform_10, window_bounds = array<i64: 16, 128, 128>}, {pipeline_mode = #tpu.pipeline_mode<synchronous>, transform_indices = @transform_11, window_bounds = array<i64: 16, 128, 128>}, {pipeline_mode = #tpu.pipeline_mode<synchronous>, transform_indices = @transform_12, window_bounds = array<i64: 16, 128, 128>}, {pipeline_mode = #tpu.pipeline_mode<synchronous>, transform_indices = @transform_13, window_bounds = array<i64: 16, 128, 128>}, {pipeline_mode = #tpu.pipeline_mode<synchronous>, transform_indices = @transform_14, window_bounds = array<i64: 4, 128>}, {pipeline_mode = #tpu.pipeline_mode<synchronous>, transform_indices = @transform_15, window_bounds = array<i64: 4, 128>}, {pipeline_mode = #tpu.pipeline_mode<synchronous>, transform_indices = @transform_16, window_bounds = array<i64: 32, 128>}]} {
    %c0 = arith.constant 0 : index
    %c0_0 = arith.constant 0 : index
    %0 = vector.load %arg1[%c0, %c0_0] : memref<512x128xbf16, #tpu.memory_space<vmem>>, vector<512x128xbf16>
    %c0_1 = arith.constant 0 : index
    %c0_2 = arith.constant 0 : index
    %1 = vector.load %arg2[%c0_1, %c0_2] : memref<128x128xbf16, #tpu.memory_space<vmem>>, vector<128x128xbf16>
    %cst = arith.constant dense<0.000000e+00> : vector<512x128xf32>
    %2 = tpu.matmul %0, %1, %cst {dimension_numbers = #tpu.dot_dimension_numbers<[1], [0], [0], [1], [0, 0, 1, 1], [], []>} : vector<512x128xbf16>, vector<128x128xbf16>, vector<512x128xf32> -> vector<512x128xf32>
    %cst_3 = arith.constant 0.000000e+00 : f32
    %3 = vector.broadcast %cst_3 : f32 to vector<512x128xf32>
    %4 = arith.cmpf oge, %2, %3 : vector<512x128xf32>
    %cst_4 = arith.constant 2.000000e-01 : f32
    %5 = vector.broadcast %cst_4 : f32 to vector<512x128xf32>
    %6 = arith.mulf %5, %2 : vector<512x128xf32>
    %7 = arith.select %4, %2, %6 : vector<512x128xi1>, vector<512x128xf32>
    %8 = arith.truncf %7 : vector<512x128xf32> to vector<512x128xbf16>
    %c0_5 = arith.constant 0 : index
    %c0_6 = arith.constant 0 : index
    %9 = vector.load %arg3[%c0_5, %c0_6] : memref<2048x512xbf16, #tpu.memory_space<vmem>>, vector<2048x512xbf16>
    %cst_7 = arith.constant dense<0.000000e+00> : vector<2048x128xf32>
    %10 = tpu.matmul %9, %8, %cst_7 {dimension_numbers = #tpu.dot_dimension_numbers<[1], [0], [0], [1], [0, 0, 1, 1], [], []>} : vector<2048x512xbf16>, vector<512x128xbf16>, vector<2048x128xf32> -> vector<2048x128xf32>
    %11 = arith.truncf %10 : vector<2048x128xf32> to vector<2048x128xbf16>
    %12 = vector.shape_cast %11 : vector<2048x128xbf16> to vector<16x128x128xbf16>
    %c0_8 = arith.constant 0 : index
    %c0_9 = arith.constant 0 : index
    %c0_10 = arith.constant 0 : index
    %13 = vector.load %arg9[%c0_8, %c0_9, %c0_10] : memref<16x128x128xbf16, #tpu.memory_space<vmem>>, vector<16x128x128xbf16>
    "tpu.trace_start"() <{level = 10 : i32, message = "tmk,tkn->tmn"}> : () -> ()
    %cst_11 = arith.constant dense<0.000000e+00> : vector<16x128x128xf32>
    %14 = tpu.matmul %12, %13, %cst_11 {dimension_numbers = #tpu.dot_dimension_numbers<[2], [1], [1], [2], [0, 0, 0, 1, 1, 2], [0], [0]>} : vector<16x128x128xbf16>, vector<16x128x128xbf16>, vector<16x128x128xf32> -> vector<16x128x128xf32>
    "tpu.trace_stop"() : () -> ()
    %cst_12 = arith.constant dense<0.000000e+00> : vector<128x128xf32>
    %15 = vector.multi_reduction <add>, %14, %cst_12 [0] : vector<16x128x128xf32> to vector<128x128xf32>
    %cst_13 = arith.constant dense<0.000000e+00> : vector<128xf32>
    %16 = vector.multi_reduction <add>, %15, %cst_13 [0] : vector<128x128xf32> to vector<128xf32>
    %17 = vector.shape_cast %16 : vector<128xf32> to vector<1x128xf32>
    %cst_14 = arith.constant 1.280000e+02 : f32
    %18 = vector.broadcast %cst_14 : f32 to vector<1x128xf32>
    %19 = arith.divf %17, %18 : vector<1x128xf32>
    %20 = vector.broadcast %19 : vector<1x128xf32> to vector<128x128xf32>
    %21 = arith.subf %15, %20 : vector<128x128xf32>
    %22 = arith.mulf %21, %21 : vector<128x128xf32>
    %cst_15 = arith.constant dense<0.000000e+00> : vector<128xf32>
    %23 = vector.multi_reduction <add>, %22, %cst_15 [0] : vector<128x128xf32> to vector<128xf32>
    %24 = vector.shape_cast %23 : vector<128xf32> to vector<1x128xf32>
    %cst_16 = arith.constant 1.280000e+02 : f32
    %25 = vector.broadcast %cst_16 : f32 to vector<1x128xf32>
    %26 = arith.divf %24, %25 : vector<1x128xf32>
    %27 = vector.broadcast %19 : vector<1x128xf32> to vector<128x128xf32>
    %28 = arith.subf %15, %27 : vector<128x128xf32>
    %cst_17 = arith.constant 9.99999974E-6 : f32
    %29 = vector.broadcast %cst_17 : f32 to vector<1x128xf32>
    %30 = arith.addf %26, %29 : vector<1x128xf32>
    %31 = math.rsqrt %30 : vector<1x128xf32>
    %32 = vector.broadcast %31 : vector<1x128xf32> to vector<128x128xf32>
    %33 = arith.mulf %28, %32 : vector<128x128xf32>
    %c0_18 = arith.constant 0 : index
    %c0_19 = arith.constant 0 : index
    %34 = vector.load %arg15[%c0_18, %c0_19] : memref<4x128xf32, #tpu.memory_space<vmem>>, vector<1x128xf32>
    %35 = vector.broadcast %34 : vector<1x128xf32> to vector<128x128xf32>
    %36 = arith.mulf %33, %35 : vector<128x128xf32>
    %c0_20 = arith.constant 0 : index
    %c0_21 = arith.constant 0 : index
    %37 = vector.load %arg16[%c0_20, %c0_21] : memref<4x128xf32, #tpu.memory_space<vmem>>, vector<1x128xf32>
    %38 = vector.broadcast %37 : vector<1x128xf32> to vector<128x128xf32>
    %39 = arith.addf %36, %38 : vector<128x128xf32>
    %cst_22 = arith.constant 0.000000e+00 : f32
    %40 = vector.broadcast %cst_22 : f32 to vector<128x128xf32>
    %41 = arith.cmpf oge, %39, %40 : vector<128x128xf32>
    %cst_23 = arith.constant 2.000000e-01 : f32
    %42 = vector.broadcast %cst_23 : f32 to vector<128x128xf32>
    %43 = arith.mulf %42, %39 : vector<128x128xf32>
    %44 = arith.select %41, %39, %43 : vector<128x128xi1>, vector<128x128xf32>
    %45 = arith.truncf %44 : vector<128x128xf32> to vector<128x128xbf16>
    %c0_24 = arith.constant 0 : index
    %c0_25 = arith.constant 0 : index
    %46 = vector.load %arg4[%c0_24, %c0_25] : memref<512x128xbf16, #tpu.memory_space<vmem>>, vector<512x128xbf16>
    %cst_26 = arith.constant dense<0.000000e+00> : vector<512x128xf32>
    %47 = tpu.matmul %46, %45, %cst_26 {dimension_numbers = #tpu.dot_dimension_numbers<[1], [0], [0], [1], [0, 0, 1, 1], [], []>} : vector<512x128xbf16>, vector<128x128xbf16>, vector<512x128xf32> -> vector<512x128xf32>
    %48 = arith.truncf %47 : vector<512x128xf32> to vector<512x128xbf16>
    %49 = vector.shape_cast %48 : vector<512x128xbf16> to vector<16x32x128xbf16>
    %c0_27 = arith.constant 0 : index
    %c0_28 = arith.constant 0 : index
    %c0_29 = arith.constant 0 : index
    %50 = vector.load %arg10[%c0_27, %c0_28, %c0_29] : memref<16x128x128xbf16, #tpu.memory_space<vmem>>, vector<16x128x128xbf16>
    "tpu.trace_start"() <{level = 10 : i32, message = "tmk,tkn->tmn"}> : () -> ()
    %cst_30 = arith.constant dense<0.000000e+00> : vector<16x32x128xf32>
    %51 = tpu.matmul %49, %50, %cst_30 {dimension_numbers = #tpu.dot_dimension_numbers<[2], [1], [1], [2], [0, 0, 0, 1, 1, 2], [0], [0]>} : vector<16x32x128xbf16>, vector<16x128x128xbf16>, vector<16x32x128xf32> -> vector<16x32x128xf32>
    "tpu.trace_stop"() : () -> ()
    %cst_31 = arith.constant dense<0.000000e+00> : vector<32x128xf32>
    %52 = vector.multi_reduction <add>, %51, %cst_31 [0] : vector<16x32x128xf32> to vector<32x128xf32>
    %cst_32 = arith.constant dense<0.000000e+00> : vector<128xf32>
    %53 = vector.multi_reduction <add>, %52, %cst_32 [0] : vector<32x128xf32> to vector<128xf32>
    %54 = vector.shape_cast %53 : vector<128xf32> to vector<1x128xf32>
    %cst_33 = arith.constant 3.200000e+01 : f32
    %55 = vector.broadcast %cst_33 : f32 to vector<1x128xf32>
    %56 = arith.divf %54, %55 : vector<1x128xf32>
    %57 = vector.broadcast %56 : vector<1x128xf32> to vector<32x128xf32>
    %58 = arith.subf %52, %57 : vector<32x128xf32>
    %59 = arith.mulf %58, %58 : vector<32x128xf32>
    %cst_34 = arith.constant dense<0.000000e+00> : vector<128xf32>
    %60 = vector.multi_reduction <add>, %59, %cst_34 [0] : vector<32x128xf32> to vector<128xf32>
    %61 = vector.shape_cast %60 : vector<128xf32> to vector<1x128xf32>
    %cst_35 = arith.constant 3.200000e+01 : f32
    %62 = vector.broadcast %cst_35 : f32 to vector<1x128xf32>
    %63 = arith.divf %61, %62 : vector<1x128xf32>
    %64 = vector.broadcast %56 : vector<1x128xf32> to vector<32x128xf32>
    %65 = arith.subf %52, %64 : vector<32x128xf32>
    %cst_36 = arith.constant 9.99999974E-6 : f32
    %66 = vector.broadcast %cst_36 : f32 to vector<1x128xf32>
    %67 = arith.addf %63, %66 : vector<1x128xf32>
    %68 = math.rsqrt %67 : vector<1x128xf32>
    %69 = vector.broadcast %68 : vector<1x128xf32> to vector<32x128xf32>
    %70 = arith.mulf %65, %69 : vector<32x128xf32>
    %c1 = arith.constant 1 : index
    %c0_37 = arith.constant 0 : index
    %71 = vector.load %arg15[%c1, %c0_37] : memref<4x128xf32, #tpu.memory_space<vmem>>, vector<1x128xf32>
    %72 = vector.broadcast %71 : vector<1x128xf32> to vector<32x128xf32>
    %73 = arith.mulf %70, %72 : vector<32x128xf32>
    %c1_38 = arith.constant 1 : index
    %c0_39 = arith.constant 0 : index
    %74 = vector.load %arg16[%c1_38, %c0_39] : memref<4x128xf32, #tpu.memory_space<vmem>>, vector<1x128xf32>
    %75 = vector.broadcast %74 : vector<1x128xf32> to vector<32x128xf32>
    %76 = arith.addf %73, %75 : vector<32x128xf32>
    %cst_40 = arith.constant 0.000000e+00 : f32
    %77 = vector.broadcast %cst_40 : f32 to vector<32x128xf32>
    %78 = arith.cmpf oge, %76, %77 : vector<32x128xf32>
    %cst_41 = arith.constant 2.000000e-01 : f32
    %79 = vector.broadcast %cst_41 : f32 to vector<32x128xf32>
    %80 = arith.mulf %79, %76 : vector<32x128xf32>
    %81 = arith.select %78, %76, %80 : vector<32x128xi1>, vector<32x128xf32>
    %82 = arith.truncf %81 : vector<32x128xf32> to vector<32x128xbf16>
    %c0_42 = arith.constant 0 : index
    %c0_43 = arith.constant 0 : index
    %83 = vector.load %arg5[%c0_42, %c0_43] : memref<256x32xbf16, #tpu.memory_space<vmem>>, vector<256x32xbf16>
    %cst_44 = arith.constant dense<0.000000e+00> : vector<256x128xf32>
    %84 = tpu.matmul %83, %82, %cst_44 {dimension_numbers = #tpu.dot_dimension_numbers<[1], [0], [0], [1], [0, 0, 1, 1], [], []>} : vector<256x32xbf16>, vector<32x128xbf16>, vector<256x128xf32> -> vector<256x128xf32>
    %85 = arith.truncf %84 : vector<256x128xf32> to vector<256x128xbf16>
    %86 = vector.shape_cast %85 : vector<256x128xbf16> to vector<16x16x128xbf16>
    %c0_45 = arith.constant 0 : index
    %c0_46 = arith.constant 0 : index
    %c0_47 = arith.constant 0 : index
    %87 = vector.load %arg11[%c0_45, %c0_46, %c0_47] : memref<16x128x128xbf16, #tpu.memory_space<vmem>>, vector<16x128x128xbf16>
    "tpu.trace_start"() <{level = 10 : i32, message = "tmk,tkn->tmn"}> : () -> ()
    %cst_48 = arith.constant dense<0.000000e+00> : vector<16x16x128xf32>
    %88 = tpu.matmul %86, %87, %cst_48 {dimension_numbers = #tpu.dot_dimension_numbers<[2], [1], [1], [2], [0, 0, 0, 1, 1, 2], [0], [0]>} : vector<16x16x128xbf16>, vector<16x128x128xbf16>, vector<16x16x128xf32> -> vector<16x16x128xf32>
    "tpu.trace_stop"() : () -> ()
    %cst_49 = arith.constant dense<0.000000e+00> : vector<16x128xf32>
    %89 = vector.multi_reduction <add>, %88, %cst_49 [0] : vector<16x16x128xf32> to vector<16x128xf32>
    %90 = vector.extract_strided_slice %89 {offsets = [0, 0], sizes = [8, 128], strides = [1, 1]} : vector<16x128xf32> to vector<8x128xf32>
    %cst_50 = arith.constant dense<0.000000e+00> : vector<128xf32>
    %91 = vector.multi_reduction <add>, %90, %cst_50 [0] : vector<8x128xf32> to vector<128xf32>
    %92 = vector.shape_cast %91 : vector<128xf32> to vector<1x128xf32>
    %cst_51 = arith.constant 8.000000e+00 : f32
    %93 = vector.broadcast %cst_51 : f32 to vector<1x128xf32>
    %94 = arith.divf %92, %93 : vector<1x128xf32>
    %95 = vector.broadcast %94 : vector<1x128xf32> to vector<8x128xf32>
    %96 = arith.subf %90, %95 : vector<8x128xf32>
    %97 = arith.mulf %96, %96 : vector<8x128xf32>
    %cst_52 = arith.constant dense<0.000000e+00> : vector<128xf32>
    %98 = vector.multi_reduction <add>, %97, %cst_52 [0] : vector<8x128xf32> to vector<128xf32>
    %99 = vector.shape_cast %98 : vector<128xf32> to vector<1x128xf32>
    %cst_53 = arith.constant 8.000000e+00 : f32
    %100 = vector.broadcast %cst_53 : f32 to vector<1x128xf32>
    %101 = arith.divf %99, %100 : vector<1x128xf32>
    %102 = vector.broadcast %94 : vector<1x128xf32> to vector<16x128xf32>
    %103 = arith.subf %89, %102 : vector<16x128xf32>
    %cst_54 = arith.constant 9.99999974E-6 : f32
    %104 = vector.broadcast %cst_54 : f32 to vector<1x128xf32>
    %105 = arith.addf %101, %104 : vector<1x128xf32>
    %106 = math.rsqrt %105 : vector<1x128xf32>
    %107 = vector.broadcast %106 : vector<1x128xf32> to vector<16x128xf32>
    %108 = arith.mulf %103, %107 : vector<16x128xf32>
    %c2 = arith.constant 2 : index
    %c0_55 = arith.constant 0 : index
    %109 = vector.load %arg15[%c2, %c0_55] : memref<4x128xf32, #tpu.memory_space<vmem>>, vector<1x128xf32>
    %110 = vector.broadcast %109 : vector<1x128xf32> to vector<16x128xf32>
    %111 = arith.mulf %108, %110 : vector<16x128xf32>
    %c2_56 = arith.constant 2 : index
    %c0_57 = arith.constant 0 : index
    %112 = vector.load %arg16[%c2_56, %c0_57] : memref<4x128xf32, #tpu.memory_space<vmem>>, vector<1x128xf32>
    %113 = vector.broadcast %112 : vector<1x128xf32> to vector<16x128xf32>
    %114 = arith.addf %111, %113 : vector<16x128xf32>
    %cst_58 = arith.constant 0.000000e+00 : f32
    %115 = vector.broadcast %cst_58 : f32 to vector<16x128xf32>
    %116 = arith.cmpf oge, %114, %115 : vector<16x128xf32>
    %cst_59 = arith.constant 2.000000e-01 : f32
    %117 = vector.broadcast %cst_59 : f32 to vector<16x128xf32>
    %118 = arith.mulf %117, %114 : vector<16x128xf32>
    %119 = arith.select %116, %114, %118 : vector<16x128xi1>, vector<16x128xf32>
    %120 = tpu.iota {dimensions = array<i32: 0>} : vector<16x1xi32>
    %c8_i32 = arith.constant 8 : i32
    %121 = vector.broadcast %c8_i32 : i32 to vector<16x1xi32>
    %122 = arith.cmpi slt, %120, %121 : vector<16x1xi32>
    %cst_60 = arith.constant 0.000000e+00 : f32
    %123 = vector.shape_cast %122 : vector<16x1xi1> to vector<16x1xi1>
    %124 = vector.broadcast %123 : vector<16x1xi1> to vector<16x128xi1>
    %125 = vector.broadcast %cst_60 : f32 to vector<16x128xf32>
    %126 = arith.select %124, %119, %125 : vector<16x128xi1>, vector<16x128xf32>
    %127 = arith.truncf %126 : vector<16x128xf32> to vector<16x128xbf16>
    %c0_61 = arith.constant 0 : index
    %c0_62 = arith.constant 0 : index
    %128 = vector.load %arg6[%c0_61, %c0_62] : memref<256x16xbf16, #tpu.memory_space<vmem>>, vector<256x16xbf16>
    %cst_63 = arith.constant dense<0.000000e+00> : vector<256x128xf32>
    %129 = tpu.matmul %128, %127, %cst_63 {dimension_numbers = #tpu.dot_dimension_numbers<[1], [0], [0], [1], [0, 0, 1, 1], [], []>} : vector<256x16xbf16>, vector<16x128xbf16>, vector<256x128xf32> -> vector<256x128xf32>
    %130 = arith.truncf %129 : vector<256x128xf32> to vector<256x128xbf16>
    %131 = vector.shape_cast %130 : vector<256x128xbf16> to vector<16x16x128xbf16>
    %c0_64 = arith.constant 0 : index
    %c0_65 = arith.constant 0 : index
    %c0_66 = arith.constant 0 : index
    %132 = vector.load %arg12[%c0_64, %c0_65, %c0_66] : memref<16x128x128xbf16, #tpu.memory_space<vmem>>, vector<16x128x128xbf16>
    "tpu.trace_start"() <{level = 10 : i32, message = "tmk,tkn->tmn"}> : () -> ()
    %cst_67 = arith.constant dense<0.000000e+00> : vector<16x16x128xf32>
    %133 = tpu.matmul %131, %132, %cst_67 {dimension_numbers = #tpu.dot_dimension_numbers<[2], [1], [1], [2], [0, 0, 0, 1, 1, 2], [0], [0]>} : vector<16x16x128xbf16>, vector<16x128x128xbf16>, vector<16x16x128xf32> -> vector<16x16x128xf32>
    "tpu.trace_stop"() : () -> ()
    %cst_68 = arith.constant dense<0.000000e+00> : vector<16x128xf32>
    %134 = vector.multi_reduction <add>, %133, %cst_68 [0] : vector<16x16x128xf32> to vector<16x128xf32>
    %cst_69 = arith.constant 0.000000e+00 : f32
    %135 = vector.broadcast %cst_69 : f32 to vector<16x128xf32>
    %136 = arith.maximumf %134, %135 : vector<16x128xf32>
    %137 = tpu.iota {dimensions = array<i32: 0>} : vector<16x1xi32>
    %c2_i32 = arith.constant 2 : i32
    %138 = vector.broadcast %c2_i32 : i32 to vector<16x1xi32>
    %139 = arith.cmpi slt, %137, %138 : vector<16x1xi32>
    %cst_70 = arith.constant 0.000000e+00 : f32
    %140 = vector.shape_cast %139 : vector<16x1xi1> to vector<16x1xi1>
    %141 = vector.broadcast %140 : vector<16x1xi1> to vector<16x128xi1>
    %142 = vector.broadcast %cst_70 : f32 to vector<16x128xf32>
    %143 = arith.select %141, %136, %142 : vector<16x128xi1>, vector<16x128xf32>
    %144 = arith.truncf %143 : vector<16x128xf32> to vector<16x128xbf16>
    %c0_71 = arith.constant 0 : index
    %c0_72 = arith.constant 0 : index
    %145 = vector.load %arg7[%c0_71, %c0_72] : memref<256x16xbf16, #tpu.memory_space<vmem>>, vector<256x16xbf16>
    %cst_73 = arith.constant dense<0.000000e+00> : vector<256x128xf32>
    %146 = tpu.matmul %145, %144, %cst_73 {dimension_numbers = #tpu.dot_dimension_numbers<[1], [0], [0], [1], [0, 0, 1, 1], [], []>} : vector<256x16xbf16>, vector<16x128xbf16>, vector<256x128xf32> -> vector<256x128xf32>
    %147 = arith.truncf %146 : vector<256x128xf32> to vector<256x128xbf16>
    %148 = vector.shape_cast %147 : vector<256x128xbf16> to vector<16x16x128xbf16>
    %c0_74 = arith.constant 0 : index
    %c0_75 = arith.constant 0 : index
    %c0_76 = arith.constant 0 : index
    %149 = vector.load %arg13[%c0_74, %c0_75, %c0_76] : memref<16x128x128xbf16, #tpu.memory_space<vmem>>, vector<16x128x128xbf16>
    "tpu.trace_start"() <{level = 10 : i32, message = "tmk,tkn->tmn"}> : () -> ()
    %cst_77 = arith.constant dense<0.000000e+00> : vector<16x16x128xf32>
    %150 = tpu.matmul %148, %149, %cst_77 {dimension_numbers = #tpu.dot_dimension_numbers<[2], [1], [1], [2], [0, 0, 0, 1, 1, 2], [0], [0]>} : vector<16x16x128xbf16>, vector<16x128x128xbf16>, vector<16x16x128xf32> -> vector<16x16x128xf32>
    "tpu.trace_stop"() : () -> ()
    %cst_78 = arith.constant dense<0.000000e+00> : vector<16x128xf32>
    %151 = vector.multi_reduction <add>, %150, %cst_78 [0] : vector<16x16x128xf32> to vector<16x128xf32>
    %152 = vector.extract_strided_slice %151 {offsets = [0, 0], sizes = [8, 128], strides = [1, 1]} : vector<16x128xf32> to vector<8x128xf32>
    %cst_79 = arith.constant dense<0.000000e+00> : vector<128xf32>
    %153 = vector.multi_reduction <add>, %152, %cst_79 [0] : vector<8x128xf32> to vector<128xf32>
    %154 = vector.shape_cast %153 : vector<128xf32> to vector<1x128xf32>
    %cst_80 = arith.constant 8.000000e+00 : f32
    %155 = vector.broadcast %cst_80 : f32 to vector<1x128xf32>
    %156 = arith.divf %154, %155 : vector<1x128xf32>
    %157 = vector.broadcast %156 : vector<1x128xf32> to vector<8x128xf32>
    %158 = arith.subf %152, %157 : vector<8x128xf32>
    %159 = arith.mulf %158, %158 : vector<8x128xf32>
    %cst_81 = arith.constant dense<0.000000e+00> : vector<128xf32>
    %160 = vector.multi_reduction <add>, %159, %cst_81 [0] : vector<8x128xf32> to vector<128xf32>
    %161 = vector.shape_cast %160 : vector<128xf32> to vector<1x128xf32>
    %cst_82 = arith.constant 8.000000e+00 : f32
    %162 = vector.broadcast %cst_82 : f32 to vector<1x128xf32>
    %163 = arith.divf %161, %162 : vector<1x128xf32>
    %164 = vector.broadcast %156 : vector<1x128xf32> to vector<16x128xf32>
    %165 = arith.subf %151, %164 : vector<16x128xf32>
    %cst_83 = arith.constant 9.99999974E-6 : f32
    %166 = vector.broadcast %cst_83 : f32 to vector<1x128xf32>
    %167 = arith.addf %163, %166 : vector<1x128xf32>
    %168 = math.rsqrt %167 : vector<1x128xf32>
    %169 = vector.broadcast %168 : vector<1x128xf32> to vector<16x128xf32>
    %170 = arith.mulf %165, %169 : vector<16x128xf32>
    %c3 = arith.constant 3 : index
    %c0_84 = arith.constant 0 : index
    %171 = vector.load %arg15[%c3, %c0_84] : memref<4x128xf32, #tpu.memory_space<vmem>>, vector<1x128xf32>
    %172 = vector.broadcast %171 : vector<1x128xf32> to vector<16x128xf32>
    %173 = arith.mulf %170, %172 : vector<16x128xf32>
    %c3_85 = arith.constant 3 : index
    %c0_86 = arith.constant 0 : index
    %174 = vector.load %arg16[%c3_85, %c0_86] : memref<4x128xf32, #tpu.memory_space<vmem>>, vector<1x128xf32>
    %175 = vector.broadcast %174 : vector<1x128xf32> to vector<16x128xf32>
    %176 = arith.addf %173, %175 : vector<16x128xf32>
    %cst_87 = arith.constant 0.000000e+00 : f32
    %177 = vector.broadcast %cst_87 : f32 to vector<16x128xf32>
    %178 = arith.maximumf %176, %177 : vector<16x128xf32>
    %179 = tpu.iota {dimensions = array<i32: 0>} : vector<16x1xi32>
    %c8_i32_88 = arith.constant 8 : i32
    %180 = vector.broadcast %c8_i32_88 : i32 to vector<16x1xi32>
    %181 = arith.cmpi slt, %179, %180 : vector<16x1xi32>
    %cst_89 = arith.constant 0.000000e+00 : f32
    %182 = vector.shape_cast %181 : vector<16x1xi1> to vector<16x1xi1>
    %183 = vector.broadcast %182 : vector<16x1xi1> to vector<16x128xi1>
    %184 = vector.broadcast %cst_89 : f32 to vector<16x128xf32>
    %185 = arith.select %183, %178, %184 : vector<16x128xi1>, vector<16x128xf32>
    %186 = arith.truncf %185 : vector<16x128xf32> to vector<16x128xbf16>
    %c0_90 = arith.constant 0 : index
    %c0_91 = arith.constant 0 : index
    %187 = vector.load %arg8[%c0_90, %c0_91] : memref<512x16xbf16, #tpu.memory_space<vmem>>, vector<512x16xbf16>
    %cst_92 = arith.constant dense<0.000000e+00> : vector<512x128xf32>
    %188 = tpu.matmul %187, %186, %cst_92 {dimension_numbers = #tpu.dot_dimension_numbers<[1], [0], [0], [1], [0, 0, 1, 1], [], []>} : vector<512x16xbf16>, vector<16x128xbf16>, vector<512x128xf32> -> vector<512x128xf32>
    %189 = arith.truncf %188 : vector<512x128xf32> to vector<512x128xbf16>
    %190 = vector.shape_cast %189 : vector<512x128xbf16> to vector<16x32x128xbf16>
    %c0_93 = arith.constant 0 : index
    %c0_94 = arith.constant 0 : index
    %c0_95 = arith.constant 0 : index
    %191 = vector.load %arg14[%c0_93, %c0_94, %c0_95] : memref<16x128x128xbf16, #tpu.memory_space<vmem>>, vector<16x128x128xbf16>
    "tpu.trace_start"() <{level = 10 : i32, message = "tmk,tkn->tmn"}> : () -> ()
    %cst_96 = arith.constant dense<0.000000e+00> : vector<16x32x128xf32>
    %192 = tpu.matmul %190, %191, %cst_96 {dimension_numbers = #tpu.dot_dimension_numbers<[2], [1], [1], [2], [0, 0, 0, 1, 1, 2], [0], [0]>} : vector<16x32x128xbf16>, vector<16x128x128xbf16>, vector<16x32x128xf32> -> vector<16x32x128xf32>
    "tpu.trace_stop"() : () -> ()
    %cst_97 = arith.constant dense<0.000000e+00> : vector<32x128xf32>
    %193 = vector.multi_reduction <add>, %192, %cst_97 [0] : vector<16x32x128xf32> to vector<32x128xf32>
    %c0_98 = arith.constant 0 : index
    %c0_99 = arith.constant 0 : index
    %194 = vector.load %arg17[%c0_98, %c0_99] : memref<32x128xf32, #tpu.memory_space<vmem>>, vector<32x128xf32>
    tpu.vector_store %arg17[%c0_98, %c0_99], %193 {strides = array<i32>} : memref<32x128xf32, #tpu.memory_space<vmem>>, vector<32x128xf32>,
    return
  }
  func.func @transform_0(%arg0: i32) -> (i32, i32) {
    %c0_i32 = arith.constant 0 : i32
    %c0_i32_0 = arith.constant 0 : i32
    %c0_i32_1 = arith.constant 0 : i32
    return %c0_i32, %c0_i32_0 : i32, i32
  }
  func.func @transform_1(%arg0: i32) -> (i32, i32) {
    %c0_i32 = arith.constant 0 : i32
    %c0_i32_0 = arith.constant 0 : i32
    %c0_i32_1 = arith.constant 0 : i32
    return %c0_i32, %c0_i32_0 : i32, i32
  }
  func.func @transform_2(%arg0: i32) -> (i32, i32) {
    %c0_i32 = arith.constant 0 : i32
    %c0_i32_0 = arith.constant 0 : i32
    %c0_i32_1 = arith.constant 0 : i32
    return %c0_i32, %c0_i32_0 : i32, i32
  }
  func.func @transform_3(%arg0: i32) -> (i32, i32) {
    %c0_i32 = arith.constant 0 : i32
    %c0_i32_0 = arith.constant 0 : i32
    %c0_i32_1 = arith.constant 0 : i32
    return %c0_i32, %c0_i32_0 : i32, i32
  }
  func.func @transform_4(%arg0: i32) -> (i32, i32) {
    %c0_i32 = arith.constant 0 : i32
    %c0_i32_0 = arith.constant 0 : i32
    %c0_i32_1 = arith.constant 0 : i32
    return %c0_i32, %c0_i32_0 : i32, i32
  }
  func.func @transform_5(%arg0: i32) -> (i32, i32) {
    %c0_i32 = arith.constant 0 : i32
    %c0_i32_0 = arith.constant 0 : i32
    %c0_i32_1 = arith.constant 0 : i32
    return %c0_i32, %c0_i32_0 : i32, i32
  }
  func.func @transform_6(%arg0: i32) -> (i32, i32) {
    %c0_i32 = arith.constant 0 : i32
    %c0_i32_0 = arith.constant 0 : i32
    %c0_i32_1 = arith.constant 0 : i32
    return %c0_i32, %c0_i32_0 : i32, i32
  }
  func.func @transform_7(%arg0: i32) -> (i32, i32) {
    %c0_i32 = arith.constant 0 : i32
    %c0_i32_0 = arith.constant 0 : i32
    %c0_i32_1 = arith.constant 0 : i32
    return %c0_i32, %c0_i32_0 : i32, i32
  }
  func.func @transform_8(%arg0: i32) -> (i32, i32, i32) {
    %c0_i32 = arith.constant 0 : i32
    %c0_i32_0 = arith.constant 0 : i32
    %c0_i32_1 = arith.constant 0 : i32
    %c0_i32_2 = arith.constant 0 : i32
    return %c0_i32, %c0_i32_0, %c0_i32_1 : i32, i32, i32
  }
  func.func @transform_9(%arg0: i32) -> (i32, i32, i32) {
    %c0_i32 = arith.constant 0 : i32
    %c0_i32_0 = arith.constant 0 : i32
    %c0_i32_1 = arith.constant 0 : i32
    %c0_i32_2 = arith.constant 0 : i32
    return %c0_i32, %c0_i32_0, %c0_i32_1 : i32, i32, i32
  }
  func.func @transform_10(%arg0: i32) -> (i32, i32, i32) {
    %c0_i32 = arith.constant 0 : i32
    %c0_i32_0 = arith.constant 0 : i32
    %c0_i32_1 = arith.constant 0 : i32
    %c0_i32_2 = arith.constant 0 : i32
    return %c0_i32, %c0_i32_0, %c0_i32_1 : i32, i32, i32
  }
  func.func @transform_11(%arg0: i32) -> (i32, i32, i32) {
    %c0_i32 = arith.constant 0 : i32
    %c0_i32_0 = arith.constant 0 : i32
    %c0_i32_1 = arith.constant 0 : i32
    %c0_i32_2 = arith.constant 0 : i32
    return %c0_i32, %c0_i32_0, %c0_i32_1 : i32, i32, i32
  }
  func.func @transform_12(%arg0: i32) -> (i32, i32, i32) {
    %c0_i32 = arith.constant 0 : i32
    %c0_i32_0 = arith.constant 0 : i32
    %c0_i32_1 = arith.constant 0 : i32
    %c0_i32_2 = arith.constant 0 : i32
    return %c0_i32, %c0_i32_0, %c0_i32_1 : i32, i32, i32
  }
  func.func @transform_13(%arg0: i32) -> (i32, i32, i32) {
    %c0_i32 = arith.constant 0 : i32
    %c0_i32_0 = arith.constant 0 : i32
    %c0_i32_1 = arith.constant 0 : i32
    %c0_i32_2 = arith.constant 0 : i32
    return %c0_i32, %c0_i32_0, %c0_i32_1 : i32, i32, i32
  }
  func.func @transform_14(%arg0: i32) -> (i32, i32) {
    %c0_i32 = arith.constant 0 : i32
    %c0_i32_0 = arith.constant 0 : i32
    %c0_i32_1 = arith.constant 0 : i32
    return %c0_i32, %c0_i32_0 : i32, i32
  }
  func.func @transform_15(%arg0: i32) -> (i32, i32) {
    %c0_i32 = arith.constant 0 : i32
    %c0_i32_0 = arith.constant 0 : i32
    %c0_i32_1 = arith.constant 0 : i32
    return %c0_i32, %c0_i32_0 : i32, i32
  }
  func.func @transform_16(%arg0: i32) -> (i32, i32) {
    %c0_i32 = arith.constant 0 : i32
    %c0_i32_0 = arith.constant 0 : i32
    %c0_i32_1 = arith.constant 0 : i32
    return %c0_i32, %c0_i32_0 : i32, i32
  }
}

</mosaic_0001>

<bundles_post_ra>
// kernel: unet_forward.1
= control target key start
LH: loop header
LB: loop body
LE: loop exit
PB: predicated region body
PF: predicated region fallthrough
CT: control target
= control target key end

     0   :  { %s34690_s0 = inlined_call_operand.vmem [shape: bf16[512,128], index: 0, kind: input, shape index: {}]   ;;  %s34691_s1 = inlined_call_operand.vmem [shape: bf16[128,128], index: 1, kind: input, shape index: {}]   ;;  %s34692_s2 = inlined_call_operand.vmem [shape: bf16[2048,512], index: 2, kind: input, shape index: {}]   ;;  %s34693_s3 = inlined_call_operand.vmem [shape: bf16[512,128], index: 3, kind: input, shape index: {}]   ;;  %s34694_s4 = inlined_call_operand.vmem [shape: bf16[256,32], index: 4, kind: input, shape index: {}]   ;;  %s34695_s5 = inlined_call_operand.vmem [shape: bf16[256,16], index: 5, kind: input, shape index: {}]   ;;  %s34696_s6 = inlined_call_operand.vmem [shape: bf16[256,16], index: 6, kind: input, shape index: {}]   ;;  %s34697_s7 = inlined_call_operand.vmem [shape: bf16[512,16], index: 7, kind: input, shape index: {}]   ;;  %s34698_s8 = inlined_call_operand.vmem [shape: bf16[16,128,128], index: 8, kind: input, shape index: {}]   ;;  %s34699_s9 = inlined_call_operand.vmem [shape: bf16[16,128,128], index: 9, kind: input, shape index: {}]   ;;  %s34700_s10 = inlined_call_operand.vmem [shape: bf16[16,128,128], index: 10, kind: input, shape index: {}]   ;;  %s34701_s11 = inlined_call_operand.vmem [shape: bf16[16,128,128], index: 11, kind: input, shape index: {}]   ;;  %s34702_s12 = inlined_call_operand.vmem [shape: bf16[16,128,128], index: 12, kind: input, shape index: {}]   ;;  %s34703_s13 = inlined_call_operand.vmem [shape: bf16[16,128,128], index: 13, kind: input, shape index: {}]   ;;  %s34704_s14 = inlined_call_operand.vmem [shape: f32[4,128], index: 14, kind: input, shape index: {}]   ;;  %s34705_s15 = inlined_call_operand.vmem [shape: f32[4,128], index: 15, kind: input, shape index: {}]   ;;  %s34706_s16 = inlined_call_operand.hbm [shape: f32[32,128], index: 16, kind: output, shape index: {}]  }
   0x1   :  { %34708 = sst [smem:[#allocation84_spill]] %s34690_s0 }
   0x2   :  { %v26585_v0 = vld [vmem:[%s34691_s1] sm:$0xff]   ;;  %v26586_v1 = vld [vmem:[%s34691_s1 + $0x8] sm:$0xff]   ;;  %v26587_v2 = vld [vmem:[%s34691_s1 + $0x10] sm:$0xff]   ;;  %s34709_s0 = sld [smem:[#allocation84_spill]]  ;;  %v28305_v28 = vmov 0  }
   0x3   :  { %23196 = vmatprep.subr.bf16.mxu1 %v26585_v0  ;;  %v26588_v3 = vld [vmem:[%s34691_s1 + $0x18] sm:$0xff]   ;;  %v26589_v5 = vld [vmem:[%s34691_s1 + $0x20] sm:$0xff]   ;;  %v26590_v6 = vld [vmem:[%s34691_s1 + $0x28] sm:$0xff]  }
   0x4   :  { %23197 = vmatpush3.bf16.msra.mxu1 %v26585_v0  ;;  %v26591_v7 = vld [vmem:[%s34691_s1 + $0x30] sm:$0xff]   ;;  %v26592_v8 = vld [vmem:[%s34691_s1 + $0x38] sm:$0xff]  }
   0x5   :  { %23198 = vmatprep.subr.bf16.mxu1 %v26586_v1  ;;  %v26627_v41 = vld [vmem:[%s34692_s2 + $0x4] ss:$16 sps:$4 sm:$0xff]  }
   0x8   :  { %23199 = vmatpush3.bf16.msra.mxu1 %v26586_v1  ;;  %v26593_v4 = vld [vmem:[%s34709_s0] sm:$0xff]   ;;  %v26594_v9 = vld [vmem:[%s34709_s0 + $0x8] sm:$0xff]   ;;  %v26595_v10 = vld [vmem:[%s34709_s0 + $0x10] sm:$0xff]  }
   0x9   :  { %23200 = vmatprep.subr.bf16.mxu1 %v26587_v2  ;;  %23212 = vmatprep.mubr.bf16.mxu1 %v26593_v4  ;;  %v26596_v11 = vld [vmem:[%s34709_s0 + $0x18] sm:$0xff]   ;;  %v26597_v12 = vld [vmem:[%s34709_s0 + $0x20] sm:$0xff]   ;;  %v26598_v13 = vld [vmem:[%s34709_s0 + $0x28] sm:$0xff]  }
   0xa   :  { %v26599_v14 = vld [vmem:[%s34709_s0 + $0x30] sm:$0xff]   ;;  %v26600_v15 = vld [vmem:[%s34709_s0 + $0x38] sm:$0xff]   ;;  %v26601_v16 = vld [vmem:[%s34709_s0 + $0x40] sm:$0xff]  }
   0xb   :  { %v26602_v17 = vld [vmem:[%s34709_s0 + $0x48] sm:$0xff]   ;;  %v26603_v18 = vld [vmem:[%s34709_s0 + $0x50] sm:$0xff]   ;;  %v26604_v19 = vld [vmem:[%s34709_s0 + $0x58] sm:$0xff]  }
   0xc   :  { %23201 = vmatpush3.bf16.msra.mxu1 %v26587_v2  ;;  %v26605_v20 = vld [vmem:[%s34709_s0 + $0x60] sm:$0xff]   ;;  %v26606_v21 = vld [vmem:[%s34709_s0 + $0x68] sm:$0xff]   ;;  %v26607_v22 = vld [vmem:[%s34709_s0 + $0x70] sm:$0xff]  }
   0xd   :  { %23202 = vmatprep.subr.bf16.mxu1 %v26588_v3  ;;  %v26608_v23 = vld [vmem:[%s34709_s0 + $0x78] sm:$0xff]   ;;  %v26609_v24 = vld [vmem:[%s34709_s0 + $0x80] sm:$0xff]   ;;  %v26610_v25 = vld [vmem:[%s34709_s0 + $0x88] sm:$0xff]  }
   0xe   :  { %v26611_v26 = vld [vmem:[%s34709_s0 + $0x90] sm:$0xff]   ;;  %v26612_v27 = vld [vmem:[%s34709_s0 + $0x98] sm:$0xff]   ;;  %v26613_v29 = vld [vmem:[%s34709_s0 + $0xa0] sm:$0xff]  }
   0xf   :  { %v26614_v30 = vld [vmem:[%s34709_s0 + $0xa8] sm:$0xff]   ;;  %v26615_v31 = vld [vmem:[%s34709_s0 + $0xb0] sm:$0xff]   ;;  %v26616_v32 = vld [vmem:[%s34709_s0 + $0xb8] sm:$0xff]  }
  0x10   :  { %23203 = vmatpush3.bf16.msra.mxu1 %v26588_v3  ;;  %v26617_v33 = vld [vmem:[%s34709_s0 + $0xc0] sm:$0xff]   ;;  %v26618_v34 = vld [vmem:[%s34709_s0 + $0xc8] sm:$0xff]   ;;  %v26619_v35 = vld [vmem:[%s34709_s0 + $0xd0] sm:$0xff]  }
  0x11   :  { %23204 = vmatprep.subr.bf16.mxu1 %v26589_v5  ;;  %v26620_v36 = vld [vmem:[%s34709_s0 + $0xd8] sm:$0xff]   ;;  %v26621_v37 = vld [vmem:[%s34709_s0 + $0xe0] sm:$0xff]   ;;  %v26622_v38 = vld [vmem:[%s34709_s0 + $0xe8] sm:$0xff]  }
  0x12   :  { %v26623_v39 = vld [vmem:[%s34709_s0 + $0xf0] sm:$0xff]   ;;  %v26624_v40 = vld [vmem:[%s34709_s0 + $0xf8] sm:$0xff]  }
  0x14   :  { %23205 = vmatpush3.bf16.msra.mxu1 %v26589_v5 }
  0x15   :  { %23206 = vmatprep.subr.bf16.mxu1 %v26590_v6 }
  0x18   :  { %23207 = vmatpush3.bf16.msra.mxu1 %v26590_v6 }
  0x19   :  { %23208 = vmatprep.subr.bf16.mxu1 %v26591_v7 }
  0x1c   :  { %23209 = vmatpush3.bf16.msra.mxu1 %v26591_v7 }
  0x1d   :  { %23210 = vmatprep.subr.bf16.mxu1 %v26592_v8 }
  0x20   :  { %23211 = vmatpush3.bf16.msra.mxu1 %v26592_v8 }
  0x21   :  { %3960 = vmatprep.subr.bf16.mxu1 %v28305_v28 }
  0x23   :  { %23213 = vmatmul.mubr.bf16.vlgmr.msra.gmra.mrb[0].mxu1 %v26594_v9 }
  0x24   :  { %23216 = vmatprep.mubr.bf16.mxu1 %v26595_v10 }
  0x2b   :  { %23217 = vmatmul.mubr.bf16.gmra.mrb[4].mxu1 %v26596_v11 }
  0x2c   :  { %23220 = vmatprep.mubr.bf16.mxu1 %v26597_v12 }
  0x33   :  { %23221 = vmatmul.mubr.bf16.gmra.mrb[8].mxu1 %v26598_v13 }
  0x34   :  { %23224 = vmatprep.mubr.bf16.mxu1 %v26599_v14 }
  0x3b   :  { %23225 = vmatmul.mubr.bf16.gmra.mrb[12].mxu1 %v26600_v15 }
  0x3c   :  { %23228 = vmatprep.mubr.bf16.mxu1 %v26601_v16 }
  0x43   :  { %23229 = vmatmul.mubr.bf16.gmra.mrb[16].mxu1 %v26602_v17 }
  0x44   :  { %23232 = vmatprep.mubr.bf16.mxu1 %v26603_v18 }
  0x4b   :  { %23233 = vmatmul.mubr.bf16.gmra.mrb[20].mxu1 %v26604_v19 }
  0x4c   :  { %23236 = vmatprep.mubr.bf16.mxu1 %v26605_v20 }
  0x53   :  { %23237 = vmatmul.mubr.bf16.gmra.mrb[24].mxu1 %v26606_v21 }
  0x54   :  { %23240 = vmatprep.mubr.bf16.mxu1 %v26607_v22 }
  0x5b   :  { %23241 = vmatmul.mubr.bf16.gmra.mrb[28].mxu1 %v26608_v23 }
  0x5c   :  { %23244 = vmatprep.mubr.bf16.mxu1 %v26609_v24 }
  0x63   :  { %23245 = vmatmul.mubr.bf16.gmra.mrb[32].mxu1 %v26610_v25 }
  0x64   :  { %23248 = vmatprep.mubr.bf16.mxu1 %v26611_v26 }
  0x6b   :  { %23249 = vmatmul.mubr.bf16.gmra.mrb[36].mxu1 %v26612_v27 }
  0x6c   :  { %23252 = vmatprep.mubr.bf16.mxu1 %v26613_v29 }
  0x73   :  { %23253 = vmatmul.mubr.bf16.gmra.mrb[40].mxu1 %v26614_v30 }
  0x74   :  { %23256 = vmatprep.mubr.bf16.mxu1 %v26615_v31 }
  0x7b   :  { %23257 = vmatmul.mubr.bf16.gmra.mrb[44].mxu1 %v26616_v32 }
  0x7c   :  { %23260 = vmatprep.mubr.bf16.mxu1 %v26617_v33 }
  0x83   :  { %23261 = vmatmul.mubr.bf16.gmra.mrb[48].mxu1 %v26618_v34 }
  0x84   :  { %23264 = vmatprep.mubr.bf16.mxu1 %v26619_v35 }
  0x8b   :  { %23265 = vmatmul.mubr.bf16.gmra.mrb[52].mxu1 %v26620_v36 }
  0x8c   :  { %23268 = vmatprep.mubr.bf16.mxu1 %v26621_v37 }
  0x93   :  { %23269 = vmatmul.mubr.bf16.gmra.mrb[56].mxu1 %v26622_v38 }
  0x94   :  { %23272 = vmatprep.mubr.bf16.mxu1 %v26623_v39 }
  0x9b   :  { %23273 = vmatmul.mubr.bf16.gmra.mrb[60].mxu1 %v26624_v40 }
  0x9c   :  { %3992 = vmatprep.mubr.bf16.mxu1 %v26627_v41 }
  0xf6   :  { %v23214_v42 = vpop.f32.mrb[0].mxu1 }
  0xf7   :  { %vm666_vm0 = vcmp.ge.f32.partialorder %v23214_v42, 0.0  ;;  %v730_v43 = vmul.f32 0.2, %v23214_v42  ;;  %v409_v44 = vpop.f32.mrb[1].mxu1 }
  0xf8   :  { %vm664_vm1 = vcmp.ge.f32.partialorder %v409_v44, 0.0  ;;  %v728_v45 = vmul.f32 0.2, %v409_v44  ;;  %v23215_v46 = vpop.f32.mrb[2].mxu1 }
  0xf9   :  { %vm667_vm2 = vcmp.ge.f32.partialorder %v23215_v46, 0.0  ;;  %v731_v47 = vmul.f32 0.2, %v23215_v46  ;;  %v412_v48 = vpop.f32.mrb[3].mxu1  ;;  %v794_v50 = vsel %vm666_vm0, %v23214_v42, %v730_v43 }
  0xfa   :  { %vm665_vm3 = vcmp.ge.f32.partialorder %v412_v48, 0.0  ;;  %v729_v49 = vmul.f32 0.2, %v412_v48  ;;  %v792_v52 = vsel %vm664_vm1, %v409_v44, %v728_v45 }
  0xfb   :  { %v795_v51 = vsel %vm667_vm2, %v23215_v46, %v731_v47 }
  0xfc   :  { %v793_v53 = vsel %vm665_vm3, %v412_v48, %v729_v49  ;;  %v857_v54 = vpack.c.bf16 %v795_v51, %v794_v50 }
  0xfd   :  { %v856_v55 = vpack.c.bf16 %v793_v53, %v792_v52 }
  0xfe   :  { %v23218_v56 = vpop.f32.mrb[4].mxu1 }
  0xff   :  { %vm670_vm4 = vcmp.ge.f32.partialorder %v23218_v56, 0.0  ;;  %v734_v57 = vmul.f32 0.2, %v23218_v56  ;;  %v425_v58 = vpop.f32.mrb[5].mxu1  ;;  %3961 = vmatpush1.bf16.msra.mxu1 %v856_v55 }
 0x100   :  { %vm668_vm5 = vcmp.ge.f32.partialorder %v425_v58, 0.0  ;;  %v732_v59 = vmul.f32 0.2, %v425_v58  ;;  %v23219_v60 = vpop.f32.mrb[6].mxu1  ;;  %3962 = vmatprep.subr.bf16.mxu1 %v28305_v28 }
 0x101   :  { %vm671_vm6 = vcmp.ge.f32.partialorder %v23219_v60, 0.0  ;;  %v735_v61 = vmul.f32 0.2, %v23219_v60  ;;  %v428_v62 = vpop.f32.mrb[7].mxu1  ;;  %v798_v0 = vsel %vm670_vm4, %v23218_v56, %v734_v57 }
 0x102   :  { %vm669_vm7 = vcmp.ge.f32.partialorder %v428_v62, 0.0  ;;  %v733_v63 = vmul.f32 0.2, %v428_v62  ;;  %v796_v2 = vsel %vm668_vm5, %v425_v58, %v732_v59 }
 0x103   :  { %3963 = vmatpush1.bf16.msra.mxu1 %v857_v54  ;;  %v799_v1 = vsel %vm671_vm6, %v23219_v60, %v735_v61 }
 0x104   :  { %3964 = vmatprep.subr.bf16.mxu1 %v28305_v28  ;;  %v797_v3 = vsel %vm669_vm7, %v428_v62, %v733_v63  ;;  %v859_v4 = vpack.c.bf16 %v799_v1, %v798_v0 }
 0x105   :  { %v858_v5 = vpack.c.bf16 %v797_v3, %v796_v2 }
 0x106   :  { %v23222_v6 = vpop.f32.mrb[8].mxu1 }
 0x107   :  { %vm674_vm8 = vcmp.ge.f32.partialorder %v23222_v6, 0.0  ;;  %v738_v7 = vmul.f32 0.2, %v23222_v6  ;;  %v441_v8 = vpop.f32.mrb[9].mxu1  ;;  %3965 = vmatpush1.bf16.msra.mxu1 %v858_v5 }
 0x108   :  { %vm672_vm9 = vcmp.ge.f32.partialorder %v441_v8, 0.0  ;;  %v736_v9 = vmul.f32 0.2, %v441_v8  ;;  %v23223_v10 = vpop.f32.mrb[10].mxu1  ;;  %3966 = vmatprep.subr.bf16.mxu1 %v28305_v28 }
 0x109   :  { %vm675_vm10 = vcmp.ge.f32.partialorder %v23223_v10, 0.0  ;;  %v739_v11 = vmul.f32 0.2, %v23223_v10  ;;  %v444_v12 = vpop.f32.mrb[11].mxu1  ;;  %v802_v14 = vsel %vm674_vm8, %v23222_v6, %v738_v7 }
 0x10a   :  { %vm673_vm11 = vcmp.ge.f32.partialorder %v444_v12, 0.0  ;;  %v737_v13 = vmul.f32 0.2, %v444_v12  ;;  %v800_v16 = vsel %vm672_vm9, %v441_v8, %v736_v9 }
 0x10b   :  { %3967 = vmatpush1.bf16.msra.mxu1 %v859_v4  ;;  %v803_v15 = vsel %vm675_vm10, %v23223_v10, %v739_v11 }
 0x10c   :  { %3968 = vmatprep.subr.bf16.mxu1 %v28305_v28  ;;  %v801_v17 = vsel %vm673_vm11, %v444_v12, %v737_v13  ;;  %v861_v18 = vpack.c.bf16 %v803_v15, %v802_v14 }
 0x10d   :  { %v860_v19 = vpack.c.bf16 %v801_v17, %v800_v16 }
 0x10e   :  { %v23226_v20 = vpop.f32.mrb[12].mxu1 }
 0x10f   :  { %vm678_vm12 = vcmp.ge.f32.partialorder %v23226_v20, 0.0  ;;  %v742_v21 = vmul.f32 0.2, %v23226_v20  ;;  %v457_v22 = vpop.f32.mrb[13].mxu1  ;;  %3969 = vmatpush1.bf16.msra.mxu1 %v860_v19 }
 0x110   :  { %vm676_vm13 = vcmp.ge.f32.partialorder %v457_v22, 0.0  ;;  %v740_v23 = vmul.f32 0.2, %v457_v22  ;;  %v23227_v24 = vpop.f32.mrb[14].mxu1  ;;  %3970 = vmatprep.subr.bf16.mxu1 %v28305_v28 }
 0x111   :  { %vm679_vm14 = vcmp.ge.f32.partialorder %v23227_v24, 0.0  ;;  %v743_v25 = vmul.f32 0.2, %v23227_v24  ;;  %v460_v26 = vpop.f32.mrb[15].mxu1  ;;  %v806_v29 = vsel %vm678_vm12, %v23226_v20, %v742_v21 }
 0x112   :  { %vm677_vm15 = vcmp.ge.f32.partialorder %v460_v26, 0.0  ;;  %v741_v27 = vmul.f32 0.2, %v460_v26  ;;  %v804_v31 = vsel %vm676_vm13, %v457_v22, %v740_v23 }
 0x113   :  { %3971 = vmatpush1.bf16.msra.mxu1 %v861_v18  ;;  %v807_v30 = vsel %vm679_vm14, %v23227_v24, %v743_v25 }
 0x114   :  { %3972 = vmatprep.subr.bf16.mxu1 %v28305_v28  ;;  %v805_v32 = vsel %vm677_vm15, %v460_v26, %v741_v27  ;;  %v863_v33 = vpack.c.bf16 %v807_v30, %v806_v29  ;;  %v26625_v27 = vld [vmem:[%s34692_s2] ss:$16 sps:$4 sm:$0xff]   ;;  %v26628_v29 = vld [vmem:[%s34692_s2 + $0x24] ss:$16 sps:$4 sm:$0xff]  }
 0x115   :  { %v862_v34 = vpack.c.bf16 %v805_v32, %v804_v31  ;;  %v26630_v30 = vld [vmem:[%s34692_s2 + $0x20] ss:$16 sps:$4 sm:$0xff]   ;;  %v26631_v31 = vld [vmem:[%s34692_s2 + $0x44] ss:$16 sps:$4 sm:$0xff]  }
 0x116   :  { %v23230_v35 = vpop.f32.mrb[16].mxu1 }
 0x117   :  { %vm682_vm0 = vcmp.ge.f32.partialorder %v23230_v35, 0.0  ;;  %v746_v36 = vmul.f32 0.2, %v23230_v35  ;;  %v473_v37 = vpop.f32.mrb[17].mxu1  ;;  %3973 = vmatpush1.bf16.msra.mxu1 %v862_v34 }
 0x118   :  { %vm680_vm1 = vcmp.ge.f32.partialorder %v473_v37, 0.0  ;;  %v744_v38 = vmul.f32 0.2, %v473_v37  ;;  %v23231_v39 = vpop.f32.mrb[18].mxu1  ;;  %3974 = vmatprep.subr.bf16.mxu1 %v28305_v28 }
 0x119   :  { %vm683_vm2 = vcmp.ge.f32.partialorder %v23231_v39, 0.0  ;;  %v747_v40 = vmul.f32 0.2, %v23231_v39  ;;  %v476_v41 = vpop.f32.mrb[19].mxu1  ;;  %v810_v43 = vsel %vm682_vm0, %v23230_v35, %v746_v36  ;;  %v26633_v35 = vld [vmem:[%s34692_s2 + $0x40] ss:$16 sps:$4 sm:$0xff]  }
 0x11a   :  { %vm681_vm3 = vcmp.ge.f32.partialorder %v476_v41, 0.0  ;;  %v745_v42 = vmul.f32 0.2, %v476_v41  ;;  %v808_v45 = vsel %vm680_vm1, %v473_v37, %v744_v38  ;;  %v26634_v38 = vld [vmem:[%s34692_s2 + $0x64] ss:$16 sps:$4 sm:$0xff]  }
 0x11b   :  { %3975 = vmatpush1.bf16.msra.mxu1 %v863_v33  ;;  %v811_v44 = vsel %vm683_vm2, %v23231_v39, %v747_v40 }
 0x11c   :  { %3976 = vmatprep.subr.bf16.mxu1 %v28305_v28  ;;  %v809_v46 = vsel %vm681_vm3, %v476_v41, %v745_v42  ;;  %v865_v47 = vpack.c.bf16 %v811_v44, %v810_v43 }
 0x11d   :  { %v864_v48 = vpack.c.bf16 %v809_v46, %v808_v45 }
 0x11e   :  { %v23234_v49 = vpop.f32.mrb[20].mxu1 }
 0x11f   :  { %vm686_vm4 = vcmp.ge.f32.partialorder %v23234_v49, 0.0  ;;  %v750_v50 = vmul.f32 0.2, %v23234_v49  ;;  %v489_v51 = vpop.f32.mrb[21].mxu1  ;;  %3977 = vmatpush1.bf16.msra.mxu1 %v864_v48 }
 0x120   :  { %vm684_vm5 = vcmp.ge.f32.partialorder %v489_v51, 0.0  ;;  %v748_v52 = vmul.f32 0.2, %v489_v51  ;;  %v23235_v53 = vpop.f32.mrb[22].mxu1  ;;  %3978 = vmatprep.subr.bf16.mxu1 %v28305_v28 }
 0x121   :  { %vm687_vm6 = vcmp.ge.f32.partialorder %v23235_v53, 0.0  ;;  %v751_v54 = vmul.f32 0.2, %v23235_v53  ;;  %v492_v55 = vpop.f32.mrb[23].mxu1  ;;  %v814_v57 = vsel %vm686_vm4, %v23234_v49, %v750_v50  ;;  %v26637_v50 = vld [vmem:[%s34692_s2 + $0x84] ss:$16 sps:$4 sm:$0xff]  }
 0x122   :  { %vm685_vm7 = vcmp.ge.f32.partialorder %v492_v55, 0.0  ;;  %v749_v56 = vmul.f32 0.2, %v492_v55  ;;  %v812_v59 = vsel %vm684_vm5, %v489_v51, %v748_v52 }
 0x123   :  { %3979 = vmatpush1.bf16.msra.mxu1 %v865_v47  ;;  %v815_v58 = vsel %vm687_vm6, %v23235_v53, %v751_v54  ;;  %v26636_v47 = vld [vmem:[%s34692_s2 + $0x60] ss:$16 sps:$4 sm:$0xff]  }
 0x124   :  { %3980 = vmatprep.subr.bf16.mxu1 %v28305_v28  ;;  %v813_v60 = vsel %vm685_vm7, %v492_v55, %v749_v56  ;;  %v867_v61 = vpack.c.bf16 %v815_v58, %v814_v57 }
 0x125   :  { %v866_v62 = vpack.c.bf16 %v813_v60, %v812_v59 }
 0x126   :  { %v23238_v63 = vpop.f32.mrb[24].mxu1 }
 0x127   :  { %vm690_vm8 = vcmp.ge.f32.partialorder %v23238_v63, 0.0  ;;  %v754_v0 = vmul.f32 0.2, %v23238_v63  ;;  %v505_v1 = vpop.f32.mrb[25].mxu1  ;;  %3981 = vmatpush1.bf16.msra.mxu1 %v866_v62 }
 0x128   :  { %vm688_vm9 = vcmp.ge.f32.partialorder %v505_v1, 0.0  ;;  %v752_v2 = vmul.f32 0.2, %v505_v1  ;;  %v23239_v3 = vpop.f32.mrb[26].mxu1  ;;  %3982 = vmatprep.subr.bf16.mxu1 %v28305_v28 }
 0x129   :  { %vm691_vm10 = vcmp.ge.f32.partialorder %v23239_v3, 0.0  ;;  %v755_v4 = vmul.f32 0.2, %v23239_v3  ;;  %v508_v5 = vpop.f32.mrb[27].mxu1  ;;  %v818_v7 = vsel %vm690_vm8, %v23238_v63, %v754_v0  ;;  %v26639_v63 = vld [vmem:[%s34692_s2 + $0x80] ss:$16 sps:$4 sm:$0xff]  }
 0x12a   :  { %vm689_vm11 = vcmp.ge.f32.partialorder %v508_v5, 0.0  ;;  %v753_v6 = vmul.f32 0.2, %v508_v5  ;;  %v816_v9 = vsel %vm688_vm9, %v505_v1, %v752_v2  ;;  %v26640_v2 = vld [vmem:[%s34692_s2 + $0xa4] ss:$16 sps:$4 sm:$0xff]  }
 0x12b   :  { %3983 = vmatpush1.bf16.msra.mxu1 %v867_v61  ;;  %v819_v8 = vsel %vm691_vm10, %v23239_v3, %v755_v4 }
 0x12c   :  { %3984 = vmatprep.subr.bf16.mxu1 %v28305_v28  ;;  %v817_v10 = vsel %vm689_vm11, %v508_v5, %v753_v6  ;;  %v869_v11 = vpack.c.bf16 %v819_v8, %v818_v7 }
 0x12d   :  { %v868_v12 = vpack.c.bf16 %v817_v10, %v816_v9 }
 0x12e   :  { %v23242_v13 = vpop.f32.mrb[28].mxu1 }
 0x12f   :  { %vm694_vm12 = vcmp.ge.f32.partialorder %v23242_v13, 0.0  ;;  %v758_v14 = vmul.f32 0.2, %v23242_v13  ;;  %v521_v15 = vpop.f32.mrb[29].mxu1  ;;  %3985 = vmatpush1.bf16.msra.mxu1 %v868_v12 }
 0x130   :  { %vm692_vm13 = vcmp.ge.f32.partialorder %v521_v15, 0.0  ;;  %v756_v16 = vmul.f32 0.2, %v521_v15  ;;  %v23243_v17 = vpop.f32.mrb[30].mxu1  ;;  %3986 = vmatprep.subr.bf16.mxu1 %v28305_v28 }
 0x131   :  { %vm695_vm14 = vcmp.ge.f32.partialorder %v23243_v17, 0.0  ;;  %v759_v18 = vmul.f32 0.2, %v23243_v17  ;;  %v524_v19 = vpop.f32.mrb[31].mxu1  ;;  %v822_v21 = vsel %vm694_vm12, %v23242_v13, %v758_v14 }
 0x132   :  { %vm693_vm15 = vcmp.ge.f32.partialorder %v524_v19, 0.0  ;;  %v757_v20 = vmul.f32 0.2, %v524_v19  ;;  %v820_v23 = vsel %vm692_vm13, %v521_v15, %v756_v16  ;;  %v26642_v15 = vld [vmem:[%s34692_s2 + $0xa0] ss:$16 sps:$4 sm:$0xff]  }
 0x133   :  { %3987 = vmatpush1.bf16.msra.mxu1 %v869_v11  ;;  %v823_v22 = vsel %vm695_vm14, %v23243_v17, %v759_v18  ;;  %v26643_v18 = vld [vmem:[%s34692_s2 + $0xc4] ss:$16 sps:$4 sm:$0xff]  }
 0x134   :  { %3988 = vmatprep.subr.bf16.mxu1 %v28305_v28  ;;  %v821_v24 = vsel %vm693_vm15, %v524_v19, %v757_v20  ;;  %v871_v25 = vpack.c.bf16 %v823_v22, %v822_v21 }
 0x135   :  { %v870_v26 = vpack.c.bf16 %v821_v24, %v820_v23 }
 0x136   :  { %v23246_v32 = vpop.f32.mrb[32].mxu1 }
 0x137   :  { %3989 = vmatpush1.bf16.msra.mxu1 %v870_v26  ;;  %v762_v33 = vmul.f32 0.2, %v23246_v32  ;;  %v537_v34 = vpop.f32.mrb[33].mxu1  ;;  %vm698_vm0 = vcmp.ge.f32.partialorder %v23246_v32, 0.0 }
 0x138   :  { %3990 = vmatprep.subr.bf16.mxu1 %v28305_v28  ;;  %v760_v36 = vmul.f32 0.2, %v537_v34  ;;  %v23247_v37 = vpop.f32.mrb[34].mxu1  ;;  %vm696_vm1 = vcmp.ge.f32.partialorder %v537_v34, 0.0 }
 0x139   :  { %v763_v39 = vmul.f32 0.2, %v23247_v37  ;;  %v540_v40 = vpop.f32.mrb[35].mxu1  ;;  %vm699_vm2 = vcmp.ge.f32.partialorder %v23247_v37, 0.0  ;;  %v826_v45 = vsel %vm698_vm0, %v23246_v32, %v762_v33  ;;  %v26645_v32 = vld [vmem:[%s34692_s2 + $0xc0] ss:$16 sps:$4 sm:$0xff]  }
 0x13a   :  { %vm697_vm3 = vcmp.ge.f32.partialorder %v540_v40, 0.0  ;;  %v761_v41 = vmul.f32 0.2, %v540_v40  ;;  %v824_v42 = vsel %vm696_vm1, %v537_v34, %v760_v36 }
 0x13b   :  { %3991 = vmatpush1.bf16.msra.mxu1 %v871_v25  ;;  %v827_v46 = vsel %vm699_vm2, %v23247_v37, %v763_v39 }
 0x13c   :  { %5017 = vmatprep.subr.bf16.mxu1 %v28305_v28  ;;  %v825_v43 = vsel %vm697_vm3, %v540_v40, %v761_v41  ;;  %v873_v49 = vpack.c.bf16 %v827_v46, %v826_v45 }
 0x13d   :  { %v872_v44 = vpack.c.bf16 %v825_v43, %v824_v42 }
 0x13e   :  { %3993 = vmatmul.mubr.bf16.vlgmr.msra.gmra.mrb[64].mxu1 %v26625_v27  ;;  %v23250_v48 = vpop.f32.mrb[36].mxu1 }
 0x13f   :  { %4000 = vmatprep.mubr.bf16.mxu1 %v26628_v29  ;;  %v766_v51 = vmul.f32 0.2, %v23250_v48  ;;  %v553_v52 = vpop.f32.mrb[37].mxu1  ;;  %5018 = vmatpush1.bf16.msra.mxu1 %v872_v44  ;;  %vm702_vm4 = vcmp.ge.f32.partialorder %v23250_v48, 0.0 }
 0x140   :  { %v764_v53 = vmul.f32 0.2, %v553_v52  ;;  %v23251_v54 = vpop.f32.mrb[38].mxu1  ;;  %5019 = vmatprep.subr.bf16.mxu1 %v28305_v28  ;;  %vm700_vm5 = vcmp.ge.f32.partialorder %v553_v52, 0.0 }
 0x141   :  { %v767_v55 = vmul.f32 0.2, %v23251_v54  ;;  %v556_v56 = vpop.f32.mrb[39].mxu1  ;;  %vm703_vm6 = vcmp.ge.f32.partialorder %v23251_v54, 0.0  ;;  %v830_v61 = vsel %vm702_vm4, %v23250_v48, %v766_v51  ;;  %v26648_v48 = vld [vmem:[%s34692_s2 + $0xe0] ss:$16 sps:$4 sm:$0xff]  }
 0x142   :  { %vm701_vm7 = vcmp.ge.f32.partialorder %v556_v56, 0.0  ;;  %v765_v57 = vmul.f32 0.2, %v556_v56  ;;  %v828_v58 = vsel %vm700_vm5, %v553_v52, %v764_v53  ;;  %v26649_v51 = vld [vmem:[%s34692_s2 + $0x104] ss:$16 sps:$4 sm:$0xff]  }
 0x143   :  { %5020 = vmatpush1.bf16.msra.mxu1 %v873_v49  ;;  %v831_v62 = vsel %vm703_vm6, %v23251_v54, %v767_v55 }
 0x144   :  { %5021 = vmatprep.subr.bf16.mxu1 %v28305_v28  ;;  %v829_v59 = vsel %vm701_vm7, %v556_v56, %v765_v57  ;;  %v875_v1 = vpack.c.bf16 %v831_v62, %v830_v61 }
 0x145   :  { %v874_v60 = vpack.c.bf16 %v829_v59, %v828_v58 }
 0x146   :  { %4001 = vmatmul.mubr.bf16.gmra.mrb[68].mxu1 %v26630_v30  ;;  %v23254_v0 = vpop.f32.mrb[40].mxu1 }
 0x147   :  { %4008 = vmatprep.mubr.bf16.mxu1 %v26631_v31  ;;  %v770_v3 = vmul.f32 0.2, %v23254_v0  ;;  %v569_v4 = vpop.f32.mrb[41].mxu1  ;;  %5022 = vmatpush1.bf16.msra.mxu1 %v874_v60  ;;  %vm706_vm8 = vcmp.ge.f32.partialorder %v23254_v0, 0.0 }
 0x148   :  { %v768_v5 = vmul.f32 0.2, %v569_v4  ;;  %v23255_v6 = vpop.f32.mrb[42].mxu1  ;;  %5023 = vmatprep.subr.bf16.mxu1 %v28305_v28  ;;  %vm704_vm9 = vcmp.ge.f32.partialorder %v569_v4, 0.0 }
 0x149   :  { %v771_v7 = vmul.f32 0.2, %v23255_v6  ;;  %v572_v8 = vpop.f32.mrb[43].mxu1  ;;  %vm707_vm10 = vcmp.ge.f32.partialorder %v23255_v6, 0.0  ;;  %v834_v13 = vsel %vm706_vm8, %v23254_v0, %v770_v3  ;;  %v26651_v0 = vld [vmem:[%s34692_s2 + $0x100] ss:$16 sps:$4 sm:$0xff]  }
 0x14a   :  { %vm705_vm11 = vcmp.ge.f32.partialorder %v572_v8, 0.0  ;;  %v769_v9 = vmul.f32 0.2, %v572_v8  ;;  %v832_v10 = vsel %vm704_vm9, %v569_v4, %v768_v5  ;;  %v26652_v3 = vld [vmem:[%s34692_s2 + $0x124] ss:$16 sps:$4 sm:$0xff]  }
 0x14b   :  { %5024 = vmatpush1.bf16.msra.mxu1 %v875_v1  ;;  %v835_v14 = vsel %vm707_vm10, %v23255_v6, %v771_v7 }
 0x14c   :  { %5025 = vmatprep.subr.bf16.mxu1 %v28305_v28  ;;  %v833_v11 = vsel %vm705_vm11, %v572_v8, %v769_v9  ;;  %v877_v17 = vpack.c.bf16 %v835_v14, %v834_v13 }
 0x14d   :  { %v876_v12 = vpack.c.bf16 %v833_v11, %v832_v10 }
 0x14e   :  { %4009 = vmatmul.mubr.bf16.gmra.mrb[72].mxu1 %v26633_v35  ;;  %v23258_v16 = vpop.f32.mrb[44].mxu1  ;;  %v26646_v35 = vld [vmem:[%s34692_s2 + $0xe4] ss:$16 sps:$4 sm:$0xff]  }
 0x14f   :  { %4016 = vmatprep.mubr.bf16.mxu1 %v26634_v38  ;;  %v774_v19 = vmul.f32 0.2, %v23258_v16  ;;  %v585_v20 = vpop.f32.mrb[45].mxu1  ;;  %5026 = vmatpush1.bf16.msra.mxu1 %v876_v12  ;;  %vm710_vm12 = vcmp.ge.f32.partialorder %v23258_v16, 0.0 }
 0x150   :  { %v772_v21 = vmul.f32 0.2, %v585_v20  ;;  %v23259_v22 = vpop.f32.mrb[46].mxu1  ;;  %5027 = vmatprep.subr.bf16.mxu1 %v28305_v28  ;;  %vm708_vm13 = vcmp.ge.f32.partialorder %v585_v20, 0.0 }
 0x151   :  { %v775_v23 = vmul.f32 0.2, %v23259_v22  ;;  %v588_v24 = vpop.f32.mrb[47].mxu1  ;;  %vm711_vm14 = vcmp.ge.f32.partialorder %v23259_v22, 0.0  ;;  %v838_v30 = vsel %vm710_vm12, %v23258_v16, %v774_v19  ;;  %v26654_v16 = vld [vmem:[%s34692_s2 + $0x120] ss:$16 sps:$4 sm:$0xff]  }
 0x152   :  { %vm709_vm15 = vcmp.ge.f32.partialorder %v588_v24, 0.0  ;;  %v773_v25 = vmul.f32 0.2, %v588_v24  ;;  %v836_v26 = vsel %vm708_vm13, %v585_v20, %v772_v21  ;;  %v26655_v19 = vld [vmem:[%s34692_s2 + $0x144] ss:$16 sps:$4 sm:$0xff]  }
 0x153   :  { %5028 = vmatpush1.bf16.msra.mxu1 %v877_v17  ;;  %v839_v31 = vsel %vm711_vm14, %v23259_v22, %v775_v23 }
 0x154   :  { %5029 = vmatprep.subr.bf16.mxu1 %v28305_v28  ;;  %v837_v27 = vsel %vm709_vm15, %v588_v24, %v773_v25  ;;  %v879_v34 = vpack.c.bf16 %v839_v31, %v838_v30 }
 0x155   :  { %v878_v29 = vpack.c.bf16 %v837_v27, %v836_v26 }
 0x156   :  { %4017 = vmatmul.mubr.bf16.gmra.mrb[76].mxu1 %v26636_v47  ;;  %v23262_v33 = vpop.f32.mrb[48].mxu1 }
 0x157   :  { %4024 = vmatprep.mubr.bf16.mxu1 %v26637_v50  ;;  %v778_v36 = vmul.f32 0.2, %v23262_v33  ;;  %v601_v37 = vpop.f32.mrb[49].mxu1  ;;  %5030 = vmatpush1.bf16.msra.mxu1 %v878_v29  ;;  %vm714_vm0 = vcmp.ge.f32.partialorder %v23262_v33, 0.0 }
 0x158   :  { %v776_v38 = vmul.f32 0.2, %v601_v37  ;;  %v23263_v39 = vpop.f32.mrb[50].mxu1  ;;  %5031 = vmatprep.subr.bf16.mxu1 %v28305_v28  ;;  %vm712_vm1 = vcmp.ge.f32.partialorder %v601_v37, 0.0 }
 0x159   :  { %v779_v40 = vmul.f32 0.2, %v23263_v39  ;;  %v604_v41 = vpop.f32.mrb[51].mxu1  ;;  %vm715_vm2 = vcmp.ge.f32.partialorder %v23263_v39, 0.0  ;;  %v842_v46 = vsel %vm714_vm0, %v23262_v33, %v778_v36  ;;  %v26657_v33 = vld [vmem:[%s34692_s2 + $0x140] ss:$16 sps:$4 sm:$0xff]  }
 0x15a   :  { %vm713_vm3 = vcmp.ge.f32.partialorder %v604_v41, 0.0  ;;  %v777_v42 = vmul.f32 0.2, %v604_v41  ;;  %v840_v43 = vsel %vm712_vm1, %v601_v37, %v776_v38  ;;  %v26660_v36 = vld [vmem:[%s34692_s2 + $0x160] ss:$16 sps:$4 sm:$0xff]  }
 0x15b   :  { %5032 = vmatpush1.bf16.msra.mxu1 %v879_v34  ;;  %v843_v47 = vsel %vm715_vm2, %v23263_v39, %v779_v40  ;;  %v26661_v37 = vld [vmem:[%s34692_s2 + $0x184] ss:$16 sps:$4 sm:$0xff]   ;;  %v26663_v38 = vld [vmem:[%s34692_s2 + $0x180] ss:$16 sps:$4 sm:$0xff]  }
 0x15c   :  { %5033 = vmatprep.subr.bf16.mxu1 %v28305_v28  ;;  %v841_v44 = vsel %vm713_vm3, %v604_v41, %v777_v42  ;;  %v881_v50 = vpack.c.bf16 %v843_v47, %v842_v46  ;;  %v26666_v39 = vld [vmem:[%s34692_s2 + $0x1a0] ss:$16 sps:$4 sm:$0xff]   ;;  %v26667_v40 = vld [vmem:[%s34692_s2 + $0x1c4] ss:$16 sps:$4 sm:$0xff]  }
 0x15d   :  { %v880_v45 = vpack.c.bf16 %v841_v44, %v840_v43  ;;  %v26669_v41 = vld [vmem:[%s34692_s2 + $0x1c0] ss:$16 sps:$4 sm:$0xff]   ;;  %v26670_v42 = vld [vmem:[%s34692_s2 + $0x1e4] ss:$16 sps:$4 sm:$0xff]  }
 0x15e   :  { %4025 = vmatmul.mubr.bf16.gmra.mrb[80].mxu1 %v26639_v63  ;;  %v23266_v49 = vpop.f32.mrb[52].mxu1  ;;  %v26672_v43 = vld [vmem:[%s34692_s2 + $0x1e0] ss:$16 sps:$4 sm:$0xff]   ;;  %v26673_v44 = vld [vmem:[%s34692_s2 + $0x204] ss:$16 sps:$4 sm:$0xff]  }
 0x15f   :  { %4032 = vmatprep.mubr.bf16.mxu1 %v26640_v2  ;;  %v782_v52 = vmul.f32 0.2, %v23266_v49  ;;  %v617_v53 = vpop.f32.mrb[53].mxu1  ;;  %5034 = vmatpush1.bf16.msra.mxu1 %v880_v45  ;;  %vm718_vm4 = vcmp.ge.f32.partialorder %v23266_v49, 0.0  ;;  %v26675_v45 = vld [vmem:[%s34692_s2 + $0x200] ss:$16 sps:$4 sm:$0xff]  }
 0x160   :  { %v780_v54 = vmul.f32 0.2, %v617_v53  ;;  %v23267_v55 = vpop.f32.mrb[54].mxu1  ;;  %5035 = vmatprep.subr.bf16.mxu1 %v28305_v28  ;;  %vm716_vm5 = vcmp.ge.f32.partialorder %v617_v53, 0.0  ;;  %v26676_v46 = vld [vmem:[%s34692_s2 + $0x224] ss:$16 sps:$4 sm:$0xff]  }
 0x161   :  { %v783_v56 = vmul.f32 0.2, %v23267_v55  ;;  %v620_v57 = vpop.f32.mrb[55].mxu1  ;;  %vm719_vm6 = vcmp.ge.f32.partialorder %v23267_v55, 0.0  ;;  %v846_v62 = vsel %vm718_vm4, %v23266_v49, %v782_v52  ;;  %v26678_v47 = vld [vmem:[%s34692_s2 + $0x220] ss:$16 sps:$4 sm:$0xff]  }
 0x162   :  { %vm717_vm7 = vcmp.ge.f32.partialorder %v620_v57, 0.0  ;;  %v781_v58 = vmul.f32 0.2, %v620_v57  ;;  %v844_v59 = vsel %vm716_vm5, %v617_v53, %v780_v54  ;;  %v26681_v49 = vld [vmem:[%s34692_s2 + $0x240] ss:$16 sps:$4 sm:$0xff]  }
 0x163   :  { %5036 = vmatpush1.bf16.msra.mxu1 %v881_v50  ;;  %v847_v63 = vsel %vm719_vm6, %v23267_v55, %v783_v56  ;;  %v26682_v50 = vld [vmem:[%s34692_s2 + $0x264] ss:$16 sps:$4 sm:$0xff]   ;;  %v26687_v53 = vld [vmem:[%s34692_s2 + $0x280] ss:$16 sps:$4 sm:$0xff]  }
 0x164   :  { %5037 = vmatprep.subr.bf16.mxu1 %v28305_v28  ;;  %v845_v60 = vsel %vm717_vm7, %v620_v57, %v781_v58  ;;  %v883_v2 = vpack.c.bf16 %v847_v63, %v846_v62  ;;  %v26685_v52 = vld [vmem:[%s34692_s2 + $0x284] ss:$16 sps:$4 sm:$0xff]   ;;  %v26690_v55 = vld [vmem:[%s34692_s2 + $0x2a0] ss:$16 sps:$4 sm:$0xff]  }
 0x165   :  { %v882_v61 = vpack.c.bf16 %v845_v60, %v844_v59  ;;  %v26688_v54 = vld [vmem:[%s34692_s2 + $0x2a4] ss:$16 sps:$4 sm:$0xff]   ;;  %v26693_v57 = vld [vmem:[%s34692_s2 + $0x2c0] ss:$16 sps:$4 sm:$0xff]  }
 0x166   :  { %4033 = vmatmul.mubr.bf16.gmra.mrb[84].mxu1 %v26642_v15  ;;  %v23270_v1 = vpop.f32.mrb[56].mxu1  ;;  %v26691_v56 = vld [vmem:[%s34692_s2 + $0x2c4] ss:$16 sps:$4 sm:$0xff]   ;;  %v26696_v59 = vld [vmem:[%s34692_s2 + $0x2e0] ss:$16 sps:$4 sm:$0xff]  }
 0x167   :  { %4040 = vmatprep.mubr.bf16.mxu1 %v26643_v18  ;;  %v786_v4 = vmul.f32 0.2, %v23270_v1  ;;  %v633_v5 = vpop.f32.mrb[57].mxu1  ;;  %5038 = vmatpush1.bf16.msra.mxu1 %v882_v61  ;;  %vm722_vm8 = vcmp.ge.f32.partialorder %v23270_v1, 0.0  ;;  %v26694_v58 = vld [vmem:[%s34692_s2 + $0x2e4] ss:$16 sps:$4 sm:$0xff]  }
 0x168   :  { %v784_v6 = vmul.f32 0.2, %v633_v5  ;;  %v23271_v7 = vpop.f32.mrb[58].mxu1  ;;  %5039 = vmatprep.subr.bf16.mxu1 %v28305_v28  ;;  %vm720_vm9 = vcmp.ge.f32.partialorder %v633_v5, 0.0  ;;  %v26697_v60 = vld [vmem:[%s34692_s2 + $0x304] ss:$16 sps:$4 sm:$0xff]  }
 0x169   :  { %v787_v8 = vmul.f32 0.2, %v23271_v7  ;;  %v636_v9 = vpop.f32.mrb[59].mxu1  ;;  %vm723_vm10 = vcmp.ge.f32.partialorder %v23271_v7, 0.0  ;;  %v850_v14 = vsel %vm722_vm8, %v23270_v1, %v786_v4  ;;  %v26699_v61 = vld [vmem:[%s34692_s2 + $0x300] ss:$16 sps:$4 sm:$0xff]  }
 0x16a   :  { %vm721_vm11 = vcmp.ge.f32.partialorder %v636_v9, 0.0  ;;  %v785_v10 = vmul.f32 0.2, %v636_v9  ;;  %v848_v11 = vsel %vm720_vm9, %v633_v5, %v784_v6  ;;  %v26700_v62 = vld [vmem:[%s34692_s2 + $0x324] ss:$16 sps:$4 sm:$0xff]  }
 0x16b   :  { %5040 = vmatpush1.bf16.msra.mxu1 %v883_v2  ;;  %v851_v15 = vsel %vm723_vm10, %v23271_v7, %v787_v8  ;;  %v26702_v63 = vld [vmem:[%s34692_s2 + $0x320] ss:$16 sps:$4 sm:$0xff]   ;;  %v26706_v2 = vld [vmem:[%s34692_s2 + $0x364] ss:$16 sps:$4 sm:$0xff]  }
 0x16c   :  { %5041 = vmatprep.subr.bf16.mxu1 %v28305_v28  ;;  %v849_v12 = vsel %vm721_vm11, %v636_v9, %v785_v10  ;;  %v885_v18 = vpack.c.bf16 %v851_v15, %v850_v14  ;;  %v26705_v1 = vld [vmem:[%s34692_s2 + $0x340] ss:$16 sps:$4 sm:$0xff]   ;;  %v26709_v4 = vld [vmem:[%s34692_s2 + $0x384] ss:$16 sps:$4 sm:$0xff]  }
 0x16d   :  { %v884_v13 = vpack.c.bf16 %v849_v12, %v848_v11  ;;  %v26711_v5 = vld [vmem:[%s34692_s2 + $0x380] ss:$16 sps:$4 sm:$0xff]   ;;  %v26712_v6 = vld [vmem:[%s34692_s2 + $0x3a4] ss:$16 sps:$4 sm:$0xff]  }
 0x16e   :  { %4041 = vmatmul.mubr.bf16.gmra.mrb[88].mxu1 %v26645_v32  ;;  %v23274_v17 = vpop.f32.mrb[60].mxu1  ;;  %v26714_v7 = vld [vmem:[%s34692_s2 + $0x3a0] ss:$16 sps:$4 sm:$0xff]   ;;  %v26715_v8 = vld [vmem:[%s34692_s2 + $0x3c4] ss:$16 sps:$4 sm:$0xff]  }
 0x16f   :  { %4048 = vmatprep.mubr.bf16.mxu1 %v26646_v35  ;;  %v790_v20 = vmul.f32 0.2, %v23274_v17  ;;  %v649_v21 = vpop.f32.mrb[61].mxu1  ;;  %5042 = vmatpush1.bf16.msra.mxu1 %v884_v13  ;;  %vm726_vm12 = vcmp.ge.f32.partialorder %v23274_v17, 0.0  ;;  %v26658_v35 = vld [vmem:[%s34692_s2 + $0x164] ss:$16 sps:$4 sm:$0xff]  }
 0x170   :  { %v788_v22 = vmul.f32 0.2, %v649_v21  ;;  %v23275_v23 = vpop.f32.mrb[62].mxu1  ;;  %5043 = vmatprep.subr.bf16.mxu1 %v28305_v28  ;;  %vm724_vm13 = vcmp.ge.f32.partialorder %v649_v21, 0.0  ;;  %v26717_v9 = vld [vmem:[%s34692_s2 + $0x3c0] ss:$16 sps:$4 sm:$0xff]  }
 0x171   :  { %v791_v24 = vmul.f32 0.2, %v23275_v23  ;;  %v652_v25 = vpop.f32.mrb[63].mxu1  ;;  %vm727_vm14 = vcmp.ge.f32.partialorder %v23275_v23, 0.0  ;;  %v854_v31 = vsel %vm726_vm12, %v23274_v17, %v790_v20  ;;  %v26718_v10 = vld [vmem:[%s34692_s2 + $0x3e4] ss:$16 sps:$4 sm:$0xff]  }
 0x172   :  { %vm725_vm15 = vcmp.ge.f32.partialorder %v652_v25, 0.0  ;;  %v789_v26 = vmul.f32 0.2, %v652_v25  ;;  %v852_v27 = vsel %vm724_vm13, %v649_v21, %v788_v22  ;;  %v26720_v11 = vld [vmem:[%s34692_s2 + $0x3e0] ss:$16 sps:$4 sm:$0xff]  }
 0x173   :  { %5044 = vmatpush1.bf16.msra.mxu1 %v885_v18  ;;  %v855_v32 = vsel %vm727_vm14, %v23275_v23, %v791_v24  ;;  %v26721_v12 = vld [vmem:[%s34692_s2 + $0x404] ss:$16 sps:$4 sm:$0xff]   ;;  %v26723_v13 = vld [vmem:[%s34692_s2 + $0x400] ss:$16 sps:$4 sm:$0xff]  }
 0x174   :  { %5045 = vmatprep.subr.bf16.mxu1 %v28305_v28  ;;  %v853_v29 = vsel %vm725_vm15, %v652_v25, %v789_v26  ;;  %v887_v34 = vpack.c.bf16 %v855_v32, %v854_v31  ;;  %v26724_v14 = vld [vmem:[%s34692_s2 + $0x424] ss:$16 sps:$4 sm:$0xff]   ;;  %v26726_v15 = vld [vmem:[%s34692_s2 + $0x420] ss:$16 sps:$4 sm:$0xff]  }
 0x175   :  { %v886_v30 = vpack.c.bf16 %v853_v29, %v852_v27  ;;  %v26729_v17 = vld [vmem:[%s34692_s2 + $0x440] ss:$16 sps:$4 sm:$0xff]   ;;  %v26730_v18 = vld [vmem:[%s34692_s2 + $0x464] ss:$16 sps:$4 sm:$0xff]  }
 0x176   :  { %4049 = vmatmul.mubr.bf16.gmra.mrb[92].mxu1 %v26648_v48  ;;  %v26679_v48 = vld [vmem:[%s34692_s2 + $0x244] ss:$16 sps:$4 sm:$0xff]   ;;  %v26735_v21 = vld [vmem:[%s34692_s2 + $0x480] ss:$16 sps:$4 sm:$0xff]  }
 0x177   :  { %4056 = vmatprep.mubr.bf16.mxu1 %v26649_v51  ;;  %5046 = vmatpush1.bf16.msra.mxu1 %v886_v30  ;;  %v26684_v51 = vld [vmem:[%s34692_s2 + $0x260] ss:$16 sps:$4 sm:$0xff]   ;;  %v26733_v20 = vld [vmem:[%s34692_s2 + $0x484] ss:$16 sps:$4 sm:$0xff]  }
 0x178   :  { %5047 = vmatprep.subr.bf16.mxu1 %v28305_v28  ;;  %v26664_v28 = vld [vmem:[%s34692_s2 + $0x1a4] ss:$16 sps:$4 sm:$0xff]   ;;  %v26738_v23 = vld [vmem:[%s34692_s2 + $0x4a0] ss:$16 sps:$4 sm:$0xff]  }
 0x179   :  { %v26736_v22 = vld [vmem:[%s34692_s2 + $0x4a4] ss:$16 sps:$4 sm:$0xff]   ;;  %v26741_v25 = vld [vmem:[%s34692_s2 + $0x4c0] ss:$16 sps:$4 sm:$0xff]  }
 0x17a   :  { %v26739_v24 = vld [vmem:[%s34692_s2 + $0x4c4] ss:$16 sps:$4 sm:$0xff]   ;;  %v26744_v27 = vld [vmem:[%s34692_s2 + $0x4e0] ss:$16 sps:$4 sm:$0xff]  }
 0x17b   :  { %5048 = vmatpush1.bf16.msra.mxu1 %v887_v34  ;;  %v26742_v26 = vld [vmem:[%s34692_s2 + $0x4e4] ss:$16 sps:$4 sm:$0xff]   ;;  %v26747_v30 = vld [vmem:[%s34692_s2 + $0x500] ss:$16 sps:$4 sm:$0xff]  }
 0x17c   :  { %v26745_v29 = vld [vmem:[%s34692_s2 + $0x504] ss:$16 sps:$4 sm:$0xff]   ;;  %v26750_v32 = vld [vmem:[%s34692_s2 + $0x520] ss:$16 sps:$4 sm:$0xff]  }
 0x17d   :  { %v26748_v31 = vld [vmem:[%s34692_s2 + $0x524] ss:$16 sps:$4 sm:$0xff]   ;;  %v26753_v34 = vld [vmem:[%s34692_s2 + $0x540] ss:$16 sps:$4 sm:$0xff]  }
 0x17e   :  { %4057 = vmatmul.mubr.bf16.gmra.mrb[96].mxu1 %v26651_v0  ;;  %v26703_v0 = vld [vmem:[%s34692_s2 + $0x344] ss:$16 sps:$4 sm:$0xff]  }
 0x17f   :  { %4064 = vmatprep.mubr.bf16.mxu1 %v26652_v3  ;;  %v26708_v3 = vld [vmem:[%s34692_s2 + $0x360] ss:$16 sps:$4 sm:$0xff]  }
 0x186   :  { %4065 = vmatmul.mubr.bf16.gmra.mrb[100].mxu1 %v26654_v16  ;;  %v26727_v16 = vld [vmem:[%s34692_s2 + $0x444] ss:$16 sps:$4 sm:$0xff]  }
 0x187   :  { %4072 = vmatprep.mubr.bf16.mxu1 %v26655_v19  ;;  %v26732_v19 = vld [vmem:[%s34692_s2 + $0x460] ss:$16 sps:$4 sm:$0xff]  }
 0x18e   :  { %4073 = vmatmul.mubr.bf16.gmra.mrb[104].mxu1 %v26657_v33  ;;  %v26751_v33 = vld [vmem:[%s34692_s2 + $0x544] ss:$16 sps:$4 sm:$0xff]  }
 0x18f   :  { %4080 = vmatprep.mubr.bf16.mxu1 %v26658_v35  ;;  %v26754_v35 = vld [vmem:[%s34692_s2 + $0x564] ss:$16 sps:$4 sm:$0xff]  }
 0x196   :  { %4081 = vmatmul.mubr.bf16.gmra.mrb[108].mxu1 %v26660_v36  ;;  %v26756_v36 = vld [vmem:[%s34692_s2 + $0x560] ss:$16 sps:$4 sm:$0xff]  }
 0x197   :  { %4088 = vmatprep.mubr.bf16.mxu1 %v26661_v37  ;;  %v26757_v37 = vld [vmem:[%s34692_s2 + $0x584] ss:$16 sps:$4 sm:$0xff]  }
 0x19e   :  { %4089 = vmatmul.mubr.bf16.gmra.mrb[112].mxu1 %v26663_v38  ;;  %v26759_v38 = vld [vmem:[%s34692_s2 + $0x580] ss:$16 sps:$4 sm:$0xff]  }
 0x19f   :  { %4096 = vmatprep.mubr.bf16.mxu1 %v26664_v28  ;;  %v26760_v28 = vld [vmem:[%s34692_s2 + $0x5a4] ss:$16 sps:$4 sm:$0xff]  }
 0x1a6   :  { %4097 = vmatmul.mubr.bf16.gmra.mrb[116].mxu1 %v26666_v39  ;;  %v26762_v39 = vld [vmem:[%s34692_s2 + $0x5a0] ss:$16 sps:$4 sm:$0xff]  }
 0x1a7   :  { %4104 = vmatprep.mubr.bf16.mxu1 %v26667_v40  ;;  %v26763_v40 = vld [vmem:[%s34692_s2 + $0x5c4] ss:$16 sps:$4 sm:$0xff]  }
 0x1ae   :  { %4105 = vmatmul.mubr.bf16.gmra.mrb[120].mxu1 %v26669_v41  ;;  %v26765_v41 = vld [vmem:[%s34692_s2 + $0x5c0] ss:$16 sps:$4 sm:$0xff]  }
 0x1af   :  { %4112 = vmatprep.mubr.bf16.mxu1 %v26670_v42  ;;  %v26766_v42 = vld [vmem:[%s34692_s2 + $0x5e4] ss:$16 sps:$4 sm:$0xff]  }
 0x1b6   :  { %4113 = vmatmul.mubr.bf16.gmra.mrb[124].mxu1 %v26672_v43  ;;  %v26768_v43 = vld [vmem:[%s34692_s2 + $0x5e0] ss:$16 sps:$4 sm:$0xff]  }
 0x1b7   :  { %4120 = vmatprep.mubr.bf16.mxu1 %v26673_v44  ;;  %v26771_v44 = vld [vmem:[%s34692_s2 + $0x604] ss:$16 sps:$4 sm:$0xff]  }
 0x1be   :  { %4121 = vmatmul.mubr.bf16.gmra.mrb[128].mxu1 %v26675_v45  ;;  %v26769_v45 = vld [vmem:[%s34692_s2 + $0x600] ss:$16 sps:$4 sm:$0xff]  }
 0x1bf   :  { %4128 = vmatprep.mubr.bf16.mxu1 %v26676_v46  ;;  %v26774_v46 = vld [vmem:[%s34692_s2 + $0x624] ss:$16 sps:$4 sm:$0xff]  }
 0x1c6   :  { %4129 = vmatmul.mubr.bf16.gmra.mrb[132].mxu1 %v26678_v47  ;;  %v26772_v47 = vld [vmem:[%s34692_s2 + $0x620] ss:$16 sps:$4 sm:$0xff]  }
 0x1c7   :  { %4136 = vmatprep.mubr.bf16.mxu1 %v26679_v48  ;;  %v26777_v48 = vld [vmem:[%s34692_s2 + $0x644] ss:$16 sps:$4 sm:$0xff]  }
 0x1ce   :  { %4137 = vmatmul.mubr.bf16.gmra.mrb[136].mxu1 %v26681_v49  ;;  %v26775_v49 = vld [vmem:[%s34692_s2 + $0x640] ss:$16 sps:$4 sm:$0xff]  }
 0x1cf   :  { %4144 = vmatprep.mubr.bf16.mxu1 %v26682_v50  ;;  %v26780_v50 = vld [vmem:[%s34692_s2 + $0x664] ss:$16 sps:$4 sm:$0xff]  }
 0x1d6   :  { %4145 = vmatmul.mubr.bf16.gmra.mrb[140].mxu1 %v26684_v51  ;;  %v26778_v51 = vld [vmem:[%s34692_s2 + $0x660] ss:$16 sps:$4 sm:$0xff]  }
 0x1d7   :  { %4152 = vmatprep.mubr.bf16.mxu1 %v26685_v52  ;;  %v26783_v52 = vld [vmem:[%s34692_s2 + $0x684] ss:$16 sps:$4 sm:$0xff]  }
 0x1de   :  { %4153 = vmatmul.mubr.bf16.gmra.mrb[144].mxu1 %v26687_v53  ;;  %v26781_v53 = vld [vmem:[%s34692_s2 + $0x680] ss:$16 sps:$4 sm:$0xff]  }
 0x1df   :  { %4160 = vmatprep.mubr.bf16.mxu1 %v26688_v54  ;;  %v26786_v54 = vld [vmem:[%s34692_s2 + $0x6a4] ss:$16 sps:$4 sm:$0xff]  }
 0x1e6   :  { %4161 = vmatmul.mubr.bf16.gmra.mrb[148].mxu1 %v26690_v55  ;;  %v26784_v55 = vld [vmem:[%s34692_s2 + $0x6a0] ss:$16 sps:$4 sm:$0xff]  }
 0x1e7   :  { %4168 = vmatprep.mubr.bf16.mxu1 %v26691_v56  ;;  %v26789_v56 = vld [vmem:[%s34692_s2 + $0x6c4] ss:$16 sps:$4 sm:$0xff]  }
 0x1ee   :  { %4169 = vmatmul.mubr.bf16.gmra.mrb[152].mxu1 %v26693_v57  ;;  %v26787_v57 = vld [vmem:[%s34692_s2 + $0x6c0] ss:$16 sps:$4 sm:$0xff]  }
 0x1ef   :  { %4176 = vmatprep.mubr.bf16.mxu1 %v26694_v58  ;;  %v26792_v58 = vld [vmem:[%s34692_s2 + $0x6e4] ss:$16 sps:$4 sm:$0xff]  }
 0x1f6   :  { %4177 = vmatmul.mubr.bf16.gmra.mrb[156].mxu1 %v26696_v59  ;;  %v26790_v59 = vld [vmem:[%s34692_s2 + $0x6e0] ss:$16 sps:$4 sm:$0xff]  }
 0x1f7   :  { %4184 = vmatprep.mubr.bf16.mxu1 %v26697_v60  ;;  %v26795_v60 = vld [vmem:[%s34692_s2 + $0x704] ss:$16 sps:$4 sm:$0xff]  }
 0x1fe   :  { %4185 = vmatmul.mubr.bf16.gmra.mrb[160].mxu1 %v26699_v61  ;;  %v26793_v61 = vld [vmem:[%s34692_s2 + $0x700] ss:$16 sps:$4 sm:$0xff]  }
 0x1ff   :  { %4192 = vmatprep.mubr.bf16.mxu1 %v26700_v62  ;;  %v26798_v62 = vld [vmem:[%s34692_s2 + $0x724] ss:$16 sps:$4 sm:$0xff]  }
 0x206   :  { %4193 = vmatmul.mubr.bf16.gmra.mrb[164].mxu1 %v26702_v63  ;;  %v26796_v63 = vld [vmem:[%s34692_s2 + $0x720] ss:$16 sps:$4 sm:$0xff]  }
 0x207   :  { %4200 = vmatprep.mubr.bf16.mxu1 %v26703_v0  ;;  %v26801_v0 = vld [vmem:[%s34692_s2 + $0x744] ss:$16 sps:$4 sm:$0xff]  }
 0x20e   :  { %4201 = vmatmul.mubr.bf16.gmra.mrb[168].mxu1 %v26705_v1  ;;  %v26799_v1 = vld [vmem:[%s34692_s2 + $0x740] ss:$16 sps:$4 sm:$0xff]  }
 0x20f   :  { %4208 = vmatprep.mubr.bf16.mxu1 %v26706_v2  ;;  %v26804_v2 = vld [vmem:[%s34692_s2 + $0x764] ss:$16 sps:$4 sm:$0xff]  }
 0x216   :  { %4209 = vmatmul.mubr.bf16.gmra.mrb[172].mxu1 %v26708_v3  ;;  %v26802_v3 = vld [vmem:[%s34692_s2 + $0x760] ss:$16 sps:$4 sm:$0xff]  }
 0x217   :  { %4216 = vmatprep.mubr.bf16.mxu1 %v26709_v4  ;;  %v26807_v4 = vld [vmem:[%s34692_s2 + $0x784] ss:$16 sps:$4 sm:$0xff]  }
 0x21e   :  { %4217 = vmatmul.mubr.bf16.gmra.mrb[176].mxu1 %v26711_v5  ;;  %v26805_v5 = vld [vmem:[%s34692_s2 + $0x780] ss:$16 sps:$4 sm:$0xff]  }
 0x21f   :  { %4224 = vmatprep.mubr.bf16.mxu1 %v26712_v6  ;;  %v26810_v6 = vld [vmem:[%s34692_s2 + $0x7a4] ss:$16 sps:$4 sm:$0xff]  }
 0x226   :  { %4225 = vmatmul.mubr.bf16.gmra.mrb[180].mxu1 %v26714_v7  ;;  %v26808_v7 = vld [vmem:[%s34692_s2 + $0x7a0] ss:$16 sps:$4 sm:$0xff]  }
 0x227   :  { %4232 = vmatprep.mubr.bf16.mxu1 %v26715_v8  ;;  %v26813_v8 = vld [vmem:[%s34692_s2 + $0x7c4] ss:$16 sps:$4 sm:$0xff]  }
 0x22e   :  { %4233 = vmatmul.mubr.bf16.gmra.mrb[184].mxu1 %v26717_v9  ;;  %v26811_v9 = vld [vmem:[%s34692_s2 + $0x7c0] ss:$16 sps:$4 sm:$0xff]  }
 0x22f   :  { %4240 = vmatprep.mubr.bf16.mxu1 %v26718_v10  ;;  %v26816_v10 = vld [vmem:[%s34692_s2 + $0x7e4] ss:$16 sps:$4 sm:$0xff]  }
 0x236   :  { %4241 = vmatmul.mubr.bf16.gmra.mrb[188].mxu1 %v26720_v11  ;;  %v26814_v11 = vld [vmem:[%s34692_s2 + $0x7e0] ss:$16 sps:$4 sm:$0xff]  }
 0x237   :  { %4248 = vmatprep.mubr.bf16.mxu1 %v26721_v12  ;;  %v26819_v12 = vld [vmem:[%s34692_s2 + $0x804] ss:$16 sps:$4 sm:$0xff]  }
 0x23e   :  { %4249 = vmatmul.mubr.bf16.gmra.mrb[192].mxu1 %v26723_v13  ;;  %v26817_v13 = vld [vmem:[%s34692_s2 + $0x800] ss:$16 sps:$4 sm:$0xff]  }
 0x23f   :  { %4256 = vmatprep.mubr.bf16.mxu1 %v26724_v14 }
 0x246   :  { %4257 = vmatmul.mubr.bf16.gmra.mrb[196].mxu1 %v26726_v15 }
 0x247   :  { %4264 = vmatprep.mubr.bf16.mxu1 %v26727_v16 }
 0x24e   :  { %4265 = vmatmul.mubr.bf16.gmra.mrb[200].mxu1 %v26729_v17  ;;  %v26822_v17 = vld [vmem:[%s34692_s2 + $0x824] ss:$16 sps:$4 sm:$0xff]  }
 0x24f   :  { %4272 = vmatprep.mubr.bf16.mxu1 %v26730_v18 }
 0x256   :  { %4273 = vmatmul.mubr.bf16.gmra.mrb[204].mxu1 %v26732_v19  ;;  %v26820_v19 = vld [vmem:[%s34692_s2 + $0x820] ss:$16 sps:$4 sm:$0xff]  }
 0x257   :  { %4280 = vmatprep.mubr.bf16.mxu1 %v26733_v20 }
 0x25e   :  { %4281 = vmatmul.mubr.bf16.gmra.mrb[208].mxu1 %v26735_v21 }
 0x25f   :  { %4288 = vmatprep.mubr.bf16.mxu1 %v26736_v22 }
 0x266   :  { %4289 = vmatmul.mubr.bf16.gmra.mrb[212].mxu1 %v26738_v23  ;;  %v26825_v23 = vld [vmem:[%s34692_s2 + $0x844] ss:$16 sps:$4 sm:$0xff]  }
 0x267   :  { %4296 = vmatprep.mubr.bf16.mxu1 %v26739_v24 }
 0x26e   :  { %4297 = vmatmul.mubr.bf16.gmra.mrb[216].mxu1 %v26741_v25  ;;  %v26823_v25 = vld [vmem:[%s34692_s2 + $0x840] ss:$16 sps:$4 sm:$0xff]  }
 0x26f   :  { %4304 = vmatprep.mubr.bf16.mxu1 %v26742_v26 }
 0x276   :  { %4305 = vmatmul.mubr.bf16.gmra.mrb[220].mxu1 %v26744_v27 }
 0x277   :  { %4312 = vmatprep.mubr.bf16.mxu1 %v26745_v29 }
 0x27e   :  { %4313 = vmatmul.mubr.bf16.gmra.mrb[224].mxu1 %v26747_v30  ;;  %v26828_v30 = vld [vmem:[%s34692_s2 + $0x864] ss:$16 sps:$4 sm:$0xff]  }
 0x27f   :  { %4320 = vmatprep.mubr.bf16.mxu1 %v26748_v31 }
 0x286   :  { %4321 = vmatmul.mubr.bf16.gmra.mrb[228].mxu1 %v26750_v32  ;;  %v26826_v32 = vld [vmem:[%s34692_s2 + $0x860] ss:$16 sps:$4 sm:$0xff]  }
 0x287   :  { %4328 = vmatprep.mubr.bf16.mxu1 %v26751_v33 }
 0x28e   :  { %4329 = vmatmul.mubr.bf16.gmra.mrb[232].mxu1 %v26753_v34 }
 0x28f   :  { %4336 = vmatprep.mubr.bf16.mxu1 %v26754_v35 }
 0x296   :  { %4337 = vmatmul.mubr.bf16.gmra.mrb[236].mxu1 %v26756_v36  ;;  %v26831_v36 = vld [vmem:[%s34692_s2 + $0x884] ss:$16 sps:$4 sm:$0xff]  }
 0x297   :  { %4344 = vmatprep.mubr.bf16.mxu1 %v26757_v37 }
 0x29e   :  { %4345 = vmatmul.mubr.bf16.gmra.mrb[240].mxu1 %v26759_v38  ;;  %v26829_v38 = vld [vmem:[%s34692_s2 + $0x880] ss:$16 sps:$4 sm:$0xff]  }
 0x29f   :  { %4352 = vmatprep.mubr.bf16.mxu1 %v26760_v28 }
 0x2a6   :  { %4353 = vmatmul.mubr.bf16.gmra.mrb[244].mxu1 %v26762_v39 }
 0x2a7   :  { %4360 = vmatprep.mubr.bf16.mxu1 %v26763_v40 }
 0x2ae   :  { %4361 = vmatmul.mubr.bf16.gmra.mrb[248].mxu1 %v26765_v41  ;;  %v26834_v41 = vld [vmem:[%s34692_s2 + $0x8a4] ss:$16 sps:$4 sm:$0xff]  }
 0x2af   :  { %4368 = vmatprep.mubr.bf16.mxu1 %v26766_v42 }
 0x2b6   :  { %4369 = vmatmul.mubr.bf16.gmra.mrb[252].mxu1 %v26768_v43  ;;  %v26832_v43 = vld [vmem:[%s34692_s2 + $0x8a0] ss:$16 sps:$4 sm:$0xff]  }
 0x2b7   :  { %4376 = vmatprep.mubr.bf16.mxu1 %v26771_v44 }
 0x2be   :  { %4377 = vmatmul.mubr.bf16.gmra.mrb[0].mxu1 %v26769_v45 }
 0x2bf   :  { %4384 = vmatprep.mubr.bf16.mxu1 %v26774_v46 }
 0x2c6   :  { %4385 = vmatmul.mubr.bf16.gmra.mrb[4].mxu1 %v26772_v47  ;;  %v26837_v47 = vld [vmem:[%s34692_s2 + $0x8c4] ss:$16 sps:$4 sm:$0xff]  }
 0x2c7   :  { %4392 = vmatprep.mubr.bf16.mxu1 %v26777_v48 }
 0x2ce   :  { %4393 = vmatmul.mubr.bf16.gmra.mrb[8].mxu1 %v26775_v49  ;;  %v26835_v49 = vld [vmem:[%s34692_s2 + $0x8c0] ss:$16 sps:$4 sm:$0xff]  }
 0x2cf   :  { %4400 = vmatprep.mubr.bf16.mxu1 %v26780_v50 }
 0x2d6   :  { %4401 = vmatmul.mubr.bf16.gmra.mrb[12].mxu1 %v26778_v51 }
 0x2d7   :  { %4408 = vmatprep.mubr.bf16.mxu1 %v26783_v52 }
 0x2de   :  { %4409 = vmatmul.mubr.bf16.gmra.mrb[16].mxu1 %v26781_v53  ;;  %v26840_v53 = vld [vmem:[%s34692_s2 + $0x8e4] ss:$16 sps:$4 sm:$0xff]  }
 0x2df   :  { %4416 = vmatprep.mubr.bf16.mxu1 %v26786_v54 }
 0x2e6   :  { %4417 = vmatmul.mubr.bf16.gmra.mrb[20].mxu1 %v26784_v55  ;;  %v26838_v55 = vld [vmem:[%s34692_s2 + $0x8e0] ss:$16 sps:$4 sm:$0xff]  }
 0x2e7   :  { %4424 = vmatprep.mubr.bf16.mxu1 %v26789_v56 }
 0x2ee   :  { %4425 = vmatmul.mubr.bf16.gmra.mrb[24].mxu1 %v26787_v57 }
 0x2ef   :  { %4432 = vmatprep.mubr.bf16.mxu1 %v26792_v58 }
 0x2f6   :  { %4433 = vmatmul.mubr.bf16.gmra.mrb[28].mxu1 %v26790_v59  ;;  %v26843_v59 = vld [vmem:[%s34692_s2 + $0x904] ss:$16 sps:$4 sm:$0xff]  }
 0x2f7   :  { %4440 = vmatprep.mubr.bf16.mxu1 %v26795_v60 }
 0x2fe   :  { %4441 = vmatmul.mubr.bf16.gmra.mrb[32].mxu1 %v26793_v61  ;;  %v26841_v61 = vld [vmem:[%s34692_s2 + $0x900] ss:$16 sps:$4 sm:$0xff]  }
 0x2ff   :  { %4448 = vmatprep.mubr.bf16.mxu1 %v26798_v62 }
 0x306   :  { %4449 = vmatmul.mubr.bf16.gmra.mrb[36].mxu1 %v26796_v63 }
 0x307   :  { %4456 = vmatprep.mubr.bf16.mxu1 %v26801_v0 }
 0x30e   :  { %4457 = vmatmul.mubr.bf16.gmra.mrb[40].mxu1 %v26799_v1  ;;  %v26846_v1 = vld [vmem:[%s34692_s2 + $0x924] ss:$16 sps:$4 sm:$0xff]  }
 0x30f   :  { %4464 = vmatprep.mubr.bf16.mxu1 %v26804_v2 }
 0x316   :  { %4465 = vmatmul.mubr.bf16.gmra.mrb[44].mxu1 %v26802_v3  ;;  %v26844_v3 = vld [vmem:[%s34692_s2 + $0x920] ss:$16 sps:$4 sm:$0xff]  }
 0x317   :  { %4472 = vmatprep.mubr.bf16.mxu1 %v26807_v4 }
 0x31e   :  { %4473 = vmatmul.mubr.bf16.gmra.mrb[48].mxu1 %v26805_v5 }
 0x31f   :  { %4480 = vmatprep.mubr.bf16.mxu1 %v26810_v6 }
 0x326   :  { %4481 = vmatmul.mubr.bf16.gmra.mrb[52].mxu1 %v26808_v7  ;;  %v26849_v7 = vld [vmem:[%s34692_s2 + $0x944] ss:$16 sps:$4 sm:$0xff]  }
 0x327   :  { %4488 = vmatprep.mubr.bf16.mxu1 %v26813_v8 }
 0x32e   :  { %4489 = vmatmul.mubr.bf16.gmra.mrb[56].mxu1 %v26811_v9  ;;  %v26847_v9 = vld [vmem:[%s34692_s2 + $0x940] ss:$16 sps:$4 sm:$0xff]  }
 0x32f   :  { %4496 = vmatprep.mubr.bf16.mxu1 %v26816_v10 }
 0x336   :  { %4497 = vmatmul.mubr.bf16.gmra.mrb[60].mxu1 %v26814_v11 }
 0x337   :  { %4504 = vmatprep.mubr.bf16.mxu1 %v26819_v12 }
 0x339   :  { %v28946_v14 = vpop.f32.mrb[212].mxu1 }
 0x33a   :  { %v4292_v15 = vpop.f32.mrb[213].mxu1 }
 0x33b   :  { %v28948_v16 = vpop.f32.mrb[214].mxu1 }
 0x33c   :  { %v4295_v18 = vpop.f32.mrb[215].mxu1 }
 0x33e   :  { %4505 = vmatmul.mubr.bf16.gmra.mrb[212].mxu1 %v26817_v13  ;;  %v26852_v13 = vld [vmem:[%s34692_s2 + $0x964] ss:$16 sps:$4 sm:$0xff]  }
 0x33f   :  { %4512 = vmatprep.mubr.bf16.mxu1 %v26822_v17 }
 0x341   :  { %v28956_v20 = vpop.f32.mrb[216].mxu1 }
 0x342   :  { %v4300_v21 = vpop.f32.mrb[217].mxu1 }
 0x343   :  { %v28958_v22 = vpop.f32.mrb[218].mxu1 }
 0x344   :  { %v4303_v24 = vpop.f32.mrb[219].mxu1 }
 0x346   :  { %4513 = vmatmul.mubr.bf16.gmra.mrb[216].mxu1 %v26820_v19  ;;  %v26850_v19 = vld [vmem:[%s34692_s2 + $0x960] ss:$16 sps:$4 sm:$0xff]  }
 0x347   :  { %4520 = vmatprep.mubr.bf16.mxu1 %v26825_v23 }
 0x349   :  { %v28966_v26 = vpop.f32.mrb[220].mxu1 }
 0x34a   :  { %v4308_v27 = vpop.f32.mrb[221].mxu1 }
 0x34b   :  { %v28968_v29 = vpop.f32.mrb[222].mxu1 }
 0x34c   :  { %v4311_v31 = vpop.f32.mrb[223].mxu1 }
 0x34e   :  { %4521 = vmatmul.mubr.bf16.gmra.mrb[220].mxu1 %v26823_v25 }
 0x34f   :  { %4528 = vmatprep.mubr.bf16.mxu1 %v26828_v30 }
 0x351   :  { %v28976_v33 = vpop.f32.mrb[224].mxu1 }
 0x352   :  { %v4316_v34 = vpop.f32.mrb[225].mxu1 }
 0x353   :  { %v28978_v35 = vpop.f32.mrb[226].mxu1 }
 0x354   :  { %v4319_v37 = vpop.f32.mrb[227].mxu1 }
 0x356   :  { %4529 = vmatmul.mubr.bf16.gmra.mrb[224].mxu1 %v26826_v32 }
 0x357   :  { %4536 = vmatprep.mubr.bf16.mxu1 %v26831_v36 }
 0x359   :  { %v28986_v28 = vpop.f32.mrb[228].mxu1 }
 0x35a   :  { %v4324_v39 = vpop.f32.mrb[229].mxu1 }
 0x35b   :  { %v28988_v40 = vpop.f32.mrb[230].mxu1 }
 0x35c   :  { %v4327_v42 = vpop.f32.mrb[231].mxu1 }
 0x35e   :  { %4537 = vmatmul.mubr.bf16.gmra.mrb[228].mxu1 %v26829_v38 }
 0x35f   :  { %4544 = vmatprep.mubr.bf16.mxu1 %v26834_v41 }
 0x361   :  { %v28996_v44 = vpop.f32.mrb[232].mxu1 }
 0x362   :  { %v4332_v45 = vpop.f32.mrb[233].mxu1 }
 0x363   :  { %v28998_v46 = vpop.f32.mrb[234].mxu1 }
 0x364   :  { %v4335_v48 = vpop.f32.mrb[235].mxu1 }
 0x366   :  { %4545 = vmatmul.mubr.bf16.gmra.mrb[232].mxu1 %v26832_v43 }
 0x367   :  { %4552 = vmatprep.mubr.bf16.mxu1 %v26837_v47 }
 0x369   :  { %v29006_v50 = vpop.f32.mrb[236].mxu1 }
 0x36a   :  { %v4340_v51 = vpop.f32.mrb[237].mxu1 }
 0x36b   :  { %v29008_v52 = vpop.f32.mrb[238].mxu1 }
 0x36c   :  { %v4343_v54 = vpop.f32.mrb[239].mxu1 }
 0x36e   :  { %4553 = vmatmul.mubr.bf16.gmra.mrb[236].mxu1 %v26835_v49 }
 0x36f   :  { %4560 = vmatprep.mubr.bf16.mxu1 %v26840_v53 }
 0x371   :  { %v29016_v56 = vpop.f32.mrb[240].mxu1 }
 0x372   :  { %v4348_v57 = vpop.f32.mrb[241].mxu1 }
 0x373   :  { %v29018_v58 = vpop.f32.mrb[242].mxu1 }
 0x374   :  { %v4351_v60 = vpop.f32.mrb[243].mxu1 }
 0x376   :  { %4561 = vmatmul.mubr.bf16.gmra.mrb[240].mxu1 %v26838_v55 }
 0x377   :  { %4568 = vmatprep.mubr.bf16.mxu1 %v26843_v59 }
 0x379   :  { %v29026_v62 = vpop.f32.mrb[244].mxu1 }
 0x37a   :  { %v4356_v63 = vpop.f32.mrb[245].mxu1 }
 0x37b   :  { %v29028_v0 = vpop.f32.mrb[246].mxu1 }
 0x37c   :  { %v4359_v2 = vpop.f32.mrb[247].mxu1 }
 0x37e   :  { %4569 = vmatmul.mubr.bf16.gmra.mrb[244].mxu1 %v26841_v61 }
 0x37f   :  { %4576 = vmatprep.mubr.bf16.mxu1 %v26846_v1 }
 0x381   :  { %v29036_v4 = vpop.f32.mrb[248].mxu1 }
 0x382   :  { %v4364_v5 = vpop.f32.mrb[249].mxu1 }
 0x383   :  { %v29038_v6 = vpop.f32.mrb[250].mxu1 }
 0x384   :  { %v4367_v8 = vpop.f32.mrb[251].mxu1 }
 0x386   :  { %4577 = vmatmul.mubr.bf16.gmra.mrb[248].mxu1 %v26844_v3 }
 0x387   :  { %4584 = vmatprep.mubr.bf16.mxu1 %v26849_v7 }
 0x389   :  { %v29046_v10 = vpop.f32.mrb[252].mxu1 }
 0x38a   :  { %v4372_v11 = vpop.f32.mrb[253].mxu1 }
 0x38b   :  { %v29048_v12 = vpop.f32.mrb[254].mxu1 }
 0x38c   :  { %v4375_v15 = vpop.f32.mrb[255].mxu1 }
 0x38e   :  { %4585 = vmatmul.mubr.bf16.gmra.mrb[252].mxu1 %v26847_v9 }
 0x38f   :  { %4592 = vmatprep.mubr.bf16.mxu1 %v26852_v13 }
 0x391   :  { %v29053_v17 = vpop.f32.mrb[0].mxu1 }
 0x392   :  { %v4380_v18 = vpop.f32.mrb[1].mxu1 }
 0x393   :  { %21 = vsyncpa [#allocation3], 0  ;;  %v29058_v21 = vpop.f32.mrb[2].mxu1  ;;  %v26855_v23 = vld [vmem:[%s34692_s2 + $0x984] ss:$16 sps:$4 sm:$0xff]   ;;  %s28309_s25 = smov [#allocation2]  }
 0x394   :  { %v4383_v24 = vpop.f32.mrb[3].mxu1  ;;  %v26853_v30 = vld [vmem:[%s34692_s2 + $0x980] ss:$16 sps:$4 sm:$0xff]   ;;  %v26858_v32 = vld [vmem:[%s34692_s2 + $0x9a4] ss:$16 sps:$4 sm:$0xff]  }
 0x395   :  { %v26856_v38 = vld [vmem:[%s34692_s2 + $0x9a0] ss:$16 sps:$4 sm:$0xff]   ;;  %v26861_v41 = vld [vmem:[%s34692_s2 + $0x9c4] ss:$16 sps:$4 sm:$0xff]  }
 0x396   :  { %4593 = vmatmul.mubr.bf16.gmra.mrb[0].mxu1 %v26850_v19  ;;  %v26859_v47 = vld [vmem:[%s34692_s2 + $0x9c0] ss:$16 sps:$4 sm:$0xff]   ;;  %v26864_v49 = vld [vmem:[%s34692_s2 + $0x9e4] ss:$16 sps:$4 sm:$0xff]  }
 0x397   :  { %4600 = vmatprep.mubr.bf16.mxu1 %v26855_v23  ;;  %v26862_v55 = vld [vmem:[%s34692_s2 + $0x9e0] ss:$16 sps:$4 sm:$0xff]   ;;  %v26867_v59 = vld [vmem:[%s34692_s2 + $0xa04] ss:$16 sps:$4 sm:$0xff]  }
 0x398   :  { %v26865_v1 = vld [vmem:[%s34692_s2 + $0xa00] ss:$16 sps:$4 sm:$0xff]   ;;  %v26870_v3 = vld [vmem:[%s34692_s2 + $0xa24] ss:$16 sps:$4 sm:$0xff]  }
 0x399   :  { %v29063_v25 = vpop.f32.mrb[4].mxu1  ;;  %v26868_v9 = vld [vmem:[%s34692_s2 + $0xa20] ss:$16 sps:$4 sm:$0xff]   ;;  %v26873_v13 = vld [vmem:[%s34692_s2 + $0xa44] ss:$16 sps:$4 sm:$0xff]  }
 0x39a   :  { %v4388_v27 = vpop.f32.mrb[5].mxu1  ;;  %v26871_v23 = vld [vmem:[%s34692_s2 + $0xa40] ss:$16 sps:$4 sm:$0xff]  }
 0x39b   :  { %v29068_v31 = vpop.f32.mrb[6].mxu1  ;;  %v26876_v27 = vld [vmem:[%s34692_s2 + $0xa64] ss:$16 sps:$4 sm:$0xff]  }
 0x39c   :  { %v4391_v34 = vpop.f32.mrb[7].mxu1 }
 0x39e   :  { %4601 = vmatmul.mubr.bf16.gmra.mrb[4].mxu1 %v26853_v30 }
 0x39f   :  { %4608 = vmatprep.mubr.bf16.mxu1 %v26858_v32 }
 0x3a1   :  { %v29073_v36 = vpop.f32.mrb[8].mxu1 }
 0x3a2   :  { %v4396_v37 = vpop.f32.mrb[9].mxu1 }
 0x3a3   :  { %v29078_v39 = vpop.f32.mrb[10].mxu1  ;;  %v26874_v37 = vld [vmem:[%s34692_s2 + $0xa60] ss:$16 sps:$4 sm:$0xff]  }
 0x3a4   :  { %v4399_v42 = vpop.f32.mrb[11].mxu1 }
 0x3a6   :  { %4609 = vmatmul.mubr.bf16.gmra.mrb[8].mxu1 %v26856_v38 }
 0x3a7   :  { %4616 = vmatprep.mubr.bf16.mxu1 %v26861_v41  ;;  %v26879_v41 = vld [vmem:[%s34692_s2 + $0xa84] ss:$16 sps:$4 sm:$0xff]  }
 0x3a9   :  { %v29083_v43 = vpop.f32.mrb[12].mxu1 }
 0x3aa   :  { %v4404_v45 = vpop.f32.mrb[13].mxu1 }
 0x3ab   :  { %v29088_v48 = vpop.f32.mrb[14].mxu1 }
 0x3ac   :  { %v4407_v51 = vpop.f32.mrb[15].mxu1 }
 0x3ae   :  { %4617 = vmatmul.mubr.bf16.gmra.mrb[12].mxu1 %v26859_v47 }
 0x3af   :  { %4624 = vmatprep.mubr.bf16.mxu1 %v26864_v49  ;;  %v26877_v49 = vld [vmem:[%s34692_s2 + $0xa80] ss:$16 sps:$4 sm:$0xff]  }
 0x3b1   :  { %v29093_v53 = vpop.f32.mrb[16].mxu1 }
 0x3b2   :  { %v4412_v54 = vpop.f32.mrb[17].mxu1 }
 0x3b3   :  { %v29098_v57 = vpop.f32.mrb[18].mxu1  ;;  %v26882_v54 = vld [vmem:[%s34692_s2 + $0xaa4] ss:$16 sps:$4 sm:$0xff]  }
 0x3b4   :  { %v4415_v60 = vpop.f32.mrb[19].mxu1 }
 0x3b6   :  { %4625 = vmatmul.mubr.bf16.gmra.mrb[16].mxu1 %v26862_v55 }
 0x3b7   :  { %4632 = vmatprep.mubr.bf16.mxu1 %v26867_v59 }
 0x3b9   :  { %v29103_v61 = vpop.f32.mrb[20].mxu1 }
 0x3ba   :  { %v4420_v63 = vpop.f32.mrb[21].mxu1 }
 0x3bb   :  { %v29108_v2 = vpop.f32.mrb[22].mxu1  ;;  %v26880_v63 = vld [vmem:[%s34692_s2 + $0xaa0] ss:$16 sps:$4 sm:$0xff]  }
 0x3bc   :  { %v4423_v5 = vpop.f32.mrb[23].mxu1 }
 0x3be   :  { %4633 = vmatmul.mubr.bf16.gmra.mrb[20].mxu1 %v26865_v1 }
 0x3bf   :  { %4640 = vmatprep.mubr.bf16.mxu1 %v26870_v3  ;;  %v26885_v3 = vld [vmem:[%s34692_s2 + $0xac4] ss:$16 sps:$4 sm:$0xff]  }
 0x3c1   :  { %v29113_v7 = vpop.f32.mrb[24].mxu1 }
 0x3c2   :  { %v4428_v8 = vpop.f32.mrb[25].mxu1 }
 0x3c3   :  { %v29118_v11 = vpop.f32.mrb[26].mxu1 }
 0x3c4   :  { %v4431_v15 = vpop.f32.mrb[27].mxu1 }
 0x3c6   :  { %4641 = vmatmul.mubr.bf16.gmra.mrb[24].mxu1 %v26868_v9 }
 0x3c7   :  { %4648 = vmatprep.mubr.bf16.mxu1 %v26873_v13  ;;  %v26883_v13 = vld [vmem:[%s34692_s2 + $0xac0] ss:$16 sps:$4 sm:$0xff]  }
 0x3c9   :  { %v29123_v18 = vpop.f32.mrb[28].mxu1 }
 0x3ca   :  { %v4436_v19 = vpop.f32.mrb[29].mxu1 }
 0x3cb   :  { %v29128_v24 = vpop.f32.mrb[30].mxu1  ;;  %v26888_v19 = vld [vmem:[%s34692_s2 + $0xae4] ss:$16 sps:$4 sm:$0xff]  }
 0x3cc   :  { %v4439_v30 = vpop.f32.mrb[31].mxu1 }
 0x3ce   :  { %4649 = vmatmul.mubr.bf16.gmra.mrb[28].mxu1 %v26871_v23 }
 0x3cf   :  { %4656 = vmatprep.mubr.bf16.mxu1 %v26876_v27 }
 0x3d1   :  { %v29133_v32 = vpop.f32.mrb[32].mxu1 }
 0x3d2   :  { %v4444_v34 = vpop.f32.mrb[33].mxu1 }
 0x3d3   :  { %v29138_v38 = vpop.f32.mrb[34].mxu1  ;;  %v26886_v34 = vld [vmem:[%s34692_s2 + $0xae0] ss:$16 sps:$4 sm:$0xff]  }
 0x3d4   :  { %v4447_v42 = vpop.f32.mrb[35].mxu1 }
 0x3d6   :  { %4657 = vmatmul.mubr.bf16.gmra.mrb[32].mxu1 %v26874_v37 }
 0x3d7   :  { %4664 = vmatprep.mubr.bf16.mxu1 %v26879_v41  ;;  %v26891_v41 = vld [vmem:[%s34692_s2 + $0xb04] ss:$16 sps:$4 sm:$0xff]  }
 0x3d9   :  { %v29143_v45 = vpop.f32.mrb[36].mxu1 }
 0x3da   :  { %v4452_v47 = vpop.f32.mrb[37].mxu1 }
 0x3db   :  { %v29148_v51 = vpop.f32.mrb[38].mxu1 }
 0x3dc   :  { %v4455_v55 = vpop.f32.mrb[39].mxu1 }
 0x3de   :  { %4665 = vmatmul.mubr.bf16.gmra.mrb[36].mxu1 %v26877_v49 }
 0x3df   :  { %4672 = vmatprep.mubr.bf16.mxu1 %v26882_v54  ;;  %v26889_v54 = vld [vmem:[%s34692_s2 + $0xb00] ss:$16 sps:$4 sm:$0xff]  }
 0x3e1   :  { %v29153_v59 = vpop.f32.mrb[40].mxu1 }
 0x3e2   :  { %v4460_v60 = vpop.f32.mrb[41].mxu1 }
 0x3e3   :  { %v29158_v1 = vpop.f32.mrb[42].mxu1  ;;  %v26894_v60 = vld [vmem:[%s34692_s2 + $0xb24] ss:$16 sps:$4 sm:$0xff]  }
 0x3e4   :  { %v4463_v5 = vpop.f32.mrb[43].mxu1 }
 0x3e6   :  { %4673 = vmatmul.mubr.bf16.gmra.mrb[40].mxu1 %v26880_v63 }
 0x3e7   :  { %4680 = vmatprep.mubr.bf16.mxu1 %v26885_v3 }
 0x3e9   :  { %v29163_v8 = vpop.f32.mrb[44].mxu1 }
 0x3ea   :  { %v4468_v9 = vpop.f32.mrb[45].mxu1 }
 0x3eb   :  { %v29168_v15 = vpop.f32.mrb[46].mxu1  ;;  %v26892_v9 = vld [vmem:[%s34692_s2 + $0xb20] ss:$16 sps:$4 sm:$0xff]  }
 0x3ec   :  { %v4471_v23 = vpop.f32.mrb[47].mxu1 }
 0x3ee   :  { %4681 = vmatmul.mubr.bf16.gmra.mrb[44].mxu1 %v26883_v13 }
 0x3ef   :  { %4688 = vmatprep.mubr.bf16.mxu1 %v26888_v19  ;;  %v26897_v19 = vld [vmem:[%s34692_s2 + $0xb44] ss:$16 sps:$4 sm:$0xff]  }
 0x3f1   :  { %v29173_v27 = vpop.f32.mrb[48].mxu1 }
 0x3f2   :  { %v4476_v30 = vpop.f32.mrb[49].mxu1 }
 0x3f3   :  { %v29178_v37 = vpop.f32.mrb[50].mxu1 }
 0x3f4   :  { %v4479_v42 = vpop.f32.mrb[51].mxu1 }
 0x3f6   :  { %4689 = vmatmul.mubr.bf16.gmra.mrb[48].mxu1 %v26886_v34 }
 0x3f7   :  { %4696 = vmatprep.mubr.bf16.mxu1 %v26891_v41  ;;  %v26895_v41 = vld [vmem:[%s34692_s2 + $0xb40] ss:$16 sps:$4 sm:$0xff]  }
 0x3f9   :  { %v29183_v47 = vpop.f32.mrb[52].mxu1 }
 0x3fa   :  { %v4484_v49 = vpop.f32.mrb[53].mxu1 }
 0x3fb   :  { %v29188_v55 = vpop.f32.mrb[54].mxu1  ;;  %v26900_v49 = vld [vmem:[%s34692_s2 + $0xb64] ss:$16 sps:$4 sm:$0xff]  }
 0x3fc   :  { %34710 = vst [vmem:[#allocation5_spill] sm:$0xff] %v29188_v55  ;;  %v4487_v63 = vpop.f32.mrb[55].mxu1 }
 0x3fe   :  { %4697 = vmatmul.mubr.bf16.gmra.mrb[52].mxu1 %v26889_v54 }
 0x3ff   :  { %4704 = vmatprep.mubr.bf16.mxu1 %v26894_v60 }
 0x401   :  { %v29193_v3 = vpop.f32.mrb[56].mxu1 }
 0x402   :  { %34711 = vst [vmem:[#allocation6_spill] sm:$0xff] %v29193_v3  ;;  %v4492_v5 = vpop.f32.mrb[57].mxu1 }
 0x403   :  { %v29198_v13 = vpop.f32.mrb[58].mxu1  ;;  %v26898_v5 = vld [vmem:[%s34692_s2 + $0xb60] ss:$16 sps:$4 sm:$0xff]  }
 0x404   :  { %34712 = vst [vmem:[#allocation7_spill] sm:$0xff] %v29198_v13  ;;  %v4495_v23 = vpop.f32.mrb[59].mxu1 }
 0x406   :  { %4705 = vmatmul.mubr.bf16.gmra.mrb[56].mxu1 %v26892_v9 }
 0x407   :  { %4712 = vmatprep.mubr.bf16.mxu1 %v26897_v19  ;;  %v26903_v19 = vld [vmem:[%s34692_s2 + $0xb84] ss:$16 sps:$4 sm:$0xff]  }
 0x409   :  { %v29203_v30 = vpop.f32.mrb[60].mxu1 }
 0x40a   :  { %34713 = vst [vmem:[#allocation8_spill] sm:$0xff] %v29203_v30  ;;  %v4500_v34 = vpop.f32.mrb[61].mxu1 }
 0x40b   :  { %v29208_v42 = vpop.f32.mrb[62].mxu1 }
 0x40c   :  { %34714 = vst [vmem:[#allocation9_spill] sm:$0xff] %v29208_v42  ;;  %v4503_v54 = vpop.f32.mrb[63].mxu1 }
 0x40e   :  { %4713 = vmatmul.mubr.bf16.gmra.mrb[60].mxu1 %v26895_v41 }
 0x40f   :  { %4720 = vmatprep.mubr.bf16.mxu1 %v26900_v49  ;;  %v26901_v49 = vld [vmem:[%s34692_s2 + $0xb80] ss:$16 sps:$4 sm:$0xff]  }
 0x411   :  { %v29213_v60 = vpop.f32.mrb[212].mxu1 }
 0x412   :  { %34715 = vst [vmem:[#allocation10_spill] sm:$0xff] %v29213_v60  ;;  %v4508_v63 = vpop.f32.mrb[213].mxu1 }
 0x413   :  { %v29218_v9 = vpop.f32.mrb[214].mxu1  ;;  %v26906_v63 = vld [vmem:[%s34692_s2 + $0xba4] ss:$16 sps:$4 sm:$0xff]  }
 0x414   :  { %34716 = vst [vmem:[#allocation11_spill] sm:$0xff] %v29218_v9  ;;  %v4511_v23 = vpop.f32.mrb[215].mxu1 }
 0x416   :  { %4721 = vmatmul.mubr.bf16.gmra.mrb[212].mxu1 %v26898_v5 }
 0x417   :  { %4728 = vmatprep.mubr.bf16.mxu1 %v26903_v19  ;;  %v26904_v19 = vld [vmem:[%s34692_s2 + $0xba0] ss:$16 sps:$4 sm:$0xff]  }
 0x419   :  { %v29223_v34 = vpop.f32.mrb[216].mxu1 }
 0x41a   :  { %34717 = vst [vmem:[#allocation12_spill] sm:$0xff] %v29223_v34  ;;  %v4516_v41 = vpop.f32.mrb[217].mxu1 }
 0x41b   :  { %v29228_v54 = vpop.f32.mrb[218].mxu1  ;;  %v26909_v41 = vld [vmem:[%s34692_s2 + $0xbc4] ss:$16 sps:$4 sm:$0xff]  }
 0x41c   :  { %34718 = vst [vmem:[#allocation13_spill] sm:$0xff] %v29228_v54  ;;  %v4519_v9 = vpop.f32.mrb[219].mxu1 }
 0x41e   :  { %4729 = vmatmul.mubr.bf16.gmra.mrb[216].mxu1 %v26901_v49  ;;  %v26907_v49 = vld [vmem:[%s34692_s2 + $0xbc0] ss:$16 sps:$4 sm:$0xff]  }
 0x41f   :  { %4736 = vmatprep.mubr.bf16.mxu1 %v26906_v63 }
 0x421   :  { %v29233_v60 = vpop.f32.mrb[220].mxu1 }
 0x422   :  { %34719 = vst [vmem:[#allocation14_spill] sm:$0xff] %v29233_v60  ;;  %v4524_v5 = vpop.f32.mrb[221].mxu1 }
 0x423   :  { %v29238_v23 = vpop.f32.mrb[222].mxu1  ;;  %v26912_v5 = vld [vmem:[%s34692_s2 + $0xbe4] ss:$16 sps:$4 sm:$0xff]  }
 0x424   :  { %34720 = vst [vmem:[#allocation15_spill] sm:$0xff] %v29238_v23  ;;  %v4527_v54 = vpop.f32.mrb[223].mxu1 }
 0x426   :  { %4737 = vmatmul.mubr.bf16.gmra.mrb[220].mxu1 %v26904_v19  ;;  %v26910_v19 = vld [vmem:[%s34692_s2 + $0xbe0] ss:$16 sps:$4 sm:$0xff]  }
 0x427   :  { %4744 = vmatprep.mubr.bf16.mxu1 %v26909_v41 }
 0x429   :  { %v29243_v34 = vpop.f32.mrb[224].mxu1 }
 0x42a   :  { %34721 = vst [vmem:[#allocation16_spill] sm:$0xff] %v29243_v34  ;;  %v4532_v9 = vpop.f32.mrb[225].mxu1 }
 0x42b   :  { %v29248_v63 = vpop.f32.mrb[226].mxu1  ;;  %v26915_v9 = vld [vmem:[%s34692_s2 + $0xc04] ss:$16 sps:$4 sm:$0xff]  }
 0x42c   :  { %34722 = vst [vmem:[#allocation17_spill] sm:$0xff] %v29248_v63  ;;  %v4535_v23 = vpop.f32.mrb[227].mxu1 }
 0x42e   :  { %4745 = vmatmul.mubr.bf16.gmra.mrb[224].mxu1 %v26907_v49  ;;  %v26913_v49 = vld [vmem:[%s34692_s2 + $0xc00] ss:$16 sps:$4 sm:$0xff]  }
 0x42f   :  { %4752 = vmatprep.mubr.bf16.mxu1 %v26912_v5 }
 0x431   :  { %v29253_v60 = vpop.f32.mrb[228].mxu1 }
 0x432   :  { %34723 = vst [vmem:[#allocation18_spill] sm:$0xff] %v29253_v60  ;;  %v4540_v54 = vpop.f32.mrb[229].mxu1 }
 0x433   :  { %v29258_v41 = vpop.f32.mrb[230].mxu1  ;;  %v26918_v54 = vld [vmem:[%s34692_s2 + $0xc24] ss:$16 sps:$4 sm:$0xff]  }
 0x434   :  { %34724 = vst [vmem:[#allocation19_spill] sm:$0xff] %v29258_v41  ;;  %v4543_v63 = vpop.f32.mrb[231].mxu1 }
 0x436   :  { %4753 = vmatmul.mubr.bf16.gmra.mrb[228].mxu1 %v26910_v19  ;;  %v26916_v19 = vld [vmem:[%s34692_s2 + $0xc20] ss:$16 sps:$4 sm:$0xff]  }
 0x437   :  { %4760 = vmatprep.mubr.bf16.mxu1 %v26915_v9 }
 0x439   :  { %v29263_v34 = vpop.f32.mrb[232].mxu1 }
 0x43a   :  { %34725 = vst [vmem:[#allocation20_spill] sm:$0xff] %v29263_v34  ;;  %v4548_v23 = vpop.f32.mrb[233].mxu1 }
 0x43b   :  { %v29268_v5 = vpop.f32.mrb[234].mxu1  ;;  %v26921_v23 = vld [vmem:[%s34692_s2 + $0xc44] ss:$16 sps:$4 sm:$0xff]  }
 0x43c   :  { %34726 = vst [vmem:[#allocation21_spill] sm:$0xff] %v29268_v5  ;;  %v4551_v41 = vpop.f32.mrb[235].mxu1 }
 0x43e   :  { %4761 = vmatmul.mubr.bf16.gmra.mrb[232].mxu1 %v26913_v49  ;;  %v26919_v49 = vld [vmem:[%s34692_s2 + $0xc40] ss:$16 sps:$4 sm:$0xff]  }
 0x43f   :  { %4768 = vmatprep.mubr.bf16.mxu1 %v26918_v54 }
 0x441   :  { %v29273_v60 = vpop.f32.mrb[236].mxu1 }
 0x442   :  { %34727 = vst [vmem:[#allocation22_spill] sm:$0xff] %v29273_v60  ;;  %v4556_v63 = vpop.f32.mrb[237].mxu1 }
 0x443   :  { %v29278_v9 = vpop.f32.mrb[238].mxu1  ;;  %v26924_v63 = vld [vmem:[%s34692_s2 + $0xc64] ss:$16 sps:$4 sm:$0xff]  }
 0x444   :  { %34728 = vst [vmem:[#allocation23_spill] sm:$0xff] %v29278_v9  ;;  %v4559_v5 = vpop.f32.mrb[239].mxu1 }
 0x446   :  { %4769 = vmatmul.mubr.bf16.gmra.mrb[236].mxu1 %v26916_v19  ;;  %v26922_v19 = vld [vmem:[%s34692_s2 + $0xc60] ss:$16 sps:$4 sm:$0xff]  }
 0x447   :  { %4776 = vmatprep.mubr.bf16.mxu1 %v26921_v23 }
 0x449   :  { %v29283_v34 = vpop.f32.mrb[240].mxu1 }
 0x44a   :  { %34729 = vst [vmem:[#allocation24_spill] sm:$0xff] %v29283_v34  ;;  %v4564_v41 = vpop.f32.mrb[241].mxu1 }
 0x44b   :  { %v29288_v54 = vpop.f32.mrb[242].mxu1  ;;  %v26927_v41 = vld [vmem:[%s34692_s2 + $0xc84] ss:$16 sps:$4 sm:$0xff]  }
 0x44c   :  { %34730 = vst [vmem:[#allocation25_spill] sm:$0xff] %v29288_v54  ;;  %v4567_v9 = vpop.f32.mrb[243].mxu1 }
 0x44e   :  { %4777 = vmatmul.mubr.bf16.gmra.mrb[240].mxu1 %v26919_v49  ;;  %v26925_v49 = vld [vmem:[%s34692_s2 + $0xc80] ss:$16 sps:$4 sm:$0xff]  }
 0x44f   :  { %4784 = vmatprep.mubr.bf16.mxu1 %v26924_v63 }
 0x451   :  { %v29293_v60 = vpop.f32.mrb[244].mxu1 }
 0x452   :  { %34731 = vst [vmem:[#allocation26_spill] sm:$0xff] %v29293_v60  ;;  %v4572_v5 = vpop.f32.mrb[245].mxu1 }
 0x453   :  { %v29298_v23 = vpop.f32.mrb[246].mxu1  ;;  %v26930_v5 = vld [vmem:[%s34692_s2 + $0xca4] ss:$16 sps:$4 sm:$0xff]  }
 0x454   :  { %34732 = vst [vmem:[#allocation27_spill] sm:$0xff] %v29298_v23  ;;  %v4575_v54 = vpop.f32.mrb[247].mxu1 }
 0x456   :  { %4785 = vmatmul.mubr.bf16.gmra.mrb[244].mxu1 %v26922_v19  ;;  %v26928_v19 = vld [vmem:[%s34692_s2 + $0xca0] ss:$16 sps:$4 sm:$0xff]  }
 0x457   :  { %4792 = vmatprep.mubr.bf16.mxu1 %v26927_v41 }
 0x459   :  { %v29303_v34 = vpop.f32.mrb[248].mxu1 }
 0x45a   :  { %34733 = vst [vmem:[#allocation28_spill] sm:$0xff] %v29303_v34  ;;  %v4580_v9 = vpop.f32.mrb[249].mxu1 }
 0x45b   :  { %v29308_v63 = vpop.f32.mrb[250].mxu1  ;;  %v26933_v9 = vld [vmem:[%s34692_s2 + $0xcc4] ss:$16 sps:$4 sm:$0xff]  }
 0x45c   :  { %34734 = vst [vmem:[#allocation29_spill] sm:$0xff] %v29308_v63  ;;  %v4583_v23 = vpop.f32.mrb[251].mxu1 }
 0x45e   :  { %4793 = vmatmul.mubr.bf16.gmra.mrb[248].mxu1 %v26925_v49  ;;  %v26931_v49 = vld [vmem:[%s34692_s2 + $0xcc0] ss:$16 sps:$4 sm:$0xff]  }
 0x45f   :  { %4800 = vmatprep.mubr.bf16.mxu1 %v26930_v5 }
 0x461   :  { %v29313_v60 = vpop.f32.mrb[252].mxu1 }
 0x462   :  { %34735 = vst [vmem:[#allocation30_spill] sm:$0xff] %v29313_v60  ;;  %v4588_v54 = vpop.f32.mrb[253].mxu1 }
 0x463   :  { %v29318_v41 = vpop.f32.mrb[254].mxu1  ;;  %v26936_v54 = vld [vmem:[%s34692_s2 + $0xce4] ss:$16 sps:$4 sm:$0xff]  }
 0x464   :  { %34736 = vst [vmem:[#allocation31_spill] sm:$0xff] %v29318_v41  ;;  %v4591_v63 = vpop.f32.mrb[255].mxu1 }
 0x466   :  { %4801 = vmatmul.mubr.bf16.gmra.mrb[252].mxu1 %v26928_v19  ;;  %v26934_v19 = vld [vmem:[%s34692_s2 + $0xce0] ss:$16 sps:$4 sm:$0xff]  }
 0x467   :  { %4808 = vmatprep.mubr.bf16.mxu1 %v26933_v9 }
 0x469   :  { %v29323_v34 = vpop.f32.mrb[0].mxu1 }
 0x46a   :  { %34737 = vst [vmem:[#allocation32_spill] sm:$0xff] %v29323_v34  ;;  %v4596_v23 = vpop.f32.mrb[1].mxu1 }
 0x46b   :  { %v29328_v5 = vpop.f32.mrb[2].mxu1  ;;  %v26939_v23 = vld [vmem:[%s34692_s2 + $0xd04] ss:$16 sps:$4 sm:$0xff]  }
 0x46c   :  { %34738 = vst [vmem:[#allocation33_spill] sm:$0xff] %v29328_v5  ;;  %v4599_v41 = vpop.f32.mrb[3].mxu1 }
 0x46e   :  { %4809 = vmatmul.mubr.bf16.gmra.mrb[0].mxu1 %v26931_v49  ;;  %v26937_v49 = vld [vmem:[%s34692_s2 + $0xd00] ss:$16 sps:$4 sm:$0xff]  }
 0x46f   :  { %4816 = vmatprep.mubr.bf16.mxu1 %v26936_v54 }
 0x471   :  { %v29333_v60 = vpop.f32.mrb[4].mxu1 }
 0x472   :  { %34739 = vst [vmem:[#allocation34_spill] sm:$0xff] %v29333_v60  ;;  %v4604_v63 = vpop.f32.mrb[5].mxu1 }
 0x473   :  { %v29338_v9 = vpop.f32.mrb[6].mxu1  ;;  %v26942_v63 = vld [vmem:[%s34692_s2 + $0xd24] ss:$16 sps:$4 sm:$0xff]  }
 0x474   :  { %34740 = vst [vmem:[#allocation35_spill] sm:$0xff] %v29338_v9  ;;  %v4607_v5 = vpop.f32.mrb[7].mxu1 }
 0x476   :  { %4817 = vmatmul.mubr.bf16.gmra.mrb[4].mxu1 %v26934_v19  ;;  %v26940_v19 = vld [vmem:[%s34692_s2 + $0xd20] ss:$16 sps:$4 sm:$0xff]  }
 0x477   :  { %4824 = vmatprep.mubr.bf16.mxu1 %v26939_v23 }
 0x479   :  { %v29343_v34 = vpop.f32.mrb[8].mxu1 }
 0x47a   :  { %34741 = vst [vmem:[#allocation36_spill] sm:$0xff] %v29343_v34  ;;  %v4612_v41 = vpop.f32.mrb[9].mxu1 }
 0x47b   :  { %v29348_v54 = vpop.f32.mrb[10].mxu1  ;;  %v26945_v41 = vld [vmem:[%s34692_s2 + $0xd44] ss:$16 sps:$4 sm:$0xff]  }
 0x47c   :  { %34742 = vst [vmem:[#allocation37_spill] sm:$0xff] %v29348_v54  ;;  %v4615_v9 = vpop.f32.mrb[11].mxu1 }
 0x47e   :  { %4825 = vmatmul.mubr.bf16.gmra.mrb[8].mxu1 %v26937_v49  ;;  %v26943_v49 = vld [vmem:[%s34692_s2 + $0xd40] ss:$16 sps:$4 sm:$0xff]  }
 0x47f   :  { %4832 = vmatprep.mubr.bf16.mxu1 %v26942_v63 }
 0x481   :  { %v29353_v60 = vpop.f32.mrb[12].mxu1 }
 0x482   :  { %34743 = vst [vmem:[#allocation38_spill] sm:$0xff] %v29353_v60  ;;  %v4620_v5 = vpop.f32.mrb[13].mxu1 }
 0x483   :  { %v29358_v23 = vpop.f32.mrb[14].mxu1  ;;  %v26948_v5 = vld [vmem:[%s34692_s2 + $0xd64] ss:$16 sps:$4 sm:$0xff]  }
 0x484   :  { %34744 = vst [vmem:[#allocation39_spill] sm:$0xff] %v29358_v23  ;;  %v4623_v54 = vpop.f32.mrb[15].mxu1 }
 0x486   :  { %4833 = vmatmul.mubr.bf16.gmra.mrb[12].mxu1 %v26940_v19  ;;  %v26946_v19 = vld [vmem:[%s34692_s2 + $0xd60] ss:$16 sps:$4 sm:$0xff]  }
 0x487   :  { %4840 = vmatprep.mubr.bf16.mxu1 %v26945_v41 }
 0x489   :  { %v29363_v34 = vpop.f32.mrb[16].mxu1 }
 0x48a   :  { %34745 = vst [vmem:[#allocation40_spill] sm:$0xff] %v29363_v34  ;;  %v4628_v9 = vpop.f32.mrb[17].mxu1 }
 0x48b   :  { %v29368_v63 = vpop.f32.mrb[18].mxu1  ;;  %v26951_v9 = vld [vmem:[%s34692_s2 + $0xd84] ss:$16 sps:$4 sm:$0xff]  }
 0x48c   :  { %34746 = vst [vmem:[#allocation41_spill] sm:$0xff] %v29368_v63  ;;  %v4631_v23 = vpop.f32.mrb[19].mxu1 }
 0x48e   :  { %4841 = vmatmul.mubr.bf16.gmra.mrb[16].mxu1 %v26943_v49  ;;  %v26949_v49 = vld [vmem:[%s34692_s2 + $0xd80] ss:$16 sps:$4 sm:$0xff]  }
 0x48f   :  { %4848 = vmatprep.mubr.bf16.mxu1 %v26948_v5 }
 0x491   :  { %v29373_v60 = vpop.f32.mrb[20].mxu1 }
 0x492   :  { %34747 = vst [vmem:[#allocation42_spill] sm:$0xff] %v29373_v60  ;;  %v4636_v54 = vpop.f32.mrb[21].mxu1 }
 0x493   :  { %v29378_v41 = vpop.f32.mrb[22].mxu1  ;;  %v26954_v54 = vld [vmem:[%s34692_s2 + $0xda4] ss:$16 sps:$4 sm:$0xff]  }
 0x494   :  { %34748 = vst [vmem:[#allocation43_spill] sm:$0xff] %v29378_v41  ;;  %v4639_v63 = vpop.f32.mrb[23].mxu1 }
 0x496   :  { %4849 = vmatmul.mubr.bf16.gmra.mrb[20].mxu1 %v26946_v19  ;;  %v26952_v19 = vld [vmem:[%s34692_s2 + $0xda0] ss:$16 sps:$4 sm:$0xff]  }
 0x497   :  { %4856 = vmatprep.mubr.bf16.mxu1 %v26951_v9 }
 0x499   :  { %v29383_v34 = vpop.f32.mrb[24].mxu1 }
 0x49a   :  { %34749 = vst [vmem:[#allocation44_spill] sm:$0xff] %v29383_v34  ;;  %v4644_v23 = vpop.f32.mrb[25].mxu1 }
 0x49b   :  { %v29388_v5 = vpop.f32.mrb[26].mxu1  ;;  %v26957_v23 = vld [vmem:[%s34692_s2 + $0xdc4] ss:$16 sps:$4 sm:$0xff]  }
 0x49c   :  { %34750 = vst [vmem:[#allocation45_spill] sm:$0xff] %v29388_v5  ;;  %v4647_v41 = vpop.f32.mrb[27].mxu1 }
 0x49e   :  { %4857 = vmatmul.mubr.bf16.gmra.mrb[24].mxu1 %v26949_v49  ;;  %v26955_v49 = vld [vmem:[%s34692_s2 + $0xdc0] ss:$16 sps:$4 sm:$0xff]  }
 0x49f   :  { %4864 = vmatprep.mubr.bf16.mxu1 %v26954_v54 }
 0x4a1   :  { %v29393_v60 = vpop.f32.mrb[28].mxu1 }
 0x4a2   :  { %34751 = vst [vmem:[#allocation46_spill] sm:$0xff] %v29393_v60  ;;  %v4652_v63 = vpop.f32.mrb[29].mxu1 }
 0x4a3   :  { %v29398_v9 = vpop.f32.mrb[30].mxu1  ;;  %v26960_v63 = vld [vmem:[%s34692_s2 + $0xde4] ss:$16 sps:$4 sm:$0xff]  }
 0x4a4   :  { %34752 = vst [vmem:[#allocation47_spill] sm:$0xff] %v29398_v9  ;;  %v4655_v5 = vpop.f32.mrb[31].mxu1 }
 0x4a6   :  { %4865 = vmatmul.mubr.bf16.gmra.mrb[28].mxu1 %v26952_v19  ;;  %v26958_v19 = vld [vmem:[%s34692_s2 + $0xde0] ss:$16 sps:$4 sm:$0xff]  }
 0x4a7   :  { %4872 = vmatprep.mubr.bf16.mxu1 %v26957_v23 }
 0x4a9   :  { %v29403_v34 = vpop.f32.mrb[32].mxu1 }
 0x4aa   :  { %34753 = vst [vmem:[#allocation48_spill] sm:$0xff] %v29403_v34  ;;  %v4660_v41 = vpop.f32.mrb[33].mxu1 }
 0x4ab   :  { %v29408_v54 = vpop.f32.mrb[34].mxu1  ;;  %v26963_v41 = vld [vmem:[%s34692_s2 + $0xe04] ss:$16 sps:$4 sm:$0xff]  }
 0x4ac   :  { %34754 = vst [vmem:[#allocation49_spill] sm:$0xff] %v29408_v54  ;;  %v4663_v9 = vpop.f32.mrb[35].mxu1 }
 0x4ae   :  { %4873 = vmatmul.mubr.bf16.gmra.mrb[32].mxu1 %v26955_v49  ;;  %v26961_v49 = vld [vmem:[%s34692_s2 + $0xe00] ss:$16 sps:$4 sm:$0xff]  }
 0x4af   :  { %4880 = vmatprep.mubr.bf16.mxu1 %v26960_v63 }
 0x4b1   :  { %v29413_v60 = vpop.f32.mrb[36].mxu1 }
 0x4b2   :  { %34755 = vst [vmem:[#allocation50_spill] sm:$0xff] %v29413_v60  ;;  %v4668_v5 = vpop.f32.mrb[37].mxu1 }
 0x4b3   :  { %v29418_v23 = vpop.f32.mrb[38].mxu1  ;;  %v26966_v5 = vld [vmem:[%s34692_s2 + $0xe24] ss:$16 sps:$4 sm:$0xff]  }
 0x4b4   :  { %34756 = vst [vmem:[#allocation51_spill] sm:$0xff] %v29418_v23  ;;  %v4671_v54 = vpop.f32.mrb[39].mxu1 }
 0x4b6   :  { %4881 = vmatmul.mubr.bf16.gmra.mrb[36].mxu1 %v26958_v19  ;;  %v26964_v19 = vld [vmem:[%s34692_s2 + $0xe20] ss:$16 sps:$4 sm:$0xff]  }
 0x4b7   :  { %4888 = vmatprep.mubr.bf16.mxu1 %v26963_v41 }
 0x4b9   :  { %v29423_v34 = vpop.f32.mrb[40].mxu1 }
 0x4ba   :  { %34757 = vst [vmem:[#allocation52_spill] sm:$0xff] %v29423_v34  ;;  %v4676_v9 = vpop.f32.mrb[41].mxu1 }
 0x4bb   :  { %v29428_v63 = vpop.f32.mrb[42].mxu1  ;;  %v26969_v9 = vld [vmem:[%s34692_s2 + $0xe44] ss:$16 sps:$4 sm:$0xff]  }
 0x4bc   :  { %34758 = vst [vmem:[#allocation53_spill] sm:$0xff] %v29428_v63  ;;  %v4679_v23 = vpop.f32.mrb[43].mxu1 }
 0x4be   :  { %4889 = vmatmul.mubr.bf16.gmra.mrb[40].mxu1 %v26961_v49  ;;  %v26967_v49 = vld [vmem:[%s34692_s2 + $0xe40] ss:$16 sps:$4 sm:$0xff]  }
 0x4bf   :  { %4896 = vmatprep.mubr.bf16.mxu1 %v26966_v5 }
 0x4c1   :  { %v29433_v60 = vpop.f32.mrb[44].mxu1 }
 0x4c2   :  { %34759 = vst [vmem:[#allocation54_spill] sm:$0xff] %v29433_v60  ;;  %v4684_v54 = vpop.f32.mrb[45].mxu1 }
 0x4c3   :  { %v29438_v41 = vpop.f32.mrb[46].mxu1  ;;  %v26972_v54 = vld [vmem:[%s34692_s2 + $0xe64] ss:$16 sps:$4 sm:$0xff]  }
 0x4c4   :  { %34760 = vst [vmem:[#allocation55_spill] sm:$0xff] %v29438_v41  ;;  %v4687_v63 = vpop.f32.mrb[47].mxu1 }
 0x4c6   :  { %4897 = vmatmul.mubr.bf16.gmra.mrb[44].mxu1 %v26964_v19  ;;  %v26970_v19 = vld [vmem:[%s34692_s2 + $0xe60] ss:$16 sps:$4 sm:$0xff]  }
 0x4c7   :  { %4904 = vmatprep.mubr.bf16.mxu1 %v26969_v9 }
 0x4c9   :  { %v29443_v34 = vpop.f32.mrb[48].mxu1 }
 0x4ca   :  { %34761 = vst [vmem:[#allocation56_spill] sm:$0xff] %v29443_v34  ;;  %v4692_v23 = vpop.f32.mrb[49].mxu1 }
 0x4cb   :  { %v29448_v5 = vpop.f32.mrb[50].mxu1  ;;  %v26975_v23 = vld [vmem:[%s34692_s2 + $0xe84] ss:$16 sps:$4 sm:$0xff]  }
 0x4cc   :  { %34762 = vst [vmem:[#allocation57_spill] sm:$0xff] %v29448_v5  ;;  %v4695_v41 = vpop.f32.mrb[51].mxu1 }
 0x4ce   :  { %4905 = vmatmul.mubr.bf16.gmra.mrb[48].mxu1 %v26967_v49  ;;  %v26973_v49 = vld [vmem:[%s34692_s2 + $0xe80] ss:$16 sps:$4 sm:$0xff]  }
 0x4cf   :  { %4912 = vmatprep.mubr.bf16.mxu1 %v26972_v54 }
 0x4d1   :  { %v29453_v60 = vpop.f32.mrb[52].mxu1 }
 0x4d2   :  { %34763 = vst [vmem:[#allocation58_spill] sm:$0xff] %v29453_v60  ;;  %v4700_v63 = vpop.f32.mrb[53].mxu1 }
 0x4d3   :  { %v29458_v9 = vpop.f32.mrb[54].mxu1  ;;  %v26978_v63 = vld [vmem:[%s34692_s2 + $0xea4] ss:$16 sps:$4 sm:$0xff]  }
 0x4d4   :  { %34764 = vst [vmem:[#allocation59_spill] sm:$0xff] %v29458_v9  ;;  %v4703_v5 = vpop.f32.mrb[55].mxu1 }
 0x4d6   :  { %4913 = vmatmul.mubr.bf16.gmra.mrb[52].mxu1 %v26970_v19  ;;  %v26976_v19 = vld [vmem:[%s34692_s2 + $0xea0] ss:$16 sps:$4 sm:$0xff]  }
 0x4d7   :  { %4920 = vmatprep.mubr.bf16.mxu1 %v26975_v23 }
 0x4d9   :  { %v29463_v34 = vpop.f32.mrb[56].mxu1 }
 0x4da   :  { %34765 = vst [vmem:[#allocation60_spill] sm:$0xff] %v29463_v34  ;;  %v4708_v41 = vpop.f32.mrb[57].mxu1 }
 0x4db   :  { %v29468_v54 = vpop.f32.mrb[58].mxu1  ;;  %v26981_v41 = vld [vmem:[%s34692_s2 + $0xec4] ss:$16 sps:$4 sm:$0xff]  }
 0x4dc   :  { %34766 = vst [vmem:[#allocation61_spill] sm:$0xff] %v29468_v54  ;;  %v4711_v9 = vpop.f32.mrb[59].mxu1 }
 0x4de   :  { %4921 = vmatmul.mubr.bf16.gmra.mrb[56].mxu1 %v26973_v49  ;;  %v26979_v49 = vld [vmem:[%s34692_s2 + $0xec0] ss:$16 sps:$4 sm:$0xff]  }
 0x4df   :  { %4928 = vmatprep.mubr.bf16.mxu1 %v26978_v63 }
 0x4e1   :  { %v29473_v60 = vpop.f32.mrb[60].mxu1 }
 0x4e2   :  { %34767 = vst [vmem:[#allocation62_spill] sm:$0xff] %v29473_v60  ;;  %v4716_v5 = vpop.f32.mrb[61].mxu1 }
 0x4e3   :  { %v29478_v23 = vpop.f32.mrb[62].mxu1  ;;  %v26984_v5 = vld [vmem:[%s34692_s2 + $0xee4] ss:$16 sps:$4 sm:$0xff]  }
 0x4e4   :  { %34768 = vst [vmem:[#allocation63_spill] sm:$0xff] %v29478_v23  ;;  %v4719_v54 = vpop.f32.mrb[63].mxu1 }
 0x4e6   :  { %4929 = vmatmul.mubr.bf16.gmra.mrb[60].mxu1 %v26976_v19  ;;  %v26982_v19 = vld [vmem:[%s34692_s2 + $0xee0] ss:$16 sps:$4 sm:$0xff]  }
 0x4e7   :  { %4936 = vmatprep.mubr.bf16.mxu1 %v26981_v41 }
 0x4e9   :  { %v29483_v34 = vpop.f32.mrb[212].mxu1 }
 0x4ea   :  { %34769 = vst [vmem:[#allocation64_spill] sm:$0xff] %v29483_v34  ;;  %v4724_v9 = vpop.f32.mrb[213].mxu1 }
 0x4eb   :  { %v29488_v63 = vpop.f32.mrb[214].mxu1  ;;  %v26987_v9 = vld [vmem:[%s34692_s2 + $0xf04] ss:$16 sps:$4 sm:$0xff]  }
 0x4ec   :  { %34770 = vst [vmem:[#allocation65_spill] sm:$0xff] %v29488_v63  ;;  %v4727_v23 = vpop.f32.mrb[215].mxu1 }
 0x4ee   :  { %4937 = vmatmul.mubr.bf16.gmra.mrb[212].mxu1 %v26979_v49  ;;  %v26985_v49 = vld [vmem:[%s34692_s2 + $0xf00] ss:$16 sps:$4 sm:$0xff]  }
 0x4ef   :  { %4944 = vmatprep.mubr.bf16.mxu1 %v26984_v5 }
 0x4f1   :  { %v29493_v60 = vpop.f32.mrb[216].mxu1 }
 0x4f2   :  { %34771 = vst [vmem:[#allocation66_spill] sm:$0xff] %v29493_v60  ;;  %v4732_v54 = vpop.f32.mrb[217].mxu1 }
 0x4f3   :  { %v29498_v41 = vpop.f32.mrb[218].mxu1  ;;  %v26990_v54 = vld [vmem:[%s34692_s2 + $0xf24] ss:$16 sps:$4 sm:$0xff]  }
 0x4f4   :  { %34772 = vst [vmem:[#allocation67_spill] sm:$0xff] %v29498_v41  ;;  %v4735_v63 = vpop.f32.mrb[219].mxu1 }
 0x4f6   :  { %4945 = vmatmul.mubr.bf16.gmra.mrb[216].mxu1 %v26982_v19  ;;  %v26988_v19 = vld [vmem:[%s34692_s2 + $0xf20] ss:$16 sps:$4 sm:$0xff]  }
 0x4f7   :  { %4952 = vmatprep.mubr.bf16.mxu1 %v26987_v9 }
 0x4f9   :  { %v29503_v34 = vpop.f32.mrb[220].mxu1 }
 0x4fa   :  { %34773 = vst [vmem:[#allocation68_spill] sm:$0xff] %v29503_v34  ;;  %v4740_v23 = vpop.f32.mrb[221].mxu1 }
 0x4fb   :  { %v29508_v5 = vpop.f32.mrb[222].mxu1  ;;  %v26993_v23 = vld [vmem:[%s34692_s2 + $0xf44] ss:$16 sps:$4 sm:$0xff]  }
 0x4fc   :  { %34774 = vst [vmem:[#allocation69_spill] sm:$0xff] %v29508_v5  ;;  %v4743_v41 = vpop.f32.mrb[223].mxu1 }
 0x4fe   :  { %4953 = vmatmul.mubr.bf16.gmra.mrb[220].mxu1 %v26985_v49  ;;  %v26991_v49 = vld [vmem:[%s34692_s2 + $0xf40] ss:$16 sps:$4 sm:$0xff]  }
 0x4ff   :  { %4960 = vmatprep.mubr.bf16.mxu1 %v26990_v54 }
 0x501   :  { %v29513_v60 = vpop.f32.mrb[224].mxu1 }
 0x502   :  { %34775 = vst [vmem:[#allocation70_spill] sm:$0xff] %v29513_v60  ;;  %v4748_v63 = vpop.f32.mrb[225].mxu1 }
 0x503   :  { %v29518_v9 = vpop.f32.mrb[226].mxu1  ;;  %v26996_v63 = vld [vmem:[%s34692_s2 + $0xf64] ss:$16 sps:$4 sm:$0xff]  }
 0x504   :  { %34776 = vst [vmem:[#allocation71_spill] sm:$0xff] %v29518_v9  ;;  %v4751_v5 = vpop.f32.mrb[227].mxu1 }
 0x506   :  { %4961 = vmatmul.mubr.bf16.gmra.mrb[224].mxu1 %v26988_v19  ;;  %v26994_v19 = vld [vmem:[%s34692_s2 + $0xf60] ss:$16 sps:$4 sm:$0xff]  }
 0x507   :  { %4968 = vmatprep.mubr.bf16.mxu1 %v26993_v23 }
 0x509   :  { %v29523_v34 = vpop.f32.mrb[228].mxu1 }
 0x50a   :  { %34777 = vst [vmem:[#allocation72_spill] sm:$0xff] %v29523_v34  ;;  %v4756_v41 = vpop.f32.mrb[229].mxu1 }
 0x50b   :  { %v29528_v54 = vpop.f32.mrb[230].mxu1  ;;  %v26999_v41 = vld [vmem:[%s34692_s2 + $0xf84] ss:$16 sps:$4 sm:$0xff]  }
 0x50c   :  { %34778 = vst [vmem:[#allocation73_spill] sm:$0xff] %v29528_v54  ;;  %v4759_v9 = vpop.f32.mrb[231].mxu1 }
 0x50e   :  { %4969 = vmatmul.mubr.bf16.gmra.mrb[228].mxu1 %v26991_v49  ;;  %v26997_v49 = vld [vmem:[%s34692_s2 + $0xf80] ss:$16 sps:$4 sm:$0xff]  }
 0x50f   :  { %4976 = vmatprep.mubr.bf16.mxu1 %v26996_v63 }
 0x511   :  { %v29533_v60 = vpop.f32.mrb[232].mxu1 }
 0x512   :  { %34779 = vst [vmem:[#allocation74_spill] sm:$0xff] %v29533_v60  ;;  %v4764_v5 = vpop.f32.mrb[233].mxu1 }
 0x513   :  { %v29538_v23 = vpop.f32.mrb[234].mxu1  ;;  %v27002_v5 = vld [vmem:[%s34692_s2 + $0xfa4] ss:$16 sps:$4 sm:$0xff]  }
 0x514   :  { %34780 = vst [vmem:[#allocation75_spill] sm:$0xff] %v29538_v23  ;;  %v4767_v54 = vpop.f32.mrb[235].mxu1 }
 0x516   :  { %4977 = vmatmul.mubr.bf16.gmra.mrb[232].mxu1 %v26994_v19  ;;  %v27000_v19 = vld [vmem:[%s34692_s2 + $0xfa0] ss:$16 sps:$4 sm:$0xff]  }
 0x517   :  { %4984 = vmatprep.mubr.bf16.mxu1 %v26999_v41 }
 0x519   :  { %v29543_v34 = vpop.f32.mrb[236].mxu1 }
 0x51a   :  { %34781 = vst [vmem:[#allocation76_spill] sm:$0xff] %v29543_v34  ;;  %v4772_v9 = vpop.f32.mrb[237].mxu1 }
 0x51b   :  { %v29548_v63 = vpop.f32.mrb[238].mxu1  ;;  %v27005_v9 = vld [vmem:[%s34692_s2 + $0xfc4] ss:$16 sps:$4 sm:$0xff]  }
 0x51c   :  { %34782 = vst [vmem:[#allocation77_spill] sm:$0xff] %v29548_v63  ;;  %v4775_v23 = vpop.f32.mrb[239].mxu1 }
 0x51e   :  { %4985 = vmatmul.mubr.bf16.gmra.mrb[236].mxu1 %v26997_v49  ;;  %v27003_v49 = vld [vmem:[%s34692_s2 + $0xfc0] ss:$16 sps:$4 sm:$0xff]  }
 0x51f   :  { %4992 = vmatprep.mubr.bf16.mxu1 %v27002_v5 }
 0x521   :  { %v29553_v60 = vpop.f32.mrb[240].mxu1 }
 0x522   :  { %34783 = vst [vmem:[#allocation78_spill] sm:$0xff] %v29553_v60  ;;  %v4780_v54 = vpop.f32.mrb[241].mxu1 }
 0x523   :  { %v29558_v41 = vpop.f32.mrb[242].mxu1  ;;  %v27008_v54 = vld [vmem:[%s34692_s2 + $0xfe4] ss:$16 sps:$4 sm:$0xff]  }
 0x524   :  { %34784 = vst [vmem:[#allocation79_spill] sm:$0xff] %v29558_v41  ;;  %v4783_v63 = vpop.f32.mrb[243].mxu1 }
 0x526   :  { %4993 = vmatmul.mubr.bf16.gmra.mrb[240].mxu1 %v27000_v19  ;;  %v27006_v19 = vld [vmem:[%s34692_s2 + $0xfe0] ss:$16 sps:$4 sm:$0xff]  }
 0x527   :  { %5000 = vmatprep.mubr.bf16.mxu1 %v27005_v9 }
 0x529   :  { %v29563_v34 = vpop.f32.mrb[244].mxu1 }
 0x52a   :  { %34785 = vst [vmem:[#allocation80_spill] sm:$0xff] %v29563_v34  ;;  %v4788_v23 = vpop.f32.mrb[245].mxu1 }
 0x52b   :  { %v29568_v5 = vpop.f32.mrb[246].mxu1  ;;  %v27011_v23 = vld [vmem:[%s34692_s2 + $0xc] ss:$16 sps:$4 sm:$0xff]  }
 0x52c   :  { %34786 = vst [vmem:[#allocation81_spill] sm:$0xff] %v29568_v5  ;;  %v4791_v41 = vpop.f32.mrb[247].mxu1 }
 0x52d   :  { %v27009_v41 = vld [vmem:[%s34692_s2 + $0x8] ss:$16 sps:$4 sm:$0xff]  }
 0x52e   :  { %5001 = vmatmul.mubr.bf16.gmra.mrb[244].mxu1 %v27003_v49  ;;  %v27012_v49 = vld [vmem:[%s34692_s2 + $0x2c] ss:$16 sps:$4 sm:$0xff]  }
 0x52f   :  { %5008 = vmatprep.mubr.bf16.mxu1 %v27008_v54  ;;  %v27014_v54 = vld [vmem:[%s34692_s2 + $0x28] ss:$16 sps:$4 sm:$0xff]  }
 0x531   :  { %v29573_v60 = vpop.f32.mrb[248].mxu1 }
 0x532   :  { %34787 = vst [vmem:[#allocation82_spill] sm:$0xff] %v29573_v60  ;;  %v4796_v63 = vpop.f32.mrb[249].mxu1 }
 0x533   :  { %v29578_v9 = vpop.f32.mrb[250].mxu1  ;;  %v27017_v63 = vld [vmem:[%s34692_s2 + $0x48] ss:$16 sps:$4 sm:$0xff]  }
 0x534   :  { %34788 = vst [vmem:[#allocation83_spill] sm:$0xff] %v29578_v9  ;;  %v4799_v5 = vpop.f32.mrb[251].mxu1  ;;  %v27098_v9 = vld [vmem:[%s34692_s2 + $0x368] ss:$16 sps:$4 sm:$0xff]  }
 0x535   :  { %v27015_v5 = vld [vmem:[%s34692_s2 + $0x4c] ss:$16 sps:$4 sm:$0xff]  }
 0x536   :  { %5009 = vmatmul.mubr.bf16.gmra.mrb[248].mxu1 %v27006_v19  ;;  %v27018_v19 = vld [vmem:[%s34692_s2 + $0x6c] ss:$16 sps:$4 sm:$0xff]  }
 0x537   :  { %5049 = vmatprep.mubr.bf16.mxu1 %v27011_v23  ;;  %v27020_v23 = vld [vmem:[%s34692_s2 + $0x68] ss:$16 sps:$4 sm:$0xff]  }
 0x53e   :  { %5050 = vmatmul.mubr.bf16.vlgmr.msra.gmra.mrb[64].mxu1 %v27009_v41  ;;  %v27021_v41 = vld [vmem:[%s34692_s2 + $0x8c] ss:$16 sps:$4 sm:$0xff]  }
 0x53f   :  { %5057 = vmatprep.mubr.bf16.mxu1 %v27012_v49  ;;  %v27023_v49 = vld [vmem:[%s34692_s2 + $0x88] ss:$16 sps:$4 sm:$0xff]  }
 0x546   :  { %5058 = vmatmul.mubr.bf16.gmra.mrb[68].mxu1 %v27014_v54  ;;  %v27024_v54 = vld [vmem:[%s34692_s2 + $0xac] ss:$16 sps:$4 sm:$0xff]  }
 0x547   :  { %5065 = vmatprep.mubr.bf16.mxu1 %v27015_v5  ;;  %v27026_v5 = vld [vmem:[%s34692_s2 + $0xa8] ss:$16 sps:$4 sm:$0xff]  }
 0x54e   :  { %5066 = vmatmul.mubr.bf16.gmra.mrb[72].mxu1 %v27017_v63  ;;  %v27027_v63 = vld [vmem:[%s34692_s2 + $0xcc] ss:$16 sps:$4 sm:$0xff]  }
 0x54f   :  { %5073 = vmatprep.mubr.bf16.mxu1 %v27018_v19  ;;  %v27029_v19 = vld [vmem:[%s34692_s2 + $0xc8] ss:$16 sps:$4 sm:$0xff]  }
 0x556   :  { %5074 = vmatmul.mubr.bf16.gmra.mrb[76].mxu1 %v27020_v23  ;;  %v27030_v23 = vld [vmem:[%s34692_s2 + $0xec] ss:$16 sps:$4 sm:$0xff]  }
 0x557   :  { %5081 = vmatprep.mubr.bf16.mxu1 %v27021_v41  ;;  %v27032_v41 = vld [vmem:[%s34692_s2 + $0xe8] ss:$16 sps:$4 sm:$0xff]  }
 0x55e   :  { %5082 = vmatmul.mubr.bf16.gmra.mrb[80].mxu1 %v27023_v49  ;;  %v27033_v49 = vld [vmem:[%s34692_s2 + $0x10c] ss:$16 sps:$4 sm:$0xff]  }
 0x55f   :  { %5089 = vmatprep.mubr.bf16.mxu1 %v27024_v54  ;;  %v27035_v54 = vld [vmem:[%s34692_s2 + $0x108] ss:$16 sps:$4 sm:$0xff]  }
 0x566   :  { %5090 = vmatmul.mubr.bf16.gmra.mrb[84].mxu1 %v27026_v5  ;;  %v27036_v5 = vld [vmem:[%s34692_s2 + $0x12c] ss:$16 sps:$4 sm:$0xff]  }
 0x567   :  { %5097 = vmatprep.mubr.bf16.mxu1 %v27027_v63  ;;  %v27084_v63 = vld [vmem:[%s34698_s8] sm:$0xff]  }
 0x568   :  { %23276 = vmatprep.subr.bf16.mxu0 %v27084_v63 }
 0x569   :  { %23277 = vmatpush3.bf16.msra.mxu0 %v27084_v63  ;;  %v27042_v63 = vld [vmem:[%s34692_s2 + $0x16c] ss:$16 sps:$4 sm:$0xff]  }
 0x56e   :  { %5098 = vmatmul.mubr.bf16.gmra.mrb[88].mxu1 %v27029_v19  ;;  %v27085_v19 = vld [vmem:[%s34698_s8 + $0x8] sm:$0xff]  }
 0x56f   :  { %5105 = vmatprep.mubr.bf16.mxu1 %v27030_v23  ;;  %23278 = vmatprep.subr.bf16.mxu0 %v27085_v19  ;;  %v27038_v23 = vld [vmem:[%s34692_s2 + $0x128] ss:$16 sps:$4 sm:$0xff]  }
 0x570   :  { %23279 = vmatpush3.bf16.msra.mxu0 %v27085_v19  ;;  %v27094_v19 = vld [vmem:[%s34698_s8 + $0x20] sm:$0xff]  }
 0x576   :  { %5106 = vmatmul.mubr.bf16.gmra.mrb[92].mxu1 %v27032_v41  ;;  %v27039_v41 = vld [vmem:[%s34692_s2 + $0x14c] ss:$16 sps:$4 sm:$0xff]  }
 0x577   :  { %5113 = vmatprep.mubr.bf16.mxu1 %v27033_v49  ;;  %v27089_v49 = vld [vmem:[%s34698_s8 + $0x10] sm:$0xff]  }
 0x578   :  { %23280 = vmatprep.subr.bf16.mxu0 %v27089_v49 }
 0x579   :  { %23281 = vmatpush3.bf16.msra.mxu0 %v27089_v49  ;;  %v27045_v49 = vld [vmem:[%s34692_s2 + $0x18c] ss:$16 sps:$4 sm:$0xff]  }
 0x57e   :  { %5114 = vmatmul.mubr.bf16.gmra.mrb[96].mxu1 %v27035_v54  ;;  %v27090_v54 = vld [vmem:[%s34698_s8 + $0x18] sm:$0xff]  }
 0x57f   :  { %5121 = vmatprep.mubr.bf16.mxu1 %v27036_v5  ;;  %23282 = vmatprep.subr.bf16.mxu0 %v27090_v54  ;;  %v27041_v5 = vld [vmem:[%s34692_s2 + $0x148] ss:$16 sps:$4 sm:$0xff]  }
 0x580   :  { %23283 = vmatpush3.bf16.msra.mxu0 %v27090_v54  ;;  %v27099_v54 = vld [vmem:[%s34698_s8 + $0x30] sm:$0xff]  }
 0x581   :  { %23284 = vmatprep.subr.bf16.mxu0 %v27094_v19 }
 0x584   :  { %23285 = vmatpush3.bf16.msra.mxu0 %v27094_v19  ;;  %v27048_v19 = vld [vmem:[%s34692_s2 + $0x1ac] ss:$16 sps:$4 sm:$0xff]  }
 0x586   :  { %5122 = vmatmul.mubr.bf16.gmra.mrb[100].mxu1 %v27038_v23  ;;  %v27095_v23 = vld [vmem:[%s34698_s8 + $0x28] sm:$0xff]  }
 0x587   :  { %5129 = vmatprep.mubr.bf16.mxu1 %v27039_v41  ;;  %v27044_v41 = vld [vmem:[%s34692_s2 + $0x168] ss:$16 sps:$4 sm:$0xff]   ;;  %23286 = vmatprep.subr.bf16.mxu0 %v27095_v23 }
 0x588   :  { %23287 = vmatpush3.bf16.msra.mxu0 %v27095_v23  ;;  %v27050_v23 = vld [vmem:[%s34692_s2 + $0x1a8] ss:$16 sps:$4 sm:$0xff]  }
 0x589   :  { %23288 = vmatprep.subr.bf16.mxu0 %v27099_v54 }
 0x58c   :  { %23289 = vmatpush3.bf16.msra.mxu0 %v27099_v54  ;;  %v27054_v54 = vld [vmem:[%s34692_s2 + $0x1ec] ss:$16 sps:$4 sm:$0xff]  }
 0x58e   :  { %5130 = vmatmul.mubr.bf16.gmra.mrb[104].mxu1 %v27041_v5  ;;  %v27100_v5 = vld [vmem:[%s34698_s8 + $0x38] sm:$0xff]  }
 0x58f   :  { %5137 = vmatprep.mubr.bf16.mxu1 %v27042_v63  ;;  %v27047_v63 = vld [vmem:[%s34692_s2 + $0x188] ss:$16 sps:$4 sm:$0xff]   ;;  %23290 = vmatprep.subr.bf16.mxu0 %v27100_v5 }
 0x590   :  { %23291 = vmatpush3.bf16.msra.mxu0 %v27100_v5  ;;  %v27056_v5 = vld [vmem:[%s34692_s2 + $0x1e8] ss:$16 sps:$4 sm:$0xff]  }
 0x596   :  { %5138 = vmatmul.mubr.bf16.gmra.mrb[108].mxu1 %v27044_v41  ;;  %v27051_v41 = vld [vmem:[%s34692_s2 + $0x1cc] ss:$16 sps:$4 sm:$0xff]  }
 0x597   :  { %5145 = vmatprep.mubr.bf16.mxu1 %v27045_v49  ;;  %v27053_v49 = vld [vmem:[%s34692_s2 + $0x1c8] ss:$16 sps:$4 sm:$0xff]  }
 0x59e   :  { %5146 = vmatmul.mubr.bf16.gmra.mrb[112].mxu1 %v27047_v63  ;;  %v27057_v63 = vld [vmem:[%s34692_s2 + $0x20c] ss:$16 sps:$4 sm:$0xff]  }
 0x59f   :  { %5153 = vmatprep.mubr.bf16.mxu1 %v27048_v19  ;;  %v27059_v19 = vld [vmem:[%s34692_s2 + $0x208] ss:$16 sps:$4 sm:$0xff]  }
 0x5a6   :  { %5154 = vmatmul.mubr.bf16.gmra.mrb[116].mxu1 %v27050_v23  ;;  %v27060_v23 = vld [vmem:[%s34692_s2 + $0x22c] ss:$16 sps:$4 sm:$0xff]  }
 0x5a7   :  { %5161 = vmatprep.mubr.bf16.mxu1 %v27051_v41  ;;  %v29712_v41 = vld [vmem:[%s34698_s8 + $0x40] sm:$0xff]  }
 0x5a8   :  { %23308 = vmatprep.subr.bf16.mxu0 %v29712_v41 }
 0x5ae   :  { %5162 = vmatmul.mubr.bf16.gmra.mrb[120].mxu1 %v27053_v49  ;;  %v27062_v49 = vld [vmem:[%s34692_s2 + $0x228] ss:$16 sps:$4 sm:$0xff]  }
 0x5af   :  { %5169 = vmatprep.mubr.bf16.mxu1 %v27054_v54  ;;  %v27063_v54 = vld [vmem:[%s34692_s2 + $0x24c] ss:$16 sps:$4 sm:$0xff]  }
 0x5b6   :  { %5170 = vmatmul.mubr.bf16.gmra.mrb[124].mxu1 %v27056_v5  ;;  %v27065_v5 = vld [vmem:[%s34692_s2 + $0x248] ss:$16 sps:$4 sm:$0xff]  }
 0x5b7   :  { %5177 = vmatprep.mubr.bf16.mxu1 %v27057_v63  ;;  %v27066_v63 = vld [vmem:[%s34692_s2 + $0x26c] ss:$16 sps:$4 sm:$0xff]  }
 0x5be   :  { %5178 = vmatmul.mubr.bf16.gmra.mrb[128].mxu1 %v27059_v19  ;;  %v27068_v19 = vld [vmem:[%s34692_s2 + $0x268] ss:$16 sps:$4 sm:$0xff]  }
 0x5bf   :  { %5185 = vmatprep.mubr.bf16.mxu1 %v27060_v23  ;;  %v27069_v23 = vld [vmem:[%s34692_s2 + $0x28c] ss:$16 sps:$4 sm:$0xff]  }
 0x5c6   :  { %5186 = vmatmul.mubr.bf16.gmra.mrb[132].mxu1 %v27062_v49  ;;  %v27071_v49 = vld [vmem:[%s34692_s2 + $0x288] ss:$16 sps:$4 sm:$0xff]  }
 0x5c7   :  { %5193 = vmatprep.mubr.bf16.mxu1 %v27063_v54  ;;  %v27072_v54 = vld [vmem:[%s34692_s2 + $0x2ac] ss:$16 sps:$4 sm:$0xff]  }
 0x5ce   :  { %5194 = vmatmul.mubr.bf16.gmra.mrb[136].mxu1 %v27065_v5  ;;  %v27074_v5 = vld [vmem:[%s34692_s2 + $0x2a8] ss:$16 sps:$4 sm:$0xff]  }
 0x5cf   :  { %5201 = vmatprep.mubr.bf16.mxu1 %v27066_v63  ;;  %v27075_v63 = vld [vmem:[%s34692_s2 + $0x2cc] ss:$16 sps:$4 sm:$0xff]  }
 0x5d6   :  { %5202 = vmatmul.mubr.bf16.gmra.mrb[140].mxu1 %v27068_v19  ;;  %v27077_v19 = vld [vmem:[%s34692_s2 + $0x2c8] ss:$16 sps:$4 sm:$0xff]  }
 0x5d7   :  { %5209 = vmatprep.mubr.bf16.mxu1 %v27069_v23  ;;  %v27078_v23 = vld [vmem:[%s34692_s2 + $0x2ec] ss:$16 sps:$4 sm:$0xff]  }
 0x5de   :  { %5210 = vmatmul.mubr.bf16.gmra.mrb[144].mxu1 %v27071_v49  ;;  %v27080_v49 = vld [vmem:[%s34692_s2 + $0x2e8] ss:$16 sps:$4 sm:$0xff]  }
 0x5df   :  { %5217 = vmatprep.mubr.bf16.mxu1 %v27072_v54  ;;  %v27081_v54 = vld [vmem:[%s34692_s2 + $0x30c] ss:$16 sps:$4 sm:$0xff]  }
 0x5e6   :  { %5218 = vmatmul.mubr.bf16.gmra.mrb[148].mxu1 %v27074_v5  ;;  %v27083_v5 = vld [vmem:[%s34692_s2 + $0x308] ss:$16 sps:$4 sm:$0xff]  }
 0x5e7   :  { %5225 = vmatprep.mubr.bf16.mxu1 %v27075_v63  ;;  %v27086_v63 = vld [vmem:[%s34692_s2 + $0x32c] ss:$16 sps:$4 sm:$0xff]  }
 0x5ee   :  { %5226 = vmatmul.mubr.bf16.gmra.mrb[152].mxu1 %v27077_v19  ;;  %v27088_v19 = vld [vmem:[%s34692_s2 + $0x328] ss:$16 sps:$4 sm:$0xff]  }
 0x5ef   :  { %5233 = vmatprep.mubr.bf16.mxu1 %v27078_v23  ;;  %v27091_v23 = vld [vmem:[%s34692_s2 + $0x34c] ss:$16 sps:$4 sm:$0xff]  }
 0x5f6   :  { %5234 = vmatmul.mubr.bf16.gmra.mrb[156].mxu1 %v27080_v49  ;;  %v27093_v49 = vld [vmem:[%s34692_s2 + $0x348] ss:$16 sps:$4 sm:$0xff]  }
 0x5f7   :  { %5241 = vmatprep.mubr.bf16.mxu1 %v27081_v54  ;;  %v27096_v54 = vld [vmem:[%s34692_s2 + $0x36c] ss:$16 sps:$4 sm:$0xff]  }
 0x5fe   :  { %5242 = vmatmul.mubr.bf16.gmra.mrb[160].mxu1 %v27083_v5 }
 0x5ff   :  { %5249 = vmatprep.mubr.bf16.mxu1 %v27086_v63 }
 0x606   :  { %5250 = vmatmul.mubr.bf16.gmra.mrb[164].mxu1 %v27088_v19  ;;  %v27101_v19 = vld [vmem:[%s34692_s2 + $0x38c] ss:$16 sps:$4 sm:$0xff]  }
 0x607   :  { %5257 = vmatprep.mubr.bf16.mxu1 %v27091_v23 }
 0x60e   :  { %5258 = vmatmul.mubr.bf16.gmra.mrb[168].mxu1 %v27093_v49  ;;  %v27103_v49 = vld [vmem:[%s34692_s2 + $0x388] ss:$16 sps:$4 sm:$0xff]  }
 0x60f   :  { %5265 = vmatprep.mubr.bf16.mxu1 %v27096_v54 }
 0x611   :  { %v5051_v5 = vpop.f32.mrb[64].mxu1 }
 0x612   :  { %v5053_v63 = vpop.f32.mrb[65].mxu1 }
 0x613   :  { %v5054_v60 = vpop.f32.mrb[66].mxu1  ;;  %v27104_v63 = vld [vmem:[%s34692_s2 + $0x3ac] ss:$16 sps:$4 sm:$0xff]  }
 0x614   :  { %v5056_v23 = vpop.f32.mrb[67].mxu1  ;;  %v6074_v34 = vpack.c.bf16 %v5054_v60, %v5051_v5  ;;  %v27117_v60 = vld [vmem:[%s34698_s8 + $0x48] sm:$0xff]  }
 0x615   :  { %v27107_v5 = vld [vmem:[%s34692_s2 + $0x3cc] ss:$16 sps:$4 sm:$0xff]   ;;  %v27126_v23 = vld [vmem:[%s34698_s8 + $0x60] sm:$0xff]  }
 0x616   :  { %5266 = vmatmul.mubr.bf16.gmra.mrb[172].mxu1 %v27098_v9  ;;  %23292 = vmatprep.mubr.bf16.mxu0 %v6074_v34 }
 0x617   :  { %5273 = vmatprep.mubr.bf16.mxu1 %v27101_v19 }
 0x619   :  { %v5059_v42 = vpop.f32.mrb[68].mxu1 }
 0x61a   :  { %v5061_v30 = vpop.f32.mrb[69].mxu1 }
 0x61b   :  { %v5062_v54 = vpop.f32.mrb[70].mxu1  ;;  %v27121_v30 = vld [vmem:[%s34698_s8 + $0x50] sm:$0xff]  }
 0x61c   :  { %v6075_v13 = vpack.c.bf16 %v5062_v54, %v5059_v42  ;;  %v5064_v3 = vpop.f32.mrb[71].mxu1 }
 0x61d   :  { %v27106_v3 = vld [vmem:[%s34692_s2 + $0x3a8] ss:$16 sps:$4 sm:$0xff]  }
 0x61e   :  { %5274 = vmatmul.mubr.bf16.gmra.mrb[176].mxu1 %v27103_v49  ;;  %23293 = vmatmul.mubr.bf16.vlgmr.msra.gmra.mrb[0].mxu0 %v6075_v13 }
 0x61f   :  { %5281 = vmatprep.mubr.bf16.mxu1 %v27104_v63  ;;  %23309 = vmatpush3.bf16.msra.mxu0 %v29712_v41  ;;  %v27122_v41 = vld [vmem:[%s34698_s8 + $0x58] sm:$0xff]  }
 0x620   :  { %23310 = vmatprep.subr.bf16.mxu0 %v27117_v60  ;;  %v27109_v63 = vld [vmem:[%s34692_s2 + $0x3c8] ss:$16 sps:$4 sm:$0xff]  }
 0x621   :  { %v5067_v34 = vpop.f32.mrb[72].mxu1 }
 0x622   :  { %v5069_v9 = vpop.f32.mrb[73].mxu1 }
 0x623   :  { %v5070_v42 = vpop.f32.mrb[74].mxu1  ;;  %23311 = vmatpush3.bf16.msra.mxu0 %v27117_v60 }
 0x624   :  { %v6076_v13 = vpack.c.bf16 %v5070_v42, %v5067_v34  ;;  %v5072_v19 = vpop.f32.mrb[75].mxu1  ;;  %23312 = vmatprep.subr.bf16.mxu0 %v27121_v30  ;;  %v27110_v34 = vld [vmem:[%s34692_s2 + $0x3ec] ss:$16 sps:$4 sm:$0xff]   ;;  %v27131_v42 = vld [vmem:[%s34698_s8 + $0x70] sm:$0xff]  }
 0x625   :  { %v27112_v19 = vld [vmem:[%s34692_s2 + $0x3e8] ss:$16 sps:$4 sm:$0xff]  }
 0x626   :  { %5282 = vmatmul.mubr.bf16.gmra.mrb[180].mxu1 %v27106_v3  ;;  %23296 = vmatprep.mubr.bf16.mxu0 %v6076_v13 }
 0x627   :  { %5289 = vmatprep.mubr.bf16.mxu1 %v27107_v5  ;;  %23313 = vmatpush3.bf16.msra.mxu0 %v27121_v30  ;;  %v27127_v30 = vld [vmem:[%s34698_s8 + $0x68] sm:$0xff]  }
 0x628   :  { %23314 = vmatprep.subr.bf16.mxu0 %v27122_v41 }
 0x629   :  { %v5075_v49 = vpop.f32.mrb[76].mxu1 }
 0x62a   :  { %v5077_v54 = vpop.f32.mrb[77].mxu1 }
 0x62b   :  { %v5078_v60 = vpop.f32.mrb[78].mxu1  ;;  %23315 = vmatpush3.bf16.msra.mxu0 %v27122_v41 }
 0x62c   :  { %v6077_v9 = vpack.c.bf16 %v5078_v60, %v5075_v49  ;;  %v5080_v3 = vpop.f32.mrb[79].mxu1  ;;  %23316 = vmatprep.subr.bf16.mxu0 %v27126_v23  ;;  %v27113_v49 = vld [vmem:[%s34692_s2 + $0x40c] ss:$16 sps:$4 sm:$0xff]   ;;  %v27148_v60 = vld [vmem:[%s34698_s8 + $0x80] sm:$0xff]  }
 0x62d   :  { %v27115_v3 = vld [vmem:[%s34692_s2 + $0x408] ss:$16 sps:$4 sm:$0xff]  }
 0x62e   :  { %5290 = vmatmul.mubr.bf16.gmra.mrb[184].mxu1 %v27109_v63  ;;  %23297 = vmatmul.mubr.bf16.gmra.mrb[4].mxu0 %v6077_v9 }
 0x62f   :  { %5297 = vmatprep.mubr.bf16.mxu1 %v27110_v34  ;;  %23317 = vmatpush3.bf16.msra.mxu0 %v27126_v23  ;;  %v27132_v23 = vld [vmem:[%s34698_s8 + $0x78] sm:$0xff]  }
 0x630   :  { %23318 = vmatprep.subr.bf16.mxu0 %v27127_v30 }
 0x631   :  { %v5083_v5 = vpop.f32.mrb[80].mxu1 }
 0x632   :  { %v5085_v13 = vpop.f32.mrb[81].mxu1 }
 0x633   :  { %v5086_v41 = vpop.f32.mrb[82].mxu1  ;;  %23319 = vmatpush3.bf16.msra.mxu0 %v27127_v30 }
 0x634   :  { %v6078_v54 = vpack.c.bf16 %v5086_v41, %v5083_v5  ;;  %v5088_v63 = vpop.f32.mrb[83].mxu1  ;;  %23320 = vmatprep.subr.bf16.mxu0 %v27131_v42  ;;  %v27118_v5 = vld [vmem:[%s34692_s2 + $0x42c] ss:$16 sps:$4 sm:$0xff]  }
 0x635   :  { %v27123_v63 = vld [vmem:[%s34692_s2 + $0x44c] ss:$16 sps:$4 sm:$0xff]  }
 0x636   :  { %5298 = vmatmul.mubr.bf16.gmra.mrb[188].mxu1 %v27112_v19  ;;  %23300 = vmatprep.mubr.bf16.mxu0 %v6078_v54 }
 0x637   :  { %5305 = vmatprep.mubr.bf16.mxu1 %v27113_v49  ;;  %23321 = vmatpush3.bf16.msra.mxu0 %v27131_v42  ;;  %v27120_v49 = vld [vmem:[%s34692_s2 + $0x428] ss:$16 sps:$4 sm:$0xff]  }
 0x638   :  { %23322 = vmatprep.subr.bf16.mxu0 %v27132_v23 }
 0x639   :  { %v5091_v34 = vpop.f32.mrb[84].mxu1 }
 0x63a   :  { %v5093_v9 = vpop.f32.mrb[85].mxu1 }
 0x63b   :  { %v5094_v30 = vpop.f32.mrb[86].mxu1  ;;  %23323 = vmatpush3.bf16.msra.mxu0 %v27132_v23 }
 0x63c   :  { %v6079_v13 = vpack.c.bf16 %v5094_v30, %v5091_v34  ;;  %v5096_v19 = vpop.f32.mrb[87].mxu1  ;;  %23340 = vmatprep.subr.bf16.mxu0 %v27148_v60 }
 0x63e   :  { %5306 = vmatmul.mubr.bf16.gmra.mrb[192].mxu1 %v27115_v3  ;;  %23301 = vmatmul.mubr.bf16.gmra.mrb[8].mxu0 %v6079_v13  ;;  %v27125_v3 = vld [vmem:[%s34692_s2 + $0x448] ss:$16 sps:$4 sm:$0xff]  }
 0x63f   :  { %5313 = vmatprep.mubr.bf16.mxu1 %v27118_v5  ;;  %v27128_v5 = vld [vmem:[%s34692_s2 + $0x46c] ss:$16 sps:$4 sm:$0xff]  }
 0x641   :  { %v5099_v42 = vpop.f32.mrb[88].mxu1 }
 0x642   :  { %v5101_v41 = vpop.f32.mrb[89].mxu1 }
 0x643   :  { %v5102_v54 = vpop.f32.mrb[90].mxu1  ;;  %v27130_v41 = vld [vmem:[%s34692_s2 + $0x468] ss:$16 sps:$4 sm:$0xff]  }
 0x644   :  { %v6080_v9 = vpack.c.bf16 %v5102_v54, %v5099_v42  ;;  %v5104_v55 = vpop.f32.mrb[91].mxu1  ;;  %v27133_v54 = vld [vmem:[%s34692_s2 + $0x48c] ss:$16 sps:$4 sm:$0xff]  }
 0x646   :  { %5314 = vmatmul.mubr.bf16.gmra.mrb[196].mxu1 %v27120_v49  ;;  %23304 = vmatprep.mubr.bf16.mxu0 %v6080_v9 }
 0x647   :  { %5321 = vmatprep.mubr.bf16.mxu1 %v27123_v63 }
 0x649   :  { %v5107_v23 = vpop.f32.mrb[92].mxu1 }
 0x64a   :  { %v5109_v34 = vpop.f32.mrb[93].mxu1 }
 0x64b   :  { %v5110_v30 = vpop.f32.mrb[94].mxu1 }
 0x64c   :  { %v6081_v13 = vpack.c.bf16 %v5110_v30, %v5107_v23  ;;  %v5112_v19 = vpop.f32.mrb[95].mxu1 }
 0x64e   :  { %5322 = vmatmul.mubr.bf16.gmra.mrb[200].mxu1 %v27125_v3  ;;  %23305 = vmatmul.mubr.bf16.gmra.mrb[12].mxu0 %v6081_v13  ;;  %v27135_v3 = vld [vmem:[%s34692_s2 + $0x488] ss:$16 sps:$4 sm:$0xff]  }
 0x64f   :  { %5329 = vmatprep.mubr.bf16.mxu1 %v27128_v5  ;;  %v27138_v5 = vld [vmem:[%s34692_s2 + $0x4ac] ss:$16 sps:$4 sm:$0xff]  }
 0x651   :  { %v5115_v55 = vpop.f32.mrb[96].mxu1 }
 0x652   :  { %v5117_v42 = vpop.f32.mrb[97].mxu1 }
 0x653   :  { %v5118_v49 = vpop.f32.mrb[98].mxu1  ;;  %v27153_v42 = vld [vmem:[%s34698_s8 + $0x90] sm:$0xff]  }
 0x654   :  { %v6082_v63 = vpack.c.bf16 %v5118_v49, %v5115_v55  ;;  %v5120_v9 = vpop.f32.mrb[99].mxu1  ;;  %v27149_v55 = vld [vmem:[%s34698_s8 + $0x88] sm:$0xff]  }
 0x655   :  { %v27141_v9 = vld [vmem:[%s34692_s2 + $0x4cc] ss:$16 sps:$4 sm:$0xff]  }
 0x656   :  { %5330 = vmatmul.mubr.bf16.gmra.mrb[204].mxu1 %v27130_v41  ;;  %23324 = vmatprep.mubr.bf16.mxu0 %v6082_v63 }
 0x657   :  { %5337 = vmatprep.mubr.bf16.mxu1 %v27133_v54  ;;  %v27136_v54 = vld [vmem:[%s34692_s2 + $0x4a8] ss:$16 sps:$4 sm:$0xff]  }
 0x659   :  { %v5123_v23 = vpop.f32.mrb[100].mxu1 }
 0x65a   :  { %v5125_v34 = vpop.f32.mrb[101].mxu1 }
 0x65b   :  { %v5126_v30 = vpop.f32.mrb[102].mxu1 }
 0x65c   :  { %v6083_v13 = vpack.c.bf16 %v5126_v30, %v5123_v23  ;;  %v5128_v19 = vpop.f32.mrb[103].mxu1 }
 0x65e   :  { %5338 = vmatmul.mubr.bf16.gmra.mrb[208].mxu1 %v27135_v3  ;;  %23325 = vmatmul.mubr.bf16.vlgmr.msra.gmra.mrb[0].mxu0 %v6083_v13  ;;  %v27158_v3 = vld [vmem:[%s34698_s8 + $0xa0] sm:$0xff]   ;;  %v27139_v13 = vld [vmem:[%s34692_s2 + $0x4c8] ss:$16 sps:$4 sm:$0xff]  }
 0x65f   :  { %5345 = vmatprep.mubr.bf16.mxu1 %v27138_v5  ;;  %23341 = vmatpush3.bf16.msra.mxu0 %v27148_v60  ;;  %v27154_v60 = vld [vmem:[%s34698_s8 + $0x98] sm:$0xff]  }
 0x660   :  { %23342 = vmatprep.subr.bf16.mxu0 %v27149_v55 }
 0x661   :  { %v5131_v41 = vpop.f32.mrb[104].mxu1 }
 0x662   :  { %v5133_v49 = vpop.f32.mrb[105].mxu1 }
 0x663   :  { %v5134_v63 = vpop.f32.mrb[106].mxu1  ;;  %23343 = vmatpush3.bf16.msra.mxu0 %v27149_v55  ;;  %v27144_v55 = vld [vmem:[%s34692_s2 + $0x4ec] ss:$16 sps:$4 sm:$0xff]  }
 0x664   :  { %v6084_v23 = vpack.c.bf16 %v5134_v63, %v5131_v41  ;;  %v5136_v34 = vpop.f32.mrb[107].mxu1  ;;  %23344 = vmatprep.subr.bf16.mxu0 %v27153_v42 }
 0x666   :  { %5346 = vmatmul.mubr.bf16.gmra.mrb[64].mxu1 %v27136_v54  ;;  %23328 = vmatprep.mubr.bf16.mxu0 %v6084_v23  ;;  %v27163_v54 = vld [vmem:[%s34698_s8 + $0xb0] sm:$0xff]   ;;  %v27142_v23 = vld [vmem:[%s34692_s2 + $0x4e8] ss:$16 sps:$4 sm:$0xff]  }
 0x667   :  { %5353 = vmatprep.mubr.bf16.mxu1 %v27141_v9  ;;  %23345 = vmatpush3.bf16.msra.mxu0 %v27153_v42  ;;  %v27159_v42 = vld [vmem:[%s34698_s8 + $0xa8] sm:$0xff]  }
 0x668   :  { %23346 = vmatprep.subr.bf16.mxu0 %v27154_v60 }
 0x669   :  { %v5139_v30 = vpop.f32.mrb[108].mxu1 }
 0x66a   :  { %v5141_v5 = vpop.f32.mrb[109].mxu1 }
 0x66b   :  { %v5142_v19 = vpop.f32.mrb[110].mxu1  ;;  %23347 = vmatpush3.bf16.msra.mxu0 %v27154_v60  ;;  %v27147_v60 = vld [vmem:[%s34692_s2 + $0x50c] ss:$16 sps:$4 sm:$0xff]  }
 0x66c   :  { %v6085_v41 = vpack.c.bf16 %v5142_v19, %v5139_v30  ;;  %v5144_v49 = vpop.f32.mrb[111].mxu1  ;;  %23348 = vmatprep.subr.bf16.mxu0 %v27158_v3 }
 0x66e   :  { %5354 = vmatmul.mubr.bf16.gmra.mrb[68].mxu1 %v27139_v13  ;;  %23329 = vmatmul.mubr.bf16.gmra.mrb[4].mxu0 %v6085_v41  ;;  %v27180_v13 = vld [vmem:[%s34698_s8 + $0xc0] sm:$0xff]   ;;  %v27145_v41 = vld [vmem:[%s34692_s2 + $0x508] ss:$16 sps:$4 sm:$0xff]  }
 0x66f   :  { %5361 = vmatprep.mubr.bf16.mxu1 %v27144_v55  ;;  %23349 = vmatpush3.bf16.msra.mxu0 %v27158_v3  ;;  %v27164_v3 = vld [vmem:[%s34698_s8 + $0xb8] sm:$0xff]  }
 0x670   :  { %23350 = vmatprep.subr.bf16.mxu0 %v27159_v42 }
 0x671   :  { %v5147_v63 = vpop.f32.mrb[112].mxu1 }
 0x672   :  { %v5149_v9 = vpop.f32.mrb[113].mxu1 }
 0x673   :  { %v5150_v34 = vpop.f32.mrb[114].mxu1  ;;  %23351 = vmatpush3.bf16.msra.mxu0 %v27159_v42  ;;  %v27152_v42 = vld [vmem:[%s34692_s2 + $0x52c] ss:$16 sps:$4 sm:$0xff]  }
 0x674   :  { %v6086_v30 = vpack.c.bf16 %v5150_v34, %v5147_v63  ;;  %v5152_v5 = vpop.f32.mrb[115].mxu1  ;;  %23352 = vmatprep.subr.bf16.mxu0 %v27163_v54  ;;  %v27150_v34 = vld [vmem:[%s34692_s2 + $0x528] ss:$16 sps:$4 sm:$0xff]  }
 0x676   :  { %5362 = vmatmul.mubr.bf16.gmra.mrb[72].mxu1 %v27142_v23  ;;  %23332 = vmatprep.mubr.bf16.mxu0 %v6086_v30  ;;  %v27157_v30 = vld [vmem:[%s34692_s2 + $0x54c] ss:$16 sps:$4 sm:$0xff]  }
 0x677   :  { %5369 = vmatprep.mubr.bf16.mxu1 %v27147_v60  ;;  %23353 = vmatpush3.bf16.msra.mxu0 %v27163_v54 }
 0x678   :  { %23354 = vmatprep.subr.bf16.mxu0 %v27164_v3 }
 0x679   :  { %v5155_v19 = vpop.f32.mrb[116].mxu1 }
 0x67a   :  { %v5157_v55 = vpop.f32.mrb[117].mxu1 }
 0x67b   :  { %v5158_v49 = vpop.f32.mrb[118].mxu1  ;;  %23355 = vmatpush3.bf16.msra.mxu0 %v27164_v3 }
 0x67c   :  { %v6087_v63 = vpack.c.bf16 %v5158_v49, %v5155_v19  ;;  %v5160_v9 = vpop.f32.mrb[119].mxu1  ;;  %23372 = vmatprep.subr.bf16.mxu0 %v27180_v13 }
 0x67e   :  { %5370 = vmatmul.mubr.bf16.gmra.mrb[76].mxu1 %v27145_v41  ;;  %23333 = vmatmul.mubr.bf16.gmra.mrb[8].mxu0 %v6087_v63  ;;  %v27155_v41 = vld [vmem:[%s34692_s2 + $0x548] ss:$16 sps:$4 sm:$0xff]  }
 0x67f   :  { %5377 = vmatprep.mubr.bf16.mxu1 %v27152_v42  ;;  %v27162_v42 = vld [vmem:[%s34692_s2 + $0x56c] ss:$16 sps:$4 sm:$0xff]  }
 0x681   :  { %v5163_v54 = vpop.f32.mrb[120].mxu1 }
 0x682   :  { %v5165_v23 = vpop.f32.mrb[121].mxu1 }
 0x683   :  { %v5166_v60 = vpop.f32.mrb[122].mxu1 }
 0x684   :  { %v6088_v5 = vpack.c.bf16 %v5166_v60, %v5163_v54  ;;  %v5168_v55 = vpop.f32.mrb[123].mxu1 }
 0x686   :  { %5378 = vmatmul.mubr.bf16.gmra.mrb[80].mxu1 %v27150_v34  ;;  %23336 = vmatprep.mubr.bf16.mxu0 %v6088_v5  ;;  %v27160_v34 = vld [vmem:[%s34692_s2 + $0x568] ss:$16 sps:$4 sm:$0xff]  }
 0x687   :  { %5385 = vmatprep.mubr.bf16.mxu1 %v27157_v30  ;;  %v27167_v30 = vld [vmem:[%s34692_s2 + $0x58c] ss:$16 sps:$4 sm:$0xff]  }
 0x689   :  { %v5171_v3 = vpop.f32.mrb[124].mxu1 }
 0x68a   :  { %v5173_v19 = vpop.f32.mrb[125].mxu1 }
 0x68b   :  { %v5174_v49 = vpop.f32.mrb[126].mxu1 }
 0x68c   :  { %v6089_v63 = vpack.c.bf16 %v5174_v49, %v5171_v3  ;;  %v5176_v9 = vpop.f32.mrb[127].mxu1 }
 0x68e   :  { %5386 = vmatmul.mubr.bf16.gmra.mrb[84].mxu1 %v27155_v41  ;;  %23337 = vmatmul.mubr.bf16.gmra.mrb[12].mxu0 %v6089_v63  ;;  %v27165_v41 = vld [vmem:[%s34692_s2 + $0x588] ss:$16 sps:$4 sm:$0xff]  }
 0x68f   :  { %5393 = vmatprep.mubr.bf16.mxu1 %v27162_v42  ;;  %v27170_v42 = vld [vmem:[%s34692_s2 + $0x5ac] ss:$16 sps:$4 sm:$0xff]  }
 0x691   :  { %v5179_v54 = vpop.f32.mrb[128].mxu1 }
 0x692   :  { %v5181_v23 = vpop.f32.mrb[129].mxu1 }
 0x693   :  { %v5182_v60 = vpop.f32.mrb[130].mxu1  ;;  %v27185_v23 = vld [vmem:[%s34698_s8 + $0xd0] sm:$0xff]  }
 0x694   :  { %v6090_v5 = vpack.c.bf16 %v5182_v60, %v5179_v54  ;;  %v5184_v55 = vpop.f32.mrb[131].mxu1  ;;  %v27181_v54 = vld [vmem:[%s34698_s8 + $0xc8] sm:$0xff]  }
 0x695   :  { %v27173_v55 = vld [vmem:[%s34692_s2 + $0x5cc] ss:$16 sps:$4 sm:$0xff]  }
 0x696   :  { %5394 = vmatmul.mubr.bf16.gmra.mrb[88].mxu1 %v27160_v34  ;;  %23356 = vmatprep.mubr.bf16.mxu0 %v6090_v5 }
 0x697   :  { %5401 = vmatprep.mubr.bf16.mxu1 %v27167_v30  ;;  %v27168_v30 = vld [vmem:[%s34692_s2 + $0x5a8] ss:$16 sps:$4 sm:$0xff]  }
 0x699   :  { %v5187_v3 = vpop.f32.mrb[132].mxu1 }
 0x69a   :  { %v5189_v19 = vpop.f32.mrb[133].mxu1 }
 0x69b   :  { %v5190_v49 = vpop.f32.mrb[134].mxu1 }
 0x69c   :  { %v6091_v63 = vpack.c.bf16 %v5190_v49, %v5187_v3  ;;  %v5192_v9 = vpop.f32.mrb[135].mxu1 }
 0x69e   :  { %5402 = vmatmul.mubr.bf16.gmra.mrb[92].mxu1 %v27165_v41  ;;  %23357 = vmatmul.mubr.bf16.vlgmr.msra.gmra.mrb[0].mxu0 %v6091_v63  ;;  %v27190_v41 = vld [vmem:[%s34698_s8 + $0xe0] sm:$0xff]   ;;  %v27171_v63 = vld [vmem:[%s34692_s2 + $0x5c8] ss:$16 sps:$4 sm:$0xff]  }
 0x69f   :  { %5409 = vmatprep.mubr.bf16.mxu1 %v27170_v42  ;;  %23373 = vmatpush3.bf16.msra.mxu0 %v27180_v13  ;;  %v27186_v13 = vld [vmem:[%s34698_s8 + $0xd8] sm:$0xff]  }
 0x6a0   :  { %23374 = vmatprep.subr.bf16.mxu0 %v27181_v54 }
 0x6a1   :  { %v5195_v34 = vpop.f32.mrb[136].mxu1 }
 0x6a2   :  { %v5197_v60 = vpop.f32.mrb[137].mxu1 }
 0x6a3   :  { %v5198_v5 = vpop.f32.mrb[138].mxu1  ;;  %23375 = vmatpush3.bf16.msra.mxu0 %v27181_v54  ;;  %v27176_v54 = vld [vmem:[%s34692_s2 + $0x5ec] ss:$16 sps:$4 sm:$0xff]  }
 0x6a4   :  { %v6092_v3 = vpack.c.bf16 %v5198_v5, %v5195_v34  ;;  %v5200_v19 = vpop.f32.mrb[139].mxu1  ;;  %23376 = vmatprep.subr.bf16.mxu0 %v27185_v23 }
 0x6a6   :  { %5410 = vmatmul.mubr.bf16.gmra.mrb[96].mxu1 %v27168_v30  ;;  %23360 = vmatprep.mubr.bf16.mxu0 %v6092_v3  ;;  %v27195_v30 = vld [vmem:[%s34698_s8 + $0xf0] sm:$0xff]   ;;  %v27174_v3 = vld [vmem:[%s34692_s2 + $0x5e8] ss:$16 sps:$4 sm:$0xff]  }
 0x6a7   :  { %5417 = vmatprep.mubr.bf16.mxu1 %v27173_v55  ;;  %23377 = vmatpush3.bf16.msra.mxu0 %v27185_v23  ;;  %v27191_v23 = vld [vmem:[%s34698_s8 + $0xe8] sm:$0xff]  }
 0x6a8   :  { %23378 = vmatprep.subr.bf16.mxu0 %v27186_v13 }
 0x6a9   :  { %v5203_v49 = vpop.f32.mrb[140].mxu1 }
 0x6aa   :  { %v5205_v42 = vpop.f32.mrb[141].mxu1 }
 0x6ab   :  { %v5206_v9 = vpop.f32.mrb[142].mxu1  ;;  %23379 = vmatpush3.bf16.msra.mxu0 %v27186_v13  ;;  %v27179_v13 = vld [vmem:[%s34692_s2 + $0x60c] ss:$16 sps:$4 sm:$0xff]  }
 0x6ac   :  { %v6093_v34 = vpack.c.bf16 %v5206_v9, %v5203_v49  ;;  %v5208_v60 = vpop.f32.mrb[143].mxu1  ;;  %23380 = vmatprep.subr.bf16.mxu0 %v27190_v41 }
 0x6ae   :  { %5418 = vmatmul.mubr.bf16.gmra.mrb[100].mxu1 %v27171_v63  ;;  %23361 = vmatmul.mubr.bf16.gmra.mrb[4].mxu0 %v6093_v34  ;;  %v27212_v63 = vld [vmem:[%s34698_s8 + $0x100] sm:$0xff]   ;;  %v27177_v34 = vld [vmem:[%s34692_s2 + $0x608] ss:$16 sps:$4 sm:$0xff]  }
 0x6af   :  { %5425 = vmatprep.mubr.bf16.mxu1 %v27176_v54  ;;  %23381 = vmatpush3.bf16.msra.mxu0 %v27190_v41  ;;  %v27196_v41 = vld [vmem:[%s34698_s8 + $0xf8] sm:$0xff]  }
 0x6b0   :  { %23382 = vmatprep.subr.bf16.mxu0 %v27191_v23 }
 0x6b1   :  { %v5211_v5 = vpop.f32.mrb[144].mxu1 }
 0x6b2   :  { %v5213_v55 = vpop.f32.mrb[145].mxu1 }
 0x6b3   :  { %v5214_v19 = vpop.f32.mrb[146].mxu1  ;;  %23383 = vmatpush3.bf16.msra.mxu0 %v27191_v23  ;;  %v27184_v23 = vld [vmem:[%s34692_s2 + $0x62c] ss:$16 sps:$4 sm:$0xff]  }
 0x6b4   :  { %v6094_v49 = vpack.c.bf16 %v5214_v19, %v5211_v5  ;;  %v5216_v42 = vpop.f32.mrb[147].mxu1  ;;  %23384 = vmatprep.subr.bf16.mxu0 %v27195_v30  ;;  %v27182_v19 = vld [vmem:[%s34692_s2 + $0x628] ss:$16 sps:$4 sm:$0xff]  }
 0x6b6   :  { %5426 = vmatmul.mubr.bf16.gmra.mrb[104].mxu1 %v27174_v3  ;;  %23364 = vmatprep.mubr.bf16.mxu0 %v6094_v49  ;;  %v27189_v49 = vld [vmem:[%s34692_s2 + $0x64c] ss:$16 sps:$4 sm:$0xff]  }
 0x6b7   :  { %5433 = vmatprep.mubr.bf16.mxu1 %v27179_v13  ;;  %23385 = vmatpush3.bf16.msra.mxu0 %v27195_v30 }
 0x6b8   :  { %23386 = vmatprep.subr.bf16.mxu0 %v27196_v41 }
 0x6b9   :  { %v5219_v9 = vpop.f32.mrb[148].mxu1 }
 0x6ba   :  { %v5221_v54 = vpop.f32.mrb[149].mxu1 }
 0x6bb   :  { %v5222_v60 = vpop.f32.mrb[150].mxu1  ;;  %23387 = vmatpush3.bf16.msra.mxu0 %v27196_v41 }
 0x6bc   :  { %v6095_v5 = vpack.c.bf16 %v5222_v60, %v5219_v9  ;;  %v5224_v55 = vpop.f32.mrb[151].mxu1  ;;  %23404 = vmatprep.subr.bf16.mxu0 %v27212_v63 }
 0x6be   :  { %5434 = vmatmul.mubr.bf16.gmra.mrb[108].mxu1 %v27177_v34  ;;  %23365 = vmatmul.mubr.bf16.gmra.mrb[8].mxu0 %v6095_v5  ;;  %v27187_v34 = vld [vmem:[%s34692_s2 + $0x648] ss:$16 sps:$4 sm:$0xff]  }
 0x6bf   :  { %5441 = vmatprep.mubr.bf16.mxu1 %v27184_v23  ;;  %v27194_v23 = vld [vmem:[%s34692_s2 + $0x66c] ss:$16 sps:$4 sm:$0xff]  }
 0x6c1   :  { %v5227_v30 = vpop.f32.mrb[152].mxu1 }
 0x6c2   :  { %v5229_v3 = vpop.f32.mrb[153].mxu1 }
 0x6c3   :  { %v5230_v13 = vpop.f32.mrb[154].mxu1 }
 0x6c4   :  { %v6096_v42 = vpack.c.bf16 %v5230_v13, %v5227_v30  ;;  %v5232_v54 = vpop.f32.mrb[155].mxu1 }
 0x6c6   :  { %5442 = vmatmul.mubr.bf16.gmra.mrb[112].mxu1 %v27182_v19  ;;  %23368 = vmatprep.mubr.bf16.mxu0 %v6096_v42  ;;  %v27192_v19 = vld [vmem:[%s34692_s2 + $0x668] ss:$16 sps:$4 sm:$0xff]  }
 0x6c7   :  { %5449 = vmatprep.mubr.bf16.mxu1 %v27189_v49  ;;  %v27199_v49 = vld [vmem:[%s34692_s2 + $0x68c] ss:$16 sps:$4 sm:$0xff]  }
 0x6c9   :  { %v5235_v41 = vpop.f32.mrb[156].mxu1 }
 0x6ca   :  { %v5237_v9 = vpop.f32.mrb[157].mxu1 }
 0x6cb   :  { %v5238_v60 = vpop.f32.mrb[158].mxu1 }
 0x6cc   :  { %v6097_v5 = vpack.c.bf16 %v5238_v60, %v5235_v41  ;;  %v5240_v55 = vpop.f32.mrb[159].mxu1 }
 0x6ce   :  { %5450 = vmatmul.mubr.bf16.gmra.mrb[116].mxu1 %v27187_v34  ;;  %23369 = vmatmul.mubr.bf16.gmra.mrb[12].mxu0 %v6097_v5  ;;  %v27197_v34 = vld [vmem:[%s34692_s2 + $0x688] ss:$16 sps:$4 sm:$0xff]  }
 0x6cf   :  { %5457 = vmatprep.mubr.bf16.mxu1 %v27194_v23  ;;  %v27202_v23 = vld [vmem:[%s34692_s2 + $0x6ac] ss:$16 sps:$4 sm:$0xff]  }
 0x6d1   :  { %v5243_v30 = vpop.f32.mrb[160].mxu1 }
 0x6d2   :  { %v5245_v3 = vpop.f32.mrb[161].mxu1 }
 0x6d3   :  { %v5246_v13 = vpop.f32.mrb[162].mxu1  ;;  %v27217_v3 = vld [vmem:[%s34698_s8 + $0x110] sm:$0xff]  }
 0x6d4   :  { %v6098_v42 = vpack.c.bf16 %v5246_v13, %v5243_v30  ;;  %v5248_v54 = vpop.f32.mrb[163].mxu1  ;;  %v27213_v30 = vld [vmem:[%s34698_s8 + $0x108] sm:$0xff]  }
 0x6d5   :  { %v27205_v54 = vld [vmem:[%s34692_s2 + $0x6cc] ss:$16 sps:$4 sm:$0xff]  }
 0x6d6   :  { %5458 = vmatmul.mubr.bf16.gmra.mrb[120].mxu1 %v27192_v19  ;;  %23388 = vmatprep.mubr.bf16.mxu0 %v6098_v42 }
 0x6d7   :  { %5465 = vmatprep.mubr.bf16.mxu1 %v27199_v49  ;;  %v27200_v49 = vld [vmem:[%s34692_s2 + $0x6a8] ss:$16 sps:$4 sm:$0xff]  }
 0x6d9   :  { %v5251_v41 = vpop.f32.mrb[164].mxu1 }
 0x6da   :  { %v5253_v9 = vpop.f32.mrb[165].mxu1 }
 0x6db   :  { %v5254_v60 = vpop.f32.mrb[166].mxu1 }
 0x6dc   :  { %v6099_v5 = vpack.c.bf16 %v5254_v60, %v5251_v41  ;;  %v5256_v55 = vpop.f32.mrb[167].mxu1 }
 0x6de   :  { %5466 = vmatmul.mubr.bf16.gmra.mrb[124].mxu1 %v27197_v34  ;;  %23389 = vmatmul.mubr.bf16.vlgmr.msra.gmra.mrb[0].mxu0 %v6099_v5  ;;  %v27222_v34 = vld [vmem:[%s34698_s8 + $0x120] sm:$0xff]   ;;  %v27203_v5 = vld [vmem:[%s34692_s2 + $0x6c8] ss:$16 sps:$4 sm:$0xff]  }
 0x6df   :  { %5473 = vmatprep.mubr.bf16.mxu1 %v27202_v23  ;;  %23405 = vmatpush3.bf16.msra.mxu0 %v27212_v63  ;;  %v27218_v63 = vld [vmem:[%s34698_s8 + $0x118] sm:$0xff]  }
 0x6e0   :  { %23406 = vmatprep.subr.bf16.mxu0 %v27213_v30 }
 0x6e1   :  { %v5259_v19 = vpop.f32.mrb[168].mxu1 }
 0x6e2   :  { %v5261_v13 = vpop.f32.mrb[169].mxu1 }
 0x6e3   :  { %v5262_v42 = vpop.f32.mrb[170].mxu1  ;;  %23407 = vmatpush3.bf16.msra.mxu0 %v27213_v30  ;;  %v27208_v30 = vld [vmem:[%s34692_s2 + $0x6ec] ss:$16 sps:$4 sm:$0xff]  }
 0x6e4   :  { %v6100_v41 = vpack.c.bf16 %v5262_v42, %v5259_v19  ;;  %v5264_v9 = vpop.f32.mrb[171].mxu1  ;;  %23408 = vmatprep.subr.bf16.mxu0 %v27217_v3 }
 0x6e6   :  { %5474 = vmatmul.mubr.bf16.gmra.mrb[128].mxu1 %v27200_v49  ;;  %23392 = vmatprep.mubr.bf16.mxu0 %v6100_v41  ;;  %v27227_v49 = vld [vmem:[%s34698_s8 + $0x130] sm:$0xff]   ;;  %v27206_v41 = vld [vmem:[%s34692_s2 + $0x6e8] ss:$16 sps:$4 sm:$0xff]  }
 0x6e7   :  { %5481 = vmatprep.mubr.bf16.mxu1 %v27205_v54  ;;  %23409 = vmatpush3.bf16.msra.mxu0 %v27217_v3  ;;  %v27223_v3 = vld [vmem:[%s34698_s8 + $0x128] sm:$0xff]  }
 0x6e8   :  { %23410 = vmatprep.subr.bf16.mxu0 %v27218_v63 }
 0x6e9   :  { %v5267_v60 = vpop.f32.mrb[172].mxu1 }
 0x6ea   :  { %v5269_v23 = vpop.f32.mrb[173].mxu1 }
 0x6eb   :  { %v5270_v55 = vpop.f32.mrb[174].mxu1  ;;  %23411 = vmatpush3.bf16.msra.mxu0 %v27218_v63  ;;  %v27211_v63 = vld [vmem:[%s34692_s2 + $0x70c] ss:$16 sps:$4 sm:$0xff]  }
 0x6ec   :  { %v6101_v19 = vpack.c.bf16 %v5270_v55, %v5267_v60  ;;  %v5272_v13 = vpop.f32.mrb[175].mxu1  ;;  %23412 = vmatprep.subr.bf16.mxu0 %v27222_v34 }
 0x6ee   :  { %5482 = vmatmul.mubr.bf16.gmra.mrb[132].mxu1 %v27203_v5  ;;  %23393 = vmatmul.mubr.bf16.gmra.mrb[4].mxu0 %v6101_v19  ;;  %v27244_v5 = vld [vmem:[%s34698_s8 + $0x140] sm:$0xff]   ;;  %v27209_v19 = vld [vmem:[%s34692_s2 + $0x708] ss:$16 sps:$4 sm:$0xff]  }
 0x6ef   :  { %5489 = vmatprep.mubr.bf16.mxu1 %v27208_v30  ;;  %23413 = vmatpush3.bf16.msra.mxu0 %v27222_v34  ;;  %v27228_v34 = vld [vmem:[%s34698_s8 + $0x138] sm:$0xff]  }
 0x6f0   :  { %23414 = vmatprep.subr.bf16.mxu0 %v27223_v3 }
 0x6f1   :  { %v5275_v42 = vpop.f32.mrb[176].mxu1 }
 0x6f2   :  { %v5277_v54 = vpop.f32.mrb[177].mxu1 }
 0x6f3   :  { %v5278_v9 = vpop.f32.mrb[178].mxu1  ;;  %23415 = vmatpush3.bf16.msra.mxu0 %v27223_v3  ;;  %v27216_v3 = vld [vmem:[%s34692_s2 + $0x72c] ss:$16 sps:$4 sm:$0xff]  }
 0x6f4   :  { %v6102_v60 = vpack.c.bf16 %v5278_v9, %v5275_v42  ;;  %v5280_v23 = vpop.f32.mrb[179].mxu1  ;;  %23416 = vmatprep.subr.bf16.mxu0 %v27227_v49  ;;  %v27214_v9 = vld [vmem:[%s34692_s2 + $0x728] ss:$16 sps:$4 sm:$0xff]  }
 0x6f6   :  { %5490 = vmatmul.mubr.bf16.gmra.mrb[136].mxu1 %v27206_v41  ;;  %23396 = vmatprep.mubr.bf16.mxu0 %v6102_v60  ;;  %v27221_v60 = vld [vmem:[%s34692_s2 + $0x74c] ss:$16 sps:$4 sm:$0xff]  }
 0x6f7   :  { %5497 = vmatprep.mubr.bf16.mxu1 %v27211_v63  ;;  %23417 = vmatpush3.bf16.msra.mxu0 %v27227_v49 }
 0x6f8   :  { %23418 = vmatprep.subr.bf16.mxu0 %v27228_v34 }
 0x6f9   :  { %v5283_v55 = vpop.f32.mrb[180].mxu1 }
 0x6fa   :  { %v5285_v30 = vpop.f32.mrb[181].mxu1 }
 0x6fb   :  { %v5286_v13 = vpop.f32.mrb[182].mxu1  ;;  %23419 = vmatpush3.bf16.msra.mxu0 %v27228_v34 }
 0x6fc   :  { %v6103_v42 = vpack.c.bf16 %v5286_v13, %v5283_v55  ;;  %v5288_v54 = vpop.f32.mrb[183].mxu1  ;;  %23436 = vmatprep.subr.bf16.mxu0 %v27244_v5 }
 0x6fe   :  { %5498 = vmatmul.mubr.bf16.gmra.mrb[140].mxu1 %v27209_v19  ;;  %23397 = vmatmul.mubr.bf16.gmra.mrb[8].mxu0 %v6103_v42  ;;  %v27219_v19 = vld [vmem:[%s34692_s2 + $0x748] ss:$16 sps:$4 sm:$0xff]  }
 0x6ff   :  { %5505 = vmatprep.mubr.bf16.mxu1 %v27216_v3  ;;  %v27226_v3 = vld [vmem:[%s34692_s2 + $0x76c] ss:$16 sps:$4 sm:$0xff]  }
 0x701   :  { %v5291_v49 = vpop.f32.mrb[184].mxu1 }
 0x702   :  { %v5293_v41 = vpop.f32.mrb[185].mxu1 }
 0x703   :  { %v5294_v63 = vpop.f32.mrb[186].mxu1 }
 0x704   :  { %v6104_v23 = vpack.c.bf16 %v5294_v63, %v5291_v49  ;;  %v5296_v30 = vpop.f32.mrb[187].mxu1 }
 0x706   :  { %5506 = vmatmul.mubr.bf16.gmra.mrb[144].mxu1 %v27214_v9  ;;  %23400 = vmatprep.mubr.bf16.mxu0 %v6104_v23  ;;  %v27224_v9 = vld [vmem:[%s34692_s2 + $0x768] ss:$16 sps:$4 sm:$0xff]  }
 0x707   :  { %5513 = vmatprep.mubr.bf16.mxu1 %v27221_v60  ;;  %v27231_v60 = vld [vmem:[%s34692_s2 + $0x78c] ss:$16 sps:$4 sm:$0xff]  }
 0x709   :  { %v5299_v34 = vpop.f32.mrb[188].mxu1 }
 0x70a   :  { %v5301_v55 = vpop.f32.mrb[189].mxu1 }
 0x70b   :  { %v5302_v13 = vpop.f32.mrb[190].mxu1 }
 0x70c   :  { %v6105_v42 = vpack.c.bf16 %v5302_v13, %v5299_v34  ;;  %v5304_v54 = vpop.f32.mrb[191].mxu1 }
 0x70e   :  { %5514 = vmatmul.mubr.bf16.gmra.mrb[148].mxu1 %v27219_v19  ;;  %23401 = vmatmul.mubr.bf16.gmra.mrb[12].mxu0 %v6105_v42  ;;  %v27229_v19 = vld [vmem:[%s34692_s2 + $0x788] ss:$16 sps:$4 sm:$0xff]  }
 0x70f   :  { %5521 = vmatprep.mubr.bf16.mxu1 %v27226_v3  ;;  %v27234_v3 = vld [vmem:[%s34692_s2 + $0x7ac] ss:$16 sps:$4 sm:$0xff]  }
 0x711   :  { %v5307_v49 = vpop.f32.mrb[192].mxu1 }
 0x712   :  { %v5309_v41 = vpop.f32.mrb[193].mxu1 }
 0x713   :  { %v5310_v63 = vpop.f32.mrb[194].mxu1  ;;  %v27249_v41 = vld [vmem:[%s34698_s8 + $0x150] sm:$0xff]  }
 0x714   :  { %v6106_v23 = vpack.c.bf16 %v5310_v63, %v5307_v49  ;;  %v5312_v30 = vpop.f32.mrb[195].mxu1  ;;  %v27245_v49 = vld [vmem:[%s34698_s8 + $0x148] sm:$0xff]  }
 0x715   :  { %v27237_v30 = vld [vmem:[%s34692_s2 + $0x7cc] ss:$16 sps:$4 sm:$0xff]  }
 0x716   :  { %5522 = vmatmul.mubr.bf16.gmra.mrb[152].mxu1 %v27224_v9  ;;  %23420 = vmatprep.mubr.bf16.mxu0 %v6106_v23 }
 0x717   :  { %5529 = vmatprep.mubr.bf16.mxu1 %v27231_v60  ;;  %v27232_v60 = vld [vmem:[%s34692_s2 + $0x7a8] ss:$16 sps:$4 sm:$0xff]  }
 0x719   :  { %v5315_v34 = vpop.f32.mrb[196].mxu1 }
 0x71a   :  { %v5317_v55 = vpop.f32.mrb[197].mxu1 }
 0x71b   :  { %v5318_v13 = vpop.f32.mrb[198].mxu1 }
 0x71c   :  { %v6107_v42 = vpack.c.bf16 %v5318_v13, %v5315_v34  ;;  %v5320_v54 = vpop.f32.mrb[199].mxu1 }
 0x71e   :  { %5530 = vmatmul.mubr.bf16.gmra.mrb[156].mxu1 %v27229_v19  ;;  %23421 = vmatmul.mubr.bf16.vlgmr.msra.gmra.mrb[0].mxu0 %v6107_v42  ;;  %v27254_v19 = vld [vmem:[%s34698_s8 + $0x160] sm:$0xff]   ;;  %v27235_v42 = vld [vmem:[%s34692_s2 + $0x7c8] ss:$16 sps:$4 sm:$0xff]  }
 0x71f   :  { %5537 = vmatprep.mubr.bf16.mxu1 %v27234_v3  ;;  %23437 = vmatpush3.bf16.msra.mxu0 %v27244_v5  ;;  %v27250_v5 = vld [vmem:[%s34698_s8 + $0x158] sm:$0xff]  }
 0x720   :  { %23438 = vmatprep.subr.bf16.mxu0 %v27245_v49 }
 0x721   :  { %v5323_v9 = vpop.f32.mrb[200].mxu1 }
 0x722   :  { %v5325_v63 = vpop.f32.mrb[201].mxu1 }
 0x723   :  { %v5326_v23 = vpop.f32.mrb[202].mxu1  ;;  %23439 = vmatpush3.bf16.msra.mxu0 %v27245_v49  ;;  %v27240_v49 = vld [vmem:[%s34692_s2 + $0x7ec] ss:$16 sps:$4 sm:$0xff]  }
 0x724   :  { %v6108_v34 = vpack.c.bf16 %v5326_v23, %v5323_v9  ;;  %v5328_v55 = vpop.f32.mrb[203].mxu1  ;;  %23440 = vmatprep.subr.bf16.mxu0 %v27249_v41 }
 0x726   :  { %5538 = vmatmul.mubr.bf16.gmra.mrb[160].mxu1 %v27232_v60  ;;  %23424 = vmatprep.mubr.bf16.mxu0 %v6108_v34  ;;  %v27259_v60 = vld [vmem:[%s34698_s8 + $0x170] sm:$0xff]   ;;  %v27238_v34 = vld [vmem:[%s34692_s2 + $0x7e8] ss:$16 sps:$4 sm:$0xff]  }
 0x727   :  { %5545 = vmatprep.mubr.bf16.mxu1 %v27237_v30  ;;  %23441 = vmatpush3.bf16.msra.mxu0 %v27249_v41  ;;  %v27255_v41 = vld [vmem:[%s34698_s8 + $0x168] sm:$0xff]  }
 0x728   :  { %23442 = vmatprep.subr.bf16.mxu0 %v27250_v5 }
 0x729   :  { %v5331_v13 = vpop.f32.mrb[204].mxu1 }
 0x72a   :  { %v5333_v3 = vpop.f32.mrb[205].mxu1 }
 0x72b   :  { %v5334_v54 = vpop.f32.mrb[206].mxu1  ;;  %23443 = vmatpush3.bf16.msra.mxu0 %v27250_v5  ;;  %v27243_v5 = vld [vmem:[%s34692_s2 + $0x80c] ss:$16 sps:$4 sm:$0xff]  }
 0x72c   :  { %v6109_v9 = vpack.c.bf16 %v5334_v54, %v5331_v13  ;;  %v5336_v63 = vpop.f32.mrb[207].mxu1  ;;  %23444 = vmatprep.subr.bf16.mxu0 %v27254_v19 }
 0x72d   :  { %v27241_v63 = vld [vmem:[%s34692_s2 + $0x808] ss:$16 sps:$4 sm:$0xff]  }
 0x72e   :  { %5546 = vmatmul.mubr.bf16.gmra.mrb[164].mxu1 %v27235_v42  ;;  %23425 = vmatmul.mubr.bf16.gmra.mrb[4].mxu0 %v6109_v9  ;;  %v30118_v42 = vld [vmem:[%s34698_s8 + $0x180] sm:$0xff]  }
 0x72f   :  { %5553 = vmatprep.mubr.bf16.mxu1 %v27240_v49  ;;  %23445 = vmatpush3.bf16.msra.mxu0 %v27254_v19  ;;  %v27260_v19 = vld [vmem:[%s34698_s8 + $0x178] sm:$0xff]  }
 0x730   :  { %23446 = vmatprep.subr.bf16.mxu0 %v27255_v41 }
 0x731   :  { %v5339_v23 = vpop.f32.mrb[208].mxu1 }
 0x732   :  { %v5341_v30 = vpop.f32.mrb[209].mxu1 }
 0x733   :  { %v5342_v55 = vpop.f32.mrb[210].mxu1  ;;  %23447 = vmatpush3.bf16.msra.mxu0 %v27255_v41 }
 0x734   :  { %v6110_v13 = vpack.c.bf16 %v5342_v55, %v5339_v23  ;;  %v5344_v3 = vpop.f32.mrb[211].mxu1  ;;  %23448 = vmatprep.subr.bf16.mxu0 %v27259_v60  ;;  %v27248_v23 = vld [vmem:[%s34692_s2 + $0x82c] ss:$16 sps:$4 sm:$0xff]  }
 0x736   :  { %5554 = vmatmul.mubr.bf16.gmra.mrb[168].mxu1 %v27238_v34  ;;  %23428 = vmatprep.mubr.bf16.mxu0 %v6110_v13  ;;  %v27246_v13 = vld [vmem:[%s34692_s2 + $0x828] ss:$16 sps:$4 sm:$0xff]  }
 0x737   :  { %5561 = vmatprep.mubr.bf16.mxu1 %v27243_v5  ;;  %23449 = vmatpush3.bf16.msra.mxu0 %v27259_v60 }
 0x738   :  { %23450 = vmatprep.subr.bf16.mxu0 %v27260_v19 }
 0x739   :  { %v5347_v54 = vpop.f32.mrb[64].mxu1 }
 0x73a   :  { %v5348_v49 = vadd.f32 %v5347_v54, %v28946_v14  ;;  %v5349_v9 = vpop.f32.mrb[65].mxu1 }
 0x73b   :  { %v5350_v41 = vpop.f32.mrb[66].mxu1  ;;  %23451 = vmatpush3.bf16.msra.mxu0 %v27260_v19 }
 0x73c   :  { %v5351_v60 = vadd.f32 %v5350_v41, %v28948_v16  ;;  %v5352_v30 = vpop.f32.mrb[67].mxu1  ;;  %23468 = vmatprep.subr.bf16.mxu0 %v30118_v42  ;;  %v27253_v16 = vld [vmem:[%s34692_s2 + $0x84c] ss:$16 sps:$4 sm:$0xff]   ;;  %v27251_v41 = vld [vmem:[%s34692_s2 + $0x848] ss:$16 sps:$4 sm:$0xff]  }
 0x73e   :  { %5562 = vmatmul.mubr.bf16.gmra.mrb[172].mxu1 %v27241_v63  ;;  %v6111_v34 = vpack.c.bf16 %v5351_v60, %v5348_v49  ;;  %v27258_v60 = vld [vmem:[%s34692_s2 + $0x86c] ss:$16 sps:$4 sm:$0xff]  }
 0x73f   :  { %5569 = vmatprep.mubr.bf16.mxu1 %v27248_v23 }
 0x740   :  { %23429 = vmatmul.mubr.bf16.gmra.mrb[8].mxu0 %v6111_v34 }
 0x741   :  { %v5355_v14 = vpop.f32.mrb[68].mxu1 }
 0x742   :  { %v5356_v55 = vadd.f32 %v5355_v14, %v28956_v20  ;;  %v5357_v5 = vpop.f32.mrb[69].mxu1 }
 0x743   :  { %v5358_v3 = vpop.f32.mrb[70].mxu1  ;;  %v27256_v5 = vld [vmem:[%s34692_s2 + $0x868] ss:$16 sps:$4 sm:$0xff]  }
 0x744   :  { %v5359_v19 = vadd.f32 %v5358_v3, %v28958_v22  ;;  %v5360_v54 = vpop.f32.mrb[71].mxu1  ;;  %v27263_v3 = vld [vmem:[%s34692_s2 + $0x88c] ss:$16 sps:$4 sm:$0xff]  }
 0x746   :  { %5570 = vmatmul.mubr.bf16.gmra.mrb[176].mxu1 %v27246_v13  ;;  %v6112_v49 = vpack.c.bf16 %v5359_v19, %v5356_v55 }
 0x747   :  { %5577 = vmatprep.mubr.bf16.mxu1 %v27253_v16 }
 0x748   :  { %23432 = vmatprep.mubr.bf16.mxu0 %v6112_v49 }
 0x749   :  { %v5363_v9 = vpop.f32.mrb[72].mxu1 }
 0x74a   :  { %v5364_v20 = vadd.f32 %v5363_v9, %v28966_v26  ;;  %v5365_v63 = vpop.f32.mrb[73].mxu1  ;;  %v27261_v9 = vld [vmem:[%s34692_s2 + $0x888] ss:$16 sps:$4 sm:$0xff]  }
 0x74b   :  { %v5366_v23 = vpop.f32.mrb[74].mxu1  ;;  %v27266_v63 = vld [vmem:[%s34692_s2 + $0x8ac] ss:$16 sps:$4 sm:$0xff]  }
 0x74c   :  { %v5367_v22 = vadd.f32 %v5366_v23, %v28968_v29  ;;  %v5368_v30 = vpop.f32.mrb[75].mxu1 }
 0x74e   :  { %5578 = vmatmul.mubr.bf16.gmra.mrb[180].mxu1 %v27251_v41  ;;  %v6113_v34 = vpack.c.bf16 %v5367_v22, %v5364_v20 }
 0x74f   :  { %5585 = vmatprep.mubr.bf16.mxu1 %v27258_v60  ;;  %v27277_v60 = vld [vmem:[%s34698_s8 + $0x188] sm:$0xff]  }
 0x750   :  { %23433 = vmatmul.mubr.bf16.gmra.mrb[12].mxu0 %v6113_v34  ;;  %v27264_v34 = vld [vmem:[%s34692_s2 + $0x8a8] ss:$16 sps:$4 sm:$0xff]  }
 0x751   :  { %v5371_v14 = vpop.f32.mrb[76].mxu1 }
 0x752   :  { %v5372_v26 = vadd.f32 %v5371_v14, %v28976_v33  ;;  %v5373_v55 = vpop.f32.mrb[77].mxu1 }
 0x753   :  { %v5374_v13 = vpop.f32.mrb[78].mxu1 }
 0x754   :  { %v5375_v29 = vadd.f32 %v5374_v13, %v28978_v35  ;;  %v5376_v16 = vpop.f32.mrb[79].mxu1 }
 0x755   :  { %v27286_v16 = vld [vmem:[%s34698_s8 + $0x1a0] sm:$0xff]  }
 0x756   :  { %5586 = vmatmul.mubr.bf16.gmra.mrb[184].mxu1 %v27256_v5  ;;  %v6114_v19 = vpack.c.bf16 %v5375_v29, %v5372_v26  ;;  %v27269_v26 = vld [vmem:[%s34692_s2 + $0x8cc] ss:$16 sps:$4 sm:$0xff]  }
 0x757   :  { %5593 = vmatprep.mubr.bf16.mxu1 %v27263_v3  ;;  %v27282_v5 = vld [vmem:[%s34698_s8 + $0x198] sm:$0xff]  }
 0x758   :  { %23452 = vmatprep.mubr.bf16.mxu0 %v6114_v19 }
 0x759   :  { %v5379_v54 = vpop.f32.mrb[80].mxu1 }
 0x75a   :  { %v5380_v33 = vadd.f32 %v5379_v54, %v28986_v28  ;;  %v5381_v49 = vpop.f32.mrb[81].mxu1  ;;  %v27272_v54 = vld [vmem:[%s34692_s2 + $0x8ec] ss:$16 sps:$4 sm:$0xff]  }
 0x75b   :  { %v5382_v20 = vpop.f32.mrb[82].mxu1 }
 0x75c   :  { %v5383_v35 = vadd.f32 %v5382_v20, %v28988_v40  ;;  %v5384_v41 = vpop.f32.mrb[83].mxu1  ;;  %v27281_v40 = vld [vmem:[%s34698_s8 + $0x190] sm:$0xff]  }
 0x75d   :  { %v27291_v41 = vld [vmem:[%s34698_s8 + $0x1b0] sm:$0xff]  }
 0x75e   :  { %v6115_v23 = vpack.c.bf16 %v5383_v35, %v5380_v33  ;;  %5594 = vmatmul.mubr.bf16.gmra.mrb[188].mxu1 %v27261_v9  ;;  %v27287_v9 = vld [vmem:[%s34698_s8 + $0x1a8] sm:$0xff]  }
 0x75f   :  { %5601 = vmatprep.mubr.bf16.mxu1 %v27266_v63 }
 0x760   :  { %23453 = vmatmul.mubr.bf16.vlgmr.msra.gmra.mrb[0].mxu0 %v6115_v23 }
 0x761   :  { %v5387_v28 = vpop.f32.mrb[84].mxu1  ;;  %23469 = vmatpush3.bf16.msra.mxu0 %v30118_v42 }
 0x762   :  { %v5388_v22 = vadd.f32 %v5387_v28, %v28996_v44  ;;  %v5389_v30 = vpop.f32.mrb[85].mxu1  ;;  %23470 = vmatprep.subr.bf16.mxu0 %v27277_v60 }
 0x763   :  { %v5390_v14 = vpop.f32.mrb[86].mxu1  ;;  %v27292_v30 = vld [vmem:[%s34698_s8 + $0x1b8] sm:$0xff]  }
 0x764   :  { %v5391_v55 = vadd.f32 %v5390_v14, %v28998_v46  ;;  %v5392_v42 = vpop.f32.mrb[87].mxu1  ;;  %v27267_v46 = vld [vmem:[%s34692_s2 + $0x8c8] ss:$16 sps:$4 sm:$0xff]  }
 0x765   :  { %23471 = vmatpush3.bf16.msra.mxu0 %v27277_v60  ;;  %v27275_v60 = vld [vmem:[%s34692_s2 + $0x90c] ss:$16 sps:$4 sm:$0xff]  }
 0x766   :  { %5602 = vmatmul.mubr.bf16.gmra.mrb[192].mxu1 %v27264_v34  ;;  %v6116_v44 = vpack.c.bf16 %v5391_v55, %v5388_v22  ;;  %23472 = vmatprep.subr.bf16.mxu0 %v27281_v40  ;;  %v27280_v42 = vld [vmem:[%s34692_s2 + $0x92c] ss:$16 sps:$4 sm:$0xff]  }
 0x767   :  { %5609 = vmatprep.mubr.bf16.mxu1 %v27269_v26  ;;  %v27308_v26 = vld [vmem:[%s34698_s8 + $0x1c0] sm:$0xff]  }
 0x768   :  { %23456 = vmatprep.mubr.bf16.mxu0 %v6116_v44 }
 0x769   :  { %v5395_v13 = vpop.f32.mrb[88].mxu1  ;;  %23473 = vmatpush3.bf16.msra.mxu0 %v27281_v40 }
 0x76a   :  { %v5396_v3 = vadd.f32 %v5395_v13, %v29006_v50  ;;  %v5397_v29 = vpop.f32.mrb[89].mxu1  ;;  %23474 = vmatprep.subr.bf16.mxu0 %v27282_v5 }
 0x76b   :  { %v5398_v19 = vpop.f32.mrb[90].mxu1 }
 0x76c   :  { %v5399_v33 = vadd.f32 %v5398_v19, %v29008_v52  ;;  %v5400_v49 = vpop.f32.mrb[91].mxu1  ;;  %v27270_v52 = vld [vmem:[%s34692_s2 + $0x8e8] ss:$16 sps:$4 sm:$0xff]  }
 0x76d   :  { %23475 = vmatpush3.bf16.msra.mxu0 %v27282_v5 }
 0x76e   :  { %5610 = vmatmul.mubr.bf16.gmra.mrb[196].mxu1 %v27267_v46  ;;  %v6117_v50 = vpack.c.bf16 %v5399_v33, %v5396_v3  ;;  %23476 = vmatprep.subr.bf16.mxu0 %v27286_v16  ;;  %v27278_v46 = vld [vmem:[%s34692_s2 + $0x928] ss:$16 sps:$4 sm:$0xff]  }
 0x76f   :  { %5617 = vmatprep.mubr.bf16.mxu1 %v27272_v54 }
 0x770   :  { %23457 = vmatmul.mubr.bf16.gmra.mrb[4].mxu0 %v6117_v50 }
 0x771   :  { %v5403_v20 = vpop.f32.mrb[92].mxu1  ;;  %23477 = vmatpush3.bf16.msra.mxu0 %v27286_v16 }
 0x772   :  { %v5404_v63 = vadd.f32 %v5403_v20, %v29016_v56  ;;  %v5405_v35 = vpop.f32.mrb[93].mxu1  ;;  %23478 = vmatprep.subr.bf16.mxu0 %v27287_v9 }
 0x773   :  { %v5406_v23 = vpop.f32.mrb[94].mxu1 }
 0x774   :  { %v5407_v28 = vadd.f32 %v5406_v23, %v29018_v58  ;;  %v5408_v22 = vpop.f32.mrb[95].mxu1  ;;  %v27273_v58 = vld [vmem:[%s34692_s2 + $0x908] ss:$16 sps:$4 sm:$0xff]  }
 0x775   :  { %23479 = vmatpush3.bf16.msra.mxu0 %v27287_v9  ;;  %v27283_v9 = vld [vmem:[%s34692_s2 + $0x948] ss:$16 sps:$4 sm:$0xff]   ;;  %v27295_v22 = vld [vmem:[%s34692_s2 + $0x98c] ss:$16 sps:$4 sm:$0xff]  }
 0x776   :  { %5618 = vmatmul.mubr.bf16.gmra.mrb[200].mxu1 %v27270_v52  ;;  %v6118_v56 = vpack.c.bf16 %v5407_v28, %v5404_v63  ;;  %23480 = vmatprep.subr.bf16.mxu0 %v27291_v41  ;;  %v27290_v63 = vld [vmem:[%s34692_s2 + $0x96c] ss:$16 sps:$4 sm:$0xff]  }
 0x777   :  { %5625 = vmatprep.mubr.bf16.mxu1 %v27275_v60  ;;  %v27288_v60 = vld [vmem:[%s34692_s2 + $0x968] ss:$16 sps:$4 sm:$0xff]  }
 0x778   :  { %23460 = vmatprep.mubr.bf16.mxu0 %v6118_v56 }
 0x779   :  { %v5411_v34 = vpop.f32.mrb[96].mxu1  ;;  %23481 = vmatpush3.bf16.msra.mxu0 %v27291_v41 }
 0x77a   :  { %v5412_v40 = vadd.f32 %v5411_v34, %v29026_v62  ;;  %v5413_v14 = vpop.f32.mrb[97].mxu1  ;;  %23482 = vmatprep.subr.bf16.mxu0 %v27292_v30 }
 0x77b   :  { %v5414_v55 = vpop.f32.mrb[98].mxu1  ;;  %v27293_v14 = vld [vmem:[%s34692_s2 + $0x988] ss:$16 sps:$4 sm:$0xff]  }
 0x77c   :  { %v5415_v44 = vadd.f32 %v5414_v55, %v29028_v0  ;;  %v5416_v5 = vpop.f32.mrb[99].mxu1  ;;  %v27285_v0 = vld [vmem:[%s34692_s2 + $0x94c] ss:$16 sps:$4 sm:$0xff]  }
 0x77d   :  { %23483 = vmatpush3.bf16.msra.mxu0 %v27292_v30  ;;  %v27298_v55 = vld [vmem:[%s34692_s2 + $0x9ac] ss:$16 sps:$4 sm:$0xff]  }
 0x77e   :  { %5626 = vmatmul.mubr.bf16.gmra.mrb[204].mxu1 %v27273_v58  ;;  %v6119_v62 = vpack.c.bf16 %v5415_v44, %v5412_v40  ;;  %23500 = vmatprep.subr.bf16.mxu0 %v27308_v26  ;;  %v27309_v5 = vld [vmem:[%s34698_s8 + $0x1c8] sm:$0xff]  }
 0x77f   :  { %5633 = vmatprep.mubr.bf16.mxu1 %v27280_v42 }
 0x780   :  { %23461 = vmatmul.mubr.bf16.gmra.mrb[8].mxu0 %v6119_v62 }
 0x781   :  { %v5419_v13 = vpop.f32.mrb[100].mxu1 }
 0x782   :  { %v5420_v3 = vadd.f32 %v5419_v13, %v29036_v4  ;;  %v5421_v29 = vpop.f32.mrb[101].mxu1 }
 0x783   :  { %v5422_v16 = vpop.f32.mrb[102].mxu1 }
 0x784   :  { %v5423_v19 = vadd.f32 %v5422_v16, %v29038_v6  ;;  %v5424_v54 = vpop.f32.mrb[103].mxu1 }
 0x786   :  { %5634 = vmatmul.mubr.bf16.gmra.mrb[208].mxu1 %v27278_v46  ;;  %v6120_v33 = vpack.c.bf16 %v5423_v19, %v5420_v3  ;;  %v27296_v3 = vld [vmem:[%s34692_s2 + $0x9a8] ss:$16 sps:$4 sm:$0xff]   ;;  %v27301_v46 = vld [vmem:[%s34692_s2 + $0x9cc] ss:$16 sps:$4 sm:$0xff]  }
 0x787   :  { %5641 = vmatprep.mubr.bf16.mxu1 %v27285_v0  ;;  %v27314_v0 = vld [vmem:[%s34698_s8 + $0x1d8] sm:$0xff]  }
 0x788   :  { %23464 = vmatprep.mubr.bf16.mxu0 %v6120_v33 }
 0x789   :  { %v5427_v49 = vpop.f32.mrb[104].mxu1 }
 0x78a   :  { %v5428_v4 = vadd.f32 %v5427_v49, %v29046_v10  ;;  %v5429_v50 = vpop.f32.mrb[105].mxu1  ;;  %v27318_v49 = vld [vmem:[%s34698_s8 + $0x1e0] sm:$0xff]  }
 0x78b   :  { %v5430_v20 = vpop.f32.mrb[106].mxu1  ;;  %v27304_v50 = vld [vmem:[%s34692_s2 + $0x9ec] ss:$16 sps:$4 sm:$0xff]  }
 0x78c   :  { %v5431_v6 = vadd.f32 %v5430_v20, %v29048_v12  ;;  %v5432_v35 = vpop.f32.mrb[107].mxu1 }
 0x78e   :  { %5642 = vmatmul.mubr.bf16.gmra.mrb[64].mxu1 %v27283_v9  ;;  %v6121_v52 = vpack.c.bf16 %v5431_v6, %v5428_v4 }
 0x78f   :  { %5649 = vmatprep.mubr.bf16.mxu1 %v27290_v63  ;;  %v27319_v63 = vld [vmem:[%s34698_s8 + $0x1e8] sm:$0xff]  }
 0x790   :  { %23465 = vmatmul.mubr.bf16.gmra.mrb[12].mxu0 %v6121_v52 }
 0x791   :  { %v5435_v41 = vpop.f32.mrb[108].mxu1 }
 0x792   :  { %v5436_v10 = vadd.f32 %v5435_v41, %v29053_v17  ;;  %v5437_v23 = vpop.f32.mrb[109].mxu1  ;;  %v27323_v41 = vld [vmem:[%s34698_s8 + $0x1f0] sm:$0xff]  }
 0x793   :  { %v5438_v28 = vpop.f32.mrb[110].mxu1  ;;  %v27307_v23 = vld [vmem:[%s34692_s2 + $0xa0c] ss:$16 sps:$4 sm:$0xff]  }
 0x794   :  { %v5439_v12 = vadd.f32 %v5438_v28, %v29058_v21  ;;  %v5440_v56 = vpop.f32.mrb[111].mxu1 }
 0x796   :  { %5650 = vmatmul.mubr.bf16.gmra.mrb[68].mxu1 %v27288_v60  ;;  %v6122_v30 = vpack.c.bf16 %v5439_v12, %v5436_v10 }
 0x797   :  { %5657 = vmatprep.mubr.bf16.mxu1 %v27295_v22  ;;  %v27324_v22 = vld [vmem:[%s34698_s8 + $0x1f8] sm:$0xff]  }
 0x798   :  { %23484 = vmatprep.mubr.bf16.mxu0 %v6122_v30 }
 0x799   :  { %v5443_v34 = vpop.f32.mrb[112].mxu1 }
 0x79a   :  { %v5444_v17 = vadd.f32 %v5443_v34, %v29063_v25  ;;  %v5445_v40 = vpop.f32.mrb[113].mxu1  ;;  %v27340_v34 = vld [vmem:[%s34698_s8 + $0x200] sm:$0xff]  }
 0x79b   :  { %v5446_v58 = vpop.f32.mrb[114].mxu1  ;;  %v27312_v40 = vld [vmem:[%s34692_s2 + $0xa2c] ss:$16 sps:$4 sm:$0xff]  }
 0x79c   :  { %v5447_v21 = vadd.f32 %v5446_v58, %v29068_v31  ;;  %v5448_v42 = vpop.f32.mrb[115].mxu1  ;;  %v27313_v31 = vld [vmem:[%s34698_s8 + $0x1d0] sm:$0xff]  }
 0x79e   :  { %v6123_v44 = vpack.c.bf16 %v5447_v21, %v5444_v17  ;;  %5658 = vmatmul.mubr.bf16.gmra.mrb[72].mxu1 %v27293_v14 }
 0x79f   :  { %5665 = vmatprep.mubr.bf16.mxu1 %v27298_v55 }
 0x7a0   :  { %23485 = vmatmul.mubr.bf16.vlgmr.msra.gmra.mrb[0].mxu0 %v6123_v44  ;;  %v27310_v44 = vld [vmem:[%s34692_s2 + $0xa28] ss:$16 sps:$4 sm:$0xff]  }
 0x7a1   :  { %v5451_v25 = vpop.f32.mrb[116].mxu1  ;;  %23501 = vmatpush3.bf16.msra.mxu0 %v27308_v26 }
 0x7a2   :  { %v5452_v62 = vadd.f32 %v5451_v25, %v29073_v36  ;;  %v5453_v13 = vpop.f32.mrb[117].mxu1  ;;  %23502 = vmatprep.subr.bf16.mxu0 %v27309_v5 }
 0x7a3   :  { %v5454_v29 = vpop.f32.mrb[118].mxu1 }
 0x7a4   :  { %v5455_v16 = vadd.f32 %v5454_v29, %v29078_v39  ;;  %v5456_v26 = vpop.f32.mrb[119].mxu1  ;;  %v27299_v39 = vld [vmem:[%s34692_s2 + $0x9c8] ss:$16 sps:$4 sm:$0xff]  }
 0x7a5   :  { %23503 = vmatpush3.bf16.msra.mxu0 %v27309_v5  ;;  %v27315_v29 = vld [vmem:[%s34692_s2 + $0xa48] ss:$16 sps:$4 sm:$0xff]  }
 0x7a6   :  { %5666 = vmatmul.mubr.bf16.gmra.mrb[76].mxu1 %v27296_v3  ;;  %v6124_v36 = vpack.c.bf16 %v5455_v16, %v5452_v62  ;;  %23504 = vmatprep.subr.bf16.mxu0 %v27313_v31  ;;  %v27322_v16 = vld [vmem:[%s34692_s2 + $0xa6c] ss:$16 sps:$4 sm:$0xff]  }
 0x7a7   :  { %5673 = vmatprep.mubr.bf16.mxu1 %v27301_v46 }
 0x7a8   :  { %23488 = vmatprep.mubr.bf16.mxu0 %v6124_v36 }
 0x7a9   :  { %v5459_v19 = vpop.f32.mrb[120].mxu1  ;;  %23505 = vmatpush3.bf16.msra.mxu0 %v27313_v31 }
 0x7aa   :  { %v5460_v54 = vadd.f32 %v5459_v19, %v29083_v43  ;;  %v5461_v33 = vpop.f32.mrb[121].mxu1  ;;  %23506 = vmatprep.subr.bf16.mxu0 %v27314_v0 }
 0x7ab   :  { %v5462_v4 = vpop.f32.mrb[122].mxu1 }
 0x7ac   :  { %v5463_v9 = vadd.f32 %v5462_v4, %v29088_v48  ;;  %v5464_v20 = vpop.f32.mrb[123].mxu1  ;;  %v27302_v48 = vld [vmem:[%s34692_s2 + $0x9e8] ss:$16 sps:$4 sm:$0xff]  }
 0x7ad   :  { %23507 = vmatpush3.bf16.msra.mxu0 %v27314_v0  ;;  %v27325_v20 = vld [vmem:[%s34692_s2 + $0xa88] ss:$16 sps:$4 sm:$0xff]  }
 0x7ae   :  { %5674 = vmatmul.mubr.bf16.gmra.mrb[80].mxu1 %v27299_v39  ;;  %v6125_v43 = vpack.c.bf16 %v5463_v9, %v5460_v54  ;;  %23508 = vmatprep.subr.bf16.mxu0 %v27318_v49  ;;  %v27320_v54 = vld [vmem:[%s34692_s2 + $0xa68] ss:$16 sps:$4 sm:$0xff]   ;;  %v27327_v39 = vld [vmem:[%s34692_s2 + $0xa8c] ss:$16 sps:$4 sm:$0xff]  }
 0x7af   :  { %5681 = vmatprep.mubr.bf16.mxu1 %v27304_v50 }
 0x7b0   :  { %23489 = vmatmul.mubr.bf16.gmra.mrb[4].mxu0 %v6125_v43 }
 0x7b1   :  { %v5467_v6 = vpop.f32.mrb[124].mxu1  ;;  %23509 = vmatpush3.bf16.msra.mxu0 %v27318_v49 }
 0x7b2   :  { %v5468_v35 = vadd.f32 %v5467_v6, %v29093_v53  ;;  %v5469_v52 = vpop.f32.mrb[125].mxu1  ;;  %23510 = vmatprep.subr.bf16.mxu0 %v27319_v63 }
 0x7b3   :  { %v5470_v10 = vpop.f32.mrb[126].mxu1  ;;  %v27341_v52 = vld [vmem:[%s34698_s8 + $0x208] sm:$0xff]  }
 0x7b4   :  { %v5471_v60 = vadd.f32 %v5470_v10, %v29098_v57  ;;  %v5472_v28 = vpop.f32.mrb[127].mxu1  ;;  %v27305_v57 = vld [vmem:[%s34692_s2 + $0xa08] ss:$16 sps:$4 sm:$0xff]  }
 0x7b5   :  { %23511 = vmatpush3.bf16.msra.mxu0 %v27319_v63  ;;  %v27330_v63 = vld [vmem:[%s34692_s2 + $0xaac] ss:$16 sps:$4 sm:$0xff]   ;;  %v27328_v10 = vld [vmem:[%s34692_s2 + $0xaa8] ss:$16 sps:$4 sm:$0xff]  }
 0x7b6   :  { %5682 = vmatmul.mubr.bf16.gmra.mrb[84].mxu1 %v27302_v48  ;;  %v6126_v53 = vpack.c.bf16 %v5471_v60, %v5468_v35  ;;  %23512 = vmatprep.subr.bf16.mxu0 %v27323_v41  ;;  %v27333_v60 = vld [vmem:[%s34692_s2 + $0xacc] ss:$16 sps:$4 sm:$0xff]  }
 0x7b7   :  { %5689 = vmatprep.mubr.bf16.mxu1 %v27307_v23 }
 0x7b8   :  { %23492 = vmatprep.mubr.bf16.mxu0 %v6126_v53 }
 0x7b9   :  { %v5475_v12 = vpop.f32.mrb[128].mxu1  ;;  %23513 = vmatpush3.bf16.msra.mxu0 %v27323_v41 }
 0x7ba   :  { %v5476_v56 = vadd.f32 %v5475_v12, %v29103_v61  ;;  %v5477_v30 = vpop.f32.mrb[129].mxu1  ;;  %23514 = vmatprep.subr.bf16.mxu0 %v27324_v22 }
 0x7bb   :  { %v5478_v17 = vpop.f32.mrb[130].mxu1 }
 0x7bc   :  { %v5479_v14 = vadd.f32 %v5478_v17, %v29108_v2  ;;  %v5480_v58 = vpop.f32.mrb[131].mxu1  ;;  %v27317_v2 = vld [vmem:[%s34692_s2 + $0xa4c] ss:$16 sps:$4 sm:$0xff]  }
 0x7bd   :  { %23515 = vmatpush3.bf16.msra.mxu0 %v27324_v22  ;;  %v27346_v22 = vld [vmem:[%s34698_s8 + $0x218] sm:$0xff]   ;;  %v27351_v58 = vld [vmem:[%s34698_s8 + $0x228] sm:$0xff]  }
 0x7be   :  { %5690 = vmatmul.mubr.bf16.gmra.mrb[88].mxu1 %v27305_v57  ;;  %v6127_v61 = vpack.c.bf16 %v5479_v14, %v5476_v56  ;;  %23532 = vmatprep.subr.bf16.mxu0 %v27340_v34  ;;  %v27350_v57 = vld [vmem:[%s34698_s8 + $0x220] sm:$0xff]   ;;  %v27336_v17 = vld [vmem:[%s34692_s2 + $0xaec] ss:$16 sps:$4 sm:$0xff]  }
 0x7bf   :  { %5697 = vmatprep.mubr.bf16.mxu1 %v27312_v40 }
 0x7c0   :  { %23493 = vmatmul.mubr.bf16.gmra.mrb[8].mxu0 %v6127_v61 }
 0x7c1   :  { %v5483_v55 = vpop.f32.mrb[132].mxu1 }
 0x7c2   :  { %v5484_v21 = vadd.f32 %v5483_v55, %v29113_v7  ;;  %v5485_v42 = vpop.f32.mrb[133].mxu1 }
 0x7c3   :  { %v5486_v5 = vpop.f32.mrb[134].mxu1  ;;  %v27355_v42 = vld [vmem:[%s34698_s8 + $0x230] sm:$0xff]  }
 0x7c4   :  { %v5487_v25 = vadd.f32 %v5486_v5, %v29118_v11  ;;  %v5488_v62 = vpop.f32.mrb[135].mxu1  ;;  %v27339_v5 = vld [vmem:[%s34692_s2 + $0xb0c] ss:$16 sps:$4 sm:$0xff]  }
 0x7c5   :  { %v27356_v62 = vld [vmem:[%s34698_s8 + $0x238] sm:$0xff]  }
 0x7c6   :  { %5698 = vmatmul.mubr.bf16.gmra.mrb[92].mxu1 %v27310_v44  ;;  %v6128_v13 = vpack.c.bf16 %v5487_v25, %v5484_v21 }
 0x7c7   :  { %5705 = vmatprep.mubr.bf16.mxu1 %v27317_v2 }
 0x7c8   :  { %23496 = vmatprep.mubr.bf16.mxu0 %v6128_v13 }
 0x7c9   :  { %v5491_v3 = vpop.f32.mrb[136].mxu1 }
 0x7ca   :  { %v5492_v7 = vadd.f32 %v5491_v3, %v29123_v18  ;;  %v5493_v31 = vpop.f32.mrb[137].mxu1 }
 0x7cb   :  { %v5494_v46 = vpop.f32.mrb[138].mxu1  ;;  %v27372_v31 = vld [vmem:[%s34698_s8 + $0x240] sm:$0xff]  }
 0x7cc   :  { %v5495_v11 = vadd.f32 %v5494_v46, %v29128_v24  ;;  %v5496_v26 = vpop.f32.mrb[139].mxu1  ;;  %v27344_v46 = vld [vmem:[%s34692_s2 + $0xb2c] ss:$16 sps:$4 sm:$0xff]  }
 0x7ce   :  { %5706 = vmatmul.mubr.bf16.gmra.mrb[96].mxu1 %v27315_v29  ;;  %v6129_v36 = vpack.c.bf16 %v5495_v11, %v5492_v7 }
 0x7cf   :  { %5713 = vmatprep.mubr.bf16.mxu1 %v27322_v16  ;;  %v34789_v16 = vld [vmem:[#allocation5_spill] sm:$0xff] }
 0x7d0   :  { %23497 = vmatmul.mubr.bf16.gmra.mrb[12].mxu0 %v6129_v36 }
 0x7d1   :  { %v5499_v0 = vpop.f32.mrb[140].mxu1 }
 0x7d2   :  { %v5500_v18 = vadd.f32 %v5499_v0, %v29133_v32  ;;  %v5501_v19 = vpop.f32.mrb[141].mxu1  ;;  %v34790_v0 = vld [vmem:[#allocation6_spill] sm:$0xff] }
 0x7d3   :  { %v5502_v33 = vpop.f32.mrb[142].mxu1 }
 0x7d4   :  { %v5503_v24 = vadd.f32 %v5502_v33, %v29138_v38  ;;  %v5504_v49 = vpop.f32.mrb[143].mxu1 }
 0x7d6   :  { %5714 = vmatmul.mubr.bf16.gmra.mrb[100].mxu1 %v27320_v54  ;;  %v6130_v4 = vpack.c.bf16 %v5503_v24, %v5500_v18  ;;  %v27342_v54 = vld [vmem:[%s34692_s2 + $0xb28] ss:$16 sps:$4 sm:$0xff]   ;;  %v34791_v24 = vld [vmem:[#allocation7_spill] sm:$0xff] }
 0x7d7   :  { %5721 = vmatprep.mubr.bf16.mxu1 %v27327_v39  ;;  %v27349_v39 = vld [vmem:[%s34692_s2 + $0xb4c] ss:$16 sps:$4 sm:$0xff]  }
 0x7d8   :  { %23516 = vmatprep.mubr.bf16.mxu0 %v6130_v4 }
 0x7d9   :  { %v5507_v50 = vpop.f32.mrb[144].mxu1 }
 0x7da   :  { %v5508_v32 = vadd.f32 %v5507_v50, %v29143_v45  ;;  %v5509_v9 = vpop.f32.mrb[145].mxu1 }
 0x7db   :  { %v5510_v43 = vpop.f32.mrb[146].mxu1  ;;  %v34792_v9 = vld [vmem:[#allocation8_spill] sm:$0xff] }
 0x7dc   :  { %v5511_v38 = vadd.f32 %v5510_v43, %v29148_v51  ;;  %v5512_v6 = vpop.f32.mrb[147].mxu1  ;;  %v27345_v51 = vld [vmem:[%s34698_s8 + $0x210] sm:$0xff]  }
 0x7dd   :  { %v27354_v6 = vld [vmem:[%s34692_s2 + $0xb6c] ss:$16 sps:$4 sm:$0xff]  }
 0x7de   :  { %v6131_v35 = vpack.c.bf16 %v5511_v38, %v5508_v32  ;;  %5722 = vmatmul.mubr.bf16.gmra.mrb[104].mxu1 %v27325_v20 }
 0x7df   :  { %5729 = vmatprep.mubr.bf16.mxu1 %v27330_v63  ;;  %v27347_v63 = vld [vmem:[%s34692_s2 + $0xb48] ss:$16 sps:$4 sm:$0xff]  }
 0x7e0   :  { %23517 = vmatmul.mubr.bf16.vlgmr.msra.gmra.mrb[0].mxu0 %v6131_v35  ;;  %v34793_v35 = vld [vmem:[#allocation9_spill] sm:$0xff] }
 0x7e1   :  { %v5515_v45 = vpop.f32.mrb[148].mxu1  ;;  %23533 = vmatpush3.bf16.msra.mxu0 %v27340_v34 }
 0x7e2   :  { %v5516_v48 = vadd.f32 %v5515_v45, %v29153_v59  ;;  %v5517_v41 = vpop.f32.mrb[149].mxu1  ;;  %23534 = vmatprep.subr.bf16.mxu0 %v27341_v52 }
 0x7e3   :  { %v5518_v23 = vpop.f32.mrb[150].mxu1 }
 0x7e4   :  { %v5519_v28 = vadd.f32 %v5518_v23, %v29158_v1  ;;  %v5520_v53 = vpop.f32.mrb[151].mxu1  ;;  %v27331_v1 = vld [vmem:[%s34692_s2 + $0xac8] ss:$16 sps:$4 sm:$0xff]  }
 0x7e5   :  { %23535 = vmatpush3.bf16.msra.mxu0 %v27341_v52  ;;  %v27359_v53 = vld [vmem:[%s34692_s2 + $0xb8c] ss:$16 sps:$4 sm:$0xff]  }
 0x7e6   :  { %5730 = vmatmul.mubr.bf16.gmra.mrb[108].mxu1 %v27328_v10  ;;  %v6132_v59 = vpack.c.bf16 %v5519_v28, %v5516_v48  ;;  %23536 = vmatprep.subr.bf16.mxu0 %v27345_v51  ;;  %v34794_v10 = vld [vmem:[#allocation10_spill] sm:$0xff] }
 0x7e7   :  { %5737 = vmatprep.mubr.bf16.mxu1 %v27333_v60  ;;  %v27352_v60 = vld [vmem:[%s34692_s2 + $0xb68] ss:$16 sps:$4 sm:$0xff]  }
 0x7e8   :  { %23520 = vmatprep.mubr.bf16.mxu0 %v6132_v59  ;;  %v34795_v59 = vld [vmem:[#allocation11_spill] sm:$0xff] }
 0x7e9   :  { %v5523_v12 = vpop.f32.mrb[152].mxu1  ;;  %23537 = vmatpush3.bf16.msra.mxu0 %v27345_v51 }
 0x7ea   :  { %v5524_v56 = vadd.f32 %v5523_v12, %v29163_v8  ;;  %v5525_v30 = vpop.f32.mrb[153].mxu1  ;;  %23538 = vmatprep.subr.bf16.mxu0 %v27346_v22 }
 0x7eb   :  { %v5526_v34 = vpop.f32.mrb[154].mxu1 }
 0x7ec   :  { %v5527_v40 = vadd.f32 %v5526_v34, %v29168_v15  ;;  %v5528_v14 = vpop.f32.mrb[155].mxu1  ;;  %v27334_v15 = vld [vmem:[%s34692_s2 + $0xae8] ss:$16 sps:$4 sm:$0xff]  }
 0x7ed   :  { %23539 = vmatpush3.bf16.msra.mxu0 %v27346_v22  ;;  %v27362_v14 = vld [vmem:[%s34692_s2 + $0xbac] ss:$16 sps:$4 sm:$0xff]  }
 0x7ee   :  { %5738 = vmatmul.mubr.bf16.gmra.mrb[112].mxu1 %v27331_v1  ;;  %v6133_v8 = vpack.c.bf16 %v5527_v40, %v5524_v56  ;;  %23540 = vmatprep.subr.bf16.mxu0 %v27350_v57  ;;  %v34796_v1 = vld [vmem:[#allocation12_spill] sm:$0xff] }
 0x7ef   :  { %5745 = vmatprep.mubr.bf16.mxu1 %v27336_v17  ;;  %v27357_v17 = vld [vmem:[%s34692_s2 + $0xb88] ss:$16 sps:$4 sm:$0xff]  }
 0x7f0   :  { %23521 = vmatmul.mubr.bf16.gmra.mrb[4].mxu0 %v6133_v8  ;;  %v34797_v8 = vld [vmem:[#allocation13_spill] sm:$0xff] }
 0x7f1   :  { %v5531_v61 = vpop.f32.mrb[156].mxu1  ;;  %23541 = vmatpush3.bf16.msra.mxu0 %v27350_v57 }
 0x7f2   :  { %v5532_v55 = vadd.f32 %v5531_v61, %v29173_v27  ;;  %v5533_v21 = vpop.f32.mrb[157].mxu1  ;;  %23542 = vmatprep.subr.bf16.mxu0 %v27351_v58 }
 0x7f3   :  { %v5534_v44 = vpop.f32.mrb[158].mxu1  ;;  %v27373_v21 = vld [vmem:[%s34698_s8 + $0x248] sm:$0xff]  }
 0x7f4   :  { %v5535_v2 = vadd.f32 %v5534_v44, %v29178_v37  ;;  %v5536_v25 = vpop.f32.mrb[159].mxu1  ;;  %v27337_v37 = vld [vmem:[%s34692_s2 + $0xb08] ss:$16 sps:$4 sm:$0xff]  }
 0x7f5   :  { %23543 = vmatpush3.bf16.msra.mxu0 %v27351_v58  ;;  %v27377_v25 = vld [vmem:[%s34698_s8 + $0x250] sm:$0xff]  }
 0x7f6   :  { %5746 = vmatmul.mubr.bf16.gmra.mrb[116].mxu1 %v27334_v15  ;;  %v6134_v27 = vpack.c.bf16 %v5535_v2, %v5532_v55  ;;  %23544 = vmatprep.subr.bf16.mxu0 %v27355_v42  ;;  %v27360_v2 = vld [vmem:[%s34692_s2 + $0xba8] ss:$16 sps:$4 sm:$0xff]  }
 0x7f7   :  { %5753 = vmatprep.mubr.bf16.mxu1 %v27339_v5 }
 0x7f8   :  { %23524 = vmatprep.mubr.bf16.mxu0 %v6134_v27 }
 0x7f9   :  { %v5539_v13 = vpop.f32.mrb[160].mxu1  ;;  %23545 = vmatpush3.bf16.msra.mxu0 %v27355_v42  ;;  %v34798_v42 = vld [vmem:[#allocation14_spill] sm:$0xff] }
 0x7fa   :  { %v5540_v3 = vadd.f32 %v5539_v13, %v29183_v47  ;;  %v5541_v7 = vpop.f32.mrb[161].mxu1  ;;  %23546 = vmatprep.subr.bf16.mxu0 %v27356_v62  ;;  %v34799_v13 = vld [vmem:[#allocation15_spill] sm:$0xff] }
 0x7fb   :  { %v5542_v29 = vpop.f32.mrb[162].mxu1 }
 0x7fc   :  { %v5543_v11 = vadd.f32 %v5542_v29, %v34789_v16  ;;  %v5544_v26 = vpop.f32.mrb[163].mxu1 }
 0x7fd   :  { %23547 = vmatpush3.bf16.msra.mxu0 %v27356_v62  ;;  %v27365_v62 = vld [vmem:[%s34692_s2 + $0xbcc] ss:$16 sps:$4 sm:$0xff]   ;;  %v27363_v26 = vld [vmem:[%s34692_s2 + $0xbc8] ss:$16 sps:$4 sm:$0xff]  }
 0x7fe   :  { %5754 = vmatmul.mubr.bf16.gmra.mrb[120].mxu1 %v27337_v37  ;;  %v6135_v47 = vpack.c.bf16 %v5543_v11, %v5540_v3  ;;  %23564 = vmatprep.subr.bf16.mxu0 %v27372_v31 }
 0x7ff   :  { %5761 = vmatprep.mubr.bf16.mxu1 %v27344_v46  ;;  %v34800_v46 = vld [vmem:[#allocation16_spill] sm:$0xff] }
 0x800   :  { %23525 = vmatmul.mubr.bf16.gmra.mrb[8].mxu0 %v6135_v47  ;;  %v27382_v47 = vld [vmem:[%s34698_s8 + $0x260] sm:$0xff]  }
 0x801   :  { %v5547_v36 = vpop.f32.mrb[164].mxu1 }
 0x802   :  { %v5548_v18 = vadd.f32 %v5547_v36, %v34790_v0  ;;  %v5549_v19 = vpop.f32.mrb[165].mxu1  ;;  %v27368_v0 = vld [vmem:[%s34692_s2 + $0xbec] ss:$16 sps:$4 sm:$0xff]  }
 0x803   :  { %v5550_v33 = vpop.f32.mrb[166].mxu1 }
 0x804   :  { %v5551_v49 = vadd.f32 %v5550_v33, %v34791_v24  ;;  %v5552_v4 = vpop.f32.mrb[167].mxu1 }
 0x806   :  { %5762 = vmatmul.mubr.bf16.gmra.mrb[124].mxu1 %v27342_v54  ;;  %v6136_v50 = vpack.c.bf16 %v5551_v49, %v5548_v18  ;;  %v34801_v18 = vld [vmem:[#allocation17_spill] sm:$0xff]  ;;  %v34802_v49 = vld [vmem:[#allocation18_spill] sm:$0xff] }
 0x807   :  { %5769 = vmatprep.mubr.bf16.mxu1 %v27349_v39  ;;  %v27383_v39 = vld [vmem:[%s34698_s8 + $0x268] sm:$0xff]  }
 0x808   :  { %23528 = vmatprep.mubr.bf16.mxu0 %v6136_v50 }
 0x809   :  { %v5555_v32 = vpop.f32.mrb[168].mxu1 }
 0x80a   :  { %v5556_v20 = vadd.f32 %v5555_v32, %v34792_v9  ;;  %v5557_v43 = vpop.f32.mrb[169].mxu1  ;;  %v27366_v32 = vld [vmem:[%s34692_s2 + $0xbe8] ss:$16 sps:$4 sm:$0xff]   ;;  %v27387_v9 = vld [vmem:[%s34698_s8 + $0x270] sm:$0xff]  }
 0x80b   :  { %v5558_v38 = vpop.f32.mrb[170].mxu1  ;;  %v27371_v43 = vld [vmem:[%s34692_s2 + $0xc0c] ss:$16 sps:$4 sm:$0xff]  }
 0x80c   :  { %v5559_v52 = vadd.f32 %v5558_v38, %v34793_v35  ;;  %v5560_v45 = vpop.f32.mrb[171].mxu1 }
 0x80e   :  { %5770 = vmatmul.mubr.bf16.gmra.mrb[128].mxu1 %v27347_v63  ;;  %v6137_v48 = vpack.c.bf16 %v5559_v52, %v5556_v20  ;;  %v34803_v63 = vld [vmem:[#allocation19_spill] sm:$0xff]  ;;  %v27388_v52 = vld [vmem:[%s34698_s8 + $0x278] sm:$0xff]  }
 0x80f   :  { %5777 = vmatprep.mubr.bf16.mxu1 %v27354_v6 }
 0x810   :  { %23529 = vmatmul.mubr.bf16.gmra.mrb[12].mxu0 %v6137_v48  ;;  %v34804_v48 = vld [vmem:[#allocation20_spill] sm:$0xff] }
 0x811   :  { %v5563_v41 = vpop.f32.mrb[172].mxu1 }
 0x812   :  { %v5564_v51 = vadd.f32 %v5563_v41, %v34794_v10  ;;  %v5565_v23 = vpop.f32.mrb[173].mxu1 }
 0x813   :  { %v5566_v28 = vpop.f32.mrb[174].mxu1  ;;  %v27404_v23 = vld [vmem:[%s34698_s8 + $0x280] sm:$0xff]  }
 0x814   :  { %v5567_v22 = vadd.f32 %v5566_v28, %v34795_v59  ;;  %v5568_v12 = vpop.f32.mrb[175].mxu1  ;;  %v27376_v28 = vld [vmem:[%s34692_s2 + $0xc2c] ss:$16 sps:$4 sm:$0xff]  }
 0x816   :  { %5778 = vmatmul.mubr.bf16.gmra.mrb[132].mxu1 %v27352_v60  ;;  %v6138_v56 = vpack.c.bf16 %v5567_v22, %v5564_v51  ;;  %v27369_v51 = vld [vmem:[%s34692_s2 + $0xc08] ss:$16 sps:$4 sm:$0xff]  }
 0x817   :  { %5785 = vmatprep.mubr.bf16.mxu1 %v27359_v53  ;;  %v34805_v53 = vld [vmem:[#allocation21_spill] sm:$0xff] }
 0x818   :  { %23548 = vmatprep.mubr.bf16.mxu0 %v6138_v56 }
 0x819   :  { %v5571_v30 = vpop.f32.mrb[176].mxu1 }
 0x81a   :  { %v5572_v57 = vadd.f32 %v5571_v30, %v34796_v1  ;;  %v5573_v34 = vpop.f32.mrb[177].mxu1  ;;  %v34806_v30 = vld [vmem:[#allocation22_spill] sm:$0xff] }
 0x81b   :  { %v5574_v40 = vpop.f32.mrb[178].mxu1  ;;  %v27374_v34 = vld [vmem:[%s34692_s2 + $0xc28] ss:$16 sps:$4 sm:$0xff]  }
 0x81c   :  { %v5575_v58 = vadd.f32 %v5574_v40, %v34797_v8  ;;  %v5576_v61 = vpop.f32.mrb[179].mxu1  ;;  %v27381_v40 = vld [vmem:[%s34692_s2 + $0xc4c] ss:$16 sps:$4 sm:$0xff]  }
 0x81e   :  { %v6139_v55 = vpack.c.bf16 %v5575_v58, %v5572_v57  ;;  %5786 = vmatmul.mubr.bf16.gmra.mrb[136].mxu1 %v27357_v17 }
 0x81f   :  { %5793 = vmatprep.mubr.bf16.mxu1 %v27362_v14  ;;  %v34807_v14 = vld [vmem:[#allocation23_spill] sm:$0xff] }
 0x820   :  { %23549 = vmatmul.mubr.bf16.vlgmr.msra.gmra.mrb[0].mxu0 %v6139_v55 }
 0x821   :  { %v5579_v15 = vpop.f32.mrb[180].mxu1  ;;  %23565 = vmatpush3.bf16.msra.mxu0 %v27372_v31  ;;  %v27378_v31 = vld [vmem:[%s34698_s8 + $0x258] sm:$0xff]  }
 0x822   :  { %v5580_v44 = vadd.f32 %v5579_v15, %v34798_v42  ;;  %v5581_v5 = vpop.f32.mrb[181].mxu1  ;;  %23566 = vmatprep.subr.bf16.mxu0 %v27373_v21 }
 0x823   :  { %v5582_v27 = vpop.f32.mrb[182].mxu1 }
 0x824   :  { %v5583_v3 = vadd.f32 %v5582_v27, %v34799_v13  ;;  %v5584_v7 = vpop.f32.mrb[183].mxu1 }
 0x825   :  { %23567 = vmatpush3.bf16.msra.mxu0 %v27373_v21  ;;  %v34808_v21 = vld [vmem:[#allocation24_spill] sm:$0xff]  ;;  %v34810_v7 = vld [vmem:[#allocation26_spill] sm:$0xff] }
 0x826   :  { %5794 = vmatmul.mubr.bf16.gmra.mrb[140].mxu1 %v27360_v2  ;;  %v6140_v37 = vpack.c.bf16 %v5583_v3, %v5580_v44  ;;  %23568 = vmatprep.subr.bf16.mxu0 %v27377_v25  ;;  %v27379_v44 = vld [vmem:[%s34692_s2 + $0xc48] ss:$16 sps:$4 sm:$0xff]   ;;  %v27386_v2 = vld [vmem:[%s34692_s2 + $0xc6c] ss:$16 sps:$4 sm:$0xff]  }
 0x827   :  { %5801 = vmatprep.mubr.bf16.mxu1 %v27365_v62 }
 0x828   :  { %23552 = vmatprep.mubr.bf16.mxu0 %v6140_v37 }
 0x829   :  { %v5587_v29 = vpop.f32.mrb[184].mxu1  ;;  %23569 = vmatpush3.bf16.msra.mxu0 %v27377_v25  ;;  %v34809_v25 = vld [vmem:[#allocation25_spill] sm:$0xff] }
 0x82a   :  { %v5588_v16 = vadd.f32 %v5587_v29, %v34800_v46  ;;  %v5589_v11 = vpop.f32.mrb[185].mxu1  ;;  %23570 = vmatprep.subr.bf16.mxu0 %v27378_v31  ;;  %v27384_v29 = vld [vmem:[%s34692_s2 + $0xc68] ss:$16 sps:$4 sm:$0xff]  }
 0x82b   :  { %v5590_v36 = vpop.f32.mrb[186].mxu1  ;;  %v34811_v11 = vld [vmem:[#allocation27_spill] sm:$0xff] }
 0x82c   :  { %v5591_v19 = vadd.f32 %v5590_v36, %v34801_v18  ;;  %v5592_v54 = vpop.f32.mrb[187].mxu1  ;;  %v34812_v18 = vld [vmem:[#allocation28_spill] sm:$0xff] }
 0x82d   :  { %23571 = vmatpush3.bf16.msra.mxu0 %v27378_v31 }
 0x82e   :  { %5802 = vmatmul.mubr.bf16.gmra.mrb[144].mxu1 %v27363_v26  ;;  %v6141_v33 = vpack.c.bf16 %v5591_v19, %v5588_v16  ;;  %23572 = vmatprep.subr.bf16.mxu0 %v27382_v47  ;;  %v27391_v16 = vld [vmem:[%s34692_s2 + $0xc8c] ss:$16 sps:$4 sm:$0xff]  }
 0x82f   :  { %5809 = vmatprep.mubr.bf16.mxu1 %v27368_v0 }
 0x830   :  { %23553 = vmatmul.mubr.bf16.gmra.mrb[4].mxu0 %v6141_v33  ;;  %v27389_v33 = vld [vmem:[%s34692_s2 + $0xc88] ss:$16 sps:$4 sm:$0xff]  }
 0x831   :  { %v5595_v24 = vpop.f32.mrb[188].mxu1  ;;  %23573 = vmatpush3.bf16.msra.mxu0 %v27382_v47 }
 0x832   :  { %v5596_v4 = vadd.f32 %v5595_v24, %v34802_v49  ;;  %v5597_v50 = vpop.f32.mrb[189].mxu1  ;;  %23574 = vmatprep.subr.bf16.mxu0 %v27383_v39  ;;  %v27394_v24 = vld [vmem:[%s34692_s2 + $0xcac] ss:$16 sps:$4 sm:$0xff]   ;;  %v34813_v49 = vld [vmem:[#allocation29_spill] sm:$0xff] }
 0x833   :  { %v5598_v20 = vpop.f32.mrb[190].mxu1 }
 0x834   :  { %v5599_v38 = vadd.f32 %v5598_v20, %v34803_v63  ;;  %v5600_v6 = vpop.f32.mrb[191].mxu1 }
 0x835   :  { %23575 = vmatpush3.bf16.msra.mxu0 %v27383_v39  ;;  %v27392_v6 = vld [vmem:[%s34692_s2 + $0xca8] ss:$16 sps:$4 sm:$0xff]  }
 0x836   :  { %5810 = vmatmul.mubr.bf16.gmra.mrb[148].mxu1 %v27366_v32  ;;  %v6142_v35 = vpack.c.bf16 %v5599_v38, %v5596_v4  ;;  %23576 = vmatprep.subr.bf16.mxu0 %v27387_v9 }
 0x837   :  { %5817 = vmatprep.mubr.bf16.mxu1 %v27371_v43  ;;  %v34814_v43 = vld [vmem:[#allocation30_spill] sm:$0xff] }
 0x838   :  { %23556 = vmatprep.mubr.bf16.mxu0 %v6142_v35  ;;  %v27409_v35 = vld [vmem:[%s34698_s8 + $0x290] sm:$0xff]  }
 0x839   :  { %v5603_v45 = vpop.f32.mrb[192].mxu1  ;;  %23577 = vmatpush3.bf16.msra.mxu0 %v27387_v9  ;;  %v27405_v9 = vld [vmem:[%s34698_s8 + $0x288] sm:$0xff]  }
 0x83a   :  { %v5604_v41 = vadd.f32 %v5603_v45, %v34804_v48  ;;  %v5605_v10 = vpop.f32.mrb[193].mxu1  ;;  %23578 = vmatprep.subr.bf16.mxu0 %v27388_v52  ;;  %v27397_v45 = vld [vmem:[%s34692_s2 + $0xccc] ss:$16 sps:$4 sm:$0xff]   ;;  %v34815_v48 = vld [vmem:[#allocation31_spill] sm:$0xff] }
 0x83b   :  { %v5606_v60 = vpop.f32.mrb[194].mxu1 }
 0x83c   :  { %v5607_v59 = vadd.f32 %v5606_v60, %v34805_v53  ;;  %v5608_v22 = vpop.f32.mrb[195].mxu1 }
 0x83d   :  { %23579 = vmatpush3.bf16.msra.mxu0 %v27388_v52  ;;  %v27395_v22 = vld [vmem:[%s34692_s2 + $0xcc8] ss:$16 sps:$4 sm:$0xff]  }
 0x83e   :  { %5818 = vmatmul.mubr.bf16.gmra.mrb[152].mxu1 %v27369_v51  ;;  %v6143_v12 = vpack.c.bf16 %v5607_v59, %v5604_v41  ;;  %23596 = vmatprep.subr.bf16.mxu0 %v27404_v23 }
 0x83f   :  { %5825 = vmatprep.mubr.bf16.mxu1 %v27376_v28  ;;  %v34816_v28 = vld [vmem:[#allocation32_spill] sm:$0xff] }
 0x840   :  { %23557 = vmatmul.mubr.bf16.gmra.mrb[8].mxu0 %v6143_v12  ;;  %v27414_v12 = vld [vmem:[%s34698_s8 + $0x2a0] sm:$0xff]  }
 0x841   :  { %v5611_v56 = vpop.f32.mrb[196].mxu1 }
 0x842   :  { %v5612_v1 = vadd.f32 %v5611_v56, %v34806_v30  ;;  %v5613_v57 = vpop.f32.mrb[197].mxu1  ;;  %v27400_v30 = vld [vmem:[%s34692_s2 + $0xcec] ss:$16 sps:$4 sm:$0xff]  }
 0x843   :  { %v5614_v17 = vpop.f32.mrb[198].mxu1 }
 0x844   :  { %v5615_v8 = vadd.f32 %v5614_v17, %v34807_v14  ;;  %v5616_v58 = vpop.f32.mrb[199].mxu1 }
 0x846   :  { %5826 = vmatmul.mubr.bf16.gmra.mrb[156].mxu1 %v27374_v34  ;;  %v6144_v61 = vpack.c.bf16 %v5615_v8, %v5612_v1  ;;  %v34817_v1 = vld [vmem:[#allocation33_spill] sm:$0xff]  ;;  %v34818_v8 = vld [vmem:[#allocation34_spill] sm:$0xff] }
 0x847   :  { %5833 = vmatprep.mubr.bf16.mxu1 %v27381_v40  ;;  %v27415_v40 = vld [vmem:[%s34698_s8 + $0x2a8] sm:$0xff]  }
 0x848   :  { %23560 = vmatprep.mubr.bf16.mxu0 %v6144_v61 }
 0x849   :  { %v5619_v55 = vpop.f32.mrb[200].mxu1 }
 0x84a   :  { %v5620_v15 = vadd.f32 %v5619_v55, %v34808_v21  ;;  %v5621_v42 = vpop.f32.mrb[201].mxu1  ;;  %v27398_v55 = vld [vmem:[%s34692_s2 + $0xce8] ss:$16 sps:$4 sm:$0xff]   ;;  %v27419_v21 = vld [vmem:[%s34698_s8 + $0x2b0] sm:$0xff]  }
 0x84b   :  { %v5622_v5 = vpop.f32.mrb[202].mxu1  ;;  %v27403_v42 = vld [vmem:[%s34692_s2 + $0xd0c] ss:$16 sps:$4 sm:$0xff]  }
 0x84c   :  { %v5623_v27 = vadd.f32 %v5622_v5, %v34809_v25  ;;  %v5624_v62 = vpop.f32.mrb[203].mxu1 }
 0x84e   :  { %5834 = vmatmul.mubr.bf16.gmra.mrb[160].mxu1 %v27379_v44  ;;  %v6145_v13 = vpack.c.bf16 %v5623_v27, %v5620_v15  ;;  %v34819_v44 = vld [vmem:[#allocation35_spill] sm:$0xff]  ;;  %v27420_v27 = vld [vmem:[%s34698_s8 + $0x2b8] sm:$0xff]  }
 0x84f   :  { %5841 = vmatprep.mubr.bf16.mxu1 %v27386_v2 }
 0x850   :  { %23561 = vmatmul.mubr.bf16.gmra.mrb[12].mxu0 %v6145_v13  ;;  %v34820_v13 = vld [vmem:[#allocation36_spill] sm:$0xff] }
 0x851   :  { %v5627_v3 = vpop.f32.mrb[204].mxu1 }
 0x852   :  { %v5628_v37 = vadd.f32 %v5627_v3, %v34810_v7  ;;  %v5629_v31 = vpop.f32.mrb[205].mxu1 }
 0x853   :  { %v5630_v46 = vpop.f32.mrb[206].mxu1  ;;  %v27436_v31 = vld [vmem:[%s34698_s8 + $0x2c0] sm:$0xff]  }
 0x854   :  { %v5631_v26 = vadd.f32 %v5630_v46, %v34811_v11  ;;  %v5632_v47 = vpop.f32.mrb[207].mxu1  ;;  %v27408_v46 = vld [vmem:[%s34692_s2 + $0xd2c] ss:$16 sps:$4 sm:$0xff]  }
 0x856   :  { %5842 = vmatmul.mubr.bf16.gmra.mrb[164].mxu1 %v27384_v29  ;;  %v6146_v36 = vpack.c.bf16 %v5631_v26, %v5628_v37  ;;  %v27401_v37 = vld [vmem:[%s34692_s2 + $0xd08] ss:$16 sps:$4 sm:$0xff]  }
 0x857   :  { %5849 = vmatprep.mubr.bf16.mxu1 %v27391_v16  ;;  %v34821_v16 = vld [vmem:[#allocation37_spill] sm:$0xff] }
 0x858   :  { %23580 = vmatprep.mubr.bf16.mxu0 %v6146_v36 }
 0x859   :  { %v5635_v0 = vpop.f32.mrb[208].mxu1 }
 0x85a   :  { %v5636_v19 = vadd.f32 %v5635_v0, %v34812_v18  ;;  %v5637_v54 = vpop.f32.mrb[209].mxu1  ;;  %v34822_v0 = vld [vmem:[#allocation38_spill] sm:$0xff] }
 0x85b   :  { %v5638_v39 = vpop.f32.mrb[210].mxu1  ;;  %v27406_v54 = vld [vmem:[%s34692_s2 + $0xd28] ss:$16 sps:$4 sm:$0xff]  }
 0x85c   :  { %v5639_v4 = vadd.f32 %v5638_v39, %v34813_v49  ;;  %v5640_v50 = vpop.f32.mrb[211].mxu1  ;;  %v27413_v39 = vld [vmem:[%s34692_s2 + $0xd4c] ss:$16 sps:$4 sm:$0xff]  }
 0x85e   :  { %v6147_v32 = vpack.c.bf16 %v5639_v4, %v5636_v19  ;;  %5850 = vmatmul.mubr.bf16.gmra.mrb[168].mxu1 %v27389_v33 }
 0x85f   :  { %5857 = vmatprep.mubr.bf16.mxu1 %v27394_v24  ;;  %v34823_v24 = vld [vmem:[#allocation39_spill] sm:$0xff] }
 0x860   :  { %23581 = vmatmul.mubr.bf16.vlgmr.msra.gmra.mrb[0].mxu0 %v6147_v32 }
 0x861   :  { %v5643_v20 = vpop.f32.mrb[64].mxu1  ;;  %23597 = vmatpush3.bf16.msra.mxu0 %v27404_v23  ;;  %v27410_v23 = vld [vmem:[%s34698_s8 + $0x298] sm:$0xff]  }
 0x862   :  { %v5644_v63 = vadd.f32 %v5643_v20, %v34814_v43  ;;  %v5645_v38 = vpop.f32.mrb[65].mxu1  ;;  %23598 = vmatprep.subr.bf16.mxu0 %v27405_v9  ;;  %v27411_v20 = vld [vmem:[%s34692_s2 + $0xd48] ss:$16 sps:$4 sm:$0xff]  }
 0x863   :  { %v5646_v52 = vpop.f32.mrb[66].mxu1  ;;  %v34824_v43 = vld [vmem:[#allocation40_spill] sm:$0xff] }
 0x864   :  { %v5647_v41 = vadd.f32 %v5646_v52, %v34815_v48  ;;  %v5648_v10 = vpop.f32.mrb[67].mxu1  ;;  %v34825_v52 = vld [vmem:[#allocation41_spill] sm:$0xff] }
 0x865   :  { %23599 = vmatpush3.bf16.msra.mxu0 %v27405_v9  ;;  %v34826_v10 = vld [vmem:[#allocation42_spill] sm:$0xff] }
 0x866   :  { %5858 = vmatmul.mubr.bf16.gmra.mrb[252].mxu1 %v27392_v6  ;;  %v6148_v51 = vpack.c.bf16 %v5647_v41, %v5644_v63  ;;  %23600 = vmatprep.subr.bf16.mxu0 %v27409_v35  ;;  %v27418_v6 = vld [vmem:[%s34692_s2 + $0xd6c] ss:$16 sps:$4 sm:$0xff]  }
 0x867   :  { %5865 = vmatprep.mubr.bf16.mxu1 %v27397_v45 }
 0x868   :  { %23584 = vmatprep.mubr.bf16.mxu0 %v6148_v51 }
 0x869   :  { %v5651_v60 = vpop.f32.mrb[68].mxu1  ;;  %23601 = vmatpush3.bf16.msra.mxu0 %v27409_v35 }
 0x86a   :  { %v5652_v53 = vadd.f32 %v5651_v60, %v34816_v28  ;;  %v5653_v59 = vpop.f32.mrb[69].mxu1  ;;  %23602 = vmatprep.subr.bf16.mxu0 %v27410_v23  ;;  %v27416_v60 = vld [vmem:[%s34692_s2 + $0xd68] ss:$16 sps:$4 sm:$0xff]  }
 0x86b   :  { %v5654_v56 = vpop.f32.mrb[70].mxu1  ;;  %v34827_v59 = vld [vmem:[#allocation43_spill] sm:$0xff] }
 0x86c   :  { %v5655_v57 = vadd.f32 %v5654_v56, %v34817_v1  ;;  %v5656_v34 = vpop.f32.mrb[71].mxu1  ;;  %v34828_v1 = vld [vmem:[#allocation44_spill] sm:$0xff] }
 0x86d   :  { %23603 = vmatpush3.bf16.msra.mxu0 %v27410_v23 }
 0x86e   :  { %5866 = vmatmul.mubr.bf16.gmra.mrb[0].mxu1 %v27395_v22  ;;  %v6149_v17 = vpack.c.bf16 %v5655_v57, %v5652_v53  ;;  %23604 = vmatprep.subr.bf16.mxu0 %v27414_v12  ;;  %v27423_v53 = vld [vmem:[%s34692_s2 + $0xd8c] ss:$16 sps:$4 sm:$0xff]  }
 0x86f   :  { %5873 = vmatprep.mubr.bf16.mxu1 %v27400_v30 }
 0x870   :  { %23585 = vmatmul.mubr.bf16.gmra.mrb[4].mxu0 %v6149_v17  ;;  %v27421_v17 = vld [vmem:[%s34692_s2 + $0xd88] ss:$16 sps:$4 sm:$0xff]  }
 0x871   :  { %v5659_v14 = vpop.f32.mrb[72].mxu1  ;;  %23605 = vmatpush3.bf16.msra.mxu0 %v27414_v12 }
 0x872   :  { %v5660_v58 = vadd.f32 %v5659_v14, %v34818_v8  ;;  %v5661_v61 = vpop.f32.mrb[73].mxu1  ;;  %23606 = vmatprep.subr.bf16.mxu0 %v27415_v40  ;;  %v27426_v14 = vld [vmem:[%s34692_s2 + $0xdac] ss:$16 sps:$4 sm:$0xff]   ;;  %v34829_v8 = vld [vmem:[#allocation45_spill] sm:$0xff] }
 0x873   :  { %v5662_v15 = vpop.f32.mrb[74].mxu1 }
 0x874   :  { %v5663_v5 = vadd.f32 %v5662_v15, %v34819_v44  ;;  %v5664_v2 = vpop.f32.mrb[75].mxu1 }
 0x875   :  { %23607 = vmatpush3.bf16.msra.mxu0 %v27415_v40  ;;  %v27424_v2 = vld [vmem:[%s34692_s2 + $0xda8] ss:$16 sps:$4 sm:$0xff]  }
 0x876   :  { %5874 = vmatmul.mubr.bf16.gmra.mrb[4].mxu1 %v27398_v55  ;;  %v6150_v25 = vpack.c.bf16 %v5663_v5, %v5660_v58  ;;  %23608 = vmatprep.subr.bf16.mxu0 %v27419_v21 }
 0x877   :  { %5881 = vmatprep.mubr.bf16.mxu1 %v27403_v42  ;;  %v34830_v42 = vld [vmem:[#allocation46_spill] sm:$0xff] }
 0x878   :  { %23588 = vmatprep.mubr.bf16.mxu0 %v6150_v25  ;;  %v27441_v25 = vld [vmem:[%s34698_s8 + $0x2d0] sm:$0xff]  }
 0x879   :  { %v5667_v62 = vpop.f32.mrb[76].mxu1  ;;  %23609 = vmatpush3.bf16.msra.mxu0 %v27419_v21  ;;  %v27437_v21 = vld [vmem:[%s34698_s8 + $0x2c8] sm:$0xff]  }
 0x87a   :  { %v5668_v3 = vadd.f32 %v5667_v62, %v34820_v13  ;;  %v5669_v7 = vpop.f32.mrb[77].mxu1  ;;  %23610 = vmatprep.subr.bf16.mxu0 %v27420_v27  ;;  %v27429_v62 = vld [vmem:[%s34692_s2 + $0xdcc] ss:$16 sps:$4 sm:$0xff]   ;;  %v34831_v13 = vld [vmem:[#allocation47_spill] sm:$0xff] }
 0x87b   :  { %v5670_v29 = vpop.f32.mrb[78].mxu1 }
 0x87c   :  { %v5671_v11 = vadd.f32 %v5670_v29, %v34821_v16  ;;  %v5672_v26 = vpop.f32.mrb[79].mxu1 }
 0x87d   :  { %23611 = vmatpush3.bf16.msra.mxu0 %v27420_v27  ;;  %v27427_v26 = vld [vmem:[%s34692_s2 + $0xdc8] ss:$16 sps:$4 sm:$0xff]  }
 0x87e   :  { %5882 = vmatmul.mubr.bf16.gmra.mrb[8].mxu1 %v27401_v37  ;;  %v6151_v47 = vpack.c.bf16 %v5671_v11, %v5668_v3  ;;  %23628 = vmatprep.subr.bf16.mxu0 %v27436_v31 }
 0x87f   :  { %5889 = vmatprep.mubr.bf16.mxu1 %v27408_v46  ;;  %v34832_v46 = vld [vmem:[#allocation48_spill] sm:$0xff] }
 0x880   :  { %23589 = vmatmul.mubr.bf16.gmra.mrb[8].mxu0 %v6151_v47  ;;  %v27446_v47 = vld [vmem:[%s34698_s8 + $0x2e0] sm:$0xff]  }
 0x881   :  { %v5675_v36 = vpop.f32.mrb[80].mxu1 }
 0x882   :  { %v5676_v18 = vadd.f32 %v5675_v36, %v34822_v0  ;;  %v5677_v19 = vpop.f32.mrb[81].mxu1  ;;  %v27432_v0 = vld [vmem:[%s34692_s2 + $0xdec] ss:$16 sps:$4 sm:$0xff]  }
 0x883   :  { %v5678_v33 = vpop.f32.mrb[82].mxu1 }
 0x884   :  { %v5679_v49 = vadd.f32 %v5678_v33, %v34823_v24  ;;  %v5680_v4 = vpop.f32.mrb[83].mxu1 }
 0x886   :  { %5890 = vmatmul.mubr.bf16.gmra.mrb[12].mxu1 %v27406_v54  ;;  %v6152_v50 = vpack.c.bf16 %v5679_v49, %v5676_v18  ;;  %v34833_v18 = vld [vmem:[#allocation49_spill] sm:$0xff]  ;;  %v34834_v49 = vld [vmem:[#allocation50_spill] sm:$0xff] }
 0x887   :  { %5897 = vmatprep.mubr.bf16.mxu1 %v27413_v39  ;;  %v27447_v39 = vld [vmem:[%s34698_s8 + $0x2e8] sm:$0xff]  }
 0x888   :  { %23592 = vmatprep.mubr.bf16.mxu0 %v6152_v50 }
 0x889   :  { %v5683_v32 = vpop.f32.mrb[84].mxu1 }
 0x88a   :  { %v5685_v9 = vpop.f32.mrb[85].mxu1  ;;  %v5684_v63 = vadd.f32 %v5683_v32, %v34824_v43  ;;  %v27430_v32 = vld [vmem:[%s34692_s2 + $0xde8] ss:$16 sps:$4 sm:$0xff]   ;;  %v27435_v43 = vld [vmem:[%s34692_s2 + $0xe0c] ss:$16 sps:$4 sm:$0xff]  }
 0x88b   :  { %v5686_v38 = vpop.f32.mrb[86].mxu1  ;;  %v27451_v9 = vld [vmem:[%s34698_s8 + $0x2f0] sm:$0xff]  }
 0x88c   :  { %v5688_v35 = vpop.f32.mrb[87].mxu1  ;;  %v5687_v45 = vadd.f32 %v5686_v38, %v34825_v52  ;;  %v27452_v52 = vld [vmem:[%s34698_s8 + $0x2f8] sm:$0xff]  }
 0x88e   :  { %5898 = vmatmul.mubr.bf16.gmra.mrb[16].mxu1 %v27411_v20  ;;  %v6153_v48 = vpack.c.bf16 %v5687_v45, %v5684_v63  ;;  %v34835_v63 = vld [vmem:[#allocation51_spill] sm:$0xff] }
 0x88f   :  { %5905 = vmatprep.mubr.bf16.mxu1 %v27418_v6 }
 0x890   :  { %23593 = vmatmul.mubr.bf16.gmra.mrb[12].mxu0 %v6153_v48  ;;  %v34836_v48 = vld [vmem:[#allocation52_spill] sm:$0xff] }
 0x891   :  { %v5691_v41 = vpop.f32.mrb[88].mxu1 }
 0x892   :  { %v5692_v51 = vadd.f32 %v5691_v41, %v34826_v10  ;;  %v5693_v23 = vpop.f32.mrb[89].mxu1 }
 0x893   :  { %v5694_v28 = vpop.f32.mrb[90].mxu1  ;;  %v27468_v23 = vld [vmem:[%s34698_s8 + $0x300] sm:$0xff]  }
 0x894   :  { %v5695_v22 = vadd.f32 %v5694_v28, %v34827_v59  ;;  %v5696_v12 = vpop.f32.mrb[91].mxu1  ;;  %v27440_v28 = vld [vmem:[%s34692_s2 + $0xe2c] ss:$16 sps:$4 sm:$0xff]  }
 0x896   :  { %v6154_v56 = vpack.c.bf16 %v5695_v22, %v5692_v51  ;;  %5906 = vmatmul.mubr.bf16.gmra.mrb[20].mxu1 %v27416_v60  ;;  %v27433_v51 = vld [vmem:[%s34692_s2 + $0xe08] ss:$16 sps:$4 sm:$0xff]  }
 0x897   :  { %5913 = vmatprep.mubr.bf16.mxu1 %v27423_v53  ;;  %v34837_v53 = vld [vmem:[#allocation53_spill] sm:$0xff] }
 0x898   :  { %23612 = vmatprep.mubr.bf16.mxu0 %v6154_v56 }
 0x899   :  { %v5699_v30 = vpop.f32.mrb[92].mxu1 }
 0x89a   :  { %v5700_v57 = vadd.f32 %v5699_v30, %v34828_v1  ;;  %v5701_v34 = vpop.f32.mrb[93].mxu1  ;;  %v34838_v30 = vld [vmem:[#allocation54_spill] sm:$0xff] }
 0x89b   :  { %v5702_v40 = vpop.f32.mrb[94].mxu1  ;;  %v27438_v34 = vld [vmem:[%s34692_s2 + $0xe28] ss:$16 sps:$4 sm:$0xff]  }
 0x89c   :  { %v5703_v58 = vadd.f32 %v5702_v40, %v34829_v8  ;;  %v5704_v61 = vpop.f32.mrb[95].mxu1  ;;  %v27445_v40 = vld [vmem:[%s34692_s2 + $0xe4c] ss:$16 sps:$4 sm:$0xff]  }
 0x89e   :  { %v6155_v55 = vpack.c.bf16 %v5703_v58, %v5700_v57  ;;  %5914 = vmatmul.mubr.bf16.gmra.mrb[24].mxu1 %v27421_v17 }
 0x89f   :  { %5921 = vmatprep.mubr.bf16.mxu1 %v27426_v14  ;;  %v34839_v14 = vld [vmem:[#allocation55_spill] sm:$0xff] }
 0x8a0   :  { %23613 = vmatmul.mubr.bf16.vlgmr.msra.gmra.mrb[0].mxu0 %v6155_v55 }
 0x8a1   :  { %v5707_v15 = vpop.f32.mrb[96].mxu1  ;;  %23629 = vmatpush3.bf16.msra.mxu0 %v27436_v31  ;;  %v27442_v31 = vld [vmem:[%s34698_s8 + $0x2d8] sm:$0xff]  }
 0x8a2   :  { %v5708_v44 = vadd.f32 %v5707_v15, %v34830_v42  ;;  %v5709_v5 = vpop.f32.mrb[97].mxu1  ;;  %23630 = vmatprep.subr.bf16.mxu0 %v27437_v21 }
 0x8a3   :  { %v5710_v27 = vpop.f32.mrb[98].mxu1 }
 0x8a4   :  { %v5711_v3 = vadd.f32 %v5710_v27, %v34831_v13  ;;  %v5712_v7 = vpop.f32.mrb[99].mxu1 }
 0x8a5   :  { %23631 = vmatpush3.bf16.msra.mxu0 %v27437_v21  ;;  %v34840_v21 = vld [vmem:[#allocation56_spill] sm:$0xff]  ;;  %v34842_v7 = vld [vmem:[#allocation58_spill] sm:$0xff] }
 0x8a6   :  { %v6156_v37 = vpack.c.bf16 %v5711_v3, %v5708_v44  ;;  %5922 = vmatmul.mubr.bf16.gmra.mrb[28].mxu1 %v27424_v2  ;;  %23632 = vmatprep.subr.bf16.mxu0 %v27441_v25  ;;  %v27443_v44 = vld [vmem:[%s34692_s2 + $0xe48] ss:$16 sps:$4 sm:$0xff]   ;;  %v27450_v2 = vld [vmem:[%s34692_s2 + $0xe6c] ss:$16 sps:$4 sm:$0xff]  }
 0x8a7   :  { %5929 = vmatprep.mubr.bf16.mxu1 %v27429_v62 }
 0x8a8   :  { %23616 = vmatprep.mubr.bf16.mxu0 %v6156_v37 }
 0x8a9   :  { %v5715_v29 = vpop.f32.mrb[100].mxu1  ;;  %23633 = vmatpush3.bf16.msra.mxu0 %v27441_v25  ;;  %v34841_v25 = vld [vmem:[#allocation57_spill] sm:$0xff] }
 0x8aa   :  { %v5716_v16 = vadd.f32 %v5715_v29, %v34832_v46  ;;  %v5717_v11 = vpop.f32.mrb[101].mxu1  ;;  %23634 = vmatprep.subr.bf16.mxu0 %v27442_v31  ;;  %v27448_v29 = vld [vmem:[%s34692_s2 + $0xe68] ss:$16 sps:$4 sm:$0xff]  }
 0x8ab   :  { %v5718_v36 = vpop.f32.mrb[102].mxu1  ;;  %v34843_v11 = vld [vmem:[#allocation59_spill] sm:$0xff] }
 0x8ac   :  { %v5719_v19 = vadd.f32 %v5718_v36, %v34833_v18  ;;  %v5720_v54 = vpop.f32.mrb[103].mxu1  ;;  %v34844_v18 = vld [vmem:[#allocation60_spill] sm:$0xff] }
 0x8ad   :  { %23635 = vmatpush3.bf16.msra.mxu0 %v27442_v31 }
 0x8ae   :  { %v6157_v33 = vpack.c.bf16 %v5719_v19, %v5716_v16  ;;  %5930 = vmatmul.mubr.bf16.gmra.mrb[32].mxu1 %v27427_v26  ;;  %23636 = vmatprep.subr.bf16.mxu0 %v27446_v47  ;;  %v27455_v16 = vld [vmem:[%s34692_s2 + $0xe8c] ss:$16 sps:$4 sm:$0xff]  }
 0x8af   :  { %5937 = vmatprep.mubr.bf16.mxu1 %v27432_v0 }
 0x8b0   :  { %23617 = vmatmul.mubr.bf16.gmra.mrb[4].mxu0 %v6157_v33  ;;  %v27453_v33 = vld [vmem:[%s34692_s2 + $0xe88] ss:$16 sps:$4 sm:$0xff]  }
 0x8b1   :  { %v5723_v24 = vpop.f32.mrb[104].mxu1  ;;  %23637 = vmatpush3.bf16.msra.mxu0 %v27446_v47 }
 0x8b2   :  { %v5724_v4 = vadd.f32 %v5723_v24, %v34834_v49  ;;  %v5725_v50 = vpop.f32.mrb[105].mxu1  ;;  %23638 = vmatprep.subr.bf16.mxu0 %v27447_v39  ;;  %v27458_v24 = vld [vmem:[%s34692_s2 + $0xeac] ss:$16 sps:$4 sm:$0xff]   ;;  %v34845_v49 = vld [vmem:[#allocation61_spill] sm:$0xff] }
 0x8b3   :  { %v5726_v20 = vpop.f32.mrb[106].mxu1 }
 0x8b4   :  { %v5727_v38 = vadd.f32 %v5726_v20, %v34835_v63  ;;  %v5728_v6 = vpop.f32.mrb[107].mxu1 }
 0x8b5   :  { %23639 = vmatpush3.bf16.msra.mxu0 %v27447_v39  ;;  %v27456_v6 = vld [vmem:[%s34692_s2 + $0xea8] ss:$16 sps:$4 sm:$0xff]  }
 0x8b6   :  { %v6158_v35 = vpack.c.bf16 %v5727_v38, %v5724_v4  ;;  %5938 = vmatmul.mubr.bf16.gmra.mrb[36].mxu1 %v27430_v32  ;;  %23640 = vmatprep.subr.bf16.mxu0 %v27451_v9 }
 0x8b7   :  { %5945 = vmatprep.mubr.bf16.mxu1 %v27435_v43  ;;  %v34846_v43 = vld [vmem:[#allocation62_spill] sm:$0xff] }
 0x8b8   :  { %23620 = vmatprep.mubr.bf16.mxu0 %v6158_v35  ;;  %v27473_v35 = vld [vmem:[%s34698_s8 + $0x310] sm:$0xff]  }
 0x8b9   :  { %v5731_v45 = vpop.f32.mrb[108].mxu1  ;;  %23641 = vmatpush3.bf16.msra.mxu0 %v27451_v9  ;;  %v27469_v9 = vld [vmem:[%s34698_s8 + $0x308] sm:$0xff]  }
 0x8ba   :  { %v5732_v41 = vadd.f32 %v5731_v45, %v34836_v48  ;;  %v5733_v10 = vpop.f32.mrb[109].mxu1  ;;  %23642 = vmatprep.subr.bf16.mxu0 %v27452_v52  ;;  %v27461_v45 = vld [vmem:[%s34692_s2 + $0xecc] ss:$16 sps:$4 sm:$0xff]   ;;  %v34847_v48 = vld [vmem:[#allocation63_spill] sm:$0xff] }
 0x8bb   :  { %v5734_v60 = vpop.f32.mrb[110].mxu1 }
 0x8bc   :  { %v5735_v59 = vadd.f32 %v5734_v60, %v34837_v53  ;;  %v5736_v22 = vpop.f32.mrb[111].mxu1 }
 0x8bd   :  { %23643 = vmatpush3.bf16.msra.mxu0 %v27452_v52  ;;  %v27459_v22 = vld [vmem:[%s34692_s2 + $0xec8] ss:$16 sps:$4 sm:$0xff]  }
 0x8be   :  { %v6159_v12 = vpack.c.bf16 %v5735_v59, %v5732_v41  ;;  %5946 = vmatmul.mubr.bf16.gmra.mrb[40].mxu1 %v27433_v51  ;;  %23660 = vmatprep.subr.bf16.mxu0 %v27468_v23 }
 0x8bf   :  { %5953 = vmatprep.mubr.bf16.mxu1 %v27440_v28  ;;  %v34848_v28 = vld [vmem:[#allocation64_spill] sm:$0xff] }
 0x8c0   :  { %23621 = vmatmul.mubr.bf16.gmra.mrb[8].mxu0 %v6159_v12  ;;  %v27478_v12 = vld [vmem:[%s34698_s8 + $0x320] sm:$0xff]  }
 0x8c1   :  { %v5739_v56 = vpop.f32.mrb[112].mxu1 }
 0x8c2   :  { %v5740_v1 = vadd.f32 %v5739_v56, %v34838_v30  ;;  %v5741_v57 = vpop.f32.mrb[113].mxu1  ;;  %v27464_v30 = vld [vmem:[%s34692_s2 + $0xeec] ss:$16 sps:$4 sm:$0xff]  }
 0x8c3   :  { %v5742_v17 = vpop.f32.mrb[114].mxu1 }
 0x8c4   :  { %v5743_v8 = vadd.f32 %v5742_v17, %v34839_v14  ;;  %v5744_v58 = vpop.f32.mrb[115].mxu1 }
 0x8c6   :  { %v6160_v61 = vpack.c.bf16 %v5743_v8, %v5740_v1  ;;  %5954 = vmatmul.mubr.bf16.gmra.mrb[44].mxu1 %v27438_v34  ;;  %v34849_v1 = vld [vmem:[#allocation65_spill] sm:$0xff]  ;;  %v34850_v8 = vld [vmem:[#allocation66_spill] sm:$0xff] }
 0x8c7   :  { %5961 = vmatprep.mubr.bf16.mxu1 %v27445_v40  ;;  %v27479_v40 = vld [vmem:[%s34698_s8 + $0x328] sm:$0xff]  }
 0x8c8   :  { %23624 = vmatprep.mubr.bf16.mxu0 %v6160_v61 }
 0x8c9   :  { %v5747_v55 = vpop.f32.mrb[116].mxu1 }
 0x8ca   :  { %v5748_v15 = vadd.f32 %v5747_v55, %v34840_v21  ;;  %v5749_v42 = vpop.f32.mrb[117].mxu1  ;;  %v27462_v55 = vld [vmem:[%s34692_s2 + $0xee8] ss:$16 sps:$4 sm:$0xff]   ;;  %v27483_v21 = vld [vmem:[%s34698_s8 + $0x330] sm:$0xff]  }
 0x8cb   :  { %v5750_v5 = vpop.f32.mrb[118].mxu1  ;;  %v27467_v42 = vld [vmem:[%s34692_s2 + $0xf0c] ss:$16 sps:$4 sm:$0xff]  }
 0x8cc   :  { %v5751_v27 = vadd.f32 %v5750_v5, %v34841_v25  ;;  %v5752_v62 = vpop.f32.mrb[119].mxu1 }
 0x8ce   :  { %v6161_v13 = vpack.c.bf16 %v5751_v27, %v5748_v15  ;;  %5962 = vmatmul.mubr.bf16.gmra.mrb[48].mxu1 %v27443_v44  ;;  %v34851_v44 = vld [vmem:[#allocation67_spill] sm:$0xff]  ;;  %v27484_v27 = vld [vmem:[%s34698_s8 + $0x338] sm:$0xff]  }
 0x8cf   :  { %5969 = vmatprep.mubr.bf16.mxu1 %v27450_v2 }
 0x8d0   :  { %23625 = vmatmul.mubr.bf16.gmra.mrb[12].mxu0 %v6161_v13  ;;  %v34852_v13 = vld [vmem:[#allocation68_spill] sm:$0xff] }
 0x8d1   :  { %v5755_v3 = vpop.f32.mrb[120].mxu1 }
 0x8d2   :  { %v5756_v37 = vadd.f32 %v5755_v3, %v34842_v7  ;;  %v5757_v31 = vpop.f32.mrb[121].mxu1 }
 0x8d3   :  { %v5758_v46 = vpop.f32.mrb[122].mxu1  ;;  %v27497_v31 = vld [vmem:[%s34698_s8 + $0x340] sm:$0xff]  }
 0x8d4   :  { %v5759_v26 = vadd.f32 %v5758_v46, %v34843_v11  ;;  %v5760_v47 = vpop.f32.mrb[123].mxu1  ;;  %v27472_v46 = vld [vmem:[%s34692_s2 + $0xf2c] ss:$16 sps:$4 sm:$0xff]  }
 0x8d6   :  { %v6162_v36 = vpack.c.bf16 %v5759_v26, %v5756_v37  ;;  %5970 = vmatmul.mubr.bf16.gmra.mrb[52].mxu1 %v27448_v29  ;;  %v27465_v37 = vld [vmem:[%s34692_s2 + $0xf08] ss:$16 sps:$4 sm:$0xff]  }
 0x8d7   :  { %5977 = vmatprep.mubr.bf16.mxu1 %v27455_v16  ;;  %v34853_v16 = vld [vmem:[#allocation69_spill] sm:$0xff] }
 0x8d8   :  { %23644 = vmatprep.mubr.bf16.mxu0 %v6162_v36 }
 0x8d9   :  { %v5763_v0 = vpop.f32.mrb[124].mxu1 }
 0x8da   :  { %v5764_v19 = vadd.f32 %v5763_v0, %v34844_v18  ;;  %v5765_v54 = vpop.f32.mrb[125].mxu1  ;;  %v34854_v0 = vld [vmem:[#allocation70_spill] sm:$0xff] }
 0x8db   :  { %v5766_v39 = vpop.f32.mrb[126].mxu1  ;;  %v27470_v54 = vld [vmem:[%s34692_s2 + $0xf28] ss:$16 sps:$4 sm:$0xff]  }
 0x8dc   :  { %v5767_v4 = vadd.f32 %v5766_v39, %v34845_v49  ;;  %v5768_v50 = vpop.f32.mrb[127].mxu1  ;;  %v27477_v39 = vld [vmem:[%s34692_s2 + $0xf4c] ss:$16 sps:$4 sm:$0xff]  }
 0x8de   :  { %v6163_v32 = vpack.c.bf16 %v5767_v4, %v5764_v19  ;;  %5978 = vmatmul.mubr.bf16.gmra.mrb[56].mxu1 %v27453_v33 }
 0x8df   :  { %5985 = vmatprep.mubr.bf16.mxu1 %v27458_v24  ;;  %v34855_v24 = vld [vmem:[#allocation71_spill] sm:$0xff] }
 0x8e0   :  { %23645 = vmatmul.mubr.bf16.vlgmr.msra.gmra.mrb[0].mxu0 %v6163_v32 }
 0x8e1   :  { %v5771_v20 = vpop.f32.mrb[128].mxu1  ;;  %23661 = vmatpush3.bf16.msra.mxu0 %v27468_v23  ;;  %v27474_v23 = vld [vmem:[%s34698_s8 + $0x318] sm:$0xff]  }
 0x8e2   :  { %v5772_v63 = vadd.f32 %v5771_v20, %v34846_v43  ;;  %v5773_v38 = vpop.f32.mrb[129].mxu1  ;;  %23662 = vmatprep.subr.bf16.mxu0 %v27469_v9 }
 0x8e3   :  { %v5774_v52 = vpop.f32.mrb[130].mxu1 }
 0x8e4   :  { %v5775_v41 = vadd.f32 %v5774_v52, %v34847_v48  ;;  %v5776_v10 = vpop.f32.mrb[131].mxu1 }
 0x8e5   :  { %23663 = vmatpush3.bf16.msra.mxu0 %v27469_v9  ;;  %v34856_v9 = vld [vmem:[#allocation72_spill] sm:$0xff]  ;;  %v34858_v10 = vld [vmem:[#allocation74_spill] sm:$0xff] }
 0x8e6   :  { %v6164_v51 = vpack.c.bf16 %v5775_v41, %v5772_v63  ;;  %5986 = vmatmul.mubr.bf16.gmra.mrb[60].mxu1 %v27456_v6  ;;  %23664 = vmatprep.subr.bf16.mxu0 %v27473_v35  ;;  %v27475_v63 = vld [vmem:[%s34692_s2 + $0xf48] ss:$16 sps:$4 sm:$0xff]   ;;  %v27482_v6 = vld [vmem:[%s34692_s2 + $0xf6c] ss:$16 sps:$4 sm:$0xff]  }
 0x8e7   :  { %5993 = vmatprep.mubr.bf16.mxu1 %v27461_v45 }
 0x8e8   :  { %23648 = vmatprep.mubr.bf16.mxu0 %v6164_v51 }
 0x8e9   :  { %v5779_v60 = vpop.f32.mrb[132].mxu1  ;;  %23665 = vmatpush3.bf16.msra.mxu0 %v27473_v35  ;;  %v34857_v35 = vld [vmem:[#allocation73_spill] sm:$0xff] }
 0x8ea   :  { %v5780_v53 = vadd.f32 %v5779_v60, %v34848_v28  ;;  %v5781_v59 = vpop.f32.mrb[133].mxu1  ;;  %23666 = vmatprep.subr.bf16.mxu0 %v27474_v23  ;;  %v27480_v60 = vld [vmem:[%s34692_s2 + $0xf68] ss:$16 sps:$4 sm:$0xff]  }
 0x8eb   :  { %v5782_v56 = vpop.f32.mrb[134].mxu1  ;;  %v34859_v59 = vld [vmem:[#allocation75_spill] sm:$0xff] }
 0x8ec   :  { %v5783_v57 = vadd.f32 %v5782_v56, %v34849_v1  ;;  %v5784_v34 = vpop.f32.mrb[135].mxu1  ;;  %v34860_v1 = vld [vmem:[#allocation76_spill] sm:$0xff] }
 0x8ed   :  { %23667 = vmatpush3.bf16.msra.mxu0 %v27474_v23 }
 0x8ee   :  { %v6165_v17 = vpack.c.bf16 %v5783_v57, %v5780_v53  ;;  %5994 = vmatmul.mubr.bf16.gmra.mrb[212].mxu1 %v27459_v22  ;;  %23668 = vmatprep.subr.bf16.mxu0 %v27478_v12  ;;  %v27487_v53 = vld [vmem:[%s34692_s2 + $0xf8c] ss:$16 sps:$4 sm:$0xff]  }
 0x8ef   :  { %6001 = vmatprep.mubr.bf16.mxu1 %v27464_v30 }
 0x8f0   :  { %23649 = vmatmul.mubr.bf16.gmra.mrb[4].mxu0 %v6165_v17  ;;  %v27485_v17 = vld [vmem:[%s34692_s2 + $0xf88] ss:$16 sps:$4 sm:$0xff]  }
 0x8f1   :  { %v5787_v14 = vpop.f32.mrb[136].mxu1  ;;  %23669 = vmatpush3.bf16.msra.mxu0 %v27478_v12 }
 0x8f2   :  { %v5788_v58 = vadd.f32 %v5787_v14, %v34850_v8  ;;  %v5789_v61 = vpop.f32.mrb[137].mxu1  ;;  %23670 = vmatprep.subr.bf16.mxu0 %v27479_v40  ;;  %v27490_v14 = vld [vmem:[%s34692_s2 + $0xfac] ss:$16 sps:$4 sm:$0xff]   ;;  %v34861_v8 = vld [vmem:[#allocation77_spill] sm:$0xff] }
 0x8f3   :  { %v5790_v15 = vpop.f32.mrb[138].mxu1 }
 0x8f4   :  { %v5791_v5 = vadd.f32 %v5790_v15, %v34851_v44  ;;  %v5792_v2 = vpop.f32.mrb[139].mxu1 }
 0x8f5   :  { %23671 = vmatpush3.bf16.msra.mxu0 %v27479_v40  ;;  %v27488_v2 = vld [vmem:[%s34692_s2 + $0xfa8] ss:$16 sps:$4 sm:$0xff]  }
 0x8f6   :  { %v6166_v25 = vpack.c.bf16 %v5791_v5, %v5788_v58  ;;  %6002 = vmatmul.mubr.bf16.gmra.mrb[216].mxu1 %v27462_v55  ;;  %23672 = vmatprep.subr.bf16.mxu0 %v27483_v21 }
 0x8f7   :  { %6009 = vmatprep.mubr.bf16.mxu1 %v27467_v42  ;;  %v34862_v42 = vld [vmem:[#allocation78_spill] sm:$0xff] }
 0x8f8   :  { %23652 = vmatprep.mubr.bf16.mxu0 %v6166_v25  ;;  %v27499_v25 = vld [vmem:[%s34698_s8 + $0x350] sm:$0xff]  }
 0x8f9   :  { %v5795_v62 = vpop.f32.mrb[140].mxu1  ;;  %23673 = vmatpush3.bf16.msra.mxu0 %v27483_v21  ;;  %v27498_v21 = vld [vmem:[%s34698_s8 + $0x348] sm:$0xff]  }
 0x8fa   :  { %v5796_v3 = vadd.f32 %v5795_v62, %v34852_v13  ;;  %v5797_v7 = vpop.f32.mrb[141].mxu1  ;;  %23674 = vmatprep.subr.bf16.mxu0 %v27484_v27  ;;  %v27493_v62 = vld [vmem:[%s34692_s2 + $0xfcc] ss:$16 sps:$4 sm:$0xff]   ;;  %v34863_v13 = vld [vmem:[#allocation79_spill] sm:$0xff] }
 0x8fb   :  { %v5798_v29 = vpop.f32.mrb[142].mxu1 }
 0x8fc   :  { %v5799_v11 = vadd.f32 %v5798_v29, %v34853_v16  ;;  %v5800_v26 = vpop.f32.mrb[143].mxu1 }
 0x8fd   :  { %23675 = vmatpush3.bf16.msra.mxu0 %v27484_v27  ;;  %v27491_v26 = vld [vmem:[%s34692_s2 + $0xfc8] ss:$16 sps:$4 sm:$0xff]  }
 0x8fe   :  { %v6167_v47 = vpack.c.bf16 %v5799_v11, %v5796_v3  ;;  %6010 = vmatmul.mubr.bf16.gmra.mrb[220].mxu1 %v27465_v37  ;;  %23692 = vmatprep.subr.bf16.mxu0 %v27497_v31 }
 0x8ff   :  { %6017 = vmatprep.mubr.bf16.mxu1 %v27472_v46  ;;  %v34864_v46 = vld [vmem:[#allocation80_spill] sm:$0xff] }
 0x900   :  { %23653 = vmatmul.mubr.bf16.gmra.mrb[8].mxu0 %v6167_v47  ;;  %v27501_v47 = vld [vmem:[%s34698_s8 + $0x360] sm:$0xff]  }
 0x901   :  { %v5803_v36 = vpop.f32.mrb[144].mxu1 }
 0x902   :  { %v5804_v18 = vadd.f32 %v5803_v36, %v34854_v0  ;;  %v5805_v19 = vpop.f32.mrb[145].mxu1  ;;  %v27496_v0 = vld [vmem:[%s34692_s2 + $0xfec] ss:$16 sps:$4 sm:$0xff]  }
 0x903   :  { %v5806_v33 = vpop.f32.mrb[146].mxu1 }
 0x904   :  { %v5807_v49 = vadd.f32 %v5806_v33, %v34855_v24  ;;  %v5808_v4 = vpop.f32.mrb[147].mxu1 }
 0x906   :  { %v6168_v50 = vpack.c.bf16 %v5807_v49, %v5804_v18  ;;  %6018 = vmatmul.mubr.bf16.gmra.mrb[224].mxu1 %v27470_v54  ;;  %v34865_v18 = vld [vmem:[#allocation81_spill] sm:$0xff]  ;;  %v34866_v49 = vld [vmem:[#allocation82_spill] sm:$0xff] }
 0x907   :  { %6025 = vmatprep.mubr.bf16.mxu1 %v27477_v39  ;;  %v27502_v39 = vld [vmem:[%s34698_s8 + $0x368] sm:$0xff]  }
 0x908   :  { %23656 = vmatprep.mubr.bf16.mxu0 %v6168_v50 }
 0x909   :  { %v5811_v32 = vpop.f32.mrb[148].mxu1 }
 0x90a   :  { %v5812_v20 = vadd.f32 %v5811_v32, %v34856_v9  ;;  %v5813_v43 = vpop.f32.mrb[149].mxu1  ;;  %v27494_v32 = vld [vmem:[%s34692_s2 + $0xfe8] ss:$16 sps:$4 sm:$0xff]   ;;  %v27503_v9 = vld [vmem:[%s34698_s8 + $0x370] sm:$0xff]  }
 0x90b   :  { %v5814_v38 = vpop.f32.mrb[150].mxu1  ;;  %v34867_v43 = vld [vmem:[#allocation83_spill] sm:$0xff] }
 0x90c   :  { %v5815_v52 = vadd.f32 %v5814_v38, %v34857_v35  ;;  %v5816_v45 = vpop.f32.mrb[151].mxu1  ;;  %v27504_v35 = vld [vmem:[%s34698_s8 + $0x378] sm:$0xff]  }
 0x90e   :  { %v6169_v48 = vpack.c.bf16 %v5815_v52, %v5812_v20  ;;  %6026 = vmatmul.mubr.bf16.gmra.mrb[228].mxu1 %v27475_v63 }
 0x90f   :  { %6033 = vmatprep.mubr.bf16.mxu1 %v27482_v6 }
 0x910   :  { %23657 = vmatmul.mubr.bf16.gmra.mrb[12].mxu0 %v6169_v48  ;;  %v27505_v48 = vld [vmem:[%s34698_s8 + $0x380] sm:$0xff]  }
 0x911   :  { %v5819_v41 = vpop.f32.mrb[152].mxu1 }
 0x912   :  { %v5820_v51 = vadd.f32 %v5819_v41, %v34858_v10  ;;  %v5821_v23 = vpop.f32.mrb[153].mxu1 }
 0x913   :  { %v5822_v28 = vpop.f32.mrb[154].mxu1 }
 0x914   :  { %v5823_v22 = vadd.f32 %v5822_v28, %v34859_v59  ;;  %v5824_v12 = vpop.f32.mrb[155].mxu1 }
 0x916   :  { %v6170_v56 = vpack.c.bf16 %v5823_v22, %v5820_v51  ;;  %6034 = vmatmul.mubr.bf16.gmra.mrb[232].mxu1 %v27480_v60 }
 0x917   :  { %6041 = vmatprep.mubr.bf16.mxu1 %v27487_v53 }
 0x918   :  { %23676 = vmatprep.mubr.bf16.mxu0 %v6170_v56 }
 0x919   :  { %v5827_v30 = vpop.f32.mrb[156].mxu1 }
 0x91a   :  { %v5828_v57 = vadd.f32 %v5827_v30, %v34860_v1  ;;  %v5829_v34 = vpop.f32.mrb[157].mxu1 }
 0x91b   :  { %v5830_v40 = vpop.f32.mrb[158].mxu1 }
 0x91c   :  { %v5831_v58 = vadd.f32 %v5830_v40, %v34861_v8  ;;  %v5832_v61 = vpop.f32.mrb[159].mxu1 }
 0x91e   :  { %v6171_v55 = vpack.c.bf16 %v5831_v58, %v5828_v57  ;;  %6042 = vmatmul.mubr.bf16.gmra.mrb[236].mxu1 %v27485_v17 }
 0x91f   :  { %6049 = vmatprep.mubr.bf16.mxu1 %v27490_v14 }
 0x920   :  { %23677 = vmatmul.mubr.bf16.vlgmr.msra.gmra.mrb[0].mxu0 %v6171_v55 }
 0x921   :  { %v5835_v15 = vpop.f32.mrb[160].mxu1  ;;  %23693 = vmatpush3.bf16.msra.mxu0 %v27497_v31  ;;  %v27500_v31 = vld [vmem:[%s34698_s8 + $0x358] sm:$0xff]  }
 0x922   :  { %v5836_v44 = vadd.f32 %v5835_v15, %v34862_v42  ;;  %v5837_v5 = vpop.f32.mrb[161].mxu1  ;;  %23694 = vmatprep.subr.bf16.mxu0 %v27498_v21  ;;  %v27506_v15 = vld [vmem:[%s34698_s8 + $0x388] sm:$0xff]   ;;  %v27507_v42 = vld [vmem:[%s34698_s8 + $0x390] sm:$0xff]  }
 0x923   :  { %v5838_v27 = vpop.f32.mrb[162].mxu1 }
 0x924   :  { %v5839_v3 = vadd.f32 %v5838_v27, %v34863_v13  ;;  %v5840_v7 = vpop.f32.mrb[163].mxu1  ;;  %v27509_v13 = vld [vmem:[%s34698_s8 + $0x3a0] sm:$0xff]  }
 0x925   :  { %23695 = vmatpush3.bf16.msra.mxu0 %v27498_v21 }
 0x926   :  { %v6172_v37 = vpack.c.bf16 %v5839_v3, %v5836_v44  ;;  %6050 = vmatmul.mubr.bf16.gmra.mrb[240].mxu1 %v27488_v2  ;;  %23696 = vmatprep.subr.bf16.mxu0 %v27499_v25 }
 0x927   :  { %6057 = vmatprep.mubr.bf16.mxu1 %v27493_v62  ;;  %v27508_v62 = vld [vmem:[%s34698_s8 + $0x398] sm:$0xff]  }
 0x928   :  { %23680 = vmatprep.mubr.bf16.mxu0 %v6172_v37 }
 0x929   :  { %v5843_v29 = vpop.f32.mrb[164].mxu1  ;;  %23697 = vmatpush3.bf16.msra.mxu0 %v27499_v25 }
 0x92a   :  { %v5844_v16 = vadd.f32 %v5843_v29, %v34864_v46  ;;  %v5845_v11 = vpop.f32.mrb[165].mxu1  ;;  %23698 = vmatprep.subr.bf16.mxu0 %v27500_v31  ;;  %v27510_v46 = vld [vmem:[%s34698_s8 + $0x3a8] sm:$0xff]  }
 0x92b   :  { %v5846_v36 = vpop.f32.mrb[166].mxu1 }
 0x92c   :  { %v5847_v19 = vadd.f32 %v5846_v36, %v34865_v18  ;;  %v5848_v54 = vpop.f32.mrb[167].mxu1  ;;  %v27512_v18 = vld [vmem:[%s34698_s8 + $0x3b8] sm:$0xff]  }
 0x92d   :  { %23699 = vmatpush3.bf16.msra.mxu0 %v27500_v31 }
 0x92e   :  { %v6173_v33 = vpack.c.bf16 %v5847_v19, %v5844_v16  ;;  %6058 = vmatmul.mubr.bf16.gmra.mrb[244].mxu1 %v27491_v26  ;;  %23700 = vmatprep.subr.bf16.mxu0 %v27501_v47  ;;  %v27511_v16 = vld [vmem:[%s34698_s8 + $0x3b0] sm:$0xff]   ;;  %v27513_v19 = vld [vmem:[%s34698_s8 + $0x3c0] sm:$0xff]  }
 0x92f   :  { %6065 = vmatprep.mubr.bf16.mxu1 %v27496_v0 }
 0x930   :  { %23681 = vmatmul.mubr.bf16.gmra.mrb[4].mxu0 %v6173_v33 }
 0x931   :  { %v5851_v24 = vpop.f32.mrb[168].mxu1  ;;  %23701 = vmatpush3.bf16.msra.mxu0 %v27501_v47 }
 0x932   :  { %v5852_v4 = vadd.f32 %v5851_v24, %v34866_v49  ;;  %v5853_v50 = vpop.f32.mrb[169].mxu1  ;;  %23702 = vmatprep.subr.bf16.mxu0 %v27502_v39 }
 0x933   :  { %v5854_v20 = vpop.f32.mrb[170].mxu1 }
 0x934   :  { %v5855_v63 = vadd.f32 %v5854_v20, %v34867_v43  ;;  %v5856_v38 = vpop.f32.mrb[171].mxu1 }
 0x935   :  { %23703 = vmatpush3.bf16.msra.mxu0 %v27502_v39 }
 0x936   :  { %v6174_v6 = vpack.c.bf16 %v5855_v63, %v5852_v4  ;;  %6066 = vmatmul.mubr.bf16.gmra.mrb[248].mxu1 %v27494_v32  ;;  %23704 = vmatprep.subr.bf16.mxu0 %v27503_v9 }
 0x938   :  { %23684 = vmatprep.mubr.bf16.mxu0 %v6174_v6 }
 0x939   :  { %v5859_v52 = vpop.f32.mrb[252].mxu1  ;;  %23705 = vmatpush3.bf16.msra.mxu0 %v27503_v9 }
 0x93a   :  { %v5861_v45 = vpop.f32.mrb[253].mxu1  ;;  %23706 = vmatprep.subr.bf16.mxu0 %v27504_v35 }
 0x93b   :  { %v5862_v41 = vpop.f32.mrb[254].mxu1 }
 0x93c   :  { %v6175_v10 = vpack.c.bf16 %v5862_v41, %v5859_v52  ;;  %v5864_v51 = vpop.f32.mrb[255].mxu1 }
 0x93d   :  { %23707 = vmatpush3.bf16.msra.mxu0 %v27504_v35 }
 0x93e   :  { %23685 = vmatmul.mubr.bf16.gmra.mrb[8].mxu0 %v6175_v10  ;;  %23724 = vmatprep.subr.bf16.mxu0 %v27505_v48 }
 0x941   :  { %v5867_v23 = vpop.f32.mrb[0].mxu1 }
 0x942   :  { %v5869_v60 = vpop.f32.mrb[1].mxu1 }
 0x943   :  { %v5870_v28 = vpop.f32.mrb[2].mxu1 }
 0x944   :  { %v6176_v53 = vpack.c.bf16 %v5870_v28, %v5867_v23  ;;  %v5872_v59 = vpop.f32.mrb[3].mxu1 }
 0x945   :  { %v27514_v59 = vld [vmem:[%s34698_s8 + $0x3c8] sm:$0xff]  }
 0x946   :  { %23688 = vmatprep.mubr.bf16.mxu0 %v6176_v53 }
 0x949   :  { %v5875_v22 = vpop.f32.mrb[4].mxu1 }
 0x94a   :  { %v5877_v12 = vpop.f32.mrb[5].mxu1 }
 0x94b   :  { %v5878_v56 = vpop.f32.mrb[6].mxu1 }
 0x94c   :  { %v6177_v30 = vpack.c.bf16 %v5878_v56, %v5875_v22  ;;  %v5880_v1 = vpop.f32.mrb[7].mxu1  ;;  %v27515_v22 = vld [vmem:[%s34698_s8 + $0x3d0] sm:$0xff]  }
 0x94e   :  { %23689 = vmatmul.mubr.bf16.gmra.mrb[12].mxu0 %v6177_v30 }
 0x951   :  { %v5883_v57 = vpop.f32.mrb[8].mxu1 }
 0x952   :  { %v5885_v34 = vpop.f32.mrb[9].mxu1 }
 0x953   :  { %v5886_v17 = vpop.f32.mrb[10].mxu1  ;;  %v27516_v34 = vld [vmem:[%s34698_s8 + $0x3d8] sm:$0xff]  }
 0x954   :  { %v6178_v40 = vpack.c.bf16 %v5886_v17, %v5883_v57  ;;  %v5888_v14 = vpop.f32.mrb[11].mxu1  ;;  %v27517_v17 = vld [vmem:[%s34698_s8 + $0x3e0] sm:$0xff]  }
 0x956   :  { %23708 = vmatprep.mubr.bf16.mxu0 %v6178_v40 }
 0x959   :  { %v5891_v8 = vpop.f32.mrb[12].mxu1 }
 0x95a   :  { %v5893_v58 = vpop.f32.mrb[13].mxu1 }
 0x95b   :  { %v5894_v61 = vpop.f32.mrb[14].mxu1 }
 0x95c   :  { %v6179_v55 = vpack.c.bf16 %v5894_v61, %v5891_v8  ;;  %v5896_v21 = vpop.f32.mrb[15].mxu1 }
 0x95d   :  { %v27519_v21 = vld [vmem:[%s34698_s8 + $0x3f0] sm:$0xff]  }
 0x95e   :  { %23709 = vmatmul.mubr.bf16.vlgmr.msra.gmra.mrb[0].mxu0 %v6179_v55  ;;  %v27518_v55 = vld [vmem:[%s34698_s8 + $0x3e8] sm:$0xff]  }
 0x95f   :  { %23725 = vmatpush3.bf16.msra.mxu0 %v27505_v48 }
 0x960   :  { %23726 = vmatprep.subr.bf16.mxu0 %v27506_v15 }
 0x961   :  { %v5899_v44 = vpop.f32.mrb[16].mxu1 }
 0x962   :  { %v5901_v5 = vpop.f32.mrb[17].mxu1 }
 0x963   :  { %v5902_v2 = vpop.f32.mrb[18].mxu1  ;;  %23727 = vmatpush3.bf16.msra.mxu0 %v27506_v15 }
 0x964   :  { %v6180_v25 = vpack.c.bf16 %v5902_v2, %v5899_v44  ;;  %v5904_v27 = vpop.f32.mrb[19].mxu1  ;;  %23728 = vmatprep.subr.bf16.mxu0 %v27507_v42 }
 0x966   :  { %23712 = vmatprep.mubr.bf16.mxu0 %v6180_v25  ;;  %v27520_v25 = vld [vmem:[%s34698_s8 + $0x3f8] sm:$0xff]  }
 0x967   :  { %23729 = vmatpush3.bf16.msra.mxu0 %v27507_v42 }
 0x968   :  { %23730 = vmatprep.subr.bf16.mxu0 %v27508_v62 }
 0x969   :  { %v5907_v3 = vpop.f32.mrb[20].mxu1 }
 0x96a   :  { %v5909_v7 = vpop.f32.mrb[21].mxu1 }
 0x96b   :  { %v5910_v37 = vpop.f32.mrb[22].mxu1  ;;  %23731 = vmatpush3.bf16.msra.mxu0 %v27508_v62 }
 0x96c   :  { %v6181_v31 = vpack.c.bf16 %v5910_v37, %v5907_v3  ;;  %v5912_v29 = vpop.f32.mrb[23].mxu1  ;;  %23732 = vmatprep.subr.bf16.mxu0 %v27509_v13 }
 0x96e   :  { %23713 = vmatmul.mubr.bf16.gmra.mrb[4].mxu0 %v6181_v31 }
 0x96f   :  { %23733 = vmatpush3.bf16.msra.mxu0 %v27509_v13 }
 0x970   :  { %23734 = vmatprep.subr.bf16.mxu0 %v27510_v46 }
 0x971   :  { %v5915_v11 = vpop.f32.mrb[24].mxu1 }
 0x972   :  { %v5917_v26 = vpop.f32.mrb[25].mxu1 }
 0x973   :  { %v5918_v47 = vpop.f32.mrb[26].mxu1  ;;  %23735 = vmatpush3.bf16.msra.mxu0 %v27510_v46 }
 0x974   :  { %v6182_v36 = vpack.c.bf16 %v5918_v47, %v5915_v11  ;;  %v5920_v0 = vpop.f32.mrb[27].mxu1  ;;  %23736 = vmatprep.subr.bf16.mxu0 %v27511_v16 }
 0x976   :  { %23716 = vmatprep.mubr.bf16.mxu0 %v6182_v36 }
 0x977   :  { %23737 = vmatpush3.bf16.msra.mxu0 %v27511_v16 }
 0x978   :  { %23738 = vmatprep.subr.bf16.mxu0 %v27512_v18 }
 0x979   :  { %v5923_v54 = vpop.f32.mrb[28].mxu1 }
 0x97a   :  { %v5925_v33 = vpop.f32.mrb[29].mxu1 }
 0x97b   :  { %v5926_v39 = vpop.f32.mrb[30].mxu1  ;;  %23739 = vmatpush3.bf16.msra.mxu0 %v27512_v18 }
 0x97c   :  { %v6183_v24 = vpack.c.bf16 %v5926_v39, %v5923_v54  ;;  %v5928_v49 = vpop.f32.mrb[31].mxu1  ;;  %23756 = vmatprep.subr.bf16.mxu0 %v27513_v19 }
 0x97e   :  { %23717 = vmatmul.mubr.bf16.gmra.mrb[8].mxu0 %v6183_v24 }
 0x981   :  { %v5931_v4 = vpop.f32.mrb[32].mxu1 }
 0x982   :  { %v5933_v50 = vpop.f32.mrb[33].mxu1 }
 0x983   :  { %v5934_v32 = vpop.f32.mrb[34].mxu1 }
 0x984   :  { %v6184_v9 = vpack.c.bf16 %v5934_v32, %v5931_v4  ;;  %v5936_v20 = vpop.f32.mrb[35].mxu1 }
 0x986   :  { %23720 = vmatprep.mubr.bf16.mxu0 %v6184_v9 }
 0x989   :  { %v5939_v43 = vpop.f32.mrb[36].mxu1 }
 0x98a   :  { %v5941_v63 = vpop.f32.mrb[37].mxu1 }
 0x98b   :  { %v5942_v38 = vpop.f32.mrb[38].mxu1 }
 0x98c   :  { %v6185_v6 = vpack.c.bf16 %v5942_v38, %v5939_v43  ;;  %v5944_v35 = vpop.f32.mrb[39].mxu1 }
 0x98e   :  { %23721 = vmatmul.mubr.bf16.gmra.mrb[12].mxu0 %v6185_v6 }
 0x991   :  { %v5947_v52 = vpop.f32.mrb[40].mxu1 }
 0x992   :  { %v5949_v45 = vpop.f32.mrb[41].mxu1 }
 0x993   :  { %v5950_v48 = vpop.f32.mrb[42].mxu1 }
 0x994   :  { %v6186_v41 = vpack.c.bf16 %v5950_v48, %v5947_v52  ;;  %v5952_v10 = vpop.f32.mrb[43].mxu1 }
 0x996   :  { %23740 = vmatprep.mubr.bf16.mxu0 %v6186_v41 }
 0x999   :  { %v5955_v51 = vpop.f32.mrb[44].mxu1 }
 0x99a   :  { %v5957_v23 = vpop.f32.mrb[45].mxu1 }
 0x99b   :  { %v5958_v60 = vpop.f32.mrb[46].mxu1 }
 0x99c   :  { %v6187_v28 = vpack.c.bf16 %v5958_v60, %v5955_v51  ;;  %v5960_v53 = vpop.f32.mrb[47].mxu1 }
 0x99e   :  { %23741 = vmatmul.mubr.bf16.vlgmr.msra.gmra.mrb[0].mxu0 %v6187_v28 }
 0x99f   :  { %23757 = vmatpush3.bf16.msra.mxu0 %v27513_v19 }
 0x9a0   :  { %23758 = vmatprep.subr.bf16.mxu0 %v27514_v59 }
 0x9a1   :  { %v5963_v12 = vpop.f32.mrb[48].mxu1 }
 0x9a2   :  { %v5965_v56 = vpop.f32.mrb[49].mxu1 }
 0x9a3   :  { %v5966_v30 = vpop.f32.mrb[50].mxu1  ;;  %23759 = vmatpush3.bf16.msra.mxu0 %v27514_v59 }
 0x9a4   :  { %v6188_v1 = vpack.c.bf16 %v5966_v30, %v5963_v12  ;;  %v5968_v57 = vpop.f32.mrb[51].mxu1  ;;  %23760 = vmatprep.subr.bf16.mxu0 %v27515_v22 }
 0x9a6   :  { %23744 = vmatprep.mubr.bf16.mxu0 %v6188_v1 }
 0x9a7   :  { %23761 = vmatpush3.bf16.msra.mxu0 %v27515_v22 }
 0x9a8   :  { %23762 = vmatprep.subr.bf16.mxu0 %v27516_v34 }
 0x9a9   :  { %v5971_v40 = vpop.f32.mrb[52].mxu1 }
 0x9aa   :  { %v5973_v14 = vpop.f32.mrb[53].mxu1 }
 0x9ab   :  { %v5974_v8 = vpop.f32.mrb[54].mxu1  ;;  %23763 = vmatpush3.bf16.msra.mxu0 %v27516_v34 }
 0x9ac   :  { %v6189_v58 = vpack.c.bf16 %v5974_v8, %v5971_v40  ;;  %v5976_v61 = vpop.f32.mrb[55].mxu1  ;;  %23764 = vmatprep.subr.bf16.mxu0 %v27517_v17 }
 0x9ae   :  { %23745 = vmatmul.mubr.bf16.gmra.mrb[4].mxu0 %v6189_v58 }
 0x9af   :  { %23765 = vmatpush3.bf16.msra.mxu0 %v27517_v17 }
 0x9b0   :  { %23766 = vmatprep.subr.bf16.mxu0 %v27518_v55 }
 0x9b1   :  { %v5979_v15 = vpop.f32.mrb[56].mxu1 }
 0x9b2   :  { %v5981_v42 = vpop.f32.mrb[57].mxu1 }
 0x9b3   :  { %v5982_v44 = vpop.f32.mrb[58].mxu1  ;;  %23767 = vmatpush3.bf16.msra.mxu0 %v27518_v55 }
 0x9b4   :  { %v6190_v5 = vpack.c.bf16 %v5982_v44, %v5979_v15  ;;  %v5984_v2 = vpop.f32.mrb[59].mxu1  ;;  %23768 = vmatprep.subr.bf16.mxu0 %v27519_v21 }
 0x9b6   :  { %23748 = vmatprep.mubr.bf16.mxu0 %v6190_v5 }
 0x9b7   :  { %23769 = vmatpush3.bf16.msra.mxu0 %v27519_v21 }
 0x9b8   :  { %23770 = vmatprep.subr.bf16.mxu0 %v27520_v25 }
 0x9b9   :  { %v5987_v27 = vpop.f32.mrb[60].mxu1 }
 0x9ba   :  { %v5989_v62 = vpop.f32.mrb[61].mxu1 }
 0x9bb   :  { %v5990_v13 = vpop.f32.mrb[62].mxu1  ;;  %23771 = vmatpush3.bf16.msra.mxu0 %v27520_v25 }
 0x9bc   :  { %v6191_v3 = vpack.c.bf16 %v5990_v13, %v5987_v27  ;;  %v5992_v7 = vpop.f32.mrb[63].mxu1 }
 0x9be   :  { %23749 = vmatmul.mubr.bf16.gmra.mrb[8].mxu0 %v6191_v3 }
 0x9c1   :  { %v5995_v37 = vpop.f32.mrb[212].mxu1 }
 0x9c2   :  { %v5997_v31 = vpop.f32.mrb[213].mxu1 }
 0x9c3   :  { %v5998_v29 = vpop.f32.mrb[214].mxu1 }
 0x9c4   :  { %v6192_v46 = vpack.c.bf16 %v5998_v29, %v5995_v37  ;;  %v6000_v16 = vpop.f32.mrb[215].mxu1 }
 0x9c6   :  { %23752 = vmatprep.mubr.bf16.mxu0 %v6192_v46 }
 0x9c9   :  { %v6003_v11 = vpop.f32.mrb[216].mxu1 }
 0x9ca   :  { %v6005_v26 = vpop.f32.mrb[217].mxu1 }
 0x9cb   :  { %v6006_v47 = vpop.f32.mrb[218].mxu1 }
 0x9cc   :  { %v6193_v36 = vpack.c.bf16 %v6006_v47, %v6003_v11  ;;  %v6008_v0 = vpop.f32.mrb[219].mxu1 }
 0x9ce   :  { %23753 = vmatmul.mubr.bf16.gmra.mrb[12].mxu0 %v6193_v36 }
 0x9d1   :  { %v6011_v18 = vpop.f32.mrb[220].mxu1 }
 0x9d2   :  { %v6013_v19 = vpop.f32.mrb[221].mxu1 }
 0x9d3   :  { %v6014_v54 = vpop.f32.mrb[222].mxu1 }
 0x9d4   :  { %v6194_v33 = vpack.c.bf16 %v6014_v54, %v6011_v18  ;;  %v6016_v39 = vpop.f32.mrb[223].mxu1 }
 0x9d6   :  { %23772 = vmatprep.mubr.bf16.mxu0 %v6194_v33  ;;  %v27521_v33 = vld [vmem:[%s34693_s3] sm:$0xff]  }
 0x9d9   :  { %v6019_v24 = vpop.f32.mrb[224].mxu1 }
 0x9da   :  { %v6021_v49 = vpop.f32.mrb[225].mxu1 }
 0x9db   :  { %v6022_v4 = vpop.f32.mrb[226].mxu1 }
 0x9dc   :  { %v6195_v50 = vpack.c.bf16 %v6022_v4, %v6019_v24  ;;  %v6024_v32 = vpop.f32.mrb[227].mxu1 }
 0x9de   :  { %23773 = vmatmul.mubr.bf16.vlgmr.msra.gmra.mrb[0].mxu0 %v6195_v50 }
 0x9e1   :  { %v6027_v9 = vpop.f32.mrb[228].mxu1 }
 0x9e2   :  { %v6029_v20 = vpop.f32.mrb[229].mxu1 }
 0x9e3   :  { %v6030_v43 = vpop.f32.mrb[230].mxu1 }
 0x9e4   :  { %v6196_v63 = vpack.c.bf16 %v6030_v43, %v6027_v9  ;;  %v6032_v38 = vpop.f32.mrb[231].mxu1 }
 0x9e6   :  { %23776 = vmatprep.mubr.bf16.mxu0 %v6196_v63 }
 0x9e9   :  { %v6035_v6 = vpop.f32.mrb[232].mxu1 }
 0x9ea   :  { %v6037_v35 = vpop.f32.mrb[233].mxu1 }
 0x9eb   :  { %v6038_v52 = vpop.f32.mrb[234].mxu1 }
 0x9ec   :  { %v6197_v45 = vpack.c.bf16 %v6038_v52, %v6035_v6  ;;  %v6040_v48 = vpop.f32.mrb[235].mxu1 }
 0x9ee   :  { %23777 = vmatmul.mubr.bf16.gmra.mrb[4].mxu0 %v6197_v45 }
 0x9f1   :  { %v6043_v41 = vpop.f32.mrb[236].mxu1 }
 0x9f2   :  { %v6045_v10 = vpop.f32.mrb[237].mxu1 }
 0x9f3   :  { %v6046_v51 = vpop.f32.mrb[238].mxu1 }
 0x9f4   :  { %v6198_v23 = vpack.c.bf16 %v6046_v51, %v6043_v41  ;;  %v6048_v60 = vpop.f32.mrb[239].mxu1 }
 0x9f6   :  { %23780 = vmatprep.mubr.bf16.mxu0 %v6198_v23 }
 0x9f9   :  { %v6051_v28 = vpop.f32.mrb[240].mxu1 }
 0x9fa   :  { %v6053_v53 = vpop.f32.mrb[241].mxu1 }
 0x9fb   :  { %v6054_v59 = vpop.f32.mrb[242].mxu1 }
 0x9fc   :  { %v6199_v22 = vpack.c.bf16 %v6054_v59, %v6051_v28  ;;  %v6056_v12 = vpop.f32.mrb[243].mxu1 }
 0x9fe   :  { %23781 = vmatmul.mubr.bf16.gmra.mrb[8].mxu0 %v6199_v22 }
 0xa01   :  { %v6059_v56 = vpop.f32.mrb[244].mxu1 }
 0xa02   :  { %v6061_v30 = vpop.f32.mrb[245].mxu1 }
 0xa03   :  { %v6062_v1 = vpop.f32.mrb[246].mxu1 }
 0xa04   :  { %v6200_v57 = vpack.c.bf16 %v6062_v1, %v6059_v56  ;;  %v6064_v34 = vpop.f32.mrb[247].mxu1 }
 0xa06   :  { %23784 = vmatprep.mubr.bf16.mxu0 %v6200_v57 }
 0xa09   :  { %v6067_v17 = vpop.f32.mrb[248].mxu1 }
 0xa0a   :  { %v6069_v40 = vpop.f32.mrb[249].mxu1 }
 0xa0b   :  { %v6070_v14 = vpop.f32.mrb[250].mxu1 }
 0xa0c   :  { %v6201_v8 = vpack.c.bf16 %v6070_v14, %v6067_v17  ;;  %v6072_v58 = vpop.f32.mrb[251].mxu1 }
 0xa0e   :  { %23785 = vmatmul.mubr.bf16.gmra.mrb[12].mxu0 %v6201_v8 }
 0xa0f   :  { %23804 = vmatprep.mubr.bf16.mxu0 %v27521_v33 }
 0xab1   :  { %v23774_v61 = vpop.f32.mrb[0].mxu0 }
 0xab2   :  { %v8715_v55 = vpop.f32.mrb[1].mxu0 }
 0xab3   :  { %v23775_v21 = vpop.f32.mrb[2].mxu0 }
 0xab4   :  { %v8718_v15 = vpop.f32.mrb[3].mxu0 }
 0xab5   :  { %v9018_v42 = vadd.f32 %v8718_v15, %v8715_v55 }
 0xab7   :  { %v9019_v44 = vadd.f32 %v23774_v61, %v9018_v42 }
 0xab9   :  { %v9020_v5 = vadd.f32 %v23775_v21, %v9019_v44 }
 0xac1   :  { %v23778_v2 = vpop.f32.mrb[4].mxu0 }
 0xac2   :  { %v8731_v25 = vpop.f32.mrb[5].mxu0 }
 0xac3   :  { %v9021_v27 = vadd.f32 %v9020_v5, %v8731_v25  ;;  %v23779_v62 = vpop.f32.mrb[6].mxu0 }
 0xac4   :  { %v8734_v13 = vpop.f32.mrb[7].mxu0 }
 0xac5   :  { %v9022_v3 = vadd.f32 %v9021_v27, %v8734_v13 }
 0xac7   :  { %v9023_v7 = vadd.f32 %v23778_v2, %v9022_v3 }
 0xac9   :  { %v9024_v37 = vadd.f32 %v23779_v62, %v9023_v7 }
 0xad1   :  { %v23782_v31 = vpop.f32.mrb[8].mxu0 }
 0xad2   :  { %v8747_v29 = vpop.f32.mrb[9].mxu0 }
 0xad3   :  { %v9025_v46 = vadd.f32 %v9024_v37, %v8747_v29  ;;  %v23783_v16 = vpop.f32.mrb[10].mxu0 }
 0xad4   :  { %v8750_v11 = vpop.f32.mrb[11].mxu0 }
 0xad5   :  { %v9026_v26 = vadd.f32 %v9025_v46, %v8750_v11 }
 0xad7   :  { %v9027_v47 = vadd.f32 %v23782_v31, %v9026_v26 }
 0xad9   :  { %v9028_v36 = vadd.f32 %v23783_v16, %v9027_v47 }
 0xae1   :  { %v23786_v0 = vpop.f32.mrb[12].mxu0 }
 0xae2   :  { %v8763_v18 = vpop.f32.mrb[13].mxu0 }
 0xae3   :  { %v9029_v19 = vadd.f32 %v9028_v36, %v8763_v18  ;;  %v23787_v54 = vpop.f32.mrb[14].mxu0 }
 0xae4   :  { %v8766_v39 = vpop.f32.mrb[15].mxu0 }
 0xae5   :  { %v9030_v24 = vadd.f32 %v9029_v19, %v8766_v39 }
 0xae7   :  { %v9031_v49 = vadd.f32 %v23786_v0, %v9030_v24 }
 0xae9   :  { %v9032_v4 = vadd.f32 %v23787_v54, %v9031_v49 }
 0xaeb   :  { %v9033_v50 = vrot.slane %v9032_v4, 4 }
 0xaed   :  { %v9034_v32 = vadd.f32 %v9033_v50, %v9032_v4  ;;  %v30920_v4 = vld [vmem:[%s34704_s14] ss:$0 sm:$0xff] }
 0xaef   :  { %v9035_v9 = vrot.slane %v9034_v32, 2 }
 0xaf1   :  { %v9036_v20 = vadd.f32 %v9035_v9, %v9034_v32 }
 0xaf3   :  { %v9037_v43 = vrot.slane %v9036_v20, 1 }
 0xaf5   :  { %v9038_v63 = vadd.f32 %v9037_v43, %v9036_v20 }
 0xaf7   :  { %v9040_v38 = vmul.f32 0.0078125, %v9038_v63 }
 0xaf9   :  { %v30871_v6 = vsub.f32 %v8715_v55, %v9040_v38  ;;  %v30873_v35 = vsub.f32 %v8718_v15, %v9040_v38  ;;  %v30875_v52 = vsub.f32 %v23774_v61, %v9040_v38  ;;  %v30877_v45 = vsub.f32 %v23775_v21, %v9040_v38 }
 0xafa   :  { %v30879_v48 = vsub.f32 %v8731_v25, %v9040_v38  ;;  %v30881_v41 = vsub.f32 %v8734_v13, %v9040_v38  ;;  %v30883_v10 = vsub.f32 %v23778_v2, %v9040_v38  ;;  %v30885_v51 = vsub.f32 %v23779_v62, %v9040_v38 }
 0xafb   :  { %v30887_v23 = vsub.f32 %v8747_v29, %v9040_v38  ;;  %v30889_v60 = vsub.f32 %v8750_v11, %v9040_v38  ;;  %v30891_v28 = vsub.f32 %v23782_v31, %v9040_v38  ;;  %v9052_v53 = vsub.f32 %v23783_v16, %v9040_v38 }
 0xafc   :  { %v9053_v59 = vsub.f32 %v8763_v18, %v9040_v38  ;;  %v9054_v22 = vsub.f32 %v8766_v39, %v9040_v38  ;;  %v9055_v12 = vsub.f32 %v23786_v0, %v9040_v38  ;;  %v9056_v56 = vsub.f32 %v23787_v54, %v9040_v38 }
 0xafd   :  { %v9057_v30 = vmul.f32 %v30871_v6, %v30871_v6  ;;  %v9058_v1 = vmul.f32 %v30873_v35, %v30873_v35  ;;  %v9059_v57 = vmul.f32 %v30875_v52, %v30875_v52  ;;  %v9060_v17 = vmul.f32 %v30877_v45, %v30877_v45 }
 0xafe   :  { %v9061_v14 = vmul.f32 %v30879_v48, %v30879_v48  ;;  %v9062_v58 = vmul.f32 %v30881_v41, %v30881_v41  ;;  %v9063_v55 = vmul.f32 %v30883_v10, %v30883_v10  ;;  %v9064_v15 = vmul.f32 %v30885_v51, %v30885_v51 }
 0xaff   :  { %v9073_v34 = vadd.f32 %v9058_v1, %v9057_v30  ;;  %v9065_v44 = vmul.f32 %v30887_v23, %v30887_v23  ;;  %v9066_v2 = vmul.f32 %v30889_v60, %v30889_v60  ;;  %v9067_v27 = vmul.f32 %v30891_v28, %v30891_v28 }
 0xb00   :  { %v9068_v13 = vmul.f32 %v9052_v53, %v9052_v53  ;;  %v9069_v7 = vmul.f32 %v9053_v59, %v9053_v59  ;;  %v9070_v31 = vmul.f32 %v9054_v22, %v9054_v22  ;;  %v9071_v46 = vmul.f32 %v9055_v12, %v9055_v12 }
 0xb01   :  { %v9074_v40 = vadd.f32 %v9073_v34, %v9059_v57  ;;  %v9072_v11 = vmul.f32 %v9056_v56, %v9056_v56 }
 0xb03   :  { %v9075_v8 = vadd.f32 %v9074_v40, %v9060_v17 }
 0xb05   :  { %v9076_v61 = vadd.f32 %v9075_v8, %v9061_v14 }
 0xb07   :  { %v9077_v21 = vadd.f32 %v9076_v61, %v9062_v58 }
 0xb09   :  { %v9078_v42 = vadd.f32 %v9077_v21, %v9063_v55 }
 0xb0b   :  { %v9079_v5 = vadd.f32 %v9078_v42, %v9064_v15 }
 0xb0d   :  { %v9080_v25 = vadd.f32 %v9079_v5, %v9065_v44 }
 0xb0f   :  { %v9081_v62 = vadd.f32 %v9080_v25, %v9066_v2 }
 0xb11   :  { %v9082_v3 = vadd.f32 %v9081_v62, %v9067_v27 }
 0xb13   :  { %v9083_v37 = vadd.f32 %v9082_v3, %v9068_v13 }
 0xb15   :  { %v9084_v29 = vadd.f32 %v9083_v37, %v9069_v7 }
 0xb17   :  { %v9085_v16 = vadd.f32 %v9084_v29, %v9070_v31 }
 0xb19   :  { %v9086_v26 = vadd.f32 %v9085_v16, %v9071_v46 }
 0xb1b   :  { %v9087_v47 = vadd.f32 %v9086_v26, %v9072_v11 }
 0xb1d   :  { %v9088_v36 = vrot.slane %v9087_v47, 4 }
 0xb1f   :  { %v9089_v0 = vadd.f32 %v9088_v36, %v9087_v47 }
 0xb21   :  { %v9090_v18 = vrot.slane %v9089_v0, 2 }
 0xb23   :  { %v9091_v19 = vadd.f32 %v9090_v18, %v9089_v0 }
 0xb25   :  { %v9092_v54 = vrot.slane %v9091_v19, 1 }
 0xb27   :  { %v9093_v33 = vadd.f32 %v9092_v54, %v9091_v19 }
 0xb29   :  { %v9094_v39 = vmul.f32 0.0078125, %v9093_v33 }
 0xb2b   :  { %v9095_v24 = vadd.f32 1e-05, %v9094_v39 }
 0xb2d   :  { %28273 = vrsqrt.f32 %v9095_v24 }
 0xb37   :  { %v30915_v49 = vpop.eup %28273 }
 0xb38   :  { %v30923_v50 = vmul.f32 %v30915_v49, %v9052_v53  ;;  %v30926_v32 = vmul.f32 %v30915_v49, %v9053_v59  ;;  %v9110_v9 = vmul.f32 %v30915_v49, %v9054_v22  ;;  %v30930_v20 = vmul.f32 %v30915_v49, %v9055_v12  ;;  %v30945_v22 = vld [vmem:[%s34705_s15] ss:$0 sm:$0xff] }
 0xb39   :  { %v30933_v43 = vmul.f32 %v30915_v49, %v9056_v56  ;;  %v9097_v63 = vmul.f32 %v30915_v49, %v30871_v6  ;;  %v9098_v38 = vmul.f32 %v30915_v49, %v30873_v35  ;;  %v9099_v53 = vmul.f32 %v30915_v49, %v30875_v52 }
 0xb3a   :  { %v9131_v59 = vmul.f32 %v30920_v4, %v9110_v9  ;;  %v9100_v12 = vmul.f32 %v30915_v49, %v30877_v45  ;;  %v9101_v56 = vmul.f32 %v30915_v49, %v30879_v48  ;;  %v9102_v6 = vmul.f32 %v30915_v49, %v30881_v41 }
 0xb3b   :  { %v9118_v35 = vmul.f32 %v30920_v4, %v9097_v63  ;;  %v9119_v52 = vmul.f32 %v30920_v4, %v9098_v38  ;;  %v9120_v30 = vmul.f32 %v30920_v4, %v9099_v53  ;;  %v9103_v1 = vmul.f32 %v30915_v49, %v30883_v10 }
 0xb3c   :  { %v9121_v57 = vmul.f32 %v30920_v4, %v9100_v12  ;;  %v9122_v34 = vmul.f32 %v30920_v4, %v9101_v56  ;;  %v9123_v45 = vmul.f32 %v30920_v4, %v9102_v6  ;;  %v9104_v40 = vmul.f32 %v30915_v49, %v30885_v51 }
 0xb3d   :  { %v9139_v48 = vadd.f32 %v30945_v22, %v9118_v35  ;;  %v9140_v17 = vadd.f32 %v30945_v22, %v9119_v52  ;;  %v9141_v41 = vadd.f32 %v30945_v22, %v9120_v30  ;;  %v30967_v14 = vadd.f32 %v30945_v22, %v9131_v59 }
 0xb3e   :  { %v9142_v10 = vadd.f32 %v30945_v22, %v9121_v57  ;;  %v9143_v8 = vadd.f32 %v30945_v22, %v9122_v34  ;;  %v9144_v58 = vadd.f32 %v30945_v22, %v9123_v45  ;;  %v9124_v13 = vmul.f32 %v30920_v4, %v9103_v1 }
 0xb3f   :  { %vm9155_vm0 = vcmp.ge.f32.partialorder %v9139_v48, 0.0  ;;  %vm9156_vm1 = vcmp.ge.f32.partialorder %v9140_v17, 0.0  ;;  %v9171_v61 = vmul.f32 0.2, %v9139_v48  ;;  %v9172_v55 = vmul.f32 0.2, %v9140_v17 }
 0xb40   :  { %vm9157_vm2 = vcmp.ge.f32.partialorder %v9141_v41, 0.0  ;;  %vm9158_vm3 = vcmp.ge.f32.partialorder %v9142_v10, 0.0  ;;  %v9173_v21 = vmul.f32 0.2, %v9141_v41  ;;  %v9174_v15 = vmul.f32 0.2, %v9142_v10 }
 0xb41   :  { %v9187_v42 = vsel %vm9155_vm0, %v9139_v48, %v9171_v61  ;;  %v9188_v44 = vsel %vm9156_vm1, %v9140_v17, %v9172_v55  ;;  %vm9159_vm4 = vcmp.ge.f32.partialorder %v9143_v8, 0.0  ;;  %vm9160_vm5 = vcmp.ge.f32.partialorder %v9144_v58, 0.0  ;;  %v27534_v61 = vld [vmem:[%s34699_s9 + $0x8] sm:$0xff]   ;;  %v27537_v55 = vld [vmem:[%s34699_s9 + $0x10] sm:$0xff]  }
 0xb42   :  { %v9203_v51 = vpack.c.bf16 %v9188_v44, %v9187_v42  ;;  %v9189_v5 = vsel %vm9157_vm2, %v9141_v41, %v9173_v21  ;;  %v9190_v2 = vsel %vm9158_vm3, %v9142_v10, %v9174_v15  ;;  %v9175_v25 = vmul.f32 0.2, %v9143_v8  ;;  %v27524_v21 = vld [vmem:[%s34693_s3 + $0x18] sm:$0xff]   ;;  %v27525_v15 = vld [vmem:[%s34693_s3 + $0x20] sm:$0xff]  }
 0xb43   :  { %v9204_v27 = vpack.c.bf16 %v9190_v2, %v9189_v5  ;;  %v9176_v62 = vmul.f32 0.2, %v9144_v58  ;;  %v9125_v3 = vmul.f32 %v30920_v4, %v9104_v40  ;;  %v9105_v37 = vmul.f32 %v30915_v49, %v30887_v23  ;;  %v27538_v42 = vld [vmem:[%s34699_s9 + $0x18] sm:$0xff]   ;;  %v27540_v44 = vld [vmem:[%s34699_s9 + $0x20] sm:$0xff]   ;;  %v27527_v5 = vld [vmem:[%s34693_s3 + $0x30] sm:$0xff]  }
 0xb44   :  { %23788 = vmatprep.subr.bf16.mxu0 %v9203_v51  ;;  %25638 = vmatprep.subr.bf16.mxu1 %v9203_v51  ;;  %v9191_v7 = vsel %vm9159_vm4, %v9143_v8, %v9175_v25  ;;  %v9106_v31 = vmul.f32 %v30915_v49, %v30889_v60  ;;  %v9145_v46 = vadd.f32 %v30945_v22, %v9124_v13  ;;  %v9184_v11 = vmul.f32 0.2, %v30967_v14  ;;  %v27522_v8 = vld [vmem:[%s34693_s3 + $0x8] sm:$0xff]   ;;  %v27544_v25 = vld [vmem:[%s34699_s9 + $0x30] sm:$0xff]  }
 0xb45   :  { %23789 = vmatpush3.bf16.msra.mxu0 %v9203_v51  ;;  %25646 = vmatpush3.bf16.msra.mxu1 %v9203_v51  ;;  %v9192_v29 = vsel %vm9160_vm5, %v9144_v58, %v9176_v62  ;;  %v9146_v16 = vadd.f32 %v30945_v22, %v9125_v3  ;;  %v9126_v47 = vmul.f32 %v30920_v4, %v9105_v37  ;;  %vm9168_vm8 = vcmp.ge.f32.partialorder %v30967_v14, 0.0  ;;  %v27523_v58 = vld [vmem:[%s34693_s3 + $0x10] sm:$0xff]   ;;  %v27526_v51 = vld [vmem:[%s34693_s3 + $0x28] sm:$0xff]   ;;  %v27529_v62 = vld [vmem:[%s34693_s3 + $0x40] sm:$0xff]  }
 0xb46   :  { %23790 = vmatprep.subr.bf16.mxu0 %v9204_v27  ;;  %25639 = vmatprep.subr.bf16.mxu1 %v9204_v27  ;;  %v9205_v26 = vpack.c.bf16 %v9192_v29, %v9191_v7  ;;  %v9127_v23 = vmul.f32 %v30920_v4, %v9106_v31  ;;  %vm9161_vm6 = vcmp.ge.f32.partialorder %v9145_v46, 0.0  ;;  %v9177_v60 = vmul.f32 0.2, %v9145_v46  ;;  %v27542_v2 = vld [vmem:[%s34699_s9 + $0x28] sm:$0xff]   ;;  %v27531_v3 = vld [vmem:[%s34693_s3 + $0x50] sm:$0xff]   ;;  %v27532_v7 = vld [vmem:[%s34693_s3 + $0x58] sm:$0xff]  }
 0xb47   :  { %vm9162_vm7 = vcmp.ge.f32.partialorder %v9146_v16, 0.0  ;;  %v9178_v36 = vmul.f32 0.2, %v9146_v16  ;;  %v9147_v0 = vadd.f32 %v30945_v22, %v9126_v47  ;;  %v9107_v19 = vmul.f32 %v30915_v49, %v30891_v28  ;;  %v27530_v13 = vld [vmem:[%s34693_s3 + $0x48] sm:$0xff]   ;;  %v27535_v37 = vld [vmem:[%s34693_s3 + $0x60] sm:$0xff]   ;;  %v27539_v29 = vld [vmem:[%s34693_s3 + $0x70] sm:$0xff]  }
 0xb48   :  { %v9148_v18 = vadd.f32 %v30945_v22, %v9127_v23  ;;  %v9129_v54 = vmul.f32 %v30920_v4, %v30923_v50  ;;  %v9193_v33 = vsel %vm9161_vm6, %v9145_v46, %v9177_v60  ;;  %v9130_v24 = vmul.f32 %v30920_v4, %v30926_v32  ;;  %v27536_v31 = vld [vmem:[%s34693_s3 + $0x68] sm:$0xff]   ;;  %v27541_v46 = vld [vmem:[%s34693_s3 + $0x78] sm:$0xff]   ;;  %v27547_v47 = vld [vmem:[%s34699_s9 + $0x40] sm:$0xff]  }
 0xb49   :  { %23791 = vmatpush3.bf16.msra.mxu0 %v9204_v27  ;;  %25647 = vmatpush3.bf16.msra.mxu1 %v9204_v27  ;;  %v9194_v39 = vsel %vm9162_vm7, %v9146_v16, %v9178_v36  ;;  %vm9163_vm9 = vcmp.ge.f32.partialorder %v9147_v0, 0.0  ;;  %v9179_v63 = vmul.f32 0.2, %v9147_v0  ;;  %v9128_v28 = vmul.f32 %v30920_v4, %v9107_v19  ;;  %v27528_v27 = vld [vmem:[%s34693_s3 + $0x38] sm:$0xff]   ;;  %v27543_v16 = vld [vmem:[%s34693_s3 + $0x80] sm:$0xff]   ;;  %v27565_v23 = vld [vmem:[%s34693_s3 + $0x90] sm:$0xff]  }
 0xb4a   :  { %23792 = vmatprep.subr.bf16.mxu0 %v9205_v26  ;;  %25640 = vmatprep.subr.bf16.mxu1 %v9205_v26  ;;  %v9206_v9 = vpack.c.bf16 %v9194_v39, %v9193_v33  ;;  %vm9164_vm10 = vcmp.ge.f32.partialorder %v9148_v18, 0.0  ;;  %v9180_v38 = vmul.f32 0.2, %v9148_v18  ;;  %v9150_v49 = vadd.f32 %v30945_v22, %v9129_v54  ;;  %v27566_v60 = vld [vmem:[%s34693_s3 + $0x98] sm:$0xff]   ;;  %v27575_v36 = vld [vmem:[%s34693_s3 + $0xa0] sm:$0xff]  }
 0xb4b   :  { %v9151_v50 = vadd.f32 %v30945_v22, %v9130_v24  ;;  %v9195_v53 = vsel %vm9163_vm9, %v9147_v0, %v9179_v63  ;;  %v9200_v59 = vsel %vm9168_vm8, %v30967_v14, %v9184_v11  ;;  %v9132_v32 = vmul.f32 %v30920_v4, %v30930_v20  ;;  %v27545_v11 = vld [vmem:[%s34693_s3 + $0x88] sm:$0xff]   ;;  %23840 = vmatprep.mubr.bf16.mxu1 %v27565_v23 }
 0xb4c   :  { %v9133_v12 = vmul.f32 %v30920_v4, %v30933_v43  ;;  %v9196_v56 = vsel %vm9164_vm10, %v9148_v18, %v9180_v38  ;;  %v9149_v6 = vadd.f32 %v30945_v22, %v9128_v28  ;;  %vm9166_vm11 = vcmp.ge.f32.partialorder %v9150_v49, 0.0  ;;  %v27576_v0 = vld [vmem:[%s34693_s3 + $0xa8] sm:$0xff]   ;;  %v27549_v38 = vld [vmem:[%s34699_s9 + $0x50] sm:$0xff]  }
 0xb4d   :  { %23793 = vmatpush3.bf16.msra.mxu0 %v9205_v26  ;;  %25648 = vmatpush3.bf16.msra.mxu1 %v9205_v26  ;;  %v9182_v35 = vmul.f32 0.2, %v9150_v49  ;;  %v9207_v52 = vpack.c.bf16 %v9196_v56, %v9195_v53  ;;  %vm9167_vm12 = vcmp.ge.f32.partialorder %v9151_v50, 0.0  ;;  %v9183_v30 = vmul.f32 0.2, %v9151_v50  ;;  %v27546_v26 = vld [vmem:[%s34699_s9 + $0x38] sm:$0xff]  }
 0xb4e   :  { %23794 = vmatprep.subr.bf16.mxu0 %v9206_v9  ;;  %25641 = vmatprep.subr.bf16.mxu1 %v9206_v9  ;;  %v9153_v1 = vadd.f32 %v30945_v22, %v9132_v32  ;;  %vm9165_vm13 = vcmp.ge.f32.partialorder %v9149_v6, 0.0  ;;  %v9181_v57 = vmul.f32 0.2, %v9149_v6  ;;  %v9154_v34 = vadd.f32 %v30945_v22, %v9133_v12  ;;  %v27533_v22 = vld [vmem:[%s34699_s9] sm:$0xff]   ;;  %v27585_v32 = vld [vmem:[%s34693_s3 + $0xb0] sm:$0xff]   ;;  %v27586_v12 = vld [vmem:[%s34693_s3 + $0xb8] sm:$0xff]  }
 0xb4f   :  { %v9198_v20 = vsel %vm9166_vm11, %v9150_v49, %v9182_v35  ;;  %v9199_v4 = vsel %vm9167_vm12, %v9151_v50, %v9183_v30  ;;  %v27550_v56 = vld [vmem:[%s34699_s9 + $0x58] sm:$0xff]   ;;  %v27551_v35 = vld [vmem:[%s34699_s9 + $0x60] sm:$0xff]   ;;  %vm11835_vm0 = vcmask 261120   ;;  %vm28307_vm5 = vmmov 0  }
 0xb50   :  { %vm9169_vm14 = vcmp.ge.f32.partialorder %v9153_v1, 0.0  ;;  %v9185_v43 = vmul.f32 0.2, %v9153_v1  ;;  %v9197_v45 = vsel %vm9165_vm13, %v9149_v6, %v9181_v57  ;;  %v9209_v48 = vpack.c.bf16 %v9200_v59, %v9199_v4 }
 0xb51   :  { %23795 = vmatpush3.bf16.msra.mxu0 %v9206_v9  ;;  %25649 = vmatpush3.bf16.msra.mxu1 %v9206_v9  ;;  %vm9170_vm15 = vcmp.ge.f32.partialorder %v9154_v34, 0.0  ;;  %v9186_v17 = vmul.f32 0.2, %v9154_v34  ;;  %v9208_v41 = vpack.c.bf16 %v9198_v20, %v9197_v45  ;;  %v27548_v9 = vld [vmem:[%s34699_s9 + $0x48] sm:$0xff]   ;;  %vm13937_vm6 = vcmask 130048  }
 0xb52   :  { %23796 = vmatprep.subr.bf16.mxu0 %v9207_v52  ;;  %25642 = vmatprep.subr.bf16.mxu1 %v9207_v52  ;;  %v9201_v40 = vsel %vm9169_vm14, %v9153_v1, %v9185_v43  ;;  %v27553_v43 = vld [vmem:[%s34699_s9 + $0x70] sm:$0xff]   ;;  %vm28308_vm9 = vmmov 1  }
 0xb53   :  { %v9202_v14 = vsel %vm9170_vm15, %v9154_v34, %v9186_v17  ;;  %v27552_v34 = vld [vmem:[%s34699_s9 + $0x68] sm:$0xff]  }
 0xb54   :  { %v9210_v10 = vpack.c.bf16 %v9202_v14, %v9201_v40  ;;  %v27554_v14 = vld [vmem:[%s34699_s9 + $0x78] sm:$0xff]  }
 0xb55   :  { %23797 = vmatpush3.bf16.msra.mxu0 %v9207_v52  ;;  %25650 = vmatpush3.bf16.msra.mxu1 %v9207_v52 }
 0xb56   :  { %23798 = vmatprep.subr.bf16.mxu0 %v9208_v41  ;;  %25643 = vmatprep.subr.bf16.mxu1 %v9208_v41 }
 0xb59   :  { %23799 = vmatpush3.bf16.msra.mxu0 %v9208_v41  ;;  %25651 = vmatpush3.bf16.msra.mxu1 %v9208_v41 }
 0xb5a   :  { %23800 = vmatprep.subr.bf16.mxu0 %v9209_v48  ;;  %25644 = vmatprep.subr.bf16.mxu1 %v9209_v48 }
 0xb5d   :  { %23801 = vmatpush3.bf16.msra.mxu0 %v9209_v48  ;;  %25652 = vmatpush3.bf16.msra.mxu1 %v9209_v48 }
 0xb5e   :  { %23802 = vmatprep.subr.bf16.mxu0 %v9210_v10  ;;  %25645 = vmatprep.subr.bf16.mxu1 %v9210_v10 }
 0xb61   :  { %23803 = vmatpush3.bf16.msra.mxu0 %v9210_v10  ;;  %25653 = vmatpush3.bf16.msra.mxu1 %v9210_v10 }
 0xb62   :  { %23868 = vmatprep.subr.bf16.mxu0 %v27533_v22 }
 0xb64   :  { %23805 = vmatmul.mubr.bf16.vlgmr.msra.gmra.mrb[16].mxu0 %v27522_v8  ;;  %23841 = vmatmul.mubr.bf16.vlgmr.msra.gmra.mrb[172].mxu1 %v27566_v60 }
 0xb65   :  { %23808 = vmatprep.mubr.bf16.mxu0 %v27523_v58  ;;  %23869 = vmatpush3.bf16.msra.mxu0 %v27533_v22  ;;  %v27555_v22 = vld [vmem:[%s34699_s9 + $0x80] sm:$0xff]  }
 0xb66   :  { %23870 = vmatprep.subr.bf16.mxu0 %v27534_v61  ;;  %23844 = vmatprep.mubr.bf16.mxu1 %v27575_v36  ;;  %v27564_v36 = vld [vmem:[%s34699_s9 + $0xc8] sm:$0xff]  }
 0xb69   :  { %23871 = vmatpush3.bf16.msra.mxu0 %v27534_v61 }
 0xb6a   :  { %23872 = vmatprep.subr.bf16.mxu0 %v27537_v55 }
 0xb6c   :  { %23809 = vmatmul.mubr.bf16.gmra.mrb[20].mxu0 %v27524_v21  ;;  %23845 = vmatmul.mubr.bf16.gmra.mrb[176].mxu1 %v27576_v0  ;;  %v27567_v0 = vld [vmem:[%s34699_s9 + $0xd0] sm:$0xff]  }
 0xb6d   :  { %23812 = vmatprep.mubr.bf16.mxu0 %v27525_v15  ;;  %23873 = vmatpush3.bf16.msra.mxu0 %v27537_v55  ;;  %v27556_v15 = vld [vmem:[%s34699_s9 + $0x88] sm:$0xff]  }
 0xb6e   :  { %23874 = vmatprep.subr.bf16.mxu0 %v27538_v42  ;;  %23848 = vmatprep.mubr.bf16.mxu1 %v27585_v32 }
 0xb71   :  { %23875 = vmatpush3.bf16.msra.mxu0 %v27538_v42 }
 0xb72   :  { %23876 = vmatprep.subr.bf16.mxu0 %v27540_v44 }
 0xb74   :  { %23813 = vmatmul.mubr.bf16.gmra.mrb[24].mxu0 %v27526_v51  ;;  %23849 = vmatmul.mubr.bf16.gmra.mrb[180].mxu1 %v27586_v12 }
 0xb75   :  { %23816 = vmatprep.mubr.bf16.mxu0 %v27527_v5  ;;  %23877 = vmatpush3.bf16.msra.mxu0 %v27540_v44  ;;  %v27557_v44 = vld [vmem:[%s34699_s9 + $0x90] sm:$0xff]  }
 0xb76   :  { %23878 = vmatprep.subr.bf16.mxu0 %v27542_v2 }
 0xb79   :  { %23879 = vmatpush3.bf16.msra.mxu0 %v27542_v2 }
 0xb7a   :  { %23880 = vmatprep.subr.bf16.mxu0 %v27544_v25 }
 0xb7c   :  { %23817 = vmatmul.mubr.bf16.gmra.mrb[28].mxu0 %v27528_v27 }
 0xb7d   :  { %23820 = vmatprep.mubr.bf16.mxu0 %v27529_v62  ;;  %23881 = vmatpush3.bf16.msra.mxu0 %v27544_v25  ;;  %v27595_v62 = vld [vmem:[%s34693_s3 + $0xc0] sm:$0xff]  }
 0xb7e   :  { %23882 = vmatprep.subr.bf16.mxu0 %v27546_v26  ;;  %23852 = vmatprep.mubr.bf16.mxu1 %v27595_v62 }
 0xb81   :  { %23883 = vmatpush3.bf16.msra.mxu0 %v27546_v26 }
 0xb82   :  { %23888 = vmatprep.subr.bf16.mxu0 %v27547_v47 }
 0xb84   :  { %23821 = vmatmul.mubr.bf16.gmra.mrb[32].mxu0 %v27530_v13  ;;  %v27596_v13 = vld [vmem:[%s34693_s3 + $0xc8] sm:$0xff]  }
 0xb85   :  { %23824 = vmatprep.mubr.bf16.mxu0 %v27531_v3  ;;  %v27558_v3 = vld [vmem:[%s34699_s9 + $0x98] sm:$0xff]   ;;  %23853 = vmatmul.mubr.bf16.gmra.mrb[184].mxu1 %v27596_v13 }
 0xb8c   :  { %23825 = vmatmul.mubr.bf16.gmra.mrb[36].mxu0 %v27532_v7  ;;  %v27559_v7 = vld [vmem:[%s34699_s9 + $0xa0] sm:$0xff]  }
 0xb8d   :  { %23828 = vmatprep.mubr.bf16.mxu0 %v27535_v37  ;;  %v27560_v37 = vld [vmem:[%s34699_s9 + $0xa8] sm:$0xff]  }
 0xb94   :  { %23829 = vmatmul.mubr.bf16.gmra.mrb[40].mxu0 %v27536_v31  ;;  %v27561_v31 = vld [vmem:[%s34699_s9 + $0xb0] sm:$0xff]  }
 0xb95   :  { %23832 = vmatprep.mubr.bf16.mxu0 %v27539_v29  ;;  %v27562_v29 = vld [vmem:[%s34699_s9 + $0xb8] sm:$0xff]  }
 0xb9c   :  { %23833 = vmatmul.mubr.bf16.gmra.mrb[44].mxu0 %v27541_v46 }
 0xb9d   :  { %23836 = vmatprep.mubr.bf16.mxu0 %v27543_v16  ;;  %v27563_v16 = vld [vmem:[%s34699_s9 + $0xc0] sm:$0xff]  }
 0xba4   :  { %23837 = vmatmul.mubr.bf16.gmra.mrb[48].mxu0 %v27545_v11 }
 0xc37   :  { %v23806_v18 = vpop.f32.mrb[16].mxu0 }
 0xc38   :  { %v9501_v19 = vpop.f32.mrb[17].mxu0 }
 0xc39   :  { %v23807_v54 = vpop.f32.mrb[18].mxu0 }
 0xc3a   :  { %v9757_v33 = vpack.c.bf16 %v23807_v54, %v23806_v18  ;;  %v9504_v39 = vpop.f32.mrb[19].mxu0  ;;  %v27605_v18 = vld [vmem:[%s34693_s3 + $0xd0] sm:$0xff]   ;;  %v27568_v54 = vld [vmem:[%s34699_s9 + $0xd8] sm:$0xff]  }
 0xc3b   :  { %v9756_v24 = vpack.c.bf16 %v9504_v39, %v9501_v19  ;;  %v27606_v19 = vld [vmem:[%s34693_s3 + $0xd8] sm:$0xff]   ;;  %23856 = vmatprep.mubr.bf16.mxu1 %v27605_v18  ;;  %v27570_v39 = vld [vmem:[%s34699_s9 + $0xe8] sm:$0xff]   ;;  %v27607_v18 = vld [vmem:[%s34699_s9 + $0x1d0] sm:$0xff]  }
 0xc3c   :  { %23857 = vmatmul.mubr.bf16.gmra.mrb[188].mxu1 %v27606_v19  ;;  %v27608_v19 = vld [vmem:[%s34699_s9 + $0x1d8] sm:$0xff]  }
 0xc3d   :  { %23884 = vmatprep.mubr.bf16.mxu0 %v9756_v24  ;;  %v27571_v24 = vld [vmem:[%s34699_s9 + $0xf0] sm:$0xff]  }
 0xc3e   :  { %23885 = vmatmul.mubr.bf16.vlgmr.msra.gmra.mrb[52].mxu0 %v9757_v33  ;;  %v27569_v33 = vld [vmem:[%s34699_s9 + $0xe0] sm:$0xff]  }
 0xc3f   :  { %23889 = vmatpush3.bf16.msra.mxu0 %v27547_v47  ;;  %v23810_v63 = vpop.f32.mrb[20].mxu0 }
 0xc40   :  { %23890 = vmatprep.subr.bf16.mxu0 %v27548_v9  ;;  %v9517_v28 = vpop.f32.mrb[21].mxu0 }
 0xc41   :  { %v23811_v49 = vpop.f32.mrb[22].mxu0 }
 0xc42   :  { %v9759_v50 = vpack.c.bf16 %v23811_v49, %v23810_v63  ;;  %v9520_v53 = vpop.f32.mrb[23].mxu0  ;;  %v27572_v49 = vld [vmem:[%s34699_s9 + $0xf8] sm:$0xff]  }
 0xc43   :  { %23891 = vmatpush3.bf16.msra.mxu0 %v27548_v9  ;;  %v9758_v59 = vpack.c.bf16 %v9520_v53, %v9517_v28 }
 0xc44   :  { %23892 = vmatprep.subr.bf16.mxu0 %v27549_v38 }
 0xc45   :  { %23904 = vmatprep.mubr.bf16.mxu0 %v9758_v59  ;;  %v27573_v59 = vld [vmem:[%s34699_s9 + $0x100] sm:$0xff]  }
 0xc47   :  { %23893 = vmatpush3.bf16.msra.mxu0 %v27549_v38  ;;  %v31109_v6 = vpop.f32.mrb[24].mxu0 }
 0xc48   :  { %23894 = vmatprep.subr.bf16.mxu0 %v27550_v56  ;;  %v9533_v52 = vpop.f32.mrb[25].mxu0 }
 0xc49   :  { %v31114_v30 = vpop.f32.mrb[26].mxu0 }
 0xc4a   :  { %v9761_v1 = vpack.c.bf16 %v31114_v30, %v31109_v6  ;;  %v9536_v57 = vpop.f32.mrb[27].mxu0 }
 0xc4b   :  { %23895 = vmatpush3.bf16.msra.mxu0 %v27550_v56  ;;  %v9760_v20 = vpack.c.bf16 %v9536_v57, %v9533_v52  ;;  %v27615_v57 = vld [vmem:[%s34693_s3 + $0xe0] sm:$0xff]  }
 0xc4c   :  { %23896 = vmatprep.subr.bf16.mxu0 %v27551_v35  ;;  %23860 = vmatprep.mubr.bf16.mxu1 %v27615_v57 }
 0xc4f   :  { %23897 = vmatpush3.bf16.msra.mxu0 %v27551_v35  ;;  %v31121_v4 = vpop.f32.mrb[28].mxu0  ;;  %v27574_v35 = vld [vmem:[%s34699_s9 + $0x108] sm:$0xff]  }
 0xc50   :  { %23898 = vmatprep.subr.bf16.mxu0 %v27552_v34  ;;  %v31126_v45 = vpop.f32.mrb[29].mxu0 }
 0xc51   :  { %v31128_v48 = vpop.f32.mrb[30].mxu0 }
 0xc52   :  { %v9763_v17 = vpack.c.bf16 %v31128_v48, %v31121_v4  ;;  %v9552_v41 = vpop.f32.mrb[31].mxu0  ;;  %v27579_v4 = vld [vmem:[%s34699_s9 + $0x120] sm:$0xff]   ;;  %v27582_v48 = vld [vmem:[%s34699_s9 + $0x138] sm:$0xff]  }
 0xc53   :  { %23899 = vmatpush3.bf16.msra.mxu0 %v27552_v34  ;;  %v9762_v40 = vpack.c.bf16 %v9552_v41, %v31126_v45  ;;  %v27578_v34 = vld [vmem:[%s34699_s9 + $0x118] sm:$0xff]   ;;  %v27581_v45 = vld [vmem:[%s34699_s9 + $0x130] sm:$0xff]   ;;  %v27584_v41 = vld [vmem:[%s34699_s9 + $0x148] sm:$0xff]  }
 0xc54   :  { %23900 = vmatprep.subr.bf16.mxu0 %v27553_v43 }
 0xc57   :  { %23901 = vmatpush3.bf16.msra.mxu0 %v27553_v43  ;;  %v31136_v10 = vpop.f32.mrb[32].mxu0  ;;  %v27580_v43 = vld [vmem:[%s34699_s9 + $0x128] sm:$0xff]  }
 0xc58   :  { %23902 = vmatprep.subr.bf16.mxu0 %v27554_v14  ;;  %v31141_v8 = vpop.f32.mrb[33].mxu0 }
 0xc59   :  { %v31143_v58 = vpop.f32.mrb[34].mxu0 }
 0xc5a   :  { %v9765_v61 = vpack.c.bf16 %v31143_v58, %v31136_v10  ;;  %v31147_v55 = vpop.f32.mrb[35].mxu0  ;;  %v27626_v10 = vld [vmem:[%s34693_s3 + $0xf8] sm:$0xff]   ;;  %v27590_v58 = vld [vmem:[%s34699_s9 + $0x168] sm:$0xff]  }
 0xc5b   :  { %23903 = vmatpush3.bf16.msra.mxu0 %v27554_v14  ;;  %v9764_v21 = vpack.c.bf16 %v31147_v55, %v31141_v8  ;;  %v27625_v14 = vld [vmem:[%s34693_s3 + $0xf0] sm:$0xff]   ;;  %v27589_v8 = vld [vmem:[%s34699_s9 + $0x160] sm:$0xff]   ;;  %v27592_v55 = vld [vmem:[%s34699_s9 + $0x178] sm:$0xff]  }
 0xc5c   :  { %23908 = vmatprep.subr.bf16.mxu0 %v27555_v22 }
 0xc5e   :  { %23905 = vmatmul.mubr.bf16.vlgmr.msra.gmra.mrb[52].mxu0 %v9759_v50 }
 0xc5f   :  { %23909 = vmatpush3.bf16.msra.mxu0 %v27555_v22  ;;  %23924 = vmatprep.mubr.bf16.mxu0 %v9760_v20  ;;  %v31154_v42 = vpop.f32.mrb[36].mxu0  ;;  %v27616_v20 = vld [vmem:[%s34693_s3 + $0xe8] sm:$0xff]   ;;  %v27588_v22 = vld [vmem:[%s34699_s9 + $0x158] sm:$0xff]  }
 0xc60   :  { %23910 = vmatprep.subr.bf16.mxu0 %v27556_v15  ;;  %v31159_v51 = vpop.f32.mrb[37].mxu0  ;;  %23861 = vmatmul.mubr.bf16.gmra.mrb[192].mxu1 %v27616_v20 }
 0xc61   :  { %v31161_v5 = vpop.f32.mrb[38].mxu0  ;;  %23864 = vmatprep.mubr.bf16.mxu1 %v27625_v14 }
 0xc62   :  { %v9767_v2 = vpack.c.bf16 %v31161_v5, %v31154_v42  ;;  %v31165_v25 = vpop.f32.mrb[39].mxu0  ;;  %v27599_v42 = vld [vmem:[%s34699_s9 + $0x1a0] sm:$0xff]   ;;  %v27600_v5 = vld [vmem:[%s34699_s9 + $0x1a8] sm:$0xff]  }
 0xc63   :  { %23911 = vmatpush3.bf16.msra.mxu0 %v27556_v15  ;;  %v9766_v27 = vpack.c.bf16 %v31165_v25, %v31159_v51  ;;  %v31334_v15 = vpop.f32.mrb[172].mxu1  ;;  %v27594_v25 = vld [vmem:[%s34699_s9 + $0x188] sm:$0xff]  }
 0xc64   :  { %23912 = vmatprep.subr.bf16.mxu0 %v27557_v44 }
 0xc67   :  { %23913 = vmatpush3.bf16.msra.mxu0 %v27557_v44  ;;  %v31190_v46 = vpop.f32.mrb[40].mxu0  ;;  %v31336_v44 = vpop.f32.mrb[173].mxu1 }
 0xc68   :  { %23914 = vmatprep.subr.bf16.mxu0 %v27558_v3  ;;  %v31195_v11 = vpop.f32.mrb[41].mxu0  ;;  %23865 = vmatmul.mubr.bf16.gmra.mrb[196].mxu1 %v27626_v10  ;;  %v31338_v51 = vpop.f32.mrb[174].mxu1 }
 0xc69   :  { %v31197_v26 = vpop.f32.mrb[42].mxu0  ;;  %v31345_v62 = vpop.f32.mrb[175].mxu1 }
 0xc6a   :  { %v9769_v47 = vpack.c.bf16 %v31197_v26, %v31190_v46  ;;  %v31201_v23 = vpop.f32.mrb[43].mxu0  ;;  %v9774_v13 = vpack.c.bf16 %v31345_v62, %v31336_v44  ;;  %v27609_v46 = vld [vmem:[%s34699_s9 + $0x1e0] sm:$0xff]   ;;  %v27610_v26 = vld [vmem:[%s34699_s9 + $0x1e8] sm:$0xff]   ;;  %v27636_v44 = vld [vmem:[%s34699_s9 + $0x298] sm:$0xff]  }
 0xc6b   :  { %23915 = vmatpush3.bf16.msra.mxu0 %v27558_v3  ;;  %v9768_v60 = vpack.c.bf16 %v31201_v23, %v31195_v11  ;;  %v27597_v3 = vld [vmem:[%s34699_s9 + $0x190] sm:$0xff]   ;;  %v27604_v23 = vld [vmem:[%s34699_s9 + $0x1c8] sm:$0xff]   ;;  %v27641_v62 = vld [vmem:[%s34699_s9 + $0x2c0] sm:$0xff]  }
 0xc6c   :  { %23916 = vmatprep.subr.bf16.mxu0 %v27559_v7 }
 0xc6f   :  { %23917 = vmatpush3.bf16.msra.mxu0 %v27559_v7  ;;  %v31232_v9 = vpop.f32.mrb[44].mxu0  ;;  %v27598_v7 = vld [vmem:[%s34699_s9 + $0x198] sm:$0xff]  }
 0xc70   :  { %23918 = vmatprep.subr.bf16.mxu0 %v27560_v37  ;;  %v31234_v63 = vpop.f32.mrb[45].mxu0 }
 0xc71   :  { %v31236_v38 = vpop.f32.mrb[46].mxu0 }
 0xc72   :  { %v31238_v28 = vpop.f32.mrb[47].mxu0  ;;  %v9771_v50 = vpack.c.bf16 %v31236_v38, %v31232_v9  ;;  %v27619_v9 = vld [vmem:[%s34699_s9 + $0x220] sm:$0xff]   ;;  %v27620_v38 = vld [vmem:[%s34699_s9 + $0x228] sm:$0xff]  }
 0xc73   :  { %23919 = vmatpush3.bf16.msra.mxu0 %v27560_v37  ;;  %v9770_v53 = vpack.c.bf16 %v31238_v28, %v31234_v63  ;;  %v27602_v37 = vld [vmem:[%s34699_s9 + $0x1b8] sm:$0xff]   ;;  %v27614_v28 = vld [vmem:[%s34699_s9 + $0x208] sm:$0xff]  }
 0xc74   :  { %23920 = vmatprep.subr.bf16.mxu0 %v27561_v31 }
 0xc77   :  { %23921 = vmatpush3.bf16.msra.mxu0 %v27561_v31  ;;  %v31250_v32 = vpop.f32.mrb[48].mxu0  ;;  %v27603_v31 = vld [vmem:[%s34699_s9 + $0x1c0] sm:$0xff]  }
 0xc78   :  { %23922 = vmatprep.subr.bf16.mxu0 %v27562_v29  ;;  %v31252_v12 = vpop.f32.mrb[49].mxu0 }
 0xc79   :  { %v31254_v56 = vpop.f32.mrb[50].mxu0 }
 0xc7a   :  { %v31256_v6 = vpop.f32.mrb[51].mxu0  ;;  %v9773_v52 = vpack.c.bf16 %v31254_v56, %v31250_v32  ;;  %v27629_v32 = vld [vmem:[%s34699_s9 + $0x260] sm:$0xff]   ;;  %v27630_v56 = vld [vmem:[%s34699_s9 + $0x268] sm:$0xff]  }
 0xc7b   :  { %23923 = vmatpush3.bf16.msra.mxu0 %v27562_v29  ;;  %v9772_v30 = vpack.c.bf16 %v31256_v6, %v31252_v12  ;;  %v31376_v29 = vpop.f32.mrb[176].mxu1  ;;  %v27622_v12 = vld [vmem:[%s34699_s9 + $0x238] sm:$0xff]   ;;  %v27623_v6 = vld [vmem:[%s34699_s9 + $0x240] sm:$0xff]  }
 0xc7c   :  { %23928 = vmatprep.subr.bf16.mxu0 %v27563_v16 }
 0xc7e   :  { %23925 = vmatmul.mubr.bf16.vlgmr.msra.gmra.mrb[52].mxu0 %v9761_v1  ;;  %v27577_v1 = vld [vmem:[%s34699_s9 + $0x110] sm:$0xff]  }
 0xc7f   :  { %23929 = vmatpush3.bf16.msra.mxu0 %v27563_v16  ;;  %23944 = vmatprep.mubr.bf16.mxu0 %v9762_v40  ;;  %v27587_v40 = vld [vmem:[%s34699_s9 + $0x150] sm:$0xff]   ;;  %v31378_v16 = vpop.f32.mrb[177].mxu1 }
 0xc80   :  { %23930 = vmatprep.subr.bf16.mxu0 %v27564_v36  ;;  %v31380_v11 = vpop.f32.mrb[178].mxu1 }
 0xc83   :  { %23931 = vmatpush3.bf16.msra.mxu0 %v27564_v36  ;;  %v31387_v36 = vpop.f32.mrb[179].mxu1 }
 0xc84   :  { %23932 = vmatprep.subr.bf16.mxu0 %v27567_v0 }
 0xc87   :  { %23933 = vmatpush3.bf16.msra.mxu0 %v27567_v0  ;;  %v9776_v0 = vpack.c.bf16 %v31387_v36, %v31378_v16  ;;  %v27644_v16 = vld [vmem:[%s34699_s9 + $0x2d8] sm:$0xff]   ;;  %v27649_v36 = vld [vmem:[%s34699_s9 + $0x300] sm:$0xff]  }
 0xc88   :  { %23934 = vmatprep.subr.bf16.mxu0 %v27568_v54 }
 0xc8b   :  { %23935 = vmatpush3.bf16.msra.mxu0 %v27568_v54  ;;  %v27612_v54 = vld [vmem:[%s34699_s9 + $0x1f8] sm:$0xff]  }
 0xc8c   :  { %23936 = vmatprep.subr.bf16.mxu0 %v27569_v33 }
 0xc8f   :  { %23937 = vmatpush3.bf16.msra.mxu0 %v27569_v33  ;;  %v27613_v33 = vld [vmem:[%s34699_s9 + $0x200] sm:$0xff]  }
 0xc90   :  { %23938 = vmatprep.subr.bf16.mxu0 %v27570_v39 }
 0xc93   :  { %23939 = vmatpush3.bf16.msra.mxu0 %v27570_v39  ;;  %v31418_v39 = vpop.f32.mrb[180].mxu1 }
 0xc94   :  { %23940 = vmatprep.subr.bf16.mxu0 %v27571_v24 }
 0xc97   :  { %23941 = vmatpush3.bf16.msra.mxu0 %v27571_v24  ;;  %v31420_v24 = vpop.f32.mrb[181].mxu1 }
 0xc98   :  { %23942 = vmatprep.subr.bf16.mxu0 %v27572_v49  ;;  %v31422_v63 = vpop.f32.mrb[182].mxu1 }
 0xc9b   :  { %23943 = vmatpush3.bf16.msra.mxu0 %v27572_v49  ;;  %v9779_v49 = vpack.c.bf16 %v31422_v63, %v31418_v39  ;;  %v27653_v39 = vld [vmem:[%s34699_s9 + $0x320] sm:$0xff]   ;;  %v27654_v63 = vld [vmem:[%s34699_s9 + $0x328] sm:$0xff]  }
 0xc9c   :  { %23948 = vmatprep.subr.bf16.mxu0 %v27573_v59 }
 0xc9e   :  { %23945 = vmatmul.mubr.bf16.vlgmr.msra.gmra.mrb[52].mxu0 %v9763_v17  ;;  %v27583_v17 = vld [vmem:[%s34699_s9 + $0x140] sm:$0xff]  }
 0xc9f   :  { %23949 = vmatpush3.bf16.msra.mxu0 %v27573_v59  ;;  %23964 = vmatprep.mubr.bf16.mxu0 %v9764_v21  ;;  %v27593_v21 = vld [vmem:[%s34699_s9 + $0x180] sm:$0xff]  }
 0xca0   :  { %23950 = vmatprep.subr.bf16.mxu0 %v27574_v35 }
 0xca3   :  { %23951 = vmatpush3.bf16.msra.mxu0 %v27574_v35  ;;  %v27617_v35 = vld [vmem:[%s34699_s9 + $0x210] sm:$0xff]  }
 0xca4   :  { %23952 = vmatprep.subr.bf16.mxu0 %v27577_v1 }
 0xca7   :  { %23953 = vmatpush3.bf16.msra.mxu0 %v27577_v1  ;;  %v27618_v1 = vld [vmem:[%s34699_s9 + $0x218] sm:$0xff]  }
 0xca8   :  { %23954 = vmatprep.subr.bf16.mxu0 %v27578_v34 }
 0xcab   :  { %23955 = vmatpush3.bf16.msra.mxu0 %v27578_v34  ;;  %v27624_v34 = vld [vmem:[%s34699_s9 + $0x248] sm:$0xff]  }
 0xcac   :  { %23956 = vmatprep.subr.bf16.mxu0 %v27579_v4 }
 0xcaf   :  { %23957 = vmatpush3.bf16.msra.mxu0 %v27579_v4 }
 0xcb0   :  { %23958 = vmatprep.subr.bf16.mxu0 %v27580_v43 }
 0xcb3   :  { %23959 = vmatpush3.bf16.msra.mxu0 %v27580_v43 }
 0xcb4   :  { %23960 = vmatprep.subr.bf16.mxu0 %v27581_v45 }
 0xcb7   :  { %23961 = vmatpush3.bf16.msra.mxu0 %v27581_v45 }
 0xcb8   :  { %23962 = vmatprep.subr.bf16.mxu0 %v27582_v48 }
 0xcbb   :  { %23963 = vmatpush3.bf16.msra.mxu0 %v27582_v48  ;;  %v27627_v48 = vld [vmem:[%s34699_s9 + $0x250] sm:$0xff]  }
 0xcbc   :  { %23968 = vmatprep.subr.bf16.mxu0 %v27583_v17 }
 0xcbe   :  { %23965 = vmatmul.mubr.bf16.vlgmr.msra.gmra.mrb[52].mxu0 %v9765_v61  ;;  %v27591_v61 = vld [vmem:[%s34699_s9 + $0x170] sm:$0xff]  }
 0xcbf   :  { %23969 = vmatpush3.bf16.msra.mxu0 %v27583_v17  ;;  %23984 = vmatprep.mubr.bf16.mxu0 %v9766_v27  ;;  %v9775_v27 = vpack.c.bf16 %v31338_v51, %v31334_v15  ;;  %v27628_v17 = vld [vmem:[%s34699_s9 + $0x258] sm:$0xff]   ;;  %v27637_v15 = vld [vmem:[%s34699_s9 + $0x2a0] sm:$0xff]   ;;  %v27638_v51 = vld [vmem:[%s34699_s9 + $0x2a8] sm:$0xff]  }
 0xcc0   :  { %23970 = vmatprep.subr.bf16.mxu0 %v27584_v41 }
 0xcc3   :  { %23971 = vmatpush3.bf16.msra.mxu0 %v27584_v41  ;;  %v27632_v41 = vld [vmem:[%s34699_s9 + $0x278] sm:$0xff]  }
 0xcc4   :  { %23972 = vmatprep.subr.bf16.mxu0 %v27587_v40 }
 0xcc7   :  { %23973 = vmatpush3.bf16.msra.mxu0 %v27587_v40  ;;  %v27633_v40 = vld [vmem:[%s34699_s9 + $0x280] sm:$0xff]  }
 0xcc8   :  { %23974 = vmatprep.subr.bf16.mxu0 %v27588_v22 }
 0xccb   :  { %23975 = vmatpush3.bf16.msra.mxu0 %v27588_v22 }
 0xccc   :  { %23976 = vmatprep.subr.bf16.mxu0 %v27589_v8 }
 0xccf   :  { %23977 = vmatpush3.bf16.msra.mxu0 %v27589_v8  ;;  %v27634_v8 = vld [vmem:[%s34699_s9 + $0x288] sm:$0xff]  }
 0xcd0   :  { %23978 = vmatprep.subr.bf16.mxu0 %v27590_v58 }
 0xcd3   :  { %23979 = vmatpush3.bf16.msra.mxu0 %v27590_v58 }
 0xcd4   :  { %23980 = vmatprep.subr.bf16.mxu0 %v27591_v61 }
 0xcd7   :  { %23981 = vmatpush3.bf16.msra.mxu0 %v27591_v61 }
 0xcd8   :  { %23982 = vmatprep.subr.bf16.mxu0 %v27592_v55 }
 0xcdb   :  { %23983 = vmatpush3.bf16.msra.mxu0 %v27592_v55 }
 0xcdc   :  { %23988 = vmatprep.subr.bf16.mxu0 %v27593_v21 }
 0xcde   :  { %23985 = vmatmul.mubr.bf16.vlgmr.msra.gmra.mrb[52].mxu0 %v9767_v2  ;;  %v27601_v2 = vld [vmem:[%s34699_s9 + $0x1b0] sm:$0xff]  }
 0xcdf   :  { %23989 = vmatpush3.bf16.msra.mxu0 %v27593_v21  ;;  %24004 = vmatprep.mubr.bf16.mxu0 %v9768_v60  ;;  %v9777_v60 = vpack.c.bf16 %v31380_v11, %v31376_v29  ;;  %v27635_v21 = vld [vmem:[%s34699_s9 + $0x290] sm:$0xff]   ;;  %v27645_v29 = vld [vmem:[%s34699_s9 + $0x2e0] sm:$0xff]   ;;  %v27646_v11 = vld [vmem:[%s34699_s9 + $0x2e8] sm:$0xff]  }
 0xce0   :  { %23990 = vmatprep.subr.bf16.mxu0 %v27594_v25 }
 0xce3   :  { %23991 = vmatpush3.bf16.msra.mxu0 %v27594_v25  ;;  %v27639_v25 = vld [vmem:[%s34699_s9 + $0x2b0] sm:$0xff]  }
 0xce4   :  { %23992 = vmatprep.subr.bf16.mxu0 %v27597_v3 }
 0xce7   :  { %23993 = vmatpush3.bf16.msra.mxu0 %v27597_v3 }
 0xce8   :  { %23994 = vmatprep.subr.bf16.mxu0 %v27598_v7 }
 0xceb   :  { %23995 = vmatpush3.bf16.msra.mxu0 %v27598_v7 }
 0xcec   :  { %23996 = vmatprep.subr.bf16.mxu0 %v27599_v42 }
 0xcef   :  { %23997 = vmatpush3.bf16.msra.mxu0 %v27599_v42  ;;  %v27642_v42 = vld [vmem:[%s34699_s9 + $0x2c8] sm:$0xff]  }
 0xcf0   :  { %23998 = vmatprep.subr.bf16.mxu0 %v27600_v5 }
 0xcf3   :  { %23999 = vmatpush3.bf16.msra.mxu0 %v27600_v5 }
 0xcf4   :  { %24000 = vmatprep.subr.bf16.mxu0 %v27601_v2 }
 0xcf7   :  { %24001 = vmatpush3.bf16.msra.mxu0 %v27601_v2 }
 0xcf8   :  { %24002 = vmatprep.subr.bf16.mxu0 %v27602_v37 }
 0xcfb   :  { %24003 = vmatpush3.bf16.msra.mxu0 %v27602_v37 }
 0xcfc   :  { %24008 = vmatprep.subr.bf16.mxu0 %v27603_v31 }
 0xcfe   :  { %24005 = vmatmul.mubr.bf16.vlgmr.msra.gmra.mrb[52].mxu0 %v9769_v47  ;;  %v27611_v47 = vld [vmem:[%s34699_s9 + $0x1f0] sm:$0xff]  }
 0xcff   :  { %24009 = vmatpush3.bf16.msra.mxu0 %v27603_v31  ;;  %24024 = vmatprep.mubr.bf16.mxu0 %v9770_v53  ;;  %v31429_v53 = vpop.f32.mrb[183].mxu1  ;;  %v27643_v31 = vld [vmem:[%s34699_s9 + $0x2d0] sm:$0xff]  }
 0xd00   :  { %24010 = vmatprep.subr.bf16.mxu0 %v27604_v23  ;;  %v9778_v59 = vpack.c.bf16 %v31429_v53, %v31420_v24  ;;  %v27652_v24 = vld [vmem:[%s34699_s9 + $0x318] sm:$0xff]   ;;  %v27657_v53 = vld [vmem:[%s34699_s9 + $0x340] sm:$0xff]  }
 0xd03   :  { %24011 = vmatpush3.bf16.msra.mxu0 %v27604_v23  ;;  %v27647_v23 = vld [vmem:[%s34699_s9 + $0x2f0] sm:$0xff]  }
 0xd04   :  { %24012 = vmatprep.subr.bf16.mxu0 %v27607_v18 }
 0xd07   :  { %24013 = vmatpush3.bf16.msra.mxu0 %v27607_v18 }
 0xd08   :  { %24014 = vmatprep.subr.bf16.mxu0 %v27608_v19 }
 0xd0b   :  { %24015 = vmatpush3.bf16.msra.mxu0 %v27608_v19 }
 0xd0c   :  { %24016 = vmatprep.subr.bf16.mxu0 %v27609_v46 }
 0xd0f   :  { %24017 = vmatpush3.bf16.msra.mxu0 %v27609_v46 }
 0xd10   :  { %24018 = vmatprep.subr.bf16.mxu0 %v27610_v26 }
 0xd13   :  { %24019 = vmatpush3.bf16.msra.mxu0 %v27610_v26 }
 0xd14   :  { %24020 = vmatprep.subr.bf16.mxu0 %v27611_v47 }
 0xd17   :  { %24021 = vmatpush3.bf16.msra.mxu0 %v27611_v47  ;;  %v27650_v47 = vld [vmem:[%s34699_s9 + $0x308] sm:$0xff]  }
 0xd18   :  { %24022 = vmatprep.subr.bf16.mxu0 %v27612_v54 }
 0xd1b   :  { %24023 = vmatpush3.bf16.msra.mxu0 %v27612_v54 }
 0xd1c   :  { %24028 = vmatprep.subr.bf16.mxu0 %v27613_v33 }
 0xd1e   :  { %24025 = vmatmul.mubr.bf16.vlgmr.msra.gmra.mrb[52].mxu0 %v9771_v50  ;;  %v27621_v50 = vld [vmem:[%s34699_s9 + $0x230] sm:$0xff]  }
 0xd1f   :  { %24029 = vmatpush3.bf16.msra.mxu0 %v27613_v33  ;;  %24044 = vmatprep.mubr.bf16.mxu0 %v9772_v30  ;;  %v31460_v30 = vpop.f32.mrb[184].mxu1  ;;  %v27651_v33 = vld [vmem:[%s34699_s9 + $0x310] sm:$0xff]  }
 0xd20   :  { %24030 = vmatprep.subr.bf16.mxu0 %v27614_v28  ;;  %v31462_v57 = vpop.f32.mrb[185].mxu1 }
 0xd21   :  { %v31464_v20 = vpop.f32.mrb[186].mxu1 }
 0xd22   :  { %v9781_v4 = vpack.c.bf16 %v31464_v20, %v31460_v30  ;;  %v31471_v43 = vpop.f32.mrb[187].mxu1  ;;  %v27666_v30 = vld [vmem:[%s34699_s9 + $0x388] sm:$0xff]   ;;  %v27668_v20 = vld [vmem:[%s34699_s9 + $0x398] sm:$0xff]  }
 0xd23   :  { %24031 = vmatpush3.bf16.msra.mxu0 %v27614_v28  ;;  %v9780_v45 = vpack.c.bf16 %v31471_v43, %v31462_v57  ;;  %v31502_v14 = vpop.f32.mrb[188].mxu1  ;;  %v27655_v28 = vld [vmem:[%s34699_s9 + $0x330] sm:$0xff]  }
 0xd24   :  { %24032 = vmatprep.subr.bf16.mxu0 %v27617_v35  ;;  %v31504_v10 = vpop.f32.mrb[189].mxu1  ;;  %v27667_v57 = vld [vmem:[%s34699_s9 + $0x390] sm:$0xff]  }
 0xd25   :  { %v31506_v22 = vpop.f32.mrb[190].mxu1  ;;  %v27671_v43 = vld [vmem:[%s34699_s9 + $0x3b0] sm:$0xff]  }
 0xd26   :  { %v9783_v58 = vpack.c.bf16 %v31506_v22, %v31502_v14  ;;  %v31513_v61 = vpop.f32.mrb[191].mxu1  ;;  %v27680_v14 = vld [vmem:[%s34699_s9 + $0x3f8] sm:$0xff]  }
 0xd27   :  { %24033 = vmatpush3.bf16.msra.mxu0 %v27617_v35  ;;  %v9782_v55 = vpack.c.bf16 %v31513_v61, %v31504_v10  ;;  %v27659_v35 = vld [vmem:[%s34699_s9 + $0x350] sm:$0xff]   ;;  %v27681_v10 = vld [vmem:[%s34694_s4] sm:$0xff]  }
 0xd28   :  { %24034 = vmatprep.subr.bf16.mxu0 %v27618_v1 }
 0xd2b   :  { %24035 = vmatpush3.bf16.msra.mxu0 %v27618_v1  ;;  %v27660_v1 = vld [vmem:[%s34699_s9 + $0x358] sm:$0xff]  }
 0xd2c   :  { %24036 = vmatprep.subr.bf16.mxu0 %v27619_v9 }
 0xd2f   :  { %24037 = vmatpush3.bf16.msra.mxu0 %v27619_v9  ;;  %v27661_v9 = vld [vmem:[%s34699_s9 + $0x360] sm:$0xff]  }
 0xd30   :  { %24038 = vmatprep.subr.bf16.mxu0 %v27620_v38 }
 0xd33   :  { %24039 = vmatpush3.bf16.msra.mxu0 %v27620_v38  ;;  %v27662_v38 = vld [vmem:[%s34699_s9 + $0x368] sm:$0xff]  }
 0xd34   :  { %24040 = vmatprep.subr.bf16.mxu0 %v27621_v50 }
 0xd37   :  { %24041 = vmatpush3.bf16.msra.mxu0 %v27621_v50  ;;  %v27663_v50 = vld [vmem:[%s34699_s9 + $0x370] sm:$0xff]  }
 0xd38   :  { %24042 = vmatprep.subr.bf16.mxu0 %v27622_v12 }
 0xd3b   :  { %24043 = vmatpush3.bf16.msra.mxu0 %v27622_v12  ;;  %v27664_v12 = vld [vmem:[%s34699_s9 + $0x378] sm:$0xff]  }
 0xd3c   :  { %24048 = vmatprep.subr.bf16.mxu0 %v27623_v6 }
 0xd3e   :  { %24045 = vmatmul.mubr.bf16.vlgmr.msra.gmra.mrb[52].mxu0 %v9773_v52  ;;  %v27631_v52 = vld [vmem:[%s34699_s9 + $0x270] sm:$0xff]  }
 0xd3f   :  { %24049 = vmatpush3.bf16.msra.mxu0 %v27623_v6  ;;  %24064 = vmatprep.mubr.bf16.mxu0 %v9774_v13  ;;  %v31544_v13 = vpop.f32.mrb[192].mxu1  ;;  %v27665_v6 = vld [vmem:[%s34699_s9 + $0x380] sm:$0xff]  }
 0xd40   :  { %24050 = vmatprep.subr.bf16.mxu0 %v27624_v34  ;;  %v31546_v3 = vpop.f32.mrb[193].mxu1 }
 0xd41   :  { %v31548_v7 = vpop.f32.mrb[194].mxu1 }
 0xd42   :  { %v9785_v5 = vpack.c.bf16 %v31548_v7, %v31544_v13  ;;  %v31555_v2 = vpop.f32.mrb[195].mxu1 }
 0xd43   :  { %24051 = vmatpush3.bf16.msra.mxu0 %v27624_v34  ;;  %v9784_v37 = vpack.c.bf16 %v31555_v2, %v31546_v3  ;;  %v27669_v34 = vld [vmem:[%s34699_s9 + $0x3a0] sm:$0xff]  }
 0xd44   :  { %24052 = vmatprep.subr.bf16.mxu0 %v27627_v48 }
 0xd47   :  { %24053 = vmatpush3.bf16.msra.mxu0 %v27627_v48  ;;  %v27673_v48 = vld [vmem:[%s34699_s9 + $0x3c0] sm:$0xff]  }
 0xd48   :  { %24054 = vmatprep.subr.bf16.mxu0 %v27628_v17 }
 0xd4b   :  { %24055 = vmatpush3.bf16.msra.mxu0 %v27628_v17  ;;  %v27674_v17 = vld [vmem:[%s34699_s9 + $0x3c8] sm:$0xff]  }
 0xd4c   :  { %24056 = vmatprep.subr.bf16.mxu0 %v27629_v32 }
 0xd4f   :  { %24057 = vmatpush3.bf16.msra.mxu0 %v27629_v32  ;;  %v27675_v32 = vld [vmem:[%s34699_s9 + $0x3d0] sm:$0xff]  }
 0xd50   :  { %24058 = vmatprep.subr.bf16.mxu0 %v27630_v56 }
 0xd53   :  { %24059 = vmatpush3.bf16.msra.mxu0 %v27630_v56  ;;  %v27676_v56 = vld [vmem:[%s34699_s9 + $0x3d8] sm:$0xff]  }
 0xd54   :  { %24060 = vmatprep.subr.bf16.mxu0 %v27631_v52 }
 0xd57   :  { %24061 = vmatpush3.bf16.msra.mxu0 %v27631_v52  ;;  %v27677_v52 = vld [vmem:[%s34699_s9 + $0x3e0] sm:$0xff]  }
 0xd58   :  { %24062 = vmatprep.subr.bf16.mxu0 %v27632_v41 }
 0xd5b   :  { %24063 = vmatpush3.bf16.msra.mxu0 %v27632_v41  ;;  %v27678_v41 = vld [vmem:[%s34699_s9 + $0x3e8] sm:$0xff]  }
 0xd5c   :  { %24068 = vmatprep.subr.bf16.mxu0 %v27633_v40 }
 0xd5e   :  { %24065 = vmatmul.mubr.bf16.vlgmr.msra.gmra.mrb[52].mxu0 %v9775_v27  ;;  %v27640_v27 = vld [vmem:[%s34699_s9 + $0x2b8] sm:$0xff]  }
 0xd5f   :  { %24069 = vmatpush3.bf16.msra.mxu0 %v27633_v40  ;;  %24084 = vmatprep.mubr.bf16.mxu0 %v9776_v0  ;;  %v31586_v0 = vpop.f32.mrb[196].mxu1  ;;  %v27679_v40 = vld [vmem:[%s34699_s9 + $0x3f0] sm:$0xff]  }
 0xd60   :  { %24070 = vmatprep.subr.bf16.mxu0 %v27634_v8  ;;  %v31588_v18 = vpop.f32.mrb[197].mxu1 }
 0xd61   :  { %v31590_v19 = vpop.f32.mrb[198].mxu1 }
 0xd62   :  { %v9787_v46 = vpack.c.bf16 %v31590_v19, %v31586_v0  ;;  %v31594_v26 = vpop.f32.mrb[199].mxu1 }
 0xd63   :  { %24071 = vmatpush3.bf16.msra.mxu0 %v27634_v8  ;;  %v9786_v54 = vpack.c.bf16 %v31594_v26, %v31588_v18 }
 0xd64   :  { %24072 = vmatprep.subr.bf16.mxu0 %v27635_v21 }
 0xd67   :  { %24073 = vmatpush3.bf16.msra.mxu0 %v27635_v21 }
 0xd68   :  { %24074 = vmatprep.subr.bf16.mxu0 %v27636_v44 }
 0xd6b   :  { %24075 = vmatpush3.bf16.msra.mxu0 %v27636_v44 }
 0xd6c   :  { %24076 = vmatprep.subr.bf16.mxu0 %v27637_v15 }
 0xd6f   :  { %24077 = vmatpush3.bf16.msra.mxu0 %v27637_v15 }
 0xd70   :  { %24078 = vmatprep.subr.bf16.mxu0 %v27638_v51 }
 0xd73   :  { %24079 = vmatpush3.bf16.msra.mxu0 %v27638_v51 }
 0xd74   :  { %24080 = vmatprep.subr.bf16.mxu0 %v27639_v25 }
 0xd77   :  { %24081 = vmatpush3.bf16.msra.mxu0 %v27639_v25 }
 0xd78   :  { %24082 = vmatprep.subr.bf16.mxu0 %v27640_v27 }
 0xd7b   :  { %24083 = vmatpush3.bf16.msra.mxu0 %v27640_v27 }
 0xd7c   :  { %24088 = vmatprep.subr.bf16.mxu0 %v27641_v62 }
 0xd7e   :  { %24085 = vmatmul.mubr.bf16.vlgmr.msra.gmra.mrb[52].mxu0 %v9777_v60  ;;  %v27648_v60 = vld [vmem:[%s34699_s9 + $0x2f8] sm:$0xff]  }
 0xd7f   :  { %24089 = vmatpush3.bf16.msra.mxu0 %v27641_v62  ;;  %24104 = vmatprep.mubr.bf16.mxu0 %v9778_v59  ;;  %v27658_v59 = vld [vmem:[%s34699_s9 + $0x348] sm:$0xff]  }
 0xd80   :  { %24090 = vmatprep.subr.bf16.mxu0 %v27642_v42 }
 0xd83   :  { %24091 = vmatpush3.bf16.msra.mxu0 %v27642_v42 }
 0xd84   :  { %24092 = vmatprep.subr.bf16.mxu0 %v27643_v31 }
 0xd87   :  { %24093 = vmatpush3.bf16.msra.mxu0 %v27643_v31 }
 0xd88   :  { %24094 = vmatprep.subr.bf16.mxu0 %v27644_v16 }
 0xd8b   :  { %24095 = vmatpush3.bf16.msra.mxu0 %v27644_v16 }
 0xd8c   :  { %24096 = vmatprep.subr.bf16.mxu0 %v27645_v29 }
 0xd8f   :  { %24097 = vmatpush3.bf16.msra.mxu0 %v27645_v29 }
 0xd90   :  { %24098 = vmatprep.subr.bf16.mxu0 %v27646_v11 }
 0xd93   :  { %24099 = vmatpush3.bf16.msra.mxu0 %v27646_v11 }
 0xd94   :  { %24100 = vmatprep.subr.bf16.mxu0 %v27647_v23 }
 0xd97   :  { %24101 = vmatpush3.bf16.msra.mxu0 %v27647_v23 }
 0xd98   :  { %24102 = vmatprep.subr.bf16.mxu0 %v27648_v60 }
 0xd9b   :  { %24103 = vmatpush3.bf16.msra.mxu0 %v27648_v60 }
 0xd9c   :  { %24108 = vmatprep.subr.bf16.mxu0 %v27649_v36 }
 0xd9e   :  { %24105 = vmatmul.mubr.bf16.vlgmr.msra.gmra.mrb[52].mxu0 %v9779_v49  ;;  %v27656_v49 = vld [vmem:[%s34699_s9 + $0x338] sm:$0xff]  }
 0xd9f   :  { %24109 = vmatpush3.bf16.msra.mxu0 %v27649_v36  ;;  %24124 = vmatprep.mubr.bf16.mxu0 %v9780_v45  ;;  %v27672_v45 = vld [vmem:[%s34699_s9 + $0x3b8] sm:$0xff]  }
 0xda0   :  { %24110 = vmatprep.subr.bf16.mxu0 %v27650_v47 }
 0xda3   :  { %24111 = vmatpush3.bf16.msra.mxu0 %v27650_v47 }
 0xda4   :  { %24112 = vmatprep.subr.bf16.mxu0 %v27651_v33 }
 0xda7   :  { %24113 = vmatpush3.bf16.msra.mxu0 %v27651_v33 }
 0xda8   :  { %24114 = vmatprep.subr.bf16.mxu0 %v27652_v24 }
 0xdab   :  { %24115 = vmatpush3.bf16.msra.mxu0 %v27652_v24  ;;  %v21342_v24 = vld [vmem:[%s34704_s14 + $0x1] ss:$0 sm:$0xff] }
 0xdac   :  { %24116 = vmatprep.subr.bf16.mxu0 %v27653_v39 }
 0xdaf   :  { %24117 = vmatpush3.bf16.msra.mxu0 %v27653_v39 }
 0xdb0   :  { %24118 = vmatprep.subr.bf16.mxu0 %v27654_v63 }
 0xdb3   :  { %24119 = vmatpush3.bf16.msra.mxu0 %v27654_v63 }
 0xdb4   :  { %24120 = vmatprep.subr.bf16.mxu0 %v27655_v28 }
 0xdb7   :  { %24121 = vmatpush3.bf16.msra.mxu0 %v27655_v28 }
 0xdb8   :  { %24122 = vmatprep.subr.bf16.mxu0 %v27656_v49 }
 0xdbb   :  { %24123 = vmatpush3.bf16.msra.mxu0 %v27656_v49 }
 0xdbc   :  { %24128 = vmatprep.subr.bf16.mxu0 %v27657_v53 }
 0xdbe   :  { %24125 = vmatmul.mubr.bf16.vlgmr.msra.gmra.mrb[52].mxu0 %v9781_v4  ;;  %v27670_v4 = vld [vmem:[%s34699_s9 + $0x3a8] sm:$0xff]  }
 0xdbf   :  { %24129 = vmatpush3.bf16.msra.mxu0 %v27657_v53  ;;  %24144 = vmatprep.mubr.bf16.mxu0 %v9782_v55  ;;  %v21343_v53 = vld [vmem:[%s34705_s15 + $0x1] ss:$0 sm:$0xff] }
 0xdc0   :  { %24130 = vmatprep.subr.bf16.mxu0 %v27658_v59 }
 0xdc3   :  { %24131 = vmatpush3.bf16.msra.mxu0 %v27658_v59 }
 0xdc4   :  { %24132 = vmatprep.subr.bf16.mxu0 %v27659_v35 }
 0xdc7   :  { %24133 = vmatpush3.bf16.msra.mxu0 %v27659_v35 }
 0xdc8   :  { %24134 = vmatprep.subr.bf16.mxu0 %v27660_v1 }
 0xdcb   :  { %24135 = vmatpush3.bf16.msra.mxu0 %v27660_v1 }
 0xdcc   :  { %24136 = vmatprep.subr.bf16.mxu0 %v27661_v9 }
 0xdcf   :  { %24137 = vmatpush3.bf16.msra.mxu0 %v27661_v9 }
 0xdd0   :  { %24138 = vmatprep.subr.bf16.mxu0 %v27662_v38 }
 0xdd3   :  { %24139 = vmatpush3.bf16.msra.mxu0 %v27662_v38 }
 0xdd4   :  { %24140 = vmatprep.subr.bf16.mxu0 %v27663_v50 }
 0xdd7   :  { %24141 = vmatpush3.bf16.msra.mxu0 %v27663_v50 }
 0xdd8   :  { %24142 = vmatprep.subr.bf16.mxu0 %v27664_v12 }
 0xddb   :  { %24143 = vmatpush3.bf16.msra.mxu0 %v27664_v12 }
 0xddc   :  { %24148 = vmatprep.subr.bf16.mxu0 %v27665_v6 }
 0xdde   :  { %24145 = vmatmul.mubr.bf16.vlgmr.msra.gmra.mrb[52].mxu0 %v9783_v58 }
 0xddf   :  { %24149 = vmatpush3.bf16.msra.mxu0 %v27665_v6  ;;  %24164 = vmatprep.mubr.bf16.mxu0 %v9784_v37 }
 0xde0   :  { %24150 = vmatprep.subr.bf16.mxu0 %v27666_v30 }
 0xde3   :  { %24151 = vmatpush3.bf16.msra.mxu0 %v27666_v30 }
 0xde4   :  { %24152 = vmatprep.subr.bf16.mxu0 %v27667_v57 }
 0xde7   :  { %24153 = vmatpush3.bf16.msra.mxu0 %v27667_v57 }
 0xde8   :  { %24154 = vmatprep.subr.bf16.mxu0 %v27668_v20 }
 0xdeb   :  { %24155 = vmatpush3.bf16.msra.mxu0 %v27668_v20 }
 0xdec   :  { %24156 = vmatprep.subr.bf16.mxu0 %v27669_v34 }
 0xdef   :  { %24157 = vmatpush3.bf16.msra.mxu0 %v27669_v34 }
 0xdf0   :  { %24158 = vmatprep.subr.bf16.mxu0 %v27670_v4 }
 0xdf3   :  { %24159 = vmatpush3.bf16.msra.mxu0 %v27670_v4 }
 0xdf4   :  { %24160 = vmatprep.subr.bf16.mxu0 %v27671_v43 }
 0xdf7   :  { %24161 = vmatpush3.bf16.msra.mxu0 %v27671_v43 }
 0xdf8   :  { %24162 = vmatprep.subr.bf16.mxu0 %v27672_v45 }
 0xdfb   :  { %24163 = vmatpush3.bf16.msra.mxu0 %v27672_v45 }
 0xdfc   :  { %24168 = vmatprep.subr.bf16.mxu0 %v27673_v48 }
 0xdfe   :  { %24165 = vmatmul.mubr.bf16.vlgmr.msra.gmra.mrb[52].mxu0 %v9785_v5 }
 0xdff   :  { %24169 = vmatpush3.bf16.msra.mxu0 %v27673_v48  ;;  %24184 = vmatprep.mubr.bf16.mxu0 %v9786_v54 }
 0xe00   :  { %24170 = vmatprep.subr.bf16.mxu0 %v27674_v17 }
 0xe03   :  { %24171 = vmatpush3.bf16.msra.mxu0 %v27674_v17 }
 0xe04   :  { %24172 = vmatprep.subr.bf16.mxu0 %v27675_v32 }
 0xe07   :  { %24173 = vmatpush3.bf16.msra.mxu0 %v27675_v32 }
 0xe08   :  { %24174 = vmatprep.subr.bf16.mxu0 %v27676_v56 }
 0xe0b   :  { %24175 = vmatpush3.bf16.msra.mxu0 %v27676_v56  ;;  %v27682_v56 = vld [vmem:[%s34694_s4 + $0x8] sm:$0xff]  }
 0xe0c   :  { %24176 = vmatprep.subr.bf16.mxu0 %v27677_v52 }
 0xe0f   :  { %24177 = vmatpush3.bf16.msra.mxu0 %v27677_v52  ;;  %v27683_v52 = vld [vmem:[%s34694_s4 + $0x10] sm:$0xff]  }
 0xe10   :  { %24178 = vmatprep.subr.bf16.mxu0 %v27678_v41 }
 0xe13   :  { %24179 = vmatpush3.bf16.msra.mxu0 %v27678_v41  ;;  %v27691_v41 = vld [vmem:[%s34700_s10] sm:$0xff]  }
 0xe14   :  { %24180 = vmatprep.subr.bf16.mxu0 %v27679_v40 }
 0xe17   :  { %24181 = vmatpush3.bf16.msra.mxu0 %v27679_v40  ;;  %v28306_v40 = vmov 0.0  }
 0xe18   :  { %24182 = vmatprep.subr.bf16.mxu0 %v27680_v14 }
 0xe1b   :  { %24183 = vmatpush3.bf16.msra.mxu0 %v27680_v14  ;;  %v27692_v14 = vld [vmem:[%s34700_s10 + $0x8] sm:$0xff]  }
 0xe1e   :  { %24185 = vmatmul.mubr.bf16.vlgmr.msra.gmra.mrb[52].mxu0 %v9787_v46 }
 0xe1f   :  { %24192 = vmatprep.mubr.msk.bf16.mxu0 %vm11835_vm0, %v27681_v10  ;;  %v27684_v10 = vld [vmem:[%s34694_s4 + $0x18] sm:$0xff]  }
 0xef1   :  { %v24186_v22 = vpop.f32.mrb[52].mxu0 }
 0xef2   :  { %v11581_v8 = vpop.f32.mrb[53].mxu0 }
 0xef3   :  { %v24187_v58 = vpop.f32.mrb[54].mxu0 }
 0xef4   :  { %v11584_v61 = vpop.f32.mrb[55].mxu0 }
 0xef5   :  { %v11656_v55 = vadd.f32 %v11584_v61, %v11581_v8 }
 0xef7   :  { %v11657_v21 = vadd.f32 %v24186_v22, %v11656_v55  ;;  %v27687_v55 = vld [vmem:[%s34694_s4 + $0x30] sm:$0xff]  }
 0xef9   :  { %v11658_v44 = vadd.f32 %v24187_v58, %v11657_v21  ;;  %v27699_v21 = vld [vmem:[%s34700_s10 + $0x20] sm:$0xff]  }
 0xefb   :  { %v11659_v15 = vrot.slane %v11658_v44, 4 }
 0xefd   :  { %v11660_v51 = vadd.f32 %v11659_v15, %v11658_v44  ;;  %v27700_v44 = vld [vmem:[%s34700_s10 + $0x28] sm:$0xff]   ;;  %v27688_v15 = vld [vmem:[%s34694_s4 + $0x38] sm:$0xff]  }
 0xeff   :  { %v11661_v25 = vrot.slane %v11660_v51, 2 }
 0xf01   :  { %v11662_v27 = vadd.f32 %v11661_v25, %v11660_v51  ;;  %v27689_v51 = vld [vmem:[%s34694_s4 + $0x40] sm:$0xff]   ;;  %v27703_v25 = vld [vmem:[%s34700_s10 + $0x30] sm:$0xff]  }
 0xf03   :  { %v11663_v62 = vrot.slane %v11662_v27, 1 }
 0xf05   :  { %v11664_v13 = vadd.f32 %v11663_v62, %v11662_v27  ;;  %v27690_v27 = vld [vmem:[%s34694_s4 + $0x48] sm:$0xff]   ;;  %v27693_v62 = vld [vmem:[%s34694_s4 + $0x50] sm:$0xff]  }
 0xf07   :  { %v11666_v3 = vmul.f32 0.03125, %v11664_v13  ;;  %v27694_v13 = vld [vmem:[%s34694_s4 + $0x58] sm:$0xff]  }
 0xf09   :  { %v11667_v7 = vsub.f32 %v11581_v8, %v11666_v3  ;;  %v11668_v42 = vsub.f32 %v11584_v61, %v11666_v3  ;;  %v11669_v5 = vsub.f32 %v24186_v22, %v11666_v3  ;;  %v11670_v2 = vsub.f32 %v24187_v58, %v11666_v3  ;;  %v27685_v22 = vld [vmem:[%s34694_s4 + $0x20] sm:$0xff]   ;;  %v27695_v8 = vld [vmem:[%s34700_s10 + $0x10] sm:$0xff]   ;;  %v27696_v58 = vld [vmem:[%s34700_s10 + $0x18] sm:$0xff]  }
 0xf0a   :  { %v27686_v61 = vld [vmem:[%s34694_s4 + $0x28] sm:$0xff]   ;;  %v27697_v3 = vld [vmem:[%s34694_s4 + $0x60] sm:$0xff]  }
 0xf0b   :  { %v11671_v37 = vmul.f32 %v11667_v7, %v11667_v7  ;;  %v11672_v31 = vmul.f32 %v11668_v42, %v11668_v42  ;;  %v11673_v16 = vmul.f32 %v11669_v5, %v11669_v5  ;;  %v11674_v11 = vmul.f32 %v11670_v2, %v11670_v2 }
 0xf0d   :  { %v11675_v29 = vadd.f32 %v11672_v31, %v11671_v37 }
 0xf0f   :  { %v11676_v23 = vadd.f32 %v11675_v29, %v11673_v16 }
 0xf11   :  { %v11677_v60 = vadd.f32 %v11676_v23, %v11674_v11  ;;  %v27705_v23 = vld [vmem:[%s34700_s10 + $0x40] sm:$0xff]  }
 0xf13   :  { %v11678_v36 = vrot.slane %v11677_v60, 4 }
 0xf15   :  { %v11679_v0 = vadd.f32 %v11678_v36, %v11677_v60  ;;  %v27706_v36 = vld [vmem:[%s34700_s10 + $0x48] sm:$0xff]  }
 0xf17   :  { %v11680_v18 = vrot.slane %v11679_v0, 2 }
 0xf19   :  { %v11681_v19 = vadd.f32 %v11680_v18, %v11679_v0 }
 0xf1b   :  { %v11682_v46 = vrot.slane %v11681_v19, 1 }
 0xf1d   :  { %v11683_v26 = vadd.f32 %v11682_v46, %v11681_v19  ;;  %v27707_v46 = vld [vmem:[%s34700_s10 + $0x50] sm:$0xff]  }
 0xf1f   :  { %v11684_v47 = vmul.f32 0.03125, %v11683_v26 }
 0xf21   :  { %v11685_v54 = vadd.f32 1e-05, %v11684_v47 }
 0xf23   :  { %28275 = vrsqrt.f32 %v11685_v54 }
 0xf2d   :  { %v28276_v33 = vpop.eup %28275 }
 0xf2e   :  { %v11687_v39 = vmul.f32 %v28276_v33, %v11667_v7  ;;  %v11688_v63 = vmul.f32 %v28276_v33, %v11668_v42  ;;  %v11689_v28 = vmul.f32 %v28276_v33, %v11669_v5  ;;  %v11690_v49 = vmul.f32 %v28276_v33, %v11670_v2  ;;  %v27698_v7 = vld [vmem:[%s34694_s4 + $0x68] sm:$0xff]   ;;  %v27701_v42 = vld [vmem:[%s34694_s4 + $0x70] sm:$0xff]   ;;  %v27702_v5 = vld [vmem:[%s34694_s4 + $0x78] sm:$0xff]   ;;  %s20489_s4 = sshll.u32 %s28309_s25, 4  ;;  %s20490_s4 = int_to_ptr.vmem [resolvable:$true] %s20489_s4 }
 0xf2f   :  { %v27704_v2 = vld [vmem:[%s34700_s10 + $0x38] sm:$0xff]   ;;  %s28281_s26 = scalar_lea.vmem %s20490_s4, 512  ;;  %p28286_p1 = scmp.lt.s32.totalorder %s20490_s4, %s20490_s4 }
 0xf30   :  { %v11697_v59 = vmul.f32 %v21342_v24, %v11688_v63  ;;  %v11696_v35 = vmul.f32 %v21342_v24, %v11687_v39  ;;  %v11698_v1 = vmul.f32 %v21342_v24, %v11689_v28  ;;  %v11699_v9 = vmul.f32 %v21342_v24, %v11690_v49  ;;  %v27708_v33 = vld [vmem:[%s34700_s10 + $0x58] sm:$0xff]   ;;  %v27709_v28 = vld [vmem:[%s34700_s10 + $0x60] sm:$0xff]   ;;  %p28282_p0 = scmp.ne.s32.totalorder %s20490_s4, %s28281_s26  ;;  %p28287_p2 = scmp.lt.s32.totalorder %s28281_s26, %s28281_s26 }
 0xf32   :  { %v11706_v38 = vadd.f32 %v21343_v53, %v11697_v59  ;;  %v11705_v50 = vadd.f32 %v21343_v53, %v11696_v35  ;;  %v11707_v12 = vadd.f32 %v21343_v53, %v11698_v1  ;;  %v11708_v6 = vadd.f32 %v21343_v53, %v11699_v9  ;;  %v27710_v35 = vld [vmem:[%s34700_s10 + $0x68] sm:$0xff]   ;;  %v27711_v1 = vld [vmem:[%s34700_s10 + $0x70] sm:$0xff]   ;;  %v27712_v9 = vld [vmem:[%s34700_s10 + $0x78] sm:$0xff]   ;;  %p28288_p3 = por %p28287_p2, %p28286_p1 }
 0xf34   :  { %vm11709_vm1 = vcmp.ge.f32.partialorder %v11705_v50, 0.0  ;;  %vm11710_vm2 = vcmp.ge.f32.partialorder %v11706_v38, 0.0  ;;  %v11713_v30 = vmul.f32 0.2, %v11705_v50  ;;  %v11714_v57 = vmul.f32 0.2, %v11706_v38  ;;  %p28289_p4 = pnand %p28288_p3, %p28282_p0 }
 0xf35   :  { %vm11711_vm3 = vcmp.ge.f32.partialorder %v11707_v12, 0.0  ;;  %vm11712_vm4 = vcmp.ge.f32.partialorder %v11708_v6, 0.0  ;;  %v11715_v20 = vmul.f32 0.2, %v11707_v12  ;;  %v11716_v34 = vmul.f32 0.2, %v11708_v6 }
 0xf36   :  { %v11717_v4 = vsel %vm11709_vm1, %v11705_v50, %v11713_v30  ;;  %v11718_v43 = vsel %vm11710_vm2, %v11706_v38, %v11714_v57  ;;  %v27713_v38 = vld [vmem:[%s34700_s10 + $0x80] sm:$0xff]   ;;  %v27714_v50 = vld [vmem:[%s34700_s10 + $0x88] sm:$0xff]  }
 0xf37   :  { %v11721_v45 = vpack.c.bf16 %v11718_v43, %v11717_v4  ;;  %v11719_v48 = vsel %vm11711_vm3, %v11707_v12, %v11715_v20  ;;  %v11720_v17 = vsel %vm11712_vm4, %v11708_v6, %v11716_v34  ;;  %v27715_v12 = vld [vmem:[%s34700_s10 + $0x90] sm:$0xff]   ;;  %v27716_v6 = vld [vmem:[%s34700_s10 + $0x98] sm:$0xff]   ;;  %v27717_v30 = vld [vmem:[%s34700_s10 + $0xa0] sm:$0xff]  }
 0xf38   :  { %v11722_v32 = vpack.c.bf16 %v11720_v17, %v11719_v48  ;;  %v27718_v57 = vld [vmem:[%s34700_s10 + $0xa8] sm:$0xff]   ;;  %v27719_v20 = vld [vmem:[%s34700_s10 + $0xb0] sm:$0xff]   ;;  %v27720_v34 = vld [vmem:[%s34700_s10 + $0xb8] sm:$0xff]  }
 0xf39   :  { %24188 = vmatprep.subr.bf16.mxu0 %v11721_v45 }
 0xf3a   :  { %24189 = vmatpush3.bf16.msra.mxu0 %v11721_v45 }
 0xf3b   :  { %24190 = vmatprep.subr.bf16.mxu0 %v11722_v32 }
 0xf3e   :  { %24191 = vmatpush3.bf16.msra.mxu0 %v11722_v32  ;;  %v27721_v32 = vld [vmem:[%s34700_s10 + $0xc0] sm:$0xff]  }
 0xf3f   :  { %24224 = vmatprep.subr.bf16.mxu0 %v28306_v40 }
 0xf41   :  { %24193 = vmatmul.mubr.msk.bf16.vlgmr.msra.gmra.mrb[56].mxu0 %vm11835_vm0, %v27682_v56 }
 0xf42   :  { %24196 = vmatprep.mubr.msk.bf16.mxu0 %vm11835_vm0, %v27683_v52  ;;  %24225 = vmatpush3.bf16.msra.mxu0 %v27691_v41  ;;  %v27722_v52 = vld [vmem:[%s34700_s10 + $0xc8] sm:$0xff]  }
 0xf43   :  { %24226 = vmatprep.subr.bf16.mxu0 %v28306_v40 }
 0xf46   :  { %24227 = vmatpush3.bf16.msra.mxu0 %v27692_v14 }
 0xf47   :  { %24228 = vmatprep.subr.bf16.mxu0 %v28306_v40 }
 0xf49   :  { %24197 = vmatmul.mubr.msk.bf16.gmra.mrb[60].mxu0 %vm11835_vm0, %v27684_v10 }
 0xf4a   :  { %24200 = vmatprep.mubr.msk.bf16.mxu0 %vm11835_vm0, %v27685_v22  ;;  %24229 = vmatpush3.bf16.msra.mxu0 %v27695_v8  ;;  %v27723_v8 = vld [vmem:[%s34700_s10 + $0xd0] sm:$0xff]  }
 0xf4b   :  { %24230 = vmatprep.subr.bf16.mxu0 %v28306_v40 }
 0xf4e   :  { %24231 = vmatpush3.bf16.msra.mxu0 %v27696_v58 }
 0xf4f   :  { %24232 = vmatprep.subr.bf16.mxu0 %v28306_v40 }
 0xf51   :  { %24201 = vmatmul.mubr.msk.bf16.gmra.mrb[64].mxu0 %vm11835_vm0, %v27686_v61 }
 0xf52   :  { %24204 = vmatprep.mubr.msk.bf16.mxu0 %vm11835_vm0, %v27687_v55  ;;  %24233 = vmatpush3.bf16.msra.mxu0 %v27699_v21  ;;  %v27724_v55 = vld [vmem:[%s34700_s10 + $0xd8] sm:$0xff]  }
 0xf53   :  { %24234 = vmatprep.subr.bf16.mxu0 %v28306_v40 }
 0xf56   :  { %24235 = vmatpush3.bf16.msra.mxu0 %v27700_v44 }
 0xf57   :  { %24236 = vmatprep.subr.bf16.mxu0 %v28306_v40 }
 0xf59   :  { %24205 = vmatmul.mubr.msk.bf16.gmra.mrb[68].mxu0 %vm11835_vm0, %v27688_v15 }
 0xf5a   :  { %24208 = vmatprep.mubr.msk.bf16.mxu0 %vm11835_vm0, %v27689_v51  ;;  %24237 = vmatpush3.bf16.msra.mxu0 %v27703_v25  ;;  %v27725_v25 = vld [vmem:[%s34700_s10 + $0xe0] sm:$0xff]  }
 0xf5b   :  { %24238 = vmatprep.subr.bf16.mxu0 %v28306_v40 }
 0xf5e   :  { %24239 = vmatpush3.bf16.msra.mxu0 %v27704_v2  ;;  %v27727_v2 = vld [vmem:[%s34700_s10 + $0xf0] sm:$0xff]  }
 0xf5f   :  { %24244 = vmatprep.subr.bf16.mxu0 %v28306_v40 }
 0xf61   :  { %24209 = vmatmul.mubr.msk.bf16.gmra.mrb[72].mxu0 %vm11835_vm0, %v27690_v27 }
 0xf62   :  { %24212 = vmatprep.mubr.msk.bf16.mxu0 %vm11835_vm0, %v27693_v62 }
 0xf69   :  { %24213 = vmatmul.mubr.msk.bf16.gmra.mrb[76].mxu0 %vm11835_vm0, %v27694_v13  ;;  %v27726_v13 = vld [vmem:[%s34700_s10 + $0xe8] sm:$0xff]  }
 0xf6a   :  { %24216 = vmatprep.mubr.msk.bf16.mxu0 %vm11835_vm0, %v27697_v3 }
 0xf71   :  { %24217 = vmatmul.mubr.msk.bf16.gmra.mrb[80].mxu0 %vm11835_vm0, %v27698_v7 }
 0xf72   :  { %24220 = vmatprep.mubr.msk.bf16.mxu0 %vm11835_vm0, %v27701_v42 }
 0xf79   :  { %24221 = vmatmul.mubr.msk.bf16.gmra.mrb[84].mxu0 %vm11835_vm0, %v27702_v5 }
 0xf7a   :  { %24240 = vmatprep.mubr.msk.bf16.mxu0 %vm28307_vm5, %v28306_v40 }
0x1014   :  { %v24194_v37 = vpop.f32.mrb[56].mxu0 }
0x1015   :  { %v11918_v31 = vpop.f32.mrb[57].mxu0 }
0x1016   :  { %v24195_v16 = vpop.f32.mrb[58].mxu0 }
0x1017   :  { %v12046_v29 = vpack.c.bf16 %v24195_v16, %v24194_v37  ;;  %v11921_v11 = vpop.f32.mrb[59].mxu0  ;;  %v27728_v16 = vld [vmem:[%s34700_s10 + $0xf8] sm:$0xff]  }
0x1018   :  { %v12045_v60 = vpack.c.bf16 %v11921_v11, %v11918_v31 }
0x101a   :  { %24241 = vmatmul.mubr.bf16.vlgmr.msra.gmra.mrb[88].mxu0 %v12045_v60 }
0x101b   :  { %24245 = vmatpush3.bf16.msra.mxu0 %v27705_v23  ;;  %24260 = vmatprep.mubr.msk.bf16.mxu0 %vm28307_vm5, %v28306_v40 }
0x101c   :  { %24246 = vmatprep.subr.bf16.mxu0 %v28306_v40  ;;  %v31832_v0 = vpop.f32.mrb[60].mxu0 }
0x101d   :  { %v31834_v18 = vpop.f32.mrb[61].mxu0 }
0x101e   :  { %v31836_v19 = vpop.f32.mrb[62].mxu0 }
0x101f   :  { %24247 = vmatpush3.bf16.msra.mxu0 %v27706_v36  ;;  %v12048_v26 = vpack.c.bf16 %v31836_v19, %v31832_v0  ;;  %v11937_v47 = vpop.f32.mrb[63].mxu0  ;;  %v27729_v36 = vld [vmem:[%s34700_s10 + $0x100] sm:$0xff]   ;;  %v27732_v0 = vld [vmem:[%s34700_s10 + $0x118] sm:$0xff]  }
0x1020   :  { %24248 = vmatprep.subr.bf16.mxu0 %v28306_v40  ;;  %v12047_v54 = vpack.c.bf16 %v11937_v47, %v31834_v18  ;;  %v27730_v47 = vld [vmem:[%s34700_s10 + $0x108] sm:$0xff]   ;;  %v27733_v19 = vld [vmem:[%s34700_s10 + $0x120] sm:$0xff]  }
0x1023   :  { %24249 = vmatpush3.bf16.msra.mxu0 %v27707_v46 }
0x1024   :  { %24250 = vmatprep.subr.bf16.mxu0 %v28306_v40  ;;  %v31849_v24 = vpop.f32.mrb[64].mxu0 }
0x1025   :  { %v31851_v39 = vpop.f32.mrb[65].mxu0 }
0x1026   :  { %v31853_v63 = vpop.f32.mrb[66].mxu0 }
0x1027   :  { %24251 = vmatpush3.bf16.msra.mxu0 %v27708_v33  ;;  %v12050_v49 = vpack.c.bf16 %v31853_v63, %v31849_v24  ;;  %v31860_v53 = vpop.f32.mrb[67].mxu0  ;;  %v27735_v33 = vld [vmem:[%s34700_s10 + $0x130] sm:$0xff]   ;;  %v27748_v24 = vld [vmem:[%s34700_s10 + $0x198] sm:$0xff]   ;;  %v27749_v63 = vld [vmem:[%s34700_s10 + $0x1a0] sm:$0xff]  }
0x1028   :  { %24252 = vmatprep.subr.bf16.mxu0 %v28306_v40  ;;  %v12049_v59 = vpack.c.bf16 %v31860_v53, %v31851_v39  ;;  %v27740_v39 = vld [vmem:[%s34700_s10 + $0x158] sm:$0xff]   ;;  %v27741_v53 = vld [vmem:[%s34700_s10 + $0x160] sm:$0xff]  }
0x102b   :  { %24253 = vmatpush3.bf16.msra.mxu0 %v27709_v28  ;;  %v27736_v28 = vld [vmem:[%s34700_s10 + $0x138] sm:$0xff]  }
0x102c   :  { %24254 = vmatprep.subr.bf16.mxu0 %v28306_v40  ;;  %v31910_v4 = vpop.f32.mrb[68].mxu0 }
0x102d   :  { %v31913_v43 = vpop.f32.mrb[69].mxu0 }
0x102e   :  { %v31915_v45 = vpop.f32.mrb[70].mxu0 }
0x102f   :  { %24255 = vmatpush3.bf16.msra.mxu0 %v27710_v35  ;;  %v12052_v48 = vpack.c.bf16 %v31915_v45, %v31910_v4  ;;  %v31919_v17 = vpop.f32.mrb[71].mxu0  ;;  %v27737_v35 = vld [vmem:[%s34700_s10 + $0x140] sm:$0xff]   ;;  %v27764_v4 = vld [vmem:[%s34700_s10 + $0x218] sm:$0xff]  }
0x1030   :  { %24256 = vmatprep.subr.bf16.mxu0 %v28306_v40  ;;  %v12051_v56 = vpack.c.bf16 %v31919_v17, %v31913_v43  ;;  %v27756_v43 = vld [vmem:[%s34700_s10 + $0x1d8] sm:$0xff]   ;;  %v27757_v17 = vld [vmem:[%s34700_s10 + $0x1e0] sm:$0xff]  }
0x1031   :  { %v27765_v45 = vld [vmem:[%s34700_s10 + $0x220] sm:$0xff]  }
0x1033   :  { %24257 = vmatpush3.bf16.msra.mxu0 %v27711_v1  ;;  %v27738_v1 = vld [vmem:[%s34700_s10 + $0x148] sm:$0xff]  }
0x1034   :  { %24258 = vmatprep.subr.bf16.mxu0 %v28306_v40  ;;  %v31932_v41 = vpop.f32.mrb[72].mxu0 }
0x1035   :  { %v31935_v14 = vpop.f32.mrb[73].mxu0 }
0x1036   :  { %v31937_v10 = vpop.f32.mrb[74].mxu0 }
0x1037   :  { %24259 = vmatpush3.bf16.msra.mxu0 %v27712_v9  ;;  %v31939_v22 = vpop.f32.mrb[75].mxu0  ;;  %v12054_v58 = vpack.c.bf16 %v31937_v10, %v31932_v41  ;;  %v27739_v9 = vld [vmem:[%s34700_s10 + $0x150] sm:$0xff]   ;;  %v27780_v41 = vld [vmem:[%s34700_s10 + $0x298] sm:$0xff]   ;;  %v27781_v10 = vld [vmem:[%s34700_s10 + $0x2a0] sm:$0xff]  }
0x1038   :  { %24264 = vmatprep.subr.bf16.mxu0 %v28306_v40  ;;  %v12053_v61 = vpack.c.bf16 %v31939_v22, %v31935_v14  ;;  %v27772_v14 = vld [vmem:[%s34700_s10 + $0x258] sm:$0xff]   ;;  %v27773_v22 = vld [vmem:[%s34700_s10 + $0x260] sm:$0xff]  }
0x103a   :  { %24261 = vmatmul.mubr.bf16.vlgmr.msra.gmra.mrb[88].mxu0 %v12046_v29 }
0x103b   :  { %24265 = vmatpush3.bf16.msra.mxu0 %v27713_v38  ;;  %24280 = vmatprep.mubr.msk.bf16.mxu0 %vm28307_vm5, %v28306_v40  ;;  %v27743_v38 = vld [vmem:[%s34700_s10 + $0x170] sm:$0xff]  }
0x103c   :  { %24266 = vmatprep.subr.bf16.mxu0 %v28306_v40  ;;  %v31952_v21 = vpop.f32.mrb[76].mxu0 }
0x103d   :  { %v31955_v44 = vpop.f32.mrb[77].mxu0 }
0x103e   :  { %v31957_v15 = vpop.f32.mrb[78].mxu0 }
0x103f   :  { %24267 = vmatpush3.bf16.msra.mxu0 %v27714_v50  ;;  %v31959_v51 = vpop.f32.mrb[79].mxu0  ;;  %v12056_v27 = vpack.c.bf16 %v31957_v15, %v31952_v21  ;;  %v27744_v50 = vld [vmem:[%s34700_s10 + $0x178] sm:$0xff]   ;;  %v27797_v15 = vld [vmem:[%s34700_s10 + $0x320] sm:$0xff]  }
0x1040   :  { %24268 = vmatprep.subr.bf16.mxu0 %v28306_v40  ;;  %v12055_v62 = vpack.c.bf16 %v31959_v51, %v31955_v44  ;;  %v27788_v44 = vld [vmem:[%s34700_s10 + $0x2d8] sm:$0xff]   ;;  %v27789_v51 = vld [vmem:[%s34700_s10 + $0x2e0] sm:$0xff]  }
0x1041   :  { %v27796_v21 = vld [vmem:[%s34700_s10 + $0x318] sm:$0xff]  }
0x1043   :  { %24269 = vmatpush3.bf16.msra.mxu0 %v27715_v12  ;;  %v27745_v12 = vld [vmem:[%s34700_s10 + $0x180] sm:$0xff]  }
0x1044   :  { %24270 = vmatprep.subr.bf16.mxu0 %v28306_v40  ;;  %v31972_v3 = vpop.f32.mrb[80].mxu0 }
0x1045   :  { %v31975_v7 = vpop.f32.mrb[81].mxu0 }
0x1046   :  { %v31977_v42 = vpop.f32.mrb[82].mxu0 }
0x1047   :  { %24271 = vmatpush3.bf16.msra.mxu0 %v27716_v6  ;;  %v31979_v5 = vpop.f32.mrb[83].mxu0  ;;  %v12058_v37 = vpack.c.bf16 %v31977_v42, %v31972_v3  ;;  %v27746_v6 = vld [vmem:[%s34700_s10 + $0x188] sm:$0xff]   ;;  %v27812_v3 = vld [vmem:[%s34700_s10 + $0x398] sm:$0xff]   ;;  %v27813_v42 = vld [vmem:[%s34700_s10 + $0x3a0] sm:$0xff]  }
0x1048   :  { %24272 = vmatprep.subr.bf16.mxu0 %v28306_v40  ;;  %v12057_v31 = vpack.c.bf16 %v31979_v5, %v31975_v7  ;;  %v27804_v7 = vld [vmem:[%s34700_s10 + $0x358] sm:$0xff]   ;;  %v27805_v5 = vld [vmem:[%s34700_s10 + $0x360] sm:$0xff]  }
0x104b   :  { %24273 = vmatpush3.bf16.msra.mxu0 %v27717_v30  ;;  %v27747_v30 = vld [vmem:[%s34700_s10 + $0x190] sm:$0xff]  }
0x104c   :  { %24274 = vmatprep.subr.bf16.mxu0 %v28306_v40  ;;  %v31992_v29 = vpop.f32.mrb[84].mxu0 }
0x104d   :  { %v31995_v11 = vpop.f32.mrb[85].mxu0 }
0x104e   :  { %v31997_v23 = vpop.f32.mrb[86].mxu0 }
0x104f   :  { %24275 = vmatpush3.bf16.msra.mxu0 %v27718_v57  ;;  %v31999_v60 = vpop.f32.mrb[87].mxu0  ;;  %v12060_v18 = vpack.c.bf16 %v31997_v23, %v31992_v29  ;;  %v27751_v57 = vld [vmem:[%s34700_s10 + $0x1b0] sm:$0xff]  }
0x1050   :  { %24276 = vmatprep.subr.bf16.mxu0 %v28306_v40  ;;  %v12059_v46 = vpack.c.bf16 %v31999_v60, %v31995_v11  ;;  %v27820_v11 = vld [vmem:[%s34700_s10 + $0x3d8] sm:$0xff]   ;;  %v27821_v60 = vld [vmem:[%s34700_s10 + $0x3e0] sm:$0xff]  }
0x1053   :  { %24277 = vmatpush3.bf16.msra.mxu0 %v27719_v20  ;;  %v27752_v20 = vld [vmem:[%s34700_s10 + $0x1b8] sm:$0xff]  }
0x1054   :  { %24278 = vmatprep.subr.bf16.mxu0 %v28306_v40 }
0x1057   :  { %24279 = vmatpush3.bf16.msra.mxu0 %v27720_v34  ;;  %v27753_v34 = vld [vmem:[%s34700_s10 + $0x1c0] sm:$0xff]  }
0x1058   :  { %24284 = vmatprep.subr.bf16.mxu0 %v28306_v40 }
0x105a   :  { %24281 = vmatmul.mubr.bf16.vlgmr.msra.gmra.mrb[88].mxu0 %v12047_v54  ;;  %v27731_v54 = vld [vmem:[%s34700_s10 + $0x110] sm:$0xff]  }
0x105b   :  { %24285 = vmatpush3.bf16.msra.mxu0 %v27721_v32  ;;  %24300 = vmatprep.mubr.msk.bf16.mxu0 %vm28307_vm5, %v28306_v40  ;;  %v27754_v32 = vld [vmem:[%s34700_s10 + $0x1c8] sm:$0xff]  }
0x105c   :  { %24286 = vmatprep.subr.bf16.mxu0 %v28306_v40 }
0x105f   :  { %24287 = vmatpush3.bf16.msra.mxu0 %v27722_v52  ;;  %v27755_v52 = vld [vmem:[%s34700_s10 + $0x1d0] sm:$0xff]  }
0x1060   :  { %24288 = vmatprep.subr.bf16.mxu0 %v28306_v40 }
0x1063   :  { %24289 = vmatpush3.bf16.msra.mxu0 %v27723_v8  ;;  %v27759_v8 = vld [vmem:[%s34700_s10 + $0x1f0] sm:$0xff]  }
0x1064   :  { %24290 = vmatprep.subr.bf16.mxu0 %v28306_v40 }
0x1067   :  { %24291 = vmatpush3.bf16.msra.mxu0 %v27724_v55  ;;  %v27760_v55 = vld [vmem:[%s34700_s10 + $0x1f8] sm:$0xff]  }
0x1068   :  { %24292 = vmatprep.subr.bf16.mxu0 %v28306_v40 }
0x106b   :  { %24293 = vmatpush3.bf16.msra.mxu0 %v27725_v25  ;;  %v27761_v25 = vld [vmem:[%s34700_s10 + $0x200] sm:$0xff]  }
0x106c   :  { %24294 = vmatprep.subr.bf16.mxu0 %v28306_v40 }
0x106f   :  { %24295 = vmatpush3.bf16.msra.mxu0 %v27726_v13  ;;  %v27762_v13 = vld [vmem:[%s34700_s10 + $0x208] sm:$0xff]  }
0x1070   :  { %24296 = vmatprep.subr.bf16.mxu0 %v28306_v40 }
0x1073   :  { %24297 = vmatpush3.bf16.msra.mxu0 %v27727_v2  ;;  %v27763_v2 = vld [vmem:[%s34700_s10 + $0x210] sm:$0xff]  }
0x1074   :  { %24298 = vmatprep.subr.bf16.mxu0 %v28306_v40 }
0x1077   :  { %24299 = vmatpush3.bf16.msra.mxu0 %v27728_v16  ;;  %v27767_v16 = vld [vmem:[%s34700_s10 + $0x230] sm:$0xff]  }
0x1078   :  { %24304 = vmatprep.subr.bf16.mxu0 %v28306_v40 }
0x107a   :  { %24301 = vmatmul.mubr.bf16.vlgmr.msra.gmra.mrb[88].mxu0 %v12048_v26  ;;  %v27734_v26 = vld [vmem:[%s34700_s10 + $0x128] sm:$0xff]  }
0x107b   :  { %24305 = vmatpush3.bf16.msra.mxu0 %v27729_v36  ;;  %24320 = vmatprep.mubr.msk.bf16.mxu0 %vm28307_vm5, %v28306_v40  ;;  %v27768_v36 = vld [vmem:[%s34700_s10 + $0x238] sm:$0xff]  }
0x107c   :  { %24306 = vmatprep.subr.bf16.mxu0 %v28306_v40 }
0x107f   :  { %24307 = vmatpush3.bf16.msra.mxu0 %v27730_v47  ;;  %v27769_v47 = vld [vmem:[%s34700_s10 + $0x240] sm:$0xff]  }
0x1080   :  { %24308 = vmatprep.subr.bf16.mxu0 %v28306_v40 }
0x1083   :  { %24309 = vmatpush3.bf16.msra.mxu0 %v27731_v54  ;;  %v27770_v54 = vld [vmem:[%s34700_s10 + $0x248] sm:$0xff]  }
0x1084   :  { %24310 = vmatprep.subr.bf16.mxu0 %v28306_v40 }
0x1087   :  { %24311 = vmatpush3.bf16.msra.mxu0 %v27732_v0  ;;  %v27771_v0 = vld [vmem:[%s34700_s10 + $0x250] sm:$0xff]  }
0x1088   :  { %24312 = vmatprep.subr.bf16.mxu0 %v28306_v40 }
0x108b   :  { %24313 = vmatpush3.bf16.msra.mxu0 %v27733_v19  ;;  %v27775_v19 = vld [vmem:[%s34700_s10 + $0x270] sm:$0xff]  }
0x108c   :  { %24314 = vmatprep.subr.bf16.mxu0 %v28306_v40 }
0x108f   :  { %24315 = vmatpush3.bf16.msra.mxu0 %v27734_v26  ;;  %v27776_v26 = vld [vmem:[%s34700_s10 + $0x278] sm:$0xff]  }
0x1090   :  { %24316 = vmatprep.subr.bf16.mxu0 %v28306_v40 }
0x1093   :  { %24317 = vmatpush3.bf16.msra.mxu0 %v27735_v33  ;;  %v27777_v33 = vld [vmem:[%s34700_s10 + $0x280] sm:$0xff]  }
0x1094   :  { %24318 = vmatprep.subr.bf16.mxu0 %v28306_v40 }
0x1097   :  { %24319 = vmatpush3.bf16.msra.mxu0 %v27736_v28  ;;  %v27778_v28 = vld [vmem:[%s34700_s10 + $0x288] sm:$0xff]  }
0x1098   :  { %24324 = vmatprep.subr.bf16.mxu0 %v28306_v40 }
0x109a   :  { %24321 = vmatmul.mubr.bf16.vlgmr.msra.gmra.mrb[88].mxu0 %v12049_v59  ;;  %v27742_v59 = vld [vmem:[%s34700_s10 + $0x168] sm:$0xff]  }
0x109b   :  { %24325 = vmatpush3.bf16.msra.mxu0 %v27737_v35  ;;  %24340 = vmatprep.mubr.msk.bf16.mxu0 %vm28307_vm5, %v28306_v40  ;;  %v27779_v35 = vld [vmem:[%s34700_s10 + $0x290] sm:$0xff]  }
0x109c   :  { %24326 = vmatprep.subr.bf16.mxu0 %v28306_v40 }
0x109f   :  { %24327 = vmatpush3.bf16.msra.mxu0 %v27738_v1  ;;  %v27783_v1 = vld [vmem:[%s34700_s10 + $0x2b0] sm:$0xff]  }
0x10a0   :  { %24328 = vmatprep.subr.bf16.mxu0 %v28306_v40 }
0x10a3   :  { %24329 = vmatpush3.bf16.msra.mxu0 %v27739_v9  ;;  %v27784_v9 = vld [vmem:[%s34700_s10 + $0x2b8] sm:$0xff]  }
0x10a4   :  { %24330 = vmatprep.subr.bf16.mxu0 %v28306_v40 }
0x10a7   :  { %24331 = vmatpush3.bf16.msra.mxu0 %v27740_v39  ;;  %v27785_v39 = vld [vmem:[%s34700_s10 + $0x2c0] sm:$0xff]  }
0x10a8   :  { %24332 = vmatprep.subr.bf16.mxu0 %v28306_v40 }
0x10ab   :  { %24333 = vmatpush3.bf16.msra.mxu0 %v27741_v53  ;;  %v27786_v53 = vld [vmem:[%s34700_s10 + $0x2c8] sm:$0xff]  }
0x10ac   :  { %24334 = vmatprep.subr.bf16.mxu0 %v28306_v40 }
0x10af   :  { %24335 = vmatpush3.bf16.msra.mxu0 %v27742_v59  ;;  %v27787_v59 = vld [vmem:[%s34700_s10 + $0x2d0] sm:$0xff]  }
0x10b0   :  { %24336 = vmatprep.subr.bf16.mxu0 %v28306_v40 }
0x10b3   :  { %24337 = vmatpush3.bf16.msra.mxu0 %v27743_v38  ;;  %v27791_v38 = vld [vmem:[%s34700_s10 + $0x2f0] sm:$0xff]  }
0x10b4   :  { %24338 = vmatprep.subr.bf16.mxu0 %v28306_v40 }
0x10b7   :  { %24339 = vmatpush3.bf16.msra.mxu0 %v27744_v50  ;;  %v27792_v50 = vld [vmem:[%s34700_s10 + $0x2f8] sm:$0xff]  }
0x10b8   :  { %24344 = vmatprep.subr.bf16.mxu0 %v28306_v40 }
0x10ba   :  { %24341 = vmatmul.mubr.bf16.vlgmr.msra.gmra.mrb[88].mxu0 %v12050_v49  ;;  %v27750_v49 = vld [vmem:[%s34700_s10 + $0x1a8] sm:$0xff]  }
0x10bb   :  { %24345 = vmatpush3.bf16.msra.mxu0 %v27745_v12  ;;  %24360 = vmatprep.mubr.msk.bf16.mxu0 %vm28307_vm5, %v28306_v40  ;;  %v27793_v12 = vld [vmem:[%s34700_s10 + $0x300] sm:$0xff]  }
0x10bc   :  { %24346 = vmatprep.subr.bf16.mxu0 %v28306_v40 }
0x10bf   :  { %24347 = vmatpush3.bf16.msra.mxu0 %v27746_v6  ;;  %v27794_v6 = vld [vmem:[%s34700_s10 + $0x308] sm:$0xff]  }
0x10c0   :  { %24348 = vmatprep.subr.bf16.mxu0 %v28306_v40 }
0x10c3   :  { %24349 = vmatpush3.bf16.msra.mxu0 %v27747_v30  ;;  %v27795_v30 = vld [vmem:[%s34700_s10 + $0x310] sm:$0xff]  }
0x10c4   :  { %24350 = vmatprep.subr.bf16.mxu0 %v28306_v40 }
0x10c7   :  { %24351 = vmatpush3.bf16.msra.mxu0 %v27748_v24  ;;  %v27799_v24 = vld [vmem:[%s34700_s10 + $0x330] sm:$0xff]  }
0x10c8   :  { %24352 = vmatprep.subr.bf16.mxu0 %v28306_v40 }
0x10cb   :  { %24353 = vmatpush3.bf16.msra.mxu0 %v27749_v63  ;;  %v27800_v63 = vld [vmem:[%s34700_s10 + $0x338] sm:$0xff]  }
0x10cc   :  { %24354 = vmatprep.subr.bf16.mxu0 %v28306_v40 }
0x10cf   :  { %24355 = vmatpush3.bf16.msra.mxu0 %v27750_v49  ;;  %v27801_v49 = vld [vmem:[%s34700_s10 + $0x340] sm:$0xff]  }
0x10d0   :  { %24356 = vmatprep.subr.bf16.mxu0 %v28306_v40 }
0x10d3   :  { %24357 = vmatpush3.bf16.msra.mxu0 %v27751_v57  ;;  %v27802_v57 = vld [vmem:[%s34700_s10 + $0x348] sm:$0xff]  }
0x10d4   :  { %24358 = vmatprep.subr.bf16.mxu0 %v28306_v40 }
0x10d7   :  { %24359 = vmatpush3.bf16.msra.mxu0 %v27752_v20  ;;  %v27803_v20 = vld [vmem:[%s34700_s10 + $0x350] sm:$0xff]  }
0x10d8   :  { %24364 = vmatprep.subr.bf16.mxu0 %v28306_v40 }
0x10da   :  { %24361 = vmatmul.mubr.bf16.vlgmr.msra.gmra.mrb[88].mxu0 %v12051_v56  ;;  %v27758_v56 = vld [vmem:[%s34700_s10 + $0x1e8] sm:$0xff]  }
0x10db   :  { %24365 = vmatpush3.bf16.msra.mxu0 %v27753_v34  ;;  %24380 = vmatprep.mubr.msk.bf16.mxu0 %vm28307_vm5, %v28306_v40  ;;  %v27807_v34 = vld [vmem:[%s34700_s10 + $0x370] sm:$0xff]  }
0x10dc   :  { %24366 = vmatprep.subr.bf16.mxu0 %v28306_v40 }
0x10df   :  { %24367 = vmatpush3.bf16.msra.mxu0 %v27754_v32  ;;  %v27808_v32 = vld [vmem:[%s34700_s10 + $0x378] sm:$0xff]  }
0x10e0   :  { %24368 = vmatprep.subr.bf16.mxu0 %v28306_v40 }
0x10e3   :  { %24369 = vmatpush3.bf16.msra.mxu0 %v27755_v52  ;;  %v27809_v52 = vld [vmem:[%s34700_s10 + $0x380] sm:$0xff]  }
0x10e4   :  { %24370 = vmatprep.subr.bf16.mxu0 %v28306_v40 }
0x10e7   :  { %24371 = vmatpush3.bf16.msra.mxu0 %v27756_v43  ;;  %v27810_v43 = vld [vmem:[%s34700_s10 + $0x388] sm:$0xff]  }
0x10e8   :  { %24372 = vmatprep.subr.bf16.mxu0 %v28306_v40 }
0x10eb   :  { %24373 = vmatpush3.bf16.msra.mxu0 %v27757_v17  ;;  %v27811_v17 = vld [vmem:[%s34700_s10 + $0x390] sm:$0xff]  }
0x10ec   :  { %24374 = vmatprep.subr.bf16.mxu0 %v28306_v40 }
0x10ef   :  { %24375 = vmatpush3.bf16.msra.mxu0 %v27758_v56  ;;  %v27815_v56 = vld [vmem:[%s34700_s10 + $0x3b0] sm:$0xff]  }
0x10f0   :  { %24376 = vmatprep.subr.bf16.mxu0 %v28306_v40 }
0x10f3   :  { %24377 = vmatpush3.bf16.msra.mxu0 %v27759_v8  ;;  %v27816_v8 = vld [vmem:[%s34700_s10 + $0x3b8] sm:$0xff]  }
0x10f4   :  { %24378 = vmatprep.subr.bf16.mxu0 %v28306_v40 }
0x10f7   :  { %24379 = vmatpush3.bf16.msra.mxu0 %v27760_v55  ;;  %v27817_v55 = vld [vmem:[%s34700_s10 + $0x3c0] sm:$0xff]  }
0x10f8   :  { %24384 = vmatprep.subr.bf16.mxu0 %v28306_v40 }
0x10fa   :  { %24381 = vmatmul.mubr.bf16.vlgmr.msra.gmra.mrb[88].mxu0 %v12052_v48  ;;  %v27766_v48 = vld [vmem:[%s34700_s10 + $0x228] sm:$0xff]  }
0x10fb   :  { %24385 = vmatpush3.bf16.msra.mxu0 %v27761_v25  ;;  %24400 = vmatprep.mubr.msk.bf16.mxu0 %vm28307_vm5, %v28306_v40  ;;  %v27818_v25 = vld [vmem:[%s34700_s10 + $0x3c8] sm:$0xff]  }
0x10fc   :  { %24386 = vmatprep.subr.bf16.mxu0 %v28306_v40 }
0x10ff   :  { %24387 = vmatpush3.bf16.msra.mxu0 %v27762_v13  ;;  %v27819_v13 = vld [vmem:[%s34700_s10 + $0x3d0] sm:$0xff]  }
0x1100   :  { %24388 = vmatprep.subr.bf16.mxu0 %v28306_v40 }
0x1103   :  { %24389 = vmatpush3.bf16.msra.mxu0 %v27763_v2  ;;  %v27823_v2 = vld [vmem:[%s34700_s10 + $0x3f0] sm:$0xff]  }
0x1104   :  { %24390 = vmatprep.subr.bf16.mxu0 %v28306_v40 }
0x1107   :  { %24391 = vmatpush3.bf16.msra.mxu0 %v27764_v4  ;;  %v27824_v4 = vld [vmem:[%s34700_s10 + $0x3f8] sm:$0xff]  }
0x1108   :  { %24392 = vmatprep.subr.bf16.mxu0 %v28306_v40 }
0x110b   :  { %24393 = vmatpush3.bf16.msra.mxu0 %v27765_v45  ;;  %v27825_v45 = vld [vmem:[%s34695_s5] sm:$0xff]  }
0x110c   :  { %24394 = vmatprep.subr.bf16.mxu0 %v28306_v40 }
0x110f   :  { %24395 = vmatpush3.bf16.msra.mxu0 %v27766_v48 }
0x1110   :  { %24396 = vmatprep.subr.bf16.mxu0 %v28306_v40 }
0x1113   :  { %24397 = vmatpush3.bf16.msra.mxu0 %v27767_v16 }
0x1114   :  { %24398 = vmatprep.subr.bf16.mxu0 %v28306_v40 }
0x1117   :  { %24399 = vmatpush3.bf16.msra.mxu0 %v27768_v36 }
0x1118   :  { %24404 = vmatprep.subr.bf16.mxu0 %v28306_v40 }
0x111a   :  { %24401 = vmatmul.mubr.bf16.vlgmr.msra.gmra.mrb[88].mxu0 %v12053_v61  ;;  %v27774_v61 = vld [vmem:[%s34700_s10 + $0x268] sm:$0xff]  }
0x111b   :  { %24405 = vmatpush3.bf16.msra.mxu0 %v27769_v47  ;;  %24420 = vmatprep.mubr.msk.bf16.mxu0 %vm28307_vm5, %v28306_v40 }
0x111c   :  { %24406 = vmatprep.subr.bf16.mxu0 %v28306_v40 }
0x111f   :  { %24407 = vmatpush3.bf16.msra.mxu0 %v27770_v54 }
0x1120   :  { %24408 = vmatprep.subr.bf16.mxu0 %v28306_v40 }
0x1123   :  { %24409 = vmatpush3.bf16.msra.mxu0 %v27771_v0 }
0x1124   :  { %24410 = vmatprep.subr.bf16.mxu0 %v28306_v40 }
0x1127   :  { %24411 = vmatpush3.bf16.msra.mxu0 %v27772_v14 }
0x1128   :  { %24412 = vmatprep.subr.bf16.mxu0 %v28306_v40 }
0x112b   :  { %24413 = vmatpush3.bf16.msra.mxu0 %v27773_v22 }
0x112c   :  { %24414 = vmatprep.subr.bf16.mxu0 %v28306_v40 }
0x112f   :  { %24415 = vmatpush3.bf16.msra.mxu0 %v27774_v61 }
0x1130   :  { %24416 = vmatprep.subr.bf16.mxu0 %v28306_v40 }
0x1133   :  { %24417 = vmatpush3.bf16.msra.mxu0 %v27775_v19 }
0x1134   :  { %24418 = vmatprep.subr.bf16.mxu0 %v28306_v40 }
0x1137   :  { %24419 = vmatpush3.bf16.msra.mxu0 %v27776_v26 }
0x1138   :  { %24424 = vmatprep.subr.bf16.mxu0 %v28306_v40 }
0x113a   :  { %24421 = vmatmul.mubr.bf16.vlgmr.msra.gmra.mrb[88].mxu0 %v12054_v58  ;;  %v27782_v58 = vld [vmem:[%s34700_s10 + $0x2a8] sm:$0xff]  }
0x113b   :  { %24425 = vmatpush3.bf16.msra.mxu0 %v27777_v33  ;;  %24440 = vmatprep.mubr.msk.bf16.mxu0 %vm28307_vm5, %v28306_v40 }
0x113c   :  { %24426 = vmatprep.subr.bf16.mxu0 %v28306_v40 }
0x113f   :  { %24427 = vmatpush3.bf16.msra.mxu0 %v27778_v28 }
0x1140   :  { %24428 = vmatprep.subr.bf16.mxu0 %v28306_v40 }
0x1143   :  { %24429 = vmatpush3.bf16.msra.mxu0 %v27779_v35 }
0x1144   :  { %24430 = vmatprep.subr.bf16.mxu0 %v28306_v40 }
0x1147   :  { %24431 = vmatpush3.bf16.msra.mxu0 %v27780_v41 }
0x1148   :  { %24432 = vmatprep.subr.bf16.mxu0 %v28306_v40 }
0x114b   :  { %24433 = vmatpush3.bf16.msra.mxu0 %v27781_v10 }
0x114c   :  { %24434 = vmatprep.subr.bf16.mxu0 %v28306_v40 }
0x114f   :  { %24435 = vmatpush3.bf16.msra.mxu0 %v27782_v58 }
0x1150   :  { %24436 = vmatprep.subr.bf16.mxu0 %v28306_v40 }
0x1153   :  { %24437 = vmatpush3.bf16.msra.mxu0 %v27783_v1 }
0x1154   :  { %24438 = vmatprep.subr.bf16.mxu0 %v28306_v40 }
0x1157   :  { %24439 = vmatpush3.bf16.msra.mxu0 %v27784_v9 }
0x1158   :  { %24444 = vmatprep.subr.bf16.mxu0 %v28306_v40 }
0x115a   :  { %24441 = vmatmul.mubr.bf16.vlgmr.msra.gmra.mrb[88].mxu0 %v12055_v62  ;;  %v27790_v62 = vld [vmem:[%s34700_s10 + $0x2e8] sm:$0xff]  }
0x115b   :  { %24445 = vmatpush3.bf16.msra.mxu0 %v27785_v39  ;;  %24460 = vmatprep.mubr.msk.bf16.mxu0 %vm28307_vm5, %v28306_v40  ;;  %v21504_v39 = vld [vmem:[%s34704_s14 + $0x2] ss:$0 sm:$0xff] }
0x115c   :  { %24446 = vmatprep.subr.bf16.mxu0 %v28306_v40 }
0x115f   :  { %24447 = vmatpush3.bf16.msra.mxu0 %v27786_v53 }
0x1160   :  { %24448 = vmatprep.subr.bf16.mxu0 %v28306_v40 }
0x1163   :  { %24449 = vmatpush3.bf16.msra.mxu0 %v27787_v59  ;;  %v21505_v59 = vld [vmem:[%s34705_s15 + $0x2] ss:$0 sm:$0xff] }
0x1164   :  { %24450 = vmatprep.subr.bf16.mxu0 %v28306_v40 }
0x1167   :  { %24451 = vmatpush3.bf16.msra.mxu0 %v27788_v44 }
0x1168   :  { %24452 = vmatprep.subr.bf16.mxu0 %v28306_v40 }
0x116b   :  { %24453 = vmatpush3.bf16.msra.mxu0 %v27789_v51 }
0x116c   :  { %24454 = vmatprep.subr.bf16.mxu0 %v28306_v40 }
0x116f   :  { %24455 = vmatpush3.bf16.msra.mxu0 %v27790_v62 }
0x1170   :  { %24456 = vmatprep.subr.bf16.mxu0 %v28306_v40 }
0x1173   :  { %24457 = vmatpush3.bf16.msra.mxu0 %v27791_v38 }
0x1174   :  { %24458 = vmatprep.subr.bf16.mxu0 %v28306_v40 }
0x1177   :  { %24459 = vmatpush3.bf16.msra.mxu0 %v27792_v50 }
0x1178   :  { %24464 = vmatprep.subr.bf16.mxu0 %v28306_v40 }
0x117a   :  { %24461 = vmatmul.mubr.bf16.vlgmr.msra.gmra.mrb[88].mxu0 %v12056_v27  ;;  %v27798_v27 = vld [vmem:[%s34700_s10 + $0x328] sm:$0xff]  }
0x117b   :  { %24465 = vmatpush3.bf16.msra.mxu0 %v27793_v12  ;;  %24480 = vmatprep.mubr.msk.bf16.mxu0 %vm28307_vm5, %v28306_v40  ;;  %v27826_v12 = vld [vmem:[%s34695_s5 + $0x8] sm:$0xff]  }
0x117c   :  { %24466 = vmatprep.subr.bf16.mxu0 %v28306_v40 }
0x117f   :  { %24467 = vmatpush3.bf16.msra.mxu0 %v27794_v6  ;;  %v27827_v6 = vld [vmem:[%s34695_s5 + $0x10] sm:$0xff]  }
0x1180   :  { %24468 = vmatprep.subr.bf16.mxu0 %v28306_v40 }
0x1183   :  { %24469 = vmatpush3.bf16.msra.mxu0 %v27795_v30  ;;  %v27835_v30 = vld [vmem:[%s34701_s11] sm:$0xff]  }
0x1184   :  { %24470 = vmatprep.subr.bf16.mxu0 %v28306_v40 }
0x1187   :  { %24471 = vmatpush3.bf16.msra.mxu0 %v27796_v21  ;;  %v27836_v21 = vld [vmem:[%s34701_s11 + $0x8] sm:$0xff]  }
0x1188   :  { %24472 = vmatprep.subr.bf16.mxu0 %v28306_v40 }
0x118b   :  { %24473 = vmatpush3.bf16.msra.mxu0 %v27797_v15  ;;  %v27828_v15 = vld [vmem:[%s34695_s5 + $0x18] sm:$0xff]  }
0x118c   :  { %24474 = vmatprep.subr.bf16.mxu0 %v28306_v40 }
0x118f   :  { %24475 = vmatpush3.bf16.msra.mxu0 %v27798_v27  ;;  %v27829_v27 = vld [vmem:[%s34695_s5 + $0x20] sm:$0xff]  }
0x1190   :  { %24476 = vmatprep.subr.bf16.mxu0 %v28306_v40 }
0x1193   :  { %24477 = vmatpush3.bf16.msra.mxu0 %v27799_v24  ;;  %v27839_v24 = vld [vmem:[%s34701_s11 + $0x10] sm:$0xff]  }
0x1194   :  { %24478 = vmatprep.subr.bf16.mxu0 %v28306_v40 }
0x1197   :  { %24479 = vmatpush3.bf16.msra.mxu0 %v27800_v63  ;;  %v27840_v63 = vld [vmem:[%s34701_s11 + $0x18] sm:$0xff]  }
0x1198   :  { %24484 = vmatprep.subr.bf16.mxu0 %v28306_v40 }
0x119a   :  { %24481 = vmatmul.mubr.bf16.vlgmr.msra.gmra.mrb[88].mxu0 %v12057_v31  ;;  %v27806_v31 = vld [vmem:[%s34700_s10 + $0x368] sm:$0xff]  }
0x119b   :  { %24485 = vmatpush3.bf16.msra.mxu0 %v27801_v49  ;;  %24500 = vmatprep.mubr.msk.bf16.mxu0 %vm28307_vm5, %v28306_v40  ;;  %v27830_v49 = vld [vmem:[%s34695_s5 + $0x28] sm:$0xff]  }
0x119c   :  { %24486 = vmatprep.subr.bf16.mxu0 %v28306_v40 }
0x119f   :  { %24487 = vmatpush3.bf16.msra.mxu0 %v27802_v57  ;;  %v27831_v57 = vld [vmem:[%s34695_s5 + $0x30] sm:$0xff]  }
0x11a0   :  { %24488 = vmatprep.subr.bf16.mxu0 %v28306_v40 }
0x11a3   :  { %24489 = vmatpush3.bf16.msra.mxu0 %v27803_v20  ;;  %v27843_v20 = vld [vmem:[%s34701_s11 + $0x20] sm:$0xff]  }
0x11a4   :  { %24490 = vmatprep.subr.bf16.mxu0 %v28306_v40 }
0x11a7   :  { %24491 = vmatpush3.bf16.msra.mxu0 %v27804_v7  ;;  %v27844_v7 = vld [vmem:[%s34701_s11 + $0x28] sm:$0xff]  }
0x11a8   :  { %24492 = vmatprep.subr.bf16.mxu0 %v28306_v40 }
0x11ab   :  { %24493 = vmatpush3.bf16.msra.mxu0 %v27805_v5  ;;  %v27832_v5 = vld [vmem:[%s34695_s5 + $0x38] sm:$0xff]  }
0x11ac   :  { %24494 = vmatprep.subr.bf16.mxu0 %v28306_v40 }
0x11af   :  { %24495 = vmatpush3.bf16.msra.mxu0 %v27806_v31  ;;  %v27833_v31 = vld [vmem:[%s34695_s5 + $0x40] sm:$0xff]  }
0x11b0   :  { %24496 = vmatprep.subr.bf16.mxu0 %v28306_v40 }
0x11b3   :  { %24497 = vmatpush3.bf16.msra.mxu0 %v27807_v34  ;;  %v27847_v34 = vld [vmem:[%s34701_s11 + $0x30] sm:$0xff]  }
0x11b4   :  { %24498 = vmatprep.subr.bf16.mxu0 %v28306_v40 }
0x11b7   :  { %24499 = vmatpush3.bf16.msra.mxu0 %v27808_v32  ;;  %v27834_v32 = vld [vmem:[%s34695_s5 + $0x48] sm:$0xff]  }
0x11b8   :  { %24504 = vmatprep.subr.bf16.mxu0 %v28306_v40 }
0x11ba   :  { %24501 = vmatmul.mubr.bf16.vlgmr.msra.gmra.mrb[88].mxu0 %v12058_v37  ;;  %v27814_v37 = vld [vmem:[%s34700_s10 + $0x3a8] sm:$0xff]  }
0x11bb   :  { %24505 = vmatpush3.bf16.msra.mxu0 %v27809_v52  ;;  %24520 = vmatprep.mubr.msk.bf16.mxu0 %vm28307_vm5, %v28306_v40  ;;  %v27837_v52 = vld [vmem:[%s34695_s5 + $0x50] sm:$0xff]  }
0x11bc   :  { %24506 = vmatprep.subr.bf16.mxu0 %v28306_v40 }
0x11bf   :  { %24507 = vmatpush3.bf16.msra.mxu0 %v27810_v43  ;;  %v27838_v43 = vld [vmem:[%s34695_s5 + $0x58] sm:$0xff]  }
0x11c0   :  { %24508 = vmatprep.subr.bf16.mxu0 %v28306_v40 }
0x11c3   :  { %24509 = vmatpush3.bf16.msra.mxu0 %v27811_v17  ;;  %v27841_v17 = vld [vmem:[%s34695_s5 + $0x60] sm:$0xff]  }
0x11c4   :  { %24510 = vmatprep.subr.bf16.mxu0 %v28306_v40 }
0x11c7   :  { %24511 = vmatpush3.bf16.msra.mxu0 %v27812_v3  ;;  %v27842_v3 = vld [vmem:[%s34695_s5 + $0x68] sm:$0xff]  }
0x11c8   :  { %24512 = vmatprep.subr.bf16.mxu0 %v28306_v40 }
0x11cb   :  { %24513 = vmatpush3.bf16.msra.mxu0 %v27813_v42  ;;  %v27845_v42 = vld [vmem:[%s34695_s5 + $0x70] sm:$0xff]  }
0x11cc   :  { %24514 = vmatprep.subr.bf16.mxu0 %v28306_v40 }
0x11cf   :  { %24515 = vmatpush3.bf16.msra.mxu0 %v27814_v37  ;;  %v27846_v37 = vld [vmem:[%s34695_s5 + $0x78] sm:$0xff]  }
0x11d0   :  { %24516 = vmatprep.subr.bf16.mxu0 %v28306_v40 }
0x11d3   :  { %24517 = vmatpush3.bf16.msra.mxu0 %v27815_v56  ;;  %v27848_v56 = vld [vmem:[%s34701_s11 + $0x38] sm:$0xff]  }
0x11d4   :  { %24518 = vmatprep.subr.bf16.mxu0 %v28306_v40 }
0x11d7   :  { %24519 = vmatpush3.bf16.msra.mxu0 %v27816_v8 }
0x11d8   :  { %24524 = vmatprep.subr.bf16.mxu0 %v28306_v40 }
0x11da   :  { %24521 = vmatmul.mubr.bf16.vlgmr.msra.gmra.mrb[88].mxu0 %v12059_v46  ;;  %v27822_v46 = vld [vmem:[%s34700_s10 + $0x3e8] sm:$0xff]  }
0x11db   :  { %24525 = vmatpush3.bf16.msra.mxu0 %v27817_v55  ;;  %24540 = vmatprep.mubr.msk.bf16.mxu0 %vm28307_vm5, %v28306_v40 }
0x11dc   :  { %24526 = vmatprep.subr.bf16.mxu0 %v28306_v40 }
0x11df   :  { %24527 = vmatpush3.bf16.msra.mxu0 %v27818_v25 }
0x11e0   :  { %24528 = vmatprep.subr.bf16.mxu0 %v28306_v40 }
0x11e3   :  { %24529 = vmatpush3.bf16.msra.mxu0 %v27819_v13 }
0x11e4   :  { %24530 = vmatprep.subr.bf16.mxu0 %v28306_v40 }
0x11e7   :  { %24531 = vmatpush3.bf16.msra.mxu0 %v27820_v11 }
0x11e8   :  { %24532 = vmatprep.subr.bf16.mxu0 %v28306_v40 }
0x11eb   :  { %24533 = vmatpush3.bf16.msra.mxu0 %v27821_v60  ;;  %v27849_v60 = vld [vmem:[%s34701_s11 + $0x40] sm:$0xff]  }
0x11ec   :  { %24534 = vmatprep.subr.bf16.mxu0 %v28306_v40 }
0x11ef   :  { %24535 = vmatpush3.bf16.msra.mxu0 %v27822_v46 }
0x11f0   :  { %24536 = vmatprep.subr.bf16.mxu0 %v28306_v40 }
0x11f3   :  { %24537 = vmatpush3.bf16.msra.mxu0 %v27823_v2  ;;  %v27850_v2 = vld [vmem:[%s34701_s11 + $0x48] sm:$0xff]  }
0x11f4   :  { %24538 = vmatprep.subr.bf16.mxu0 %v28306_v40 }
0x11f7   :  { %24539 = vmatpush3.bf16.msra.mxu0 %v27824_v4 }
0x11fa   :  { %24541 = vmatmul.mubr.bf16.vlgmr.msra.gmra.mrb[88].mxu0 %v12060_v18 }
0x11fb   :  { %24546 = vmatprep.mubr.msk.bf16.mxu0 %vm13937_vm6, %v27825_v45 }
0x12cd   :  { %v13734_v48 = vpop.f32.mrb[88].mxu0 }
0x12ce   :  { %v13771_v16 = vrot.slane %v13734_v48, 4  ;;  %v24542_v36 = vpop.f32.mrb[89].mxu0 }
0x12cf   :  { %v13737_v47 = vpop.f32.mrb[90].mxu0 }
0x12d0   :  { %v13772_v54 = vadd.f32 %v13771_v16, %v13734_v48  ;;  %v24543_v0 = vpop.f32.mrb[91].mxu0  ;;  %v27851_v16 = vld [vmem:[%s34701_s11 + $0x50] sm:$0xff]  }
0x12d1   :  { %v27852_v0 = vld [vmem:[%s34701_s11 + $0x58] sm:$0xff]  }
0x12d2   :  { %v13773_v14 = vrot.slane %v13772_v54, 2 }
0x12d4   :  { %v13774_v22 = vadd.f32 %v13773_v14, %v13772_v54 }
0x12d6   :  { %v13775_v61 = vrot.slane %v13774_v22, 1 }
0x12d8   :  { %v13776_v19 = vadd.f32 %v13775_v61, %v13774_v22 }
0x12da   :  { %v13778_v26 = vmul.f32 0.125, %v13776_v19  ;;  %v27853_v19 = vld [vmem:[%s34701_s11 + $0x60] sm:$0xff]  }
0x12dc   :  { %v13779_v29 = vsub.f32 %v13734_v48, %v13778_v26 }
0x12de   :  { %v13780_v23 = vmul.f32 %v13779_v29, %v13779_v29 }
0x12e0   :  { %v13781_v18 = vrot.slane %v13780_v23, 4 }
0x12e2   :  { %v13782_v33 = vadd.f32 %v13781_v18, %v13780_v23  ;;  %v27854_v18 = vld [vmem:[%s34701_s11 + $0x68] sm:$0xff]  }
0x12e4   :  { %v13783_v28 = vrot.slane %v13782_v33, 2 }
0x12e6   :  { %v13784_v35 = vadd.f32 %v13783_v28, %v13782_v33  ;;  %v27855_v33 = vld [vmem:[%s34701_s11 + $0x70] sm:$0xff]   ;;  %v27856_v28 = vld [vmem:[%s34701_s11 + $0x78] sm:$0xff]  }
0x12e8   :  { %v13785_v41 = vrot.slane %v13784_v35, 1 }
0x12ea   :  { %v13786_v10 = vadd.f32 %v13785_v41, %v13784_v35  ;;  %v27857_v35 = vld [vmem:[%s34701_s11 + $0x80] sm:$0xff]   ;;  %v27858_v41 = vld [vmem:[%s34701_s11 + $0x88] sm:$0xff]  }
0x12ec   :  { %v13787_v58 = vmul.f32 0.125, %v13786_v10  ;;  %v27859_v10 = vld [vmem:[%s34701_s11 + $0x90] sm:$0xff]  }
0x12ee   :  { %v13789_v1 = vadd.f32 1e-05, %v13787_v58  ;;  %v27860_v58 = vld [vmem:[%s34701_s11 + $0x98] sm:$0xff]  }
0x12f0   :  { %28277 = vrsqrt.f32 %v13789_v1  ;;  %v27861_v1 = vld [vmem:[%s34701_s11 + $0xa0] sm:$0xff]  }
0x12fa   :  { %v28278_v9 = vpop.eup %28277 }
0x12fb   :  { %v13791_v53 = vmul.f32 %v28278_v9, %v13779_v29  ;;  %v27862_v9 = vld [vmem:[%s34701_s11 + $0xa8] sm:$0xff]  }
0x12fd   :  { %v13798_v44 = vmul.f32 %v21504_v39, %v13791_v53  ;;  %v27863_v39 = vld [vmem:[%s34701_s11 + $0xb0] sm:$0xff]  }
0x12ff   :  { %v13805_v51 = vadd.f32 %v21505_v59, %v13798_v44  ;;  %v27864_v59 = vld [vmem:[%s34701_s11 + $0xb8] sm:$0xff]  }
0x1301   :  { %vm13807_vm7 = vcmp.ge.f32.partialorder %v13805_v51, 0.0  ;;  %v13809_v62 = vmul.f32 0.2, %v13805_v51 }
0x1303   :  { %v13811_v38 = vsel %vm13807_vm7, %v13805_v51, %v13809_v62 }
0x1304   :  { %v13824_v50 = vpack.c.bf16 %v28306_v40, %v13811_v38 }
0x1306   :  { %24544 = vmatprep.subr.bf16.mxu0 %v13824_v50 }
0x1307   :  { %24545 = vmatpush3.bf16.msra.mxu0 %v13824_v50 }
0x1308   :  { %24578 = vmatprep.subr.bf16.mxu0 %v28306_v40 }
0x130a   :  { %24547 = vmatmul.mubr.msk.bf16.vlgmr.msra.gmra.mrb[92].mxu0 %vm13937_vm6, %v27826_v12  ;;  %v27865_v12 = vld [vmem:[%s34701_s11 + $0xc0] sm:$0xff]  }
0x130b   :  { %24550 = vmatprep.mubr.msk.bf16.mxu0 %vm13937_vm6, %v27827_v6  ;;  %24579 = vmatpush3.bf16.msra.mxu0 %v27835_v30  ;;  %v27866_v30 = vld [vmem:[%s34701_s11 + $0xc8] sm:$0xff]  }
0x130c   :  { %24580 = vmatprep.subr.bf16.mxu0 %v28306_v40 }
0x130f   :  { %24581 = vmatpush3.bf16.msra.mxu0 %v27836_v21 }
0x1310   :  { %24582 = vmatprep.subr.bf16.mxu0 %v28306_v40 }
0x1312   :  { %24551 = vmatmul.mubr.msk.bf16.gmra.mrb[96].mxu0 %vm13937_vm6, %v27828_v15 }
0x1313   :  { %24554 = vmatprep.mubr.msk.bf16.mxu0 %vm13937_vm6, %v27829_v27  ;;  %24583 = vmatpush3.bf16.msra.mxu0 %v27839_v24 }
0x1314   :  { %24584 = vmatprep.subr.bf16.mxu0 %v28306_v40 }
0x1317   :  { %24585 = vmatpush3.bf16.msra.mxu0 %v27840_v63 }
0x1318   :  { %24586 = vmatprep.subr.bf16.mxu0 %v28306_v40 }
0x131a   :  { %24555 = vmatmul.mubr.msk.bf16.gmra.mrb[100].mxu0 %vm13937_vm6, %v27830_v49  ;;  %v27867_v49 = vld [vmem:[%s34701_s11 + $0xd0] sm:$0xff]  }
0x131b   :  { %24558 = vmatprep.mubr.msk.bf16.mxu0 %vm13937_vm6, %v27831_v57  ;;  %24587 = vmatpush3.bf16.msra.mxu0 %v27843_v20  ;;  %v27868_v20 = vld [vmem:[%s34701_s11 + $0xd8] sm:$0xff]  }
0x131c   :  { %24588 = vmatprep.subr.bf16.mxu0 %v28306_v40 }
0x131f   :  { %24589 = vmatpush3.bf16.msra.mxu0 %v27844_v7 }
0x1320   :  { %24590 = vmatprep.subr.bf16.mxu0 %v28306_v40 }
0x1322   :  { %24559 = vmatmul.mubr.msk.bf16.gmra.mrb[104].mxu0 %vm13937_vm6, %v27832_v5 }
0x1323   :  { %24562 = vmatprep.mubr.msk.bf16.mxu0 %vm13937_vm6, %v27833_v31  ;;  %24591 = vmatpush3.bf16.msra.mxu0 %v27847_v34 }
0x1324   :  { %24592 = vmatprep.subr.bf16.mxu0 %v28306_v40 }
0x1327   :  { %24593 = vmatpush3.bf16.msra.mxu0 %v27848_v56 }
0x1328   :  { %24598 = vmatprep.subr.bf16.mxu0 %v28306_v40 }
0x132a   :  { %24563 = vmatmul.mubr.msk.bf16.gmra.mrb[108].mxu0 %vm13937_vm6, %v27834_v32 }
0x132b   :  { %24566 = vmatprep.mubr.msk.bf16.mxu0 %vm13937_vm6, %v27837_v52  ;;  %v27869_v52 = vld [vmem:[%s34701_s11 + $0xe0] sm:$0xff]  }
0x1332   :  { %24567 = vmatmul.mubr.msk.bf16.gmra.mrb[112].mxu0 %vm13937_vm6, %v27838_v43 }
0x1333   :  { %24570 = vmatprep.mubr.msk.bf16.mxu0 %vm13937_vm6, %v27841_v17  ;;  %v27870_v17 = vld [vmem:[%s34701_s11 + $0xe8] sm:$0xff]  }
0x133a   :  { %24571 = vmatmul.mubr.msk.bf16.gmra.mrb[116].mxu0 %vm13937_vm6, %v27842_v3 }
0x133b   :  { %24574 = vmatprep.mubr.msk.bf16.mxu0 %vm13937_vm6, %v27845_v42 }
0x1342   :  { %24575 = vmatmul.mubr.msk.bf16.gmra.mrb[120].mxu0 %vm13937_vm6, %v27846_v37 }
0x1343   :  { %24594 = vmatprep.mubr.msk.bf16.mxu0 %vm28307_vm5, %v28306_v40 }
0x13dd   :  { %v24548_v8 = vpop.f32.mrb[92].mxu0 }
0x13de   :  { %v14020_v55 = vpop.f32.mrb[93].mxu0 }
0x13df   :  { %v24549_v25 = vpop.f32.mrb[94].mxu0 }
0x13e0   :  { %v14148_v13 = vpack.c.bf16 %v24549_v25, %v24548_v8  ;;  %v14023_v11 = vpop.f32.mrb[95].mxu0 }
0x13e1   :  { %v14147_v46 = vpack.c.bf16 %v14023_v11, %v14020_v55  ;;  %v27871_v55 = vld [vmem:[%s34701_s11 + $0xf0] sm:$0xff]  }
0x13e3   :  { %24595 = vmatmul.mubr.bf16.vlgmr.msra.gmra.mrb[124].mxu0 %v14147_v46 }
0x13e4   :  { %24599 = vmatpush3.bf16.msra.mxu0 %v27849_v60  ;;  %24614 = vmatprep.mubr.msk.bf16.mxu0 %vm28307_vm5, %v28306_v40 }
0x13e5   :  { %24600 = vmatprep.subr.bf16.mxu0 %v28306_v40  ;;  %v32567_v4 = vpop.f32.mrb[96].mxu0 }
0x13e6   :  { %v32569_v45 = vpop.f32.mrb[97].mxu0 }
0x13e7   :  { %v32571_v48 = vpop.f32.mrb[98].mxu0 }
0x13e8   :  { %24601 = vmatpush3.bf16.msra.mxu0 %v27850_v2  ;;  %v14150_v36 = vpack.c.bf16 %v32571_v48, %v32567_v4  ;;  %v14039_v47 = vpop.f32.mrb[99].mxu0  ;;  %v27876_v4 = vld [vmem:[%s34701_s11 + $0x118] sm:$0xff]   ;;  %v27877_v48 = vld [vmem:[%s34701_s11 + $0x120] sm:$0xff]  }
0x13e9   :  { %24602 = vmatprep.subr.bf16.mxu0 %v28306_v40  ;;  %v14149_v54 = vpack.c.bf16 %v14039_v47, %v32569_v45  ;;  %v27874_v47 = vld [vmem:[%s34701_s11 + $0x108] sm:$0xff]  }
0x13ec   :  { %24603 = vmatpush3.bf16.msra.mxu0 %v27851_v16  ;;  %v27873_v16 = vld [vmem:[%s34701_s11 + $0x100] sm:$0xff]  }
0x13ed   :  { %24604 = vmatprep.subr.bf16.mxu0 %v28306_v40  ;;  %v32584_v14 = vpop.f32.mrb[100].mxu0 }
0x13ee   :  { %v32586_v22 = vpop.f32.mrb[101].mxu0 }
0x13ef   :  { %v32588_v61 = vpop.f32.mrb[102].mxu0 }
0x13f0   :  { %24605 = vmatpush3.bf16.msra.mxu0 %v27852_v0  ;;  %v14152_v26 = vpack.c.bf16 %v32588_v61, %v32584_v14  ;;  %v32595_v29 = vpop.f32.mrb[103].mxu0  ;;  %v27879_v0 = vld [vmem:[%s34701_s11 + $0x130] sm:$0xff]   ;;  %v27892_v14 = vld [vmem:[%s34701_s11 + $0x198] sm:$0xff]   ;;  %v27893_v61 = vld [vmem:[%s34701_s11 + $0x1a0] sm:$0xff]  }
0x13f1   :  { %24606 = vmatprep.subr.bf16.mxu0 %v28306_v40  ;;  %v14151_v23 = vpack.c.bf16 %v32595_v29, %v32586_v22  ;;  %v27884_v22 = vld [vmem:[%s34701_s11 + $0x158] sm:$0xff]   ;;  %v27885_v29 = vld [vmem:[%s34701_s11 + $0x160] sm:$0xff]  }
0x13f4   :  { %24607 = vmatpush3.bf16.msra.mxu0 %v27853_v19  ;;  %v27880_v19 = vld [vmem:[%s34701_s11 + $0x138] sm:$0xff]  }
0x13f5   :  { %24608 = vmatprep.subr.bf16.mxu0 %v28306_v40  ;;  %v32642_v53 = vpop.f32.mrb[104].mxu0 }
0x13f6   :  { %v32647_v44 = vpop.f32.mrb[105].mxu0 }
0x13f7   :  { %v32650_v51 = vpop.f32.mrb[106].mxu0 }
0x13f8   :  { %24609 = vmatpush3.bf16.msra.mxu0 %v27854_v18  ;;  %v14154_v62 = vpack.c.bf16 %v32650_v51, %v32642_v53  ;;  %v32654_v38 = vpop.f32.mrb[107].mxu0  ;;  %v27881_v18 = vld [vmem:[%s34701_s11 + $0x140] sm:$0xff]   ;;  %v27908_v53 = vld [vmem:[%s34701_s11 + $0x218] sm:$0xff]  }
0x13f9   :  { %24610 = vmatprep.subr.bf16.mxu0 %v28306_v40  ;;  %v14153_v50 = vpack.c.bf16 %v32654_v38, %v32647_v44  ;;  %v27900_v44 = vld [vmem:[%s34701_s11 + $0x1d8] sm:$0xff]   ;;  %v27901_v38 = vld [vmem:[%s34701_s11 + $0x1e0] sm:$0xff]  }
0x13fa   :  { %v27909_v51 = vld [vmem:[%s34701_s11 + $0x220] sm:$0xff]  }
0x13fc   :  { %24611 = vmatpush3.bf16.msra.mxu0 %v27855_v33  ;;  %v27882_v33 = vld [vmem:[%s34701_s11 + $0x148] sm:$0xff]  }
0x13fd   :  { %24612 = vmatprep.subr.bf16.mxu0 %v28306_v40  ;;  %v32662_v6 = vpop.f32.mrb[108].mxu0 }
0x13fe   :  { %v32669_v21 = vpop.f32.mrb[109].mxu0 }
0x13ff   :  { %v32672_v15 = vpop.f32.mrb[110].mxu0 }
0x1400   :  { %24613 = vmatpush3.bf16.msra.mxu0 %v27856_v28  ;;  %v32674_v27 = vpop.f32.mrb[111].mxu0  ;;  %v14156_v24 = vpack.c.bf16 %v32672_v15, %v32662_v6  ;;  %v27883_v28 = vld [vmem:[%s34701_s11 + $0x150] sm:$0xff]   ;;  %v27924_v6 = vld [vmem:[%s34701_s11 + $0x298] sm:$0xff]   ;;  %v27925_v15 = vld [vmem:[%s34701_s11 + $0x2a0] sm:$0xff]  }
0x1401   :  { %24618 = vmatprep.subr.bf16.mxu0 %v28306_v40  ;;  %v14155_v63 = vpack.c.bf16 %v32674_v27, %v32669_v21  ;;  %v27916_v21 = vld [vmem:[%s34701_s11 + $0x258] sm:$0xff]   ;;  %v27917_v27 = vld [vmem:[%s34701_s11 + $0x260] sm:$0xff]  }
0x1403   :  { %24615 = vmatmul.mubr.bf16.vlgmr.msra.gmra.mrb[124].mxu0 %v14148_v13  ;;  %v27872_v13 = vld [vmem:[%s34701_s11 + $0xf8] sm:$0xff]  }
0x1404   :  { %24619 = vmatpush3.bf16.msra.mxu0 %v27857_v35  ;;  %24634 = vmatprep.mubr.msk.bf16.mxu0 %vm28307_vm5, %v28306_v40  ;;  %v27887_v35 = vld [vmem:[%s34701_s11 + $0x170] sm:$0xff]  }
0x1405   :  { %24620 = vmatprep.subr.bf16.mxu0 %v28306_v40  ;;  %v32684_v57 = vpop.f32.mrb[112].mxu0 }
0x1406   :  { %v32689_v7 = vpop.f32.mrb[113].mxu0 }
0x1407   :  { %v32692_v5 = vpop.f32.mrb[114].mxu0 }
0x1408   :  { %24621 = vmatpush3.bf16.msra.mxu0 %v27858_v41  ;;  %v32694_v31 = vpop.f32.mrb[115].mxu0  ;;  %v14158_v34 = vpack.c.bf16 %v32692_v5, %v32684_v57  ;;  %v27888_v41 = vld [vmem:[%s34701_s11 + $0x178] sm:$0xff]   ;;  %v27941_v5 = vld [vmem:[%s34701_s11 + $0x320] sm:$0xff]  }
0x1409   :  { %24622 = vmatprep.subr.bf16.mxu0 %v28306_v40  ;;  %v14157_v32 = vpack.c.bf16 %v32694_v31, %v32689_v7  ;;  %v27932_v7 = vld [vmem:[%s34701_s11 + $0x2d8] sm:$0xff]   ;;  %v27933_v31 = vld [vmem:[%s34701_s11 + $0x2e0] sm:$0xff]  }
0x140a   :  { %v27940_v57 = vld [vmem:[%s34701_s11 + $0x318] sm:$0xff]  }
0x140c   :  { %24623 = vmatpush3.bf16.msra.mxu0 %v27859_v10  ;;  %v27889_v10 = vld [vmem:[%s34701_s11 + $0x180] sm:$0xff]  }
0x140d   :  { %24624 = vmatprep.subr.bf16.mxu0 %v28306_v40  ;;  %v32704_v43 = vpop.f32.mrb[116].mxu0 }
0x140e   :  { %v32709_v3 = vpop.f32.mrb[117].mxu0 }
0x140f   :  { %v32712_v42 = vpop.f32.mrb[118].mxu0 }
0x1410   :  { %24625 = vmatpush3.bf16.msra.mxu0 %v27860_v58  ;;  %v32714_v37 = vpop.f32.mrb[119].mxu0  ;;  %v14160_v56 = vpack.c.bf16 %v32712_v42, %v32704_v43  ;;  %v27890_v58 = vld [vmem:[%s34701_s11 + $0x188] sm:$0xff]   ;;  %v27956_v43 = vld [vmem:[%s34701_s11 + $0x398] sm:$0xff]   ;;  %v27957_v42 = vld [vmem:[%s34701_s11 + $0x3a0] sm:$0xff]  }
0x1411   :  { %24626 = vmatprep.subr.bf16.mxu0 %v28306_v40  ;;  %v14159_v8 = vpack.c.bf16 %v32714_v37, %v32709_v3  ;;  %v27948_v3 = vld [vmem:[%s34701_s11 + $0x358] sm:$0xff]   ;;  %v27949_v37 = vld [vmem:[%s34701_s11 + $0x360] sm:$0xff]  }
0x1414   :  { %24627 = vmatpush3.bf16.msra.mxu0 %v27861_v1  ;;  %v27891_v1 = vld [vmem:[%s34701_s11 + $0x190] sm:$0xff]  }
0x1415   :  { %24628 = vmatprep.subr.bf16.mxu0 %v28306_v40  ;;  %v32724_v25 = vpop.f32.mrb[120].mxu0 }
0x1416   :  { %v32729_v11 = vpop.f32.mrb[121].mxu0 }
0x1417   :  { %v32732_v60 = vpop.f32.mrb[122].mxu0 }
0x1418   :  { %24629 = vmatpush3.bf16.msra.mxu0 %v27862_v9  ;;  %v32734_v46 = vpop.f32.mrb[123].mxu0  ;;  %v14162_v2 = vpack.c.bf16 %v32732_v60, %v32724_v25  ;;  %v27895_v9 = vld [vmem:[%s34701_s11 + $0x1b0] sm:$0xff]   ;;  %v27970_v25 = vld [vmem:[%s34696_s6 + $0x8] sm:$0xff]  }
0x1419   :  { %24630 = vmatprep.subr.bf16.mxu0 %v28306_v40  ;;  %v14161_v45 = vpack.c.bf16 %v32734_v46, %v32729_v11  ;;  %v27964_v11 = vld [vmem:[%s34701_s11 + $0x3d8] sm:$0xff]   ;;  %v27965_v46 = vld [vmem:[%s34701_s11 + $0x3e0] sm:$0xff]   ;;  %v27971_v60 = vld [vmem:[%s34696_s6 + $0x10] sm:$0xff]  }
0x141c   :  { %24631 = vmatpush3.bf16.msra.mxu0 %v27863_v39  ;;  %v27896_v39 = vld [vmem:[%s34701_s11 + $0x1b8] sm:$0xff]  }
0x141d   :  { %24632 = vmatprep.subr.bf16.mxu0 %v28306_v40 }
0x1420   :  { %24633 = vmatpush3.bf16.msra.mxu0 %v27864_v59  ;;  %v27897_v59 = vld [vmem:[%s34701_s11 + $0x1c0] sm:$0xff]  }
0x1421   :  { %24638 = vmatprep.subr.bf16.mxu0 %v28306_v40 }
0x1423   :  { %24635 = vmatmul.mubr.bf16.vlgmr.msra.gmra.mrb[124].mxu0 %v14149_v54  ;;  %v27875_v54 = vld [vmem:[%s34701_s11 + $0x110] sm:$0xff]  }
0x1424   :  { %24639 = vmatpush3.bf16.msra.mxu0 %v27865_v12  ;;  %24654 = vmatprep.mubr.msk.bf16.mxu0 %vm28307_vm5, %v28306_v40  ;;  %v27898_v12 = vld [vmem:[%s34701_s11 + $0x1c8] sm:$0xff]  }
0x1425   :  { %24640 = vmatprep.subr.bf16.mxu0 %v28306_v40 }
0x1428   :  { %24641 = vmatpush3.bf16.msra.mxu0 %v27866_v30  ;;  %v27899_v30 = vld [vmem:[%s34701_s11 + $0x1d0] sm:$0xff]  }
0x1429   :  { %24642 = vmatprep.subr.bf16.mxu0 %v28306_v40 }
0x142c   :  { %24643 = vmatpush3.bf16.msra.mxu0 %v27867_v49  ;;  %v27903_v49 = vld [vmem:[%s34701_s11 + $0x1f0] sm:$0xff]  }
0x142d   :  { %24644 = vmatprep.subr.bf16.mxu0 %v28306_v40 }
0x1430   :  { %24645 = vmatpush3.bf16.msra.mxu0 %v27868_v20  ;;  %v27904_v20 = vld [vmem:[%s34701_s11 + $0x1f8] sm:$0xff]  }
0x1431   :  { %24646 = vmatprep.subr.bf16.mxu0 %v28306_v40 }
0x1434   :  { %24647 = vmatpush3.bf16.msra.mxu0 %v27869_v52  ;;  %v27905_v52 = vld [vmem:[%s34701_s11 + $0x200] sm:$0xff]  }
0x1435   :  { %24648 = vmatprep.subr.bf16.mxu0 %v28306_v40 }
0x1438   :  { %24649 = vmatpush3.bf16.msra.mxu0 %v27870_v17  ;;  %v27906_v17 = vld [vmem:[%s34701_s11 + $0x208] sm:$0xff]  }
0x1439   :  { %24650 = vmatprep.subr.bf16.mxu0 %v28306_v40 }
0x143c   :  { %24651 = vmatpush3.bf16.msra.mxu0 %v27871_v55  ;;  %v27907_v55 = vld [vmem:[%s34701_s11 + $0x210] sm:$0xff]  }
0x143d   :  { %24652 = vmatprep.subr.bf16.mxu0 %v28306_v40 }
0x1440   :  { %24653 = vmatpush3.bf16.msra.mxu0 %v27872_v13  ;;  %v27911_v13 = vld [vmem:[%s34701_s11 + $0x230] sm:$0xff]  }
0x1441   :  { %24658 = vmatprep.subr.bf16.mxu0 %v28306_v40 }
0x1443   :  { %24655 = vmatmul.mubr.bf16.vlgmr.msra.gmra.mrb[124].mxu0 %v14150_v36  ;;  %v27878_v36 = vld [vmem:[%s34701_s11 + $0x128] sm:$0xff]  }
0x1444   :  { %24659 = vmatpush3.bf16.msra.mxu0 %v27873_v16  ;;  %24674 = vmatprep.mubr.msk.bf16.mxu0 %vm28307_vm5, %v28306_v40  ;;  %v27912_v16 = vld [vmem:[%s34701_s11 + $0x238] sm:$0xff]  }
0x1445   :  { %24660 = vmatprep.subr.bf16.mxu0 %v28306_v40 }
0x1448   :  { %24661 = vmatpush3.bf16.msra.mxu0 %v27874_v47  ;;  %v27913_v47 = vld [vmem:[%s34701_s11 + $0x240] sm:$0xff]  }
0x1449   :  { %24662 = vmatprep.subr.bf16.mxu0 %v28306_v40 }
0x144c   :  { %24663 = vmatpush3.bf16.msra.mxu0 %v27875_v54  ;;  %v27914_v54 = vld [vmem:[%s34701_s11 + $0x248] sm:$0xff]  }
0x144d   :  { %24664 = vmatprep.subr.bf16.mxu0 %v28306_v40 }
0x1450   :  { %24665 = vmatpush3.bf16.msra.mxu0 %v27876_v4  ;;  %v27915_v4 = vld [vmem:[%s34701_s11 + $0x250] sm:$0xff]  }
0x1451   :  { %24666 = vmatprep.subr.bf16.mxu0 %v28306_v40 }
0x1454   :  { %24667 = vmatpush3.bf16.msra.mxu0 %v27877_v48  ;;  %v27919_v48 = vld [vmem:[%s34701_s11 + $0x270] sm:$0xff]  }
0x1455   :  { %24668 = vmatprep.subr.bf16.mxu0 %v28306_v40 }
0x1458   :  { %24669 = vmatpush3.bf16.msra.mxu0 %v27878_v36  ;;  %v27920_v36 = vld [vmem:[%s34701_s11 + $0x278] sm:$0xff]  }
0x1459   :  { %24670 = vmatprep.subr.bf16.mxu0 %v28306_v40 }
0x145c   :  { %24671 = vmatpush3.bf16.msra.mxu0 %v27879_v0  ;;  %v27921_v0 = vld [vmem:[%s34701_s11 + $0x280] sm:$0xff]  }
0x145d   :  { %24672 = vmatprep.subr.bf16.mxu0 %v28306_v40 }
0x1460   :  { %24673 = vmatpush3.bf16.msra.mxu0 %v27880_v19  ;;  %v27922_v19 = vld [vmem:[%s34701_s11 + $0x288] sm:$0xff]  }
0x1461   :  { %24678 = vmatprep.subr.bf16.mxu0 %v28306_v40 }
0x1463   :  { %24675 = vmatmul.mubr.bf16.vlgmr.msra.gmra.mrb[124].mxu0 %v14151_v23  ;;  %v27886_v23 = vld [vmem:[%s34701_s11 + $0x168] sm:$0xff]  }
0x1464   :  { %24679 = vmatpush3.bf16.msra.mxu0 %v27881_v18  ;;  %24694 = vmatprep.mubr.msk.bf16.mxu0 %vm28307_vm5, %v28306_v40  ;;  %v27923_v18 = vld [vmem:[%s34701_s11 + $0x290] sm:$0xff]  }
0x1465   :  { %24680 = vmatprep.subr.bf16.mxu0 %v28306_v40 }
0x1468   :  { %24681 = vmatpush3.bf16.msra.mxu0 %v27882_v33  ;;  %v27927_v33 = vld [vmem:[%s34701_s11 + $0x2b0] sm:$0xff]  }
0x1469   :  { %24682 = vmatprep.subr.bf16.mxu0 %v28306_v40 }
0x146c   :  { %24683 = vmatpush3.bf16.msra.mxu0 %v27883_v28  ;;  %v27928_v28 = vld [vmem:[%s34701_s11 + $0x2b8] sm:$0xff]  }
0x146d   :  { %24684 = vmatprep.subr.bf16.mxu0 %v28306_v40 }
0x1470   :  { %24685 = vmatpush3.bf16.msra.mxu0 %v27884_v22  ;;  %v27929_v22 = vld [vmem:[%s34701_s11 + $0x2c0] sm:$0xff]  }
0x1471   :  { %24686 = vmatprep.subr.bf16.mxu0 %v28306_v40 }
0x1474   :  { %24687 = vmatpush3.bf16.msra.mxu0 %v27885_v29  ;;  %v27930_v29 = vld [vmem:[%s34701_s11 + $0x2c8] sm:$0xff]  }
0x1475   :  { %24688 = vmatprep.subr.bf16.mxu0 %v28306_v40 }
0x1478   :  { %24689 = vmatpush3.bf16.msra.mxu0 %v27886_v23  ;;  %v27931_v23 = vld [vmem:[%s34701_s11 + $0x2d0] sm:$0xff]  }
0x1479   :  { %24690 = vmatprep.subr.bf16.mxu0 %v28306_v40 }
0x147c   :  { %24691 = vmatpush3.bf16.msra.mxu0 %v27887_v35  ;;  %v27935_v35 = vld [vmem:[%s34701_s11 + $0x2f0] sm:$0xff]  }
0x147d   :  { %24692 = vmatprep.subr.bf16.mxu0 %v28306_v40 }
0x1480   :  { %24693 = vmatpush3.bf16.msra.mxu0 %v27888_v41  ;;  %v27936_v41 = vld [vmem:[%s34701_s11 + $0x2f8] sm:$0xff]  }
0x1481   :  { %24698 = vmatprep.subr.bf16.mxu0 %v28306_v40 }
0x1483   :  { %24695 = vmatmul.mubr.bf16.vlgmr.msra.gmra.mrb[124].mxu0 %v14152_v26  ;;  %v27894_v26 = vld [vmem:[%s34701_s11 + $0x1a8] sm:$0xff]  }
0x1484   :  { %24699 = vmatpush3.bf16.msra.mxu0 %v27889_v10  ;;  %24714 = vmatprep.mubr.msk.bf16.mxu0 %vm28307_vm5, %v28306_v40  ;;  %v27937_v10 = vld [vmem:[%s34701_s11 + $0x300] sm:$0xff]  }
0x1485   :  { %24700 = vmatprep.subr.bf16.mxu0 %v28306_v40 }
0x1488   :  { %24701 = vmatpush3.bf16.msra.mxu0 %v27890_v58  ;;  %v27938_v58 = vld [vmem:[%s34701_s11 + $0x308] sm:$0xff]  }
0x1489   :  { %24702 = vmatprep.subr.bf16.mxu0 %v28306_v40 }
0x148c   :  { %24703 = vmatpush3.bf16.msra.mxu0 %v27891_v1  ;;  %v27939_v1 = vld [vmem:[%s34701_s11 + $0x310] sm:$0xff]  }
0x148d   :  { %24704 = vmatprep.subr.bf16.mxu0 %v28306_v40 }
0x1490   :  { %24705 = vmatpush3.bf16.msra.mxu0 %v27892_v14  ;;  %v27943_v14 = vld [vmem:[%s34701_s11 + $0x330] sm:$0xff]  }
0x1491   :  { %24706 = vmatprep.subr.bf16.mxu0 %v28306_v40 }
0x1494   :  { %24707 = vmatpush3.bf16.msra.mxu0 %v27893_v61  ;;  %v27944_v61 = vld [vmem:[%s34701_s11 + $0x338] sm:$0xff]  }
0x1495   :  { %24708 = vmatprep.subr.bf16.mxu0 %v28306_v40 }
0x1498   :  { %24709 = vmatpush3.bf16.msra.mxu0 %v27894_v26  ;;  %v27945_v26 = vld [vmem:[%s34701_s11 + $0x340] sm:$0xff]  }
0x1499   :  { %24710 = vmatprep.subr.bf16.mxu0 %v28306_v40 }
0x149c   :  { %24711 = vmatpush3.bf16.msra.mxu0 %v27895_v9  ;;  %v27946_v9 = vld [vmem:[%s34701_s11 + $0x348] sm:$0xff]  }
0x149d   :  { %24712 = vmatprep.subr.bf16.mxu0 %v28306_v40 }
0x14a0   :  { %24713 = vmatpush3.bf16.msra.mxu0 %v27896_v39  ;;  %v27947_v39 = vld [vmem:[%s34701_s11 + $0x350] sm:$0xff]  }
0x14a1   :  { %24718 = vmatprep.subr.bf16.mxu0 %v28306_v40 }
0x14a3   :  { %24715 = vmatmul.mubr.bf16.vlgmr.msra.gmra.mrb[124].mxu0 %v14153_v50  ;;  %v27902_v50 = vld [vmem:[%s34701_s11 + $0x1e8] sm:$0xff]  }
0x14a4   :  { %24719 = vmatpush3.bf16.msra.mxu0 %v27897_v59  ;;  %24734 = vmatprep.mubr.msk.bf16.mxu0 %vm28307_vm5, %v28306_v40  ;;  %v27951_v59 = vld [vmem:[%s34701_s11 + $0x370] sm:$0xff]  }
0x14a5   :  { %24720 = vmatprep.subr.bf16.mxu0 %v28306_v40 }
0x14a8   :  { %24721 = vmatpush3.bf16.msra.mxu0 %v27898_v12  ;;  %v27952_v12 = vld [vmem:[%s34701_s11 + $0x378] sm:$0xff]  }
0x14a9   :  { %24722 = vmatprep.subr.bf16.mxu0 %v28306_v40 }
0x14ac   :  { %24723 = vmatpush3.bf16.msra.mxu0 %v27899_v30  ;;  %v27953_v30 = vld [vmem:[%s34701_s11 + $0x380] sm:$0xff]  }
0x14ad   :  { %24724 = vmatprep.subr.bf16.mxu0 %v28306_v40 }
0x14b0   :  { %24725 = vmatpush3.bf16.msra.mxu0 %v27900_v44  ;;  %v27954_v44 = vld [vmem:[%s34701_s11 + $0x388] sm:$0xff]  }
0x14b1   :  { %24726 = vmatprep.subr.bf16.mxu0 %v28306_v40 }
0x14b4   :  { %24727 = vmatpush3.bf16.msra.mxu0 %v27901_v38  ;;  %v27955_v38 = vld [vmem:[%s34701_s11 + $0x390] sm:$0xff]  }
0x14b5   :  { %24728 = vmatprep.subr.bf16.mxu0 %v28306_v40 }
0x14b8   :  { %24729 = vmatpush3.bf16.msra.mxu0 %v27902_v50  ;;  %v27959_v50 = vld [vmem:[%s34701_s11 + $0x3b0] sm:$0xff]  }
0x14b9   :  { %24730 = vmatprep.subr.bf16.mxu0 %v28306_v40 }
0x14bc   :  { %24731 = vmatpush3.bf16.msra.mxu0 %v27903_v49  ;;  %v27960_v49 = vld [vmem:[%s34701_s11 + $0x3b8] sm:$0xff]  }
0x14bd   :  { %24732 = vmatprep.subr.bf16.mxu0 %v28306_v40 }
0x14c0   :  { %24733 = vmatpush3.bf16.msra.mxu0 %v27904_v20  ;;  %v27961_v20 = vld [vmem:[%s34701_s11 + $0x3c0] sm:$0xff]  }
0x14c1   :  { %24738 = vmatprep.subr.bf16.mxu0 %v28306_v40 }
0x14c3   :  { %24735 = vmatmul.mubr.bf16.vlgmr.msra.gmra.mrb[124].mxu0 %v14154_v62  ;;  %v27910_v62 = vld [vmem:[%s34701_s11 + $0x228] sm:$0xff]  }
0x14c4   :  { %24739 = vmatpush3.bf16.msra.mxu0 %v27905_v52  ;;  %24754 = vmatprep.mubr.msk.bf16.mxu0 %vm28307_vm5, %v28306_v40  ;;  %v27962_v52 = vld [vmem:[%s34701_s11 + $0x3c8] sm:$0xff]  }
0x14c5   :  { %24740 = vmatprep.subr.bf16.mxu0 %v28306_v40 }
0x14c8   :  { %24741 = vmatpush3.bf16.msra.mxu0 %v27906_v17  ;;  %v27963_v17 = vld [vmem:[%s34701_s11 + $0x3d0] sm:$0xff]  }
0x14c9   :  { %24742 = vmatprep.subr.bf16.mxu0 %v28306_v40 }
0x14cc   :  { %24743 = vmatpush3.bf16.msra.mxu0 %v27907_v55  ;;  %v27967_v55 = vld [vmem:[%s34701_s11 + $0x3f0] sm:$0xff]  }
0x14cd   :  { %24744 = vmatprep.subr.bf16.mxu0 %v28306_v40 }
0x14d0   :  { %24745 = vmatpush3.bf16.msra.mxu0 %v27908_v53  ;;  %v27968_v53 = vld [vmem:[%s34701_s11 + $0x3f8] sm:$0xff]  }
0x14d1   :  { %24746 = vmatprep.subr.bf16.mxu0 %v28306_v40 }
0x14d4   :  { %24747 = vmatpush3.bf16.msra.mxu0 %v27909_v51  ;;  %v27969_v51 = vld [vmem:[%s34696_s6] sm:$0xff]  }
0x14d5   :  { %24748 = vmatprep.subr.bf16.mxu0 %v28306_v40  ;;  %24900 = vmatprep.mubr.msk.bf16.mxu1 %vm13937_vm6, %v27969_v51  ;;  %v28006_v51 = vld [vmem:[%s34702_s12 + $0xa8] sm:$0xff]  }
0x14d8   :  { %24749 = vmatpush3.bf16.msra.mxu0 %v27910_v62  ;;  %v13813_v62 = vlaneseq }
0x14d9   :  { %24750 = vmatprep.subr.bf16.mxu0 %v28306_v40 }
0x14dc   :  { %24751 = vmatpush3.bf16.msra.mxu0 %v27911_v13  ;;  %v13814_v13 = vshrl.u32 %v13813_v62, 7  ;;  %v28007_v62 = vld [vmem:[%s34702_s12 + $0xb0] sm:$0xff]  }
0x14dd   :  { %24752 = vmatprep.subr.bf16.mxu0 %v28306_v40 }
0x14de   :  { %vm15875_vm8 = vcmp.lt.s32.totalorder %v13814_v13, 2 }
0x14df   :  { %vm21682_vm10 = vmpackc.low %vm28308_vm9, %vm15875_vm8 }
0x14e0   :  { %24753 = vmatpush3.bf16.msra.mxu0 %v27912_v16 }
0x14e1   :  { %24758 = vmatprep.subr.bf16.mxu0 %v28306_v40 }
0x14e3   :  { %24755 = vmatmul.mubr.bf16.vlgmr.msra.gmra.mrb[124].mxu0 %v14155_v63  ;;  %v27918_v63 = vld [vmem:[%s34701_s11 + $0x268] sm:$0xff]  }
0x14e4   :  { %24759 = vmatpush3.bf16.msra.mxu0 %v27913_v47  ;;  %24774 = vmatprep.mubr.msk.bf16.mxu0 %vm28307_vm5, %v28306_v40 }
0x14e5   :  { %24760 = vmatprep.subr.bf16.mxu0 %v28306_v40 }
0x14e8   :  { %24761 = vmatpush3.bf16.msra.mxu0 %v27914_v54 }
0x14e9   :  { %24762 = vmatprep.subr.bf16.mxu0 %v28306_v40 }
0x14ec   :  { %24763 = vmatpush3.bf16.msra.mxu0 %v27915_v4 }
0x14ed   :  { %24764 = vmatprep.subr.bf16.mxu0 %v28306_v40 }
0x14f0   :  { %24765 = vmatpush3.bf16.msra.mxu0 %v27916_v21 }
0x14f1   :  { %24766 = vmatprep.subr.bf16.mxu0 %v28306_v40 }
0x14f4   :  { %24767 = vmatpush3.bf16.msra.mxu0 %v27917_v27 }
0x14f5   :  { %24768 = vmatprep.subr.bf16.mxu0 %v28306_v40 }
0x14f8   :  { %24769 = vmatpush3.bf16.msra.mxu0 %v27918_v63  ;;  %v27980_v63 = vld [vmem:[%s34702_s12 + $0x8] sm:$0xff]  }
0x14f9   :  { %24770 = vmatprep.subr.bf16.mxu0 %v28306_v40 }
0x14fc   :  { %24771 = vmatpush3.bf16.msra.mxu0 %v27919_v48  ;;  %v27972_v48 = vld [vmem:[%s34696_s6 + $0x18] sm:$0xff]  }
0x14fd   :  { %24772 = vmatprep.subr.bf16.mxu0 %v28306_v40 }
0x1500   :  { %24773 = vmatpush3.bf16.msra.mxu0 %v27920_v36  ;;  %v27973_v36 = vld [vmem:[%s34696_s6 + $0x20] sm:$0xff]  }
0x1501   :  { %24778 = vmatprep.subr.bf16.mxu0 %v28306_v40 }
0x1503   :  { %24775 = vmatmul.mubr.bf16.vlgmr.msra.gmra.mrb[124].mxu0 %v14156_v24  ;;  %v27926_v24 = vld [vmem:[%s34701_s11 + $0x2a8] sm:$0xff]  }
0x1504   :  { %24779 = vmatpush3.bf16.msra.mxu0 %v27921_v0  ;;  %24794 = vmatprep.mubr.msk.bf16.mxu0 %vm28307_vm5, %v28306_v40  ;;  %v27983_v0 = vld [vmem:[%s34702_s12 + $0x10] sm:$0xff]  }
0x1505   :  { %24780 = vmatprep.subr.bf16.mxu0 %v28306_v40 }
0x1508   :  { %24781 = vmatpush3.bf16.msra.mxu0 %v27922_v19  ;;  %v27984_v19 = vld [vmem:[%s34702_s12 + $0x18] sm:$0xff]  }
0x1509   :  { %24782 = vmatprep.subr.bf16.mxu0 %v28306_v40 }
0x150c   :  { %24783 = vmatpush3.bf16.msra.mxu0 %v27923_v18  ;;  %v27974_v18 = vld [vmem:[%s34696_s6 + $0x28] sm:$0xff]  }
0x150d   :  { %24784 = vmatprep.subr.bf16.mxu0 %v28306_v40 }
0x1510   :  { %24785 = vmatpush3.bf16.msra.mxu0 %v27924_v6  ;;  %v27975_v6 = vld [vmem:[%s34696_s6 + $0x30] sm:$0xff]  }
0x1511   :  { %24786 = vmatprep.subr.bf16.mxu0 %v28306_v40 }
0x1514   :  { %24787 = vmatpush3.bf16.msra.mxu0 %v27925_v15  ;;  %v27987_v15 = vld [vmem:[%s34702_s12 + $0x20] sm:$0xff]  }
0x1515   :  { %24788 = vmatprep.subr.bf16.mxu0 %v28306_v40 }
0x1518   :  { %24789 = vmatpush3.bf16.msra.mxu0 %v27926_v24  ;;  %v27988_v24 = vld [vmem:[%s34702_s12 + $0x28] sm:$0xff]  }
0x1519   :  { %24790 = vmatprep.subr.bf16.mxu0 %v28306_v40 }
0x151c   :  { %24791 = vmatpush3.bf16.msra.mxu0 %v27927_v33  ;;  %v27976_v33 = vld [vmem:[%s34696_s6 + $0x38] sm:$0xff]  }
0x151d   :  { %24792 = vmatprep.subr.bf16.mxu0 %v28306_v40 }
0x1520   :  { %24793 = vmatpush3.bf16.msra.mxu0 %v27928_v28  ;;  %v27977_v28 = vld [vmem:[%s34696_s6 + $0x40] sm:$0xff]  }
0x1521   :  { %24798 = vmatprep.subr.bf16.mxu0 %v28306_v40 }
0x1523   :  { %24795 = vmatmul.mubr.bf16.vlgmr.msra.gmra.mrb[124].mxu0 %v14157_v32  ;;  %v27934_v32 = vld [vmem:[%s34701_s11 + $0x2e8] sm:$0xff]  }
0x1524   :  { %24799 = vmatpush3.bf16.msra.mxu0 %v27929_v22  ;;  %24814 = vmatprep.mubr.msk.bf16.mxu0 %vm28307_vm5, %v28306_v40  ;;  %v27991_v22 = vld [vmem:[%s34702_s12 + $0x30] sm:$0xff]  }
0x1525   :  { %24800 = vmatprep.subr.bf16.mxu0 %v28306_v40 }
0x1528   :  { %24801 = vmatpush3.bf16.msra.mxu0 %v27930_v29  ;;  %v27978_v29 = vld [vmem:[%s34696_s6 + $0x48] sm:$0xff]  }
0x1529   :  { %24802 = vmatprep.subr.bf16.mxu0 %v28306_v40 }
0x152c   :  { %24803 = vmatpush3.bf16.msra.mxu0 %v27931_v23  ;;  %v27981_v23 = vld [vmem:[%s34696_s6 + $0x50] sm:$0xff]  }
0x152d   :  { %24804 = vmatprep.subr.bf16.mxu0 %v28306_v40 }
0x1530   :  { %24805 = vmatpush3.bf16.msra.mxu0 %v27932_v7  ;;  %v27982_v7 = vld [vmem:[%s34696_s6 + $0x58] sm:$0xff]  }
0x1531   :  { %24806 = vmatprep.subr.bf16.mxu0 %v28306_v40 }
0x1534   :  { %24807 = vmatpush3.bf16.msra.mxu0 %v27933_v31  ;;  %v27985_v31 = vld [vmem:[%s34696_s6 + $0x60] sm:$0xff]  }
0x1535   :  { %24808 = vmatprep.subr.bf16.mxu0 %v28306_v40 }
0x1538   :  { %24809 = vmatpush3.bf16.msra.mxu0 %v27934_v32  ;;  %v27986_v32 = vld [vmem:[%s34696_s6 + $0x68] sm:$0xff]  }
0x1539   :  { %24810 = vmatprep.subr.bf16.mxu0 %v28306_v40 }
0x153c   :  { %24811 = vmatpush3.bf16.msra.mxu0 %v27935_v35  ;;  %v27989_v35 = vld [vmem:[%s34696_s6 + $0x70] sm:$0xff]  }
0x153d   :  { %24812 = vmatprep.subr.bf16.mxu0 %v28306_v40 }
0x1540   :  { %24813 = vmatpush3.bf16.msra.mxu0 %v27936_v41  ;;  %v27990_v41 = vld [vmem:[%s34696_s6 + $0x78] sm:$0xff]  }
0x1541   :  { %24818 = vmatprep.subr.bf16.mxu0 %v28306_v40 }
0x1543   :  { %24815 = vmatmul.mubr.bf16.vlgmr.msra.gmra.mrb[124].mxu0 %v14158_v34  ;;  %v27942_v34 = vld [vmem:[%s34701_s11 + $0x328] sm:$0xff]  }
0x1544   :  { %24819 = vmatpush3.bf16.msra.mxu0 %v27937_v10  ;;  %24834 = vmatprep.mubr.msk.bf16.mxu0 %vm28307_vm5, %v28306_v40  ;;  %v27992_v10 = vld [vmem:[%s34702_s12 + $0x38] sm:$0xff]  }
0x1545   :  { %24820 = vmatprep.subr.bf16.mxu0 %v28306_v40 }
0x1548   :  { %24821 = vmatpush3.bf16.msra.mxu0 %v27938_v58 }
0x1549   :  { %24822 = vmatprep.subr.bf16.mxu0 %v28306_v40 }
0x154c   :  { %24823 = vmatpush3.bf16.msra.mxu0 %v27939_v1 }
0x154d   :  { %24824 = vmatprep.subr.bf16.mxu0 %v28306_v40 }
0x1550   :  { %24825 = vmatpush3.bf16.msra.mxu0 %v27940_v57 }
0x1551   :  { %24826 = vmatprep.subr.bf16.mxu0 %v28306_v40 }
0x1554   :  { %24827 = vmatpush3.bf16.msra.mxu0 %v27941_v5 }
0x1555   :  { %24828 = vmatprep.subr.bf16.mxu0 %v28306_v40 }
0x1558   :  { %24829 = vmatpush3.bf16.msra.mxu0 %v27942_v34 }
0x1559   :  { %24830 = vmatprep.subr.bf16.mxu0 %v28306_v40 }
0x155c   :  { %24831 = vmatpush3.bf16.msra.mxu0 %v27943_v14  ;;  %v27993_v14 = vld [vmem:[%s34702_s12 + $0x40] sm:$0xff]  }
0x155d   :  { %24832 = vmatprep.subr.bf16.mxu0 %v28306_v40 }
0x1560   :  { %24833 = vmatpush3.bf16.msra.mxu0 %v27944_v61 }
0x1561   :  { %24838 = vmatprep.subr.bf16.mxu0 %v28306_v40 }
0x1563   :  { %24835 = vmatmul.mubr.bf16.vlgmr.msra.gmra.mrb[124].mxu0 %v14159_v8  ;;  %v27950_v8 = vld [vmem:[%s34701_s11 + $0x368] sm:$0xff]  }
0x1564   :  { %24839 = vmatpush3.bf16.msra.mxu0 %v27945_v26  ;;  %24854 = vmatprep.mubr.msk.bf16.mxu0 %vm28307_vm5, %v28306_v40  ;;  %v27994_v26 = vld [vmem:[%s34702_s12 + $0x48] sm:$0xff]  }
0x1565   :  { %24840 = vmatprep.subr.bf16.mxu0 %v28306_v40 }
0x1568   :  { %24841 = vmatpush3.bf16.msra.mxu0 %v27946_v9 }
0x1569   :  { %24842 = vmatprep.subr.bf16.mxu0 %v28306_v40 }
0x156c   :  { %24843 = vmatpush3.bf16.msra.mxu0 %v27947_v39 }
0x156d   :  { %24844 = vmatprep.subr.bf16.mxu0 %v28306_v40 }
0x1570   :  { %24845 = vmatpush3.bf16.msra.mxu0 %v27948_v3 }
0x1571   :  { %24846 = vmatprep.subr.bf16.mxu0 %v28306_v40 }
0x1574   :  { %24847 = vmatpush3.bf16.msra.mxu0 %v27949_v37  ;;  %v27995_v37 = vld [vmem:[%s34702_s12 + $0x50] sm:$0xff]  }
0x1575   :  { %24848 = vmatprep.subr.bf16.mxu0 %v28306_v40 }
0x1578   :  { %24849 = vmatpush3.bf16.msra.mxu0 %v27950_v8 }
0x1579   :  { %24850 = vmatprep.subr.bf16.mxu0 %v28306_v40 }
0x157c   :  { %24851 = vmatpush3.bf16.msra.mxu0 %v27951_v59 }
0x157d   :  { %24852 = vmatprep.subr.bf16.mxu0 %v28306_v40 }
0x1580   :  { %24853 = vmatpush3.bf16.msra.mxu0 %v27952_v12 }
0x1581   :  { %24858 = vmatprep.subr.bf16.mxu0 %v28306_v40 }
0x1583   :  { %24855 = vmatmul.mubr.bf16.vlgmr.msra.gmra.mrb[124].mxu0 %v14160_v56  ;;  %v27958_v56 = vld [vmem:[%s34701_s11 + $0x3a8] sm:$0xff]  }
0x1584   :  { %24859 = vmatpush3.bf16.msra.mxu0 %v27953_v30  ;;  %24874 = vmatprep.mubr.msk.bf16.mxu0 %vm28307_vm5, %v28306_v40  ;;  %v27996_v30 = vld [vmem:[%s34702_s12 + $0x58] sm:$0xff]  }
0x1585   :  { %24860 = vmatprep.subr.bf16.mxu0 %v28306_v40 }
0x1588   :  { %24861 = vmatpush3.bf16.msra.mxu0 %v27954_v44 }
0x1589   :  { %24862 = vmatprep.subr.bf16.mxu0 %v28306_v40 }
0x158c   :  { %24863 = vmatpush3.bf16.msra.mxu0 %v27955_v38 }
0x158d   :  { %24864 = vmatprep.subr.bf16.mxu0 %v28306_v40 }
0x1590   :  { %24865 = vmatpush3.bf16.msra.mxu0 %v27956_v43 }
0x1591   :  { %24866 = vmatprep.subr.bf16.mxu0 %v28306_v40 }
0x1594   :  { %24867 = vmatpush3.bf16.msra.mxu0 %v27957_v42  ;;  %v27997_v42 = vld [vmem:[%s34702_s12 + $0x60] sm:$0xff]  }
0x1595   :  { %24868 = vmatprep.subr.bf16.mxu0 %v28306_v40 }
0x1598   :  { %24869 = vmatpush3.bf16.msra.mxu0 %v27958_v56 }
0x1599   :  { %24870 = vmatprep.subr.bf16.mxu0 %v28306_v40 }
0x159c   :  { %24871 = vmatpush3.bf16.msra.mxu0 %v27959_v50 }
0x159d   :  { %24872 = vmatprep.subr.bf16.mxu0 %v28306_v40 }
0x15a0   :  { %24873 = vmatpush3.bf16.msra.mxu0 %v27960_v49 }
0x15a1   :  { %24878 = vmatprep.subr.bf16.mxu0 %v28306_v40 }
0x15a3   :  { %24875 = vmatmul.mubr.bf16.vlgmr.msra.gmra.mrb[124].mxu0 %v14161_v45  ;;  %v27966_v45 = vld [vmem:[%s34701_s11 + $0x3e8] sm:$0xff]  }
0x15a4   :  { %24879 = vmatpush3.bf16.msra.mxu0 %v27961_v20  ;;  %24894 = vmatprep.mubr.msk.bf16.mxu0 %vm28307_vm5, %v28306_v40  ;;  %v27998_v20 = vld [vmem:[%s34702_s12 + $0x68] sm:$0xff]  }
0x15a5   :  { %24880 = vmatprep.subr.bf16.mxu0 %v28306_v40 }
0x15a8   :  { %24881 = vmatpush3.bf16.msra.mxu0 %v27962_v52  ;;  %v27999_v52 = vld [vmem:[%s34702_s12 + $0x70] sm:$0xff]  }
0x15a9   :  { %24882 = vmatprep.subr.bf16.mxu0 %v28306_v40 }
0x15ac   :  { %24883 = vmatpush3.bf16.msra.mxu0 %v27963_v17  ;;  %v28000_v17 = vld [vmem:[%s34702_s12 + $0x78] sm:$0xff]  }
0x15ad   :  { %24884 = vmatprep.subr.bf16.mxu0 %v28306_v40 }
0x15b0   :  { %24885 = vmatpush3.bf16.msra.mxu0 %v27964_v11  ;;  %v28001_v11 = vld [vmem:[%s34702_s12 + $0x80] sm:$0xff]  }
0x15b1   :  { %24886 = vmatprep.subr.bf16.mxu0 %v28306_v40 }
0x15b4   :  { %24887 = vmatpush3.bf16.msra.mxu0 %v27965_v46  ;;  %v28002_v46 = vld [vmem:[%s34702_s12 + $0x88] sm:$0xff]  }
0x15b5   :  { %24888 = vmatprep.subr.bf16.mxu0 %v28306_v40 }
0x15b8   :  { %24889 = vmatpush3.bf16.msra.mxu0 %v27966_v45  ;;  %v28003_v45 = vld [vmem:[%s34702_s12 + $0x90] sm:$0xff]  }
0x15b9   :  { %24890 = vmatprep.subr.bf16.mxu0 %v28306_v40 }
0x15bc   :  { %24891 = vmatpush3.bf16.msra.mxu0 %v27967_v55  ;;  %v28004_v55 = vld [vmem:[%s34702_s12 + $0x98] sm:$0xff]  }
0x15bd   :  { %24892 = vmatprep.subr.bf16.mxu0 %v28306_v40 }
0x15c0   :  { %24893 = vmatpush3.bf16.msra.mxu0 %v27968_v53  ;;  %v28005_v53 = vld [vmem:[%s34702_s12 + $0xa0] sm:$0xff]  }
0x15c3   :  { %24895 = vmatmul.mubr.bf16.vlgmr.msra.gmra.mrb[124].mxu0 %v14162_v2  ;;  %v27979_v2 = vld [vmem:[%s34702_s12] sm:$0xff]  }
0x1696   :  { %v15836_v16 = vpop.f32.mrb[124].mxu0 }
0x1697   :  { %v15873_v47 = vmax.f32 %v15836_v16, 0.0  ;;  %v24896_v54 = vpop.f32.mrb[125].mxu0 }
0x1698   :  { %v15839_v4 = vpop.f32.mrb[126].mxu0 }
0x1699   :  { %v21683_v21 = vpack.c.bf16 %v28306_v40, %v15873_v47  ;;  %v24897_v27 = vpop.f32.mrb[127].mxu0  ;;  %v28008_v47 = vld [vmem:[%s34702_s12 + $0xb8] sm:$0xff]  }
0x169b   :  { %24898 = vmatprep.subr.msk.bf16.mxu1 %vm21682_vm10, %v21683_v21 }
0x169c   :  { %24899 = vmatpush3.bf16.msk.msra.mxu1 %vm21682_vm10, %v21683_v21 }
0x169d   :  { %24932 = vmatprep.subr.bf16.mxu1 %v28306_v40 }
0x169f   :  { %24901 = vmatmul.mubr.msk.bf16.vlgmr.msra.gmra.mrb[200].mxu1 %vm13937_vm6, %v27970_v25  ;;  %v28009_v25 = vld [vmem:[%s34702_s12 + $0xc0] sm:$0xff]  }
0x16a0   :  { %24904 = vmatprep.mubr.msk.bf16.mxu1 %vm13937_vm6, %v27971_v60  ;;  %24933 = vmatpush3.bf16.msra.mxu1 %v27979_v2 }
0x16a1   :  { %24934 = vmatprep.subr.bf16.mxu1 %v28306_v40 }
0x16a4   :  { %24935 = vmatpush3.bf16.msra.mxu1 %v27980_v63  ;;  %v28010_v63 = vld [vmem:[%s34702_s12 + $0xc8] sm:$0xff]  }
0x16a5   :  { %24936 = vmatprep.subr.bf16.mxu1 %v28306_v40 }
0x16a7   :  { %24905 = vmatmul.mubr.msk.bf16.gmra.mrb[204].mxu1 %vm13937_vm6, %v27972_v48 }
0x16a8   :  { %24908 = vmatprep.mubr.msk.bf16.mxu1 %vm13937_vm6, %v27973_v36  ;;  %24937 = vmatpush3.bf16.msra.mxu1 %v27983_v0 }
0x16a9   :  { %24938 = vmatprep.subr.bf16.mxu1 %v28306_v40 }
0x16ac   :  { %24939 = vmatpush3.bf16.msra.mxu1 %v27984_v19 }
0x16ad   :  { %24940 = vmatprep.subr.bf16.mxu1 %v28306_v40 }
0x16af   :  { %24909 = vmatmul.mubr.msk.bf16.gmra.mrb[208].mxu1 %vm13937_vm6, %v27974_v18  ;;  %v28011_v18 = vld [vmem:[%s34702_s12 + $0xd0] sm:$0xff]  }
0x16b0   :  { %24912 = vmatprep.mubr.msk.bf16.mxu1 %vm13937_vm6, %v27975_v6  ;;  %24941 = vmatpush3.bf16.msra.mxu1 %v27987_v15 }
0x16b1   :  { %24942 = vmatprep.subr.bf16.mxu1 %v28306_v40 }
0x16b4   :  { %24943 = vmatpush3.bf16.msra.mxu1 %v27988_v24  ;;  %v28012_v24 = vld [vmem:[%s34702_s12 + $0xd8] sm:$0xff]  }
0x16b5   :  { %24944 = vmatprep.subr.bf16.mxu1 %v28306_v40 }
0x16b7   :  { %24913 = vmatmul.mubr.msk.bf16.gmra.mrb[64].mxu1 %vm13937_vm6, %v27976_v33 }
0x16b8   :  { %24916 = vmatprep.mubr.msk.bf16.mxu1 %vm13937_vm6, %v27977_v28  ;;  %24945 = vmatpush3.bf16.msra.mxu1 %v27991_v22 }
0x16b9   :  { %24946 = vmatprep.subr.bf16.mxu1 %v28306_v40 }
0x16bc   :  { %24947 = vmatpush3.bf16.msra.mxu1 %v27992_v10 }
0x16bd   :  { %24952 = vmatprep.subr.bf16.mxu1 %v28306_v40 }
0x16bf   :  { %24917 = vmatmul.mubr.msk.bf16.gmra.mrb[68].mxu1 %vm13937_vm6, %v27978_v29 }
0x16c0   :  { %24920 = vmatprep.mubr.msk.bf16.mxu1 %vm13937_vm6, %v27981_v23  ;;  %v28013_v23 = vld [vmem:[%s34702_s12 + $0xe0] sm:$0xff]  }
0x16c7   :  { %24921 = vmatmul.mubr.msk.bf16.gmra.mrb[72].mxu1 %vm13937_vm6, %v27982_v7 }
0x16c8   :  { %24924 = vmatprep.mubr.msk.bf16.mxu1 %vm13937_vm6, %v27985_v31 }
0x16cf   :  { %24925 = vmatmul.mubr.msk.bf16.gmra.mrb[76].mxu1 %vm13937_vm6, %v27986_v32  ;;  %v28014_v32 = vld [vmem:[%s34702_s12 + $0xe8] sm:$0xff]  }
0x16d0   :  { %24928 = vmatprep.mubr.msk.bf16.mxu1 %vm13937_vm6, %v27989_v35 }
0x16d7   :  { %24929 = vmatmul.mubr.msk.bf16.gmra.mrb[80].mxu1 %vm13937_vm6, %v27990_v41 }
0x16d8   :  { %24948 = vmatprep.mubr.msk.bf16.mxu1 %vm28307_vm5, %v28306_v40 }
0x1772   :  { %v24902_v58 = vpop.f32.mrb[200].mxu1 }
0x1773   :  { %v16078_v1 = vpop.f32.mrb[201].mxu1 }
0x1774   :  { %v24903_v57 = vpop.f32.mrb[202].mxu1 }
0x1775   :  { %v16206_v5 = vpack.c.bf16 %v24903_v57, %v24902_v58  ;;  %v16081_v34 = vpop.f32.mrb[203].mxu1 }
0x1776   :  { %v16205_v61 = vpack.c.bf16 %v16081_v34, %v16078_v1  ;;  %v28015_v1 = vld [vmem:[%s34702_s12 + $0xf0] sm:$0xff]   ;;  %v28016_v34 = vld [vmem:[%s34702_s12 + $0xf8] sm:$0xff]  }
0x1778   :  { %24949 = vmatmul.mubr.bf16.vlgmr.msra.gmra.mrb[84].mxu1 %v16205_v61 }
0x1779   :  { %24953 = vmatpush3.bf16.msra.mxu1 %v27993_v14  ;;  %24968 = vmatprep.mubr.msk.bf16.mxu1 %vm28307_vm5, %v28306_v40 }
0x177a   :  { %24954 = vmatprep.subr.bf16.mxu1 %v28306_v40  ;;  %v33296_v9 = vpop.f32.mrb[204].mxu1 }
0x177b   :  { %v33298_v39 = vpop.f32.mrb[205].mxu1 }
0x177c   :  { %v33300_v3 = vpop.f32.mrb[206].mxu1 }
0x177d   :  { %24955 = vmatpush3.bf16.msra.mxu1 %v27994_v26  ;;  %v16208_v8 = vpack.c.bf16 %v33300_v3, %v33296_v9  ;;  %v16097_v59 = vpop.f32.mrb[207].mxu1  ;;  %v28020_v9 = vld [vmem:[%s34702_s12 + $0x118] sm:$0xff]   ;;  %v28021_v3 = vld [vmem:[%s34702_s12 + $0x120] sm:$0xff]  }
0x177e   :  { %24956 = vmatprep.subr.bf16.mxu1 %v28306_v40  ;;  %v16207_v12 = vpack.c.bf16 %v16097_v59, %v33298_v39  ;;  %v28018_v59 = vld [vmem:[%s34702_s12 + $0x108] sm:$0xff]  }
0x1781   :  { %24957 = vmatpush3.bf16.msra.mxu1 %v27995_v37  ;;  %v28017_v37 = vld [vmem:[%s34702_s12 + $0x100] sm:$0xff]  }
0x1782   :  { %24958 = vmatprep.subr.bf16.mxu1 %v28306_v40  ;;  %v33313_v44 = vpop.f32.mrb[208].mxu1 }
0x1783   :  { %v33315_v38 = vpop.f32.mrb[209].mxu1 }
0x1784   :  { %v33317_v43 = vpop.f32.mrb[210].mxu1 }
0x1785   :  { %24959 = vmatpush3.bf16.msra.mxu1 %v27996_v30  ;;  %v16210_v56 = vpack.c.bf16 %v33317_v43, %v33313_v44  ;;  %v33324_v50 = vpop.f32.mrb[211].mxu1  ;;  %v28023_v30 = vld [vmem:[%s34702_s12 + $0x130] sm:$0xff]   ;;  %v28036_v44 = vld [vmem:[%s34702_s12 + $0x198] sm:$0xff]   ;;  %v28037_v43 = vld [vmem:[%s34702_s12 + $0x1a0] sm:$0xff]  }
0x1786   :  { %24960 = vmatprep.subr.bf16.mxu1 %v28306_v40  ;;  %v16209_v49 = vpack.c.bf16 %v33324_v50, %v33315_v38  ;;  %v28028_v38 = vld [vmem:[%s34702_s12 + $0x158] sm:$0xff]   ;;  %v28029_v50 = vld [vmem:[%s34702_s12 + $0x160] sm:$0xff]  }
0x1789   :  { %24961 = vmatpush3.bf16.msra.mxu1 %v27997_v42  ;;  %v28024_v42 = vld [vmem:[%s34702_s12 + $0x138] sm:$0xff]  }
0x178a   :  { %24962 = vmatprep.subr.bf16.mxu1 %v28306_v40  ;;  %v33371_v13 = vpop.f32.mrb[64].mxu1 }
0x178b   :  { %v33373_v16 = vpop.f32.mrb[65].mxu1 }
0x178c   :  { %v33378_v54 = vpop.f32.mrb[66].mxu1 }
0x178d   :  { %24963 = vmatpush3.bf16.msra.mxu1 %v27998_v20  ;;  %v16212_v4 = vpack.c.bf16 %v33378_v54, %v33371_v13  ;;  %v33383_v21 = vpop.f32.mrb[67].mxu1  ;;  %v28025_v20 = vld [vmem:[%s34702_s12 + $0x140] sm:$0xff]   ;;  %v28052_v13 = vld [vmem:[%s34702_s12 + $0x218] sm:$0xff]  }
0x178e   :  { %24964 = vmatprep.subr.bf16.mxu1 %v28306_v40  ;;  %v16211_v27 = vpack.c.bf16 %v33383_v21, %v33373_v16  ;;  %v28044_v16 = vld [vmem:[%s34702_s12 + $0x1d8] sm:$0xff]   ;;  %v28045_v21 = vld [vmem:[%s34702_s12 + $0x1e0] sm:$0xff]  }
0x178f   :  { %v28053_v54 = vld [vmem:[%s34702_s12 + $0x220] sm:$0xff]  }
0x1791   :  { %24965 = vmatpush3.bf16.msra.mxu1 %v27999_v52  ;;  %v28026_v52 = vld [vmem:[%s34702_s12 + $0x148] sm:$0xff]  }
0x1792   :  { %24966 = vmatprep.subr.bf16.mxu1 %v28306_v40  ;;  %v33391_v60 = vpop.f32.mrb[68].mxu1 }
0x1793   :  { %v33393_v2 = vpop.f32.mrb[69].mxu1 }
0x1794   :  { %v33400_v48 = vpop.f32.mrb[70].mxu1 }
0x1795   :  { %24967 = vmatpush3.bf16.msra.mxu1 %v28000_v17  ;;  %v33403_v36 = vpop.f32.mrb[71].mxu1  ;;  %v16214_v0 = vpack.c.bf16 %v33400_v48, %v33391_v60  ;;  %v28027_v17 = vld [vmem:[%s34702_s12 + $0x150] sm:$0xff]   ;;  %v28068_v60 = vld [vmem:[%s34702_s12 + $0x298] sm:$0xff]   ;;  %v28069_v48 = vld [vmem:[%s34702_s12 + $0x2a0] sm:$0xff]  }
0x1796   :  { %24972 = vmatprep.subr.bf16.mxu1 %v28306_v40  ;;  %v16213_v19 = vpack.c.bf16 %v33403_v36, %v33393_v2  ;;  %v28060_v2 = vld [vmem:[%s34702_s12 + $0x258] sm:$0xff]   ;;  %v28061_v36 = vld [vmem:[%s34702_s12 + $0x260] sm:$0xff]  }
0x1798   :  { %24969 = vmatmul.mubr.bf16.vlgmr.msra.gmra.mrb[84].mxu1 %v16206_v5 }
0x1799   :  { %24973 = vmatpush3.bf16.msra.mxu1 %v28001_v11  ;;  %24988 = vmatprep.mubr.msk.bf16.mxu1 %vm28307_vm5, %v28306_v40  ;;  %v28031_v11 = vld [vmem:[%s34702_s12 + $0x170] sm:$0xff]  }
0x179a   :  { %24974 = vmatprep.subr.bf16.mxu1 %v28306_v40  ;;  %v33413_v6 = vpop.f32.mrb[72].mxu1 }
0x179b   :  { %v33415_v15 = vpop.f32.mrb[73].mxu1 }
0x179c   :  { %v33420_v33 = vpop.f32.mrb[74].mxu1 }
0x179d   :  { %24975 = vmatpush3.bf16.msra.mxu1 %v28002_v46  ;;  %v33423_v28 = vpop.f32.mrb[75].mxu1  ;;  %v16216_v22 = vpack.c.bf16 %v33420_v33, %v33413_v6  ;;  %v28032_v46 = vld [vmem:[%s34702_s12 + $0x178] sm:$0xff]   ;;  %v28085_v33 = vld [vmem:[%s34702_s12 + $0x320] sm:$0xff]  }
0x179e   :  { %24976 = vmatprep.subr.bf16.mxu1 %v28306_v40  ;;  %v16215_v29 = vpack.c.bf16 %v33423_v28, %v33415_v15  ;;  %v28076_v15 = vld [vmem:[%s34702_s12 + $0x2d8] sm:$0xff]   ;;  %v28077_v28 = vld [vmem:[%s34702_s12 + $0x2e0] sm:$0xff]  }
0x179f   :  { %v28084_v6 = vld [vmem:[%s34702_s12 + $0x318] sm:$0xff]  }
0x17a1   :  { %24977 = vmatpush3.bf16.msra.mxu1 %v28003_v45  ;;  %v28033_v45 = vld [vmem:[%s34702_s12 + $0x180] sm:$0xff]  }
0x17a2   :  { %24978 = vmatprep.subr.bf16.mxu1 %v28306_v40  ;;  %v33433_v7 = vpop.f32.mrb[76].mxu1 }
0x17a3   :  { %v33435_v31 = vpop.f32.mrb[77].mxu1 }
0x17a4   :  { %v33440_v35 = vpop.f32.mrb[78].mxu1 }
0x17a5   :  { %24979 = vmatpush3.bf16.msra.mxu1 %v28004_v55  ;;  %v33443_v41 = vpop.f32.mrb[79].mxu1  ;;  %v16218_v10 = vpack.c.bf16 %v33440_v35, %v33433_v7  ;;  %v28034_v55 = vld [vmem:[%s34702_s12 + $0x188] sm:$0xff]   ;;  %v28100_v7 = vld [vmem:[%s34702_s12 + $0x398] sm:$0xff]   ;;  %v28101_v35 = vld [vmem:[%s34702_s12 + $0x3a0] sm:$0xff]  }
0x17a6   :  { %24980 = vmatprep.subr.bf16.mxu1 %v28306_v40  ;;  %v16217_v58 = vpack.c.bf16 %v33443_v41, %v33435_v31  ;;  %v28092_v31 = vld [vmem:[%s34702_s12 + $0x358] sm:$0xff]   ;;  %v28093_v41 = vld [vmem:[%s34702_s12 + $0x360] sm:$0xff]  }
0x17a9   :  { %24981 = vmatpush3.bf16.msra.mxu1 %v28005_v53  ;;  %v28035_v53 = vld [vmem:[%s34702_s12 + $0x190] sm:$0xff]  }
0x17aa   :  { %24982 = vmatprep.subr.bf16.mxu1 %v28306_v40  ;;  %v33453_v57 = vpop.f32.mrb[80].mxu1 }
0x17ab   :  { %v33455_v5 = vpop.f32.mrb[81].mxu1 }
0x17ac   :  { %v33460_v14 = vpop.f32.mrb[82].mxu1 }
0x17ad   :  { %24983 = vmatpush3.bf16.msra.mxu1 %v28006_v51  ;;  %v33463_v61 = vpop.f32.mrb[83].mxu1  ;;  %v16220_v26 = vpack.c.bf16 %v33460_v14, %v33453_v57  ;;  %v28039_v51 = vld [vmem:[%s34702_s12 + $0x1b0] sm:$0xff]  }
0x17ae   :  { %24984 = vmatprep.subr.bf16.mxu1 %v28306_v40  ;;  %v16219_v39 = vpack.c.bf16 %v33463_v61, %v33455_v5  ;;  %v28108_v5 = vld [vmem:[%s34702_s12 + $0x3d8] sm:$0xff]   ;;  %v28109_v61 = vld [vmem:[%s34702_s12 + $0x3e0] sm:$0xff]  }
0x17b1   :  { %24985 = vmatpush3.bf16.msra.mxu1 %v28007_v62  ;;  %v28040_v62 = vld [vmem:[%s34702_s12 + $0x1b8] sm:$0xff]  }
0x17b2   :  { %24986 = vmatprep.subr.bf16.mxu1 %v28306_v40 }
0x17b5   :  { %24987 = vmatpush3.bf16.msra.mxu1 %v28008_v47  ;;  %v28041_v47 = vld [vmem:[%s34702_s12 + $0x1c0] sm:$0xff]  }
0x17b6   :  { %24992 = vmatprep.subr.bf16.mxu1 %v28306_v40 }
0x17b8   :  { %24989 = vmatmul.mubr.bf16.vlgmr.msra.gmra.mrb[84].mxu1 %v16207_v12  ;;  %v28019_v12 = vld [vmem:[%s34702_s12 + $0x110] sm:$0xff]  }
0x17b9   :  { %24993 = vmatpush3.bf16.msra.mxu1 %v28009_v25  ;;  %25008 = vmatprep.mubr.msk.bf16.mxu1 %vm28307_vm5, %v28306_v40  ;;  %v28042_v25 = vld [vmem:[%s34702_s12 + $0x1c8] sm:$0xff]  }
0x17ba   :  { %24994 = vmatprep.subr.bf16.mxu1 %v28306_v40 }
0x17bd   :  { %24995 = vmatpush3.bf16.msra.mxu1 %v28010_v63  ;;  %v28043_v63 = vld [vmem:[%s34702_s12 + $0x1d0] sm:$0xff]  }
0x17be   :  { %24996 = vmatprep.subr.bf16.mxu1 %v28306_v40 }
0x17c1   :  { %24997 = vmatpush3.bf16.msra.mxu1 %v28011_v18  ;;  %v28047_v18 = vld [vmem:[%s34702_s12 + $0x1f0] sm:$0xff]  }
0x17c2   :  { %24998 = vmatprep.subr.bf16.mxu1 %v28306_v40 }
0x17c5   :  { %24999 = vmatpush3.bf16.msra.mxu1 %v28012_v24  ;;  %v28048_v24 = vld [vmem:[%s34702_s12 + $0x1f8] sm:$0xff]  }
0x17c6   :  { %25000 = vmatprep.subr.bf16.mxu1 %v28306_v40 }
0x17c9   :  { %25001 = vmatpush3.bf16.msra.mxu1 %v28013_v23  ;;  %v28049_v23 = vld [vmem:[%s34702_s12 + $0x200] sm:$0xff]  }
0x17ca   :  { %25002 = vmatprep.subr.bf16.mxu1 %v28306_v40 }
0x17cd   :  { %25003 = vmatpush3.bf16.msra.mxu1 %v28014_v32  ;;  %v28050_v32 = vld [vmem:[%s34702_s12 + $0x208] sm:$0xff]  }
0x17ce   :  { %25004 = vmatprep.subr.bf16.mxu1 %v28306_v40 }
0x17d1   :  { %25005 = vmatpush3.bf16.msra.mxu1 %v28015_v1  ;;  %v28051_v1 = vld [vmem:[%s34702_s12 + $0x210] sm:$0xff]  }
0x17d2   :  { %25006 = vmatprep.subr.bf16.mxu1 %v28306_v40 }
0x17d5   :  { %25007 = vmatpush3.bf16.msra.mxu1 %v28016_v34  ;;  %v28055_v34 = vld [vmem:[%s34702_s12 + $0x230] sm:$0xff]  }
0x17d6   :  { %25012 = vmatprep.subr.bf16.mxu1 %v28306_v40 }
0x17d8   :  { %25009 = vmatmul.mubr.bf16.vlgmr.msra.gmra.mrb[84].mxu1 %v16208_v8  ;;  %v28022_v8 = vld [vmem:[%s34702_s12 + $0x128] sm:$0xff]  }
0x17d9   :  { %25013 = vmatpush3.bf16.msra.mxu1 %v28017_v37  ;;  %25028 = vmatprep.mubr.msk.bf16.mxu1 %vm28307_vm5, %v28306_v40  ;;  %v28056_v37 = vld [vmem:[%s34702_s12 + $0x238] sm:$0xff]  }
0x17da   :  { %25014 = vmatprep.subr.bf16.mxu1 %v28306_v40 }
0x17dd   :  { %25015 = vmatpush3.bf16.msra.mxu1 %v28018_v59  ;;  %v28057_v59 = vld [vmem:[%s34702_s12 + $0x240] sm:$0xff]  }
0x17de   :  { %25016 = vmatprep.subr.bf16.mxu1 %v28306_v40 }
0x17e1   :  { %25017 = vmatpush3.bf16.msra.mxu1 %v28019_v12  ;;  %v28058_v12 = vld [vmem:[%s34702_s12 + $0x248] sm:$0xff]  }
0x17e2   :  { %25018 = vmatprep.subr.bf16.mxu1 %v28306_v40 }
0x17e5   :  { %25019 = vmatpush3.bf16.msra.mxu1 %v28020_v9  ;;  %v28059_v9 = vld [vmem:[%s34702_s12 + $0x250] sm:$0xff]  }
0x17e6   :  { %25020 = vmatprep.subr.bf16.mxu1 %v28306_v40 }
0x17e9   :  { %25021 = vmatpush3.bf16.msra.mxu1 %v28021_v3  ;;  %v28063_v3 = vld [vmem:[%s34702_s12 + $0x270] sm:$0xff]  }
0x17ea   :  { %25022 = vmatprep.subr.bf16.mxu1 %v28306_v40 }
0x17ed   :  { %25023 = vmatpush3.bf16.msra.mxu1 %v28022_v8  ;;  %v28064_v8 = vld [vmem:[%s34702_s12 + $0x278] sm:$0xff]  }
0x17ee   :  { %25024 = vmatprep.subr.bf16.mxu1 %v28306_v40 }
0x17f1   :  { %25025 = vmatpush3.bf16.msra.mxu1 %v28023_v30  ;;  %v28065_v30 = vld [vmem:[%s34702_s12 + $0x280] sm:$0xff]  }
0x17f2   :  { %25026 = vmatprep.subr.bf16.mxu1 %v28306_v40 }
0x17f5   :  { %25027 = vmatpush3.bf16.msra.mxu1 %v28024_v42  ;;  %v28066_v42 = vld [vmem:[%s34702_s12 + $0x288] sm:$0xff]  }
0x17f6   :  { %25032 = vmatprep.subr.bf16.mxu1 %v28306_v40 }
0x17f8   :  { %25029 = vmatmul.mubr.bf16.vlgmr.msra.gmra.mrb[84].mxu1 %v16209_v49  ;;  %v28030_v49 = vld [vmem:[%s34702_s12 + $0x168] sm:$0xff]  }
0x17f9   :  { %25033 = vmatpush3.bf16.msra.mxu1 %v28025_v20  ;;  %25048 = vmatprep.mubr.msk.bf16.mxu1 %vm28307_vm5, %v28306_v40  ;;  %v28067_v20 = vld [vmem:[%s34702_s12 + $0x290] sm:$0xff]  }
0x17fa   :  { %25034 = vmatprep.subr.bf16.mxu1 %v28306_v40 }
0x17fd   :  { %25035 = vmatpush3.bf16.msra.mxu1 %v28026_v52  ;;  %v28071_v52 = vld [vmem:[%s34702_s12 + $0x2b0] sm:$0xff]  }
0x17fe   :  { %25036 = vmatprep.subr.bf16.mxu1 %v28306_v40 }
0x1801   :  { %25037 = vmatpush3.bf16.msra.mxu1 %v28027_v17  ;;  %v28072_v17 = vld [vmem:[%s34702_s12 + $0x2b8] sm:$0xff]  }
0x1802   :  { %25038 = vmatprep.subr.bf16.mxu1 %v28306_v40 }
0x1805   :  { %25039 = vmatpush3.bf16.msra.mxu1 %v28028_v38  ;;  %v28073_v38 = vld [vmem:[%s34702_s12 + $0x2c0] sm:$0xff]  }
0x1806   :  { %25040 = vmatprep.subr.bf16.mxu1 %v28306_v40 }
0x1809   :  { %25041 = vmatpush3.bf16.msra.mxu1 %v28029_v50  ;;  %v28074_v50 = vld [vmem:[%s34702_s12 + $0x2c8] sm:$0xff]  }
0x180a   :  { %25042 = vmatprep.subr.bf16.mxu1 %v28306_v40 }
0x180d   :  { %25043 = vmatpush3.bf16.msra.mxu1 %v28030_v49  ;;  %v28075_v49 = vld [vmem:[%s34702_s12 + $0x2d0] sm:$0xff]  }
0x180e   :  { %25044 = vmatprep.subr.bf16.mxu1 %v28306_v40 }
0x1811   :  { %25045 = vmatpush3.bf16.msra.mxu1 %v28031_v11  ;;  %v28079_v11 = vld [vmem:[%s34702_s12 + $0x2f0] sm:$0xff]  }
0x1812   :  { %25046 = vmatprep.subr.bf16.mxu1 %v28306_v40 }
0x1815   :  { %25047 = vmatpush3.bf16.msra.mxu1 %v28032_v46  ;;  %v28080_v46 = vld [vmem:[%s34702_s12 + $0x2f8] sm:$0xff]  }
0x1816   :  { %25052 = vmatprep.subr.bf16.mxu1 %v28306_v40 }
0x1818   :  { %25049 = vmatmul.mubr.bf16.vlgmr.msra.gmra.mrb[84].mxu1 %v16210_v56  ;;  %v28038_v56 = vld [vmem:[%s34702_s12 + $0x1a8] sm:$0xff]  }
0x1819   :  { %25053 = vmatpush3.bf16.msra.mxu1 %v28033_v45  ;;  %25068 = vmatprep.mubr.msk.bf16.mxu1 %vm28307_vm5, %v28306_v40  ;;  %v28081_v45 = vld [vmem:[%s34702_s12 + $0x300] sm:$0xff]  }
0x181a   :  { %25054 = vmatprep.subr.bf16.mxu1 %v28306_v40 }
0x181d   :  { %25055 = vmatpush3.bf16.msra.mxu1 %v28034_v55  ;;  %v28082_v55 = vld [vmem:[%s34702_s12 + $0x308] sm:$0xff]  }
0x181e   :  { %25056 = vmatprep.subr.bf16.mxu1 %v28306_v40 }
0x1821   :  { %25057 = vmatpush3.bf16.msra.mxu1 %v28035_v53  ;;  %v28083_v53 = vld [vmem:[%s34702_s12 + $0x310] sm:$0xff]  }
0x1822   :  { %25058 = vmatprep.subr.bf16.mxu1 %v28306_v40 }
0x1825   :  { %25059 = vmatpush3.bf16.msra.mxu1 %v28036_v44  ;;  %v28087_v44 = vld [vmem:[%s34702_s12 + $0x330] sm:$0xff]  }
0x1826   :  { %25060 = vmatprep.subr.bf16.mxu1 %v28306_v40 }
0x1829   :  { %25061 = vmatpush3.bf16.msra.mxu1 %v28037_v43  ;;  %v28088_v43 = vld [vmem:[%s34702_s12 + $0x338] sm:$0xff]  }
0x182a   :  { %25062 = vmatprep.subr.bf16.mxu1 %v28306_v40 }
0x182d   :  { %25063 = vmatpush3.bf16.msra.mxu1 %v28038_v56  ;;  %v28089_v56 = vld [vmem:[%s34702_s12 + $0x340] sm:$0xff]  }
0x182e   :  { %25064 = vmatprep.subr.bf16.mxu1 %v28306_v40 }
0x1831   :  { %25065 = vmatpush3.bf16.msra.mxu1 %v28039_v51  ;;  %v28090_v51 = vld [vmem:[%s34702_s12 + $0x348] sm:$0xff]  }
0x1832   :  { %25066 = vmatprep.subr.bf16.mxu1 %v28306_v40 }
0x1835   :  { %25067 = vmatpush3.bf16.msra.mxu1 %v28040_v62  ;;  %v28091_v62 = vld [vmem:[%s34702_s12 + $0x350] sm:$0xff]  }
0x1836   :  { %25072 = vmatprep.subr.bf16.mxu1 %v28306_v40 }
0x1838   :  { %25069 = vmatmul.mubr.bf16.vlgmr.msra.gmra.mrb[84].mxu1 %v16211_v27  ;;  %v28046_v27 = vld [vmem:[%s34702_s12 + $0x1e8] sm:$0xff]  }
0x1839   :  { %25073 = vmatpush3.bf16.msra.mxu1 %v28041_v47  ;;  %25088 = vmatprep.mubr.msk.bf16.mxu1 %vm28307_vm5, %v28306_v40  ;;  %v28095_v47 = vld [vmem:[%s34702_s12 + $0x370] sm:$0xff]  }
0x183a   :  { %25074 = vmatprep.subr.bf16.mxu1 %v28306_v40 }
0x183d   :  { %25075 = vmatpush3.bf16.msra.mxu1 %v28042_v25  ;;  %v28096_v25 = vld [vmem:[%s34702_s12 + $0x378] sm:$0xff]  }
0x183e   :  { %25076 = vmatprep.subr.bf16.mxu1 %v28306_v40 }
0x1841   :  { %25077 = vmatpush3.bf16.msra.mxu1 %v28043_v63  ;;  %v28097_v63 = vld [vmem:[%s34702_s12 + $0x380] sm:$0xff]  }
0x1842   :  { %25078 = vmatprep.subr.bf16.mxu1 %v28306_v40 }
0x1845   :  { %25079 = vmatpush3.bf16.msra.mxu1 %v28044_v16  ;;  %v28098_v16 = vld [vmem:[%s34702_s12 + $0x388] sm:$0xff]  }
0x1846   :  { %25080 = vmatprep.subr.bf16.mxu1 %v28306_v40 }
0x1849   :  { %25081 = vmatpush3.bf16.msra.mxu1 %v28045_v21  ;;  %v28099_v21 = vld [vmem:[%s34702_s12 + $0x390] sm:$0xff]  }
0x184a   :  { %25082 = vmatprep.subr.bf16.mxu1 %v28306_v40 }
0x184d   :  { %25083 = vmatpush3.bf16.msra.mxu1 %v28046_v27  ;;  %v28103_v27 = vld [vmem:[%s34702_s12 + $0x3b0] sm:$0xff]  }
0x184e   :  { %25084 = vmatprep.subr.bf16.mxu1 %v28306_v40 }
0x1851   :  { %25085 = vmatpush3.bf16.msra.mxu1 %v28047_v18  ;;  %v28104_v18 = vld [vmem:[%s34702_s12 + $0x3b8] sm:$0xff]  }
0x1852   :  { %25086 = vmatprep.subr.bf16.mxu1 %v28306_v40 }
0x1855   :  { %25087 = vmatpush3.bf16.msra.mxu1 %v28048_v24  ;;  %v28105_v24 = vld [vmem:[%s34702_s12 + $0x3c0] sm:$0xff]  }
0x1856   :  { %25092 = vmatprep.subr.bf16.mxu1 %v28306_v40 }
0x1858   :  { %25089 = vmatmul.mubr.bf16.vlgmr.msra.gmra.mrb[84].mxu1 %v16212_v4  ;;  %v28054_v4 = vld [vmem:[%s34702_s12 + $0x228] sm:$0xff]  }
0x1859   :  { %25093 = vmatpush3.bf16.msra.mxu1 %v28049_v23  ;;  %25108 = vmatprep.mubr.msk.bf16.mxu1 %vm28307_vm5, %v28306_v40  ;;  %v28106_v23 = vld [vmem:[%s34702_s12 + $0x3c8] sm:$0xff]  }
0x185a   :  { %25094 = vmatprep.subr.bf16.mxu1 %v28306_v40 }
0x185d   :  { %25095 = vmatpush3.bf16.msra.mxu1 %v28050_v32  ;;  %v28107_v32 = vld [vmem:[%s34702_s12 + $0x3d0] sm:$0xff]  }
0x185e   :  { %25096 = vmatprep.subr.bf16.mxu1 %v28306_v40 }
0x1861   :  { %25097 = vmatpush3.bf16.msra.mxu1 %v28051_v1  ;;  %v28111_v1 = vld [vmem:[%s34702_s12 + $0x3f0] sm:$0xff]  }
0x1862   :  { %25098 = vmatprep.subr.bf16.mxu1 %v28306_v40 }
0x1865   :  { %25099 = vmatpush3.bf16.msra.mxu1 %v28052_v13  ;;  %v28112_v13 = vld [vmem:[%s34702_s12 + $0x3f8] sm:$0xff]  }
0x1866   :  { %25100 = vmatprep.subr.bf16.mxu1 %v28306_v40 }
0x1869   :  { %25101 = vmatpush3.bf16.msra.mxu1 %v28053_v54  ;;  %v28113_v54 = vld [vmem:[%s34697_s7] sm:$0xff]  }
0x186a   :  { %25102 = vmatprep.subr.bf16.mxu1 %v28306_v40  ;;  %25254 = vmatprep.mubr.msk.bf16.mxu0 %vm13937_vm6, %v28113_v54  ;;  %v28141_v54 = vld [vmem:[%s34697_s7 + $0xd0] sm:$0xff]  }
0x186d   :  { %25103 = vmatpush3.bf16.msra.mxu1 %v28054_v4 }
0x186e   :  { %25104 = vmatprep.subr.bf16.mxu1 %v28306_v40 }
0x1871   :  { %25105 = vmatpush3.bf16.msra.mxu1 %v28055_v34 }
0x1872   :  { %25106 = vmatprep.subr.bf16.mxu1 %v28306_v40 }
0x1875   :  { %25107 = vmatpush3.bf16.msra.mxu1 %v28056_v37 }
0x1876   :  { %25112 = vmatprep.subr.bf16.mxu1 %v28306_v40 }
0x1878   :  { %25109 = vmatmul.mubr.bf16.vlgmr.msra.gmra.mrb[84].mxu1 %v16213_v19  ;;  %v28062_v19 = vld [vmem:[%s34702_s12 + $0x268] sm:$0xff]  }
0x1879   :  { %25113 = vmatpush3.bf16.msra.mxu1 %v28057_v59  ;;  %25128 = vmatprep.mubr.msk.bf16.mxu1 %vm28307_vm5, %v28306_v40 }
0x187a   :  { %25114 = vmatprep.subr.bf16.mxu1 %v28306_v40 }
0x187d   :  { %25115 = vmatpush3.bf16.msra.mxu1 %v28058_v12 }
0x187e   :  { %25116 = vmatprep.subr.bf16.mxu1 %v28306_v40 }
0x1881   :  { %25117 = vmatpush3.bf16.msra.mxu1 %v28059_v9 }
0x1882   :  { %25118 = vmatprep.subr.bf16.mxu1 %v28306_v40 }
0x1885   :  { %25119 = vmatpush3.bf16.msra.mxu1 %v28060_v2 }
0x1886   :  { %25120 = vmatprep.subr.bf16.mxu1 %v28306_v40 }
0x1889   :  { %25121 = vmatpush3.bf16.msra.mxu1 %v28061_v36 }
0x188a   :  { %25122 = vmatprep.subr.bf16.mxu1 %v28306_v40 }
0x188d   :  { %25123 = vmatpush3.bf16.msra.mxu1 %v28062_v19 }
0x188e   :  { %25124 = vmatprep.subr.bf16.mxu1 %v28306_v40 }
0x1891   :  { %25125 = vmatpush3.bf16.msra.mxu1 %v28063_v3 }
0x1892   :  { %25126 = vmatprep.subr.bf16.mxu1 %v28306_v40 }
0x1895   :  { %25127 = vmatpush3.bf16.msra.mxu1 %v28064_v8 }
0x1896   :  { %25132 = vmatprep.subr.bf16.mxu1 %v28306_v40 }
0x1898   :  { %25129 = vmatmul.mubr.bf16.vlgmr.msra.gmra.mrb[84].mxu1 %v16214_v0  ;;  %v28070_v0 = vld [vmem:[%s34702_s12 + $0x2a8] sm:$0xff]  }
0x1899   :  { %25133 = vmatpush3.bf16.msra.mxu1 %v28065_v30  ;;  %25148 = vmatprep.mubr.msk.bf16.mxu1 %vm28307_vm5, %v28306_v40 }
0x189a   :  { %25134 = vmatprep.subr.bf16.mxu1 %v28306_v40 }
0x189d   :  { %25135 = vmatpush3.bf16.msra.mxu1 %v28066_v42 }
0x189e   :  { %25136 = vmatprep.subr.bf16.mxu1 %v28306_v40 }
0x18a1   :  { %25137 = vmatpush3.bf16.msra.mxu1 %v28067_v20 }
0x18a2   :  { %25138 = vmatprep.subr.bf16.mxu1 %v28306_v40 }
0x18a5   :  { %25139 = vmatpush3.bf16.msra.mxu1 %v28068_v60 }
0x18a6   :  { %25140 = vmatprep.subr.bf16.mxu1 %v28306_v40 }
0x18a9   :  { %25141 = vmatpush3.bf16.msra.mxu1 %v28069_v48 }
0x18aa   :  { %25142 = vmatprep.subr.bf16.mxu1 %v28306_v40 }
0x18ad   :  { %25143 = vmatpush3.bf16.msra.mxu1 %v28070_v0 }
0x18ae   :  { %25144 = vmatprep.subr.bf16.mxu1 %v28306_v40 }
0x18b1   :  { %25145 = vmatpush3.bf16.msra.mxu1 %v28071_v52 }
0x18b2   :  { %25146 = vmatprep.subr.bf16.mxu1 %v28306_v40 }
0x18b5   :  { %25147 = vmatpush3.bf16.msra.mxu1 %v28072_v17 }
0x18b6   :  { %25152 = vmatprep.subr.bf16.mxu1 %v28306_v40 }
0x18b8   :  { %25149 = vmatmul.mubr.bf16.vlgmr.msra.gmra.mrb[84].mxu1 %v16215_v29  ;;  %v28078_v29 = vld [vmem:[%s34702_s12 + $0x2e8] sm:$0xff]  }
0x18b9   :  { %25153 = vmatpush3.bf16.msra.mxu1 %v28073_v38  ;;  %25168 = vmatprep.mubr.msk.bf16.mxu1 %vm28307_vm5, %v28306_v40  ;;  %v21829_v38 = vld [vmem:[%s34704_s14 + $0x3] ss:$0 sm:$0xff] }
0x18ba   :  { %25154 = vmatprep.subr.bf16.mxu1 %v28306_v40 }
0x18bd   :  { %25155 = vmatpush3.bf16.msra.mxu1 %v28074_v50 }
0x18be   :  { %25156 = vmatprep.subr.bf16.mxu1 %v28306_v40 }
0x18c1   :  { %25157 = vmatpush3.bf16.msra.mxu1 %v28075_v49  ;;  %v21830_v49 = vld [vmem:[%s34705_s15 + $0x3] ss:$0 sm:$0xff] }
0x18c2   :  { %25158 = vmatprep.subr.bf16.mxu1 %v28306_v40 }
0x18c5   :  { %25159 = vmatpush3.bf16.msra.mxu1 %v28076_v15 }
0x18c6   :  { %25160 = vmatprep.subr.bf16.mxu1 %v28306_v40 }
0x18c9   :  { %25161 = vmatpush3.bf16.msra.mxu1 %v28077_v28 }
0x18ca   :  { %25162 = vmatprep.subr.bf16.mxu1 %v28306_v40 }
0x18cd   :  { %25163 = vmatpush3.bf16.msra.mxu1 %v28078_v29 }
0x18ce   :  { %25164 = vmatprep.subr.bf16.mxu1 %v28306_v40 }
0x18d1   :  { %25165 = vmatpush3.bf16.msra.mxu1 %v28079_v11 }
0x18d2   :  { %25166 = vmatprep.subr.bf16.mxu1 %v28306_v40 }
0x18d5   :  { %25167 = vmatpush3.bf16.msra.mxu1 %v28080_v46  ;;  %v28138_v46 = vld [vmem:[%s34703_s13] sm:$0xff]  }
0x18d6   :  { %25172 = vmatprep.subr.bf16.mxu1 %v28306_v40 }
0x18d8   :  { %25169 = vmatmul.mubr.bf16.vlgmr.msra.gmra.mrb[84].mxu1 %v16216_v22  ;;  %v28086_v22 = vld [vmem:[%s34702_s12 + $0x328] sm:$0xff]  }
0x18d9   :  { %25173 = vmatpush3.bf16.msra.mxu1 %v28081_v45  ;;  %25188 = vmatprep.mubr.msk.bf16.mxu1 %vm28307_vm5, %v28306_v40  ;;  %v28114_v45 = vld [vmem:[%s34697_s7 + $0x8] sm:$0xff]  }
0x18da   :  { %25174 = vmatprep.subr.bf16.mxu1 %v28306_v40 }
0x18dd   :  { %25175 = vmatpush3.bf16.msra.mxu1 %v28082_v55  ;;  %v28115_v55 = vld [vmem:[%s34697_s7 + $0x10] sm:$0xff]  }
0x18de   :  { %25176 = vmatprep.subr.bf16.mxu1 %v28306_v40 }
0x18e1   :  { %25177 = vmatpush3.bf16.msra.mxu1 %v28083_v53  ;;  %v28140_v53 = vld [vmem:[%s34703_s13 + $0x8] sm:$0xff]  }
0x18e2   :  { %25178 = vmatprep.subr.bf16.mxu1 %v28306_v40 }
0x18e5   :  { %25179 = vmatpush3.bf16.msra.mxu1 %v28084_v6  ;;  %v28116_v6 = vld [vmem:[%s34697_s7 + $0x18] sm:$0xff]  }
0x18e6   :  { %25180 = vmatprep.subr.bf16.mxu1 %v28306_v40 }
0x18e9   :  { %25181 = vmatpush3.bf16.msra.mxu1 %v28085_v33  ;;  %v28117_v33 = vld [vmem:[%s34697_s7 + $0x20] sm:$0xff]  }
0x18ea   :  { %25182 = vmatprep.subr.bf16.mxu1 %v28306_v40 }
0x18ed   :  { %25183 = vmatpush3.bf16.msra.mxu1 %v28086_v22  ;;  %v28144_v22 = vld [vmem:[%s34703_s13 + $0x18] sm:$0xff]  }
0x18ee   :  { %25184 = vmatprep.subr.bf16.mxu1 %v28306_v40 }
0x18f1   :  { %25185 = vmatpush3.bf16.msra.mxu1 %v28087_v44  ;;  %v28146_v44 = vld [vmem:[%s34703_s13 + $0x20] sm:$0xff]  }
0x18f2   :  { %25186 = vmatprep.subr.bf16.mxu1 %v28306_v40 }
0x18f5   :  { %25187 = vmatpush3.bf16.msra.mxu1 %v28088_v43  ;;  %v28118_v43 = vld [vmem:[%s34697_s7 + $0x28] sm:$0xff]  }
0x18f6   :  { %25192 = vmatprep.subr.bf16.mxu1 %v28306_v40 }
0x18f8   :  { %25189 = vmatmul.mubr.bf16.vlgmr.msra.gmra.mrb[84].mxu1 %v16217_v58  ;;  %v28094_v58 = vld [vmem:[%s34702_s12 + $0x368] sm:$0xff]  }
0x18f9   :  { %25193 = vmatpush3.bf16.msra.mxu1 %v28089_v56  ;;  %25208 = vmatprep.mubr.msk.bf16.mxu1 %vm28307_vm5, %v28306_v40  ;;  %v28119_v56 = vld [vmem:[%s34697_s7 + $0x30] sm:$0xff]  }
0x18fa   :  { %25194 = vmatprep.subr.bf16.mxu1 %v28306_v40 }
0x18fd   :  { %25195 = vmatpush3.bf16.msra.mxu1 %v28090_v51  ;;  %v28148_v51 = vld [vmem:[%s34703_s13 + $0x28] sm:$0xff]  }
0x18fe   :  { %25196 = vmatprep.subr.bf16.mxu1 %v28306_v40 }
0x1901   :  { %25197 = vmatpush3.bf16.msra.mxu1 %v28091_v62  ;;  %v28150_v62 = vld [vmem:[%s34703_s13 + $0x30] sm:$0xff]  }
0x1902   :  { %25198 = vmatprep.subr.bf16.mxu1 %v28306_v40 }
0x1905   :  { %25199 = vmatpush3.bf16.msra.mxu1 %v28092_v31  ;;  %v28120_v31 = vld [vmem:[%s34697_s7 + $0x38] sm:$0xff]  }
0x1906   :  { %25200 = vmatprep.subr.bf16.mxu1 %v28306_v40 }
0x1909   :  { %25201 = vmatpush3.bf16.msra.mxu1 %v28093_v41  ;;  %v28121_v41 = vld [vmem:[%s34697_s7 + $0x40] sm:$0xff]  }
0x190a   :  { %25202 = vmatprep.subr.bf16.mxu1 %v28306_v40 }
0x190d   :  { %25203 = vmatpush3.bf16.msra.mxu1 %v28094_v58  ;;  %v28122_v58 = vld [vmem:[%s34697_s7 + $0x48] sm:$0xff]  }
0x190e   :  { %25204 = vmatprep.subr.bf16.mxu1 %v28306_v40 }
0x1911   :  { %25205 = vmatpush3.bf16.msra.mxu1 %v28095_v47  ;;  %v28123_v47 = vld [vmem:[%s34697_s7 + $0x50] sm:$0xff]  }
0x1912   :  { %25206 = vmatprep.subr.bf16.mxu1 %v28306_v40 }
0x1915   :  { %25207 = vmatpush3.bf16.msra.mxu1 %v28096_v25  ;;  %v28124_v25 = vld [vmem:[%s34697_s7 + $0x58] sm:$0xff]  }
0x1916   :  { %25212 = vmatprep.subr.bf16.mxu1 %v28306_v40 }
0x1918   :  { %25209 = vmatmul.mubr.bf16.vlgmr.msra.gmra.mrb[84].mxu1 %v16218_v10  ;;  %v28102_v10 = vld [vmem:[%s34702_s12 + $0x3a8] sm:$0xff]  }
0x1919   :  { %25213 = vmatpush3.bf16.msra.mxu1 %v28097_v63  ;;  %25228 = vmatprep.mubr.msk.bf16.mxu1 %vm28307_vm5, %v28306_v40  ;;  %v28125_v63 = vld [vmem:[%s34697_s7 + $0x60] sm:$0xff]  }
0x191a   :  { %25214 = vmatprep.subr.bf16.mxu1 %v28306_v40 }
0x191d   :  { %25215 = vmatpush3.bf16.msra.mxu1 %v28098_v16  ;;  %v28126_v16 = vld [vmem:[%s34697_s7 + $0x68] sm:$0xff]  }
0x191e   :  { %25216 = vmatprep.subr.bf16.mxu1 %v28306_v40 }
0x1921   :  { %25217 = vmatpush3.bf16.msra.mxu1 %v28099_v21  ;;  %v28127_v21 = vld [vmem:[%s34697_s7 + $0x70] sm:$0xff]  }
0x1922   :  { %25218 = vmatprep.subr.bf16.mxu1 %v28306_v40 }
0x1925   :  { %25219 = vmatpush3.bf16.msra.mxu1 %v28100_v7  ;;  %v28128_v7 = vld [vmem:[%s34697_s7 + $0x78] sm:$0xff]  }
0x1926   :  { %25220 = vmatprep.subr.bf16.mxu1 %v28306_v40 }
0x1929   :  { %25221 = vmatpush3.bf16.msra.mxu1 %v28101_v35  ;;  %v28129_v35 = vld [vmem:[%s34697_s7 + $0x80] sm:$0xff]  }
0x192a   :  { %25222 = vmatprep.subr.bf16.mxu1 %v28306_v40 }
0x192d   :  { %25223 = vmatpush3.bf16.msra.mxu1 %v28102_v10  ;;  %v28130_v10 = vld [vmem:[%s34697_s7 + $0x88] sm:$0xff]  }
0x192e   :  { %25224 = vmatprep.subr.bf16.mxu1 %v28306_v40 }
0x1931   :  { %25225 = vmatpush3.bf16.msra.mxu1 %v28103_v27  ;;  %v28131_v27 = vld [vmem:[%s34697_s7 + $0x90] sm:$0xff]  }
0x1932   :  { %25226 = vmatprep.subr.bf16.mxu1 %v28306_v40 }
0x1935   :  { %25227 = vmatpush3.bf16.msra.mxu1 %v28104_v18  ;;  %v28132_v18 = vld [vmem:[%s34697_s7 + $0x98] sm:$0xff]  }
0x1936   :  { %25232 = vmatprep.subr.bf16.mxu1 %v28306_v40 }
0x1938   :  { %25229 = vmatmul.mubr.bf16.vlgmr.msra.gmra.mrb[84].mxu1 %v16219_v39  ;;  %v28110_v39 = vld [vmem:[%s34702_s12 + $0x3e8] sm:$0xff]  }
0x1939   :  { %25233 = vmatpush3.bf16.msra.mxu1 %v28105_v24  ;;  %25248 = vmatprep.mubr.msk.bf16.mxu1 %vm28307_vm5, %v28306_v40  ;;  %v28133_v24 = vld [vmem:[%s34697_s7 + $0xa0] sm:$0xff]  }
0x193a   :  { %25234 = vmatprep.subr.bf16.mxu1 %v28306_v40 }
0x193d   :  { %25235 = vmatpush3.bf16.msra.mxu1 %v28106_v23  ;;  %v28134_v23 = vld [vmem:[%s34697_s7 + $0xa8] sm:$0xff]  }
0x193e   :  { %25236 = vmatprep.subr.bf16.mxu1 %v28306_v40 }
0x1941   :  { %25237 = vmatpush3.bf16.msra.mxu1 %v28107_v32  ;;  %v28135_v32 = vld [vmem:[%s34697_s7 + $0xb0] sm:$0xff]  }
0x1942   :  { %25238 = vmatprep.subr.bf16.mxu1 %v28306_v40 }
0x1945   :  { %25239 = vmatpush3.bf16.msra.mxu1 %v28108_v5  ;;  %v28136_v5 = vld [vmem:[%s34697_s7 + $0xb8] sm:$0xff]  }
0x1946   :  { %25240 = vmatprep.subr.bf16.mxu1 %v28306_v40 }
0x1949   :  { %25241 = vmatpush3.bf16.msra.mxu1 %v28109_v61  ;;  %v28137_v61 = vld [vmem:[%s34697_s7 + $0xc0] sm:$0xff]  }
0x194a   :  { %25242 = vmatprep.subr.bf16.mxu1 %v28306_v40 }
0x194d   :  { %25243 = vmatpush3.bf16.msra.mxu1 %v28110_v39  ;;  %v28152_v39 = vld [vmem:[%s34703_s13 + $0x38] sm:$0xff]  }
0x194e   :  { %25244 = vmatprep.subr.bf16.mxu1 %v28306_v40 }
0x1951   :  { %25245 = vmatpush3.bf16.msra.mxu1 %v28111_v1  ;;  %v28153_v1 = vld [vmem:[%s34703_s13 + $0x40] sm:$0xff]  }
0x1952   :  { %25246 = vmatprep.subr.bf16.mxu1 %v28306_v40 }
0x1955   :  { %25247 = vmatpush3.bf16.msra.mxu1 %v28112_v13  ;;  %v28139_v13 = vld [vmem:[%s34697_s7 + $0xc8] sm:$0xff]  }
0x1958   :  { %25249 = vmatmul.mubr.bf16.vlgmr.msra.gmra.mrb[84].mxu1 %v16220_v26 }
0x1a2b   :  { %v17894_v4 = vpop.f32.mrb[84].mxu1 }
0x1a2c   :  { %v17931_v34 = vrot.slane %v17894_v4, 4  ;;  %v25250_v37 = vpop.f32.mrb[85].mxu1 }
0x1a2d   :  { %v17897_v59 = vpop.f32.mrb[86].mxu1  ;;  %v28147_v37 = vld [vmem:[%s34697_s7 + $0xe8] sm:$0xff]  }
0x1a2e   :  { %v17932_v12 = vadd.f32 %v17931_v34, %v17894_v4  ;;  %v25251_v9 = vpop.f32.mrb[87].mxu1  ;;  %v28145_v34 = vld [vmem:[%s34697_s7 + $0xe0] sm:$0xff]   ;;  %v28149_v59 = vld [vmem:[%s34697_s7 + $0xf0] sm:$0xff]  }
0x1a30   :  { %v17933_v2 = vrot.slane %v17932_v12, 2 }
0x1a32   :  { %v17934_v36 = vadd.f32 %v17933_v2, %v17932_v12  ;;  %v28151_v12 = vld [vmem:[%s34697_s7 + $0xf8] sm:$0xff]  }
0x1a34   :  { %v17935_v19 = vrot.slane %v17934_v36, 1 }
0x1a36   :  { %v17936_v3 = vadd.f32 %v17935_v19, %v17934_v36 }
0x1a38   :  { %v17937_v8 = vmul.f32 0.125, %v17936_v3 }
0x1a3a   :  { %v17938_v30 = vsub.f32 %v17894_v4, %v17937_v8  ;;  %v28143_v4 = vld [vmem:[%s34697_s7 + $0xd8] sm:$0xff]  }
0x1a3c   :  { %v17939_v57 = vmul.f32 %v17938_v30, %v17938_v30 }
0x1a3e   :  { %v17940_v14 = vrot.slane %v17939_v57, 4 }
0x1a40   :  { %v17941_v26 = vadd.f32 %v17940_v14, %v17939_v57  ;;  %v28155_v14 = vld [vmem:[%s34703_s13 + $0x50] sm:$0xff]  }
0x1a42   :  { %v17942_v42 = vrot.slane %v17941_v26, 2 }
0x1a44   :  { %v17943_v20 = vadd.f32 %v17942_v42, %v17941_v26 }
0x1a46   :  { %v17944_v60 = vrot.slane %v17943_v20, 1 }
0x1a48   :  { %v17945_v48 = vadd.f32 %v17944_v60, %v17943_v20 }
0x1a4a   :  { %v17946_v0 = vmul.f32 0.125, %v17945_v48 }
0x1a4c   :  { %v17948_v52 = vadd.f32 1e-05, %v17946_v0  ;;  %v28156_v0 = vld [vmem:[%s34703_s13 + $0x58] sm:$0xff]  }
0x1a4e   :  { %28279 = vrsqrt.f32 %v17948_v52 }
0x1a58   :  { %v28280_v17 = vpop.eup %28279 }
0x1a59   :  { %v17950_v50 = vmul.f32 %v28280_v17, %v17938_v30  ;;  %v28154_v30 = vld [vmem:[%s34703_s13 + $0x48] sm:$0xff]   ;;  %v28157_v17 = vld [vmem:[%s34703_s13 + $0x60] sm:$0xff]  }
0x1a5b   :  { %v17957_v15 = vmul.f32 %v21829_v38, %v17950_v50 }
0x1a5d   :  { %v17964_v28 = vadd.f32 %v21830_v49, %v17957_v15 }
0x1a5f   :  { %v17966_v29 = vmax.f32 %v17964_v28, 0.0 }
0x1a61   :  { %v17970_v11 = vpack.c.bf16 %v28306_v40, %v17966_v29  ;;  %v28142_v40 = vld [vmem:[%s34703_s13 + $0x10] sm:$0xff]   ;;  %v28158_v29 = vld [vmem:[%s34703_s13 + $0x68] sm:$0xff]  }
0x1a63   :  { %25252 = vmatprep.subr.bf16.mxu0 %v17970_v11 }
0x1a64   :  { %25253 = vmatpush3.bf16.msra.mxu0 %v17970_v11 }
0x1a65   :  { %25318 = vmatprep.subr.bf16.mxu0 %v28138_v46 }
0x1a67   :  { %25255 = vmatmul.mubr.msk.bf16.vlgmr.msra.gmra.mrb[128].mxu0 %vm13937_vm6, %v28114_v45 }
0x1a68   :  { %25258 = vmatprep.mubr.msk.bf16.mxu0 %vm13937_vm6, %v28115_v55  ;;  %25319 = vmatpush3.bf16.msra.mxu0 %v28138_v46  ;;  %v28159_v46 = vld [vmem:[%s34703_s13 + $0x70] sm:$0xff]  }
0x1a69   :  { %25320 = vmatprep.subr.bf16.mxu0 %v28140_v53 }
0x1a6c   :  { %25321 = vmatpush3.bf16.msra.mxu0 %v28140_v53 }
0x1a6d   :  { %25322 = vmatprep.subr.bf16.mxu0 %v28142_v40 }
0x1a6f   :  { %25259 = vmatmul.mubr.msk.bf16.gmra.mrb[132].mxu0 %vm13937_vm6, %v28116_v6 }
0x1a70   :  { %25262 = vmatprep.mubr.msk.bf16.mxu0 %vm13937_vm6, %v28117_v33  ;;  %25323 = vmatpush3.bf16.msra.mxu0 %v28142_v40  ;;  %v28160_v33 = vld [vmem:[%s34703_s13 + $0x78] sm:$0xff]  }
0x1a71   :  { %25324 = vmatprep.subr.bf16.mxu0 %v28144_v22 }
0x1a74   :  { %25325 = vmatpush3.bf16.msra.mxu0 %v28144_v22 }
0x1a75   :  { %25326 = vmatprep.subr.bf16.mxu0 %v28146_v44 }
0x1a77   :  { %25263 = vmatmul.mubr.msk.bf16.gmra.mrb[136].mxu0 %vm13937_vm6, %v28118_v43 }
0x1a78   :  { %25266 = vmatprep.mubr.msk.bf16.mxu0 %vm13937_vm6, %v28119_v56  ;;  %25327 = vmatpush3.bf16.msra.mxu0 %v28146_v44  ;;  %v28161_v44 = vld [vmem:[%s34703_s13 + $0x80] sm:$0xff]  }
0x1a79   :  { %25328 = vmatprep.subr.bf16.mxu0 %v28148_v51 }
0x1a7c   :  { %25329 = vmatpush3.bf16.msra.mxu0 %v28148_v51 }
0x1a7d   :  { %25330 = vmatprep.subr.bf16.mxu0 %v28150_v62 }
0x1a7f   :  { %25267 = vmatmul.mubr.msk.bf16.gmra.mrb[140].mxu0 %vm13937_vm6, %v28120_v31 }
0x1a80   :  { %25270 = vmatprep.mubr.msk.bf16.mxu0 %vm13937_vm6, %v28121_v41  ;;  %25331 = vmatpush3.bf16.msra.mxu0 %v28150_v62  ;;  %v28162_v41 = vld [vmem:[%s34703_s13 + $0x88] sm:$0xff]  }
0x1a81   :  { %25332 = vmatprep.subr.bf16.mxu0 %v28152_v39 }
0x1a84   :  { %25333 = vmatpush3.bf16.msra.mxu0 %v28152_v39 }
0x1a85   :  { %25338 = vmatprep.subr.bf16.mxu0 %v28153_v1 }
0x1a87   :  { %25271 = vmatmul.mubr.msk.bf16.gmra.mrb[144].mxu0 %vm13937_vm6, %v28122_v58 }
0x1a88   :  { %25274 = vmatprep.mubr.msk.bf16.mxu0 %vm13937_vm6, %v28123_v47  ;;  %v28163_v47 = vld [vmem:[%s34703_s13 + $0x90] sm:$0xff]  }
0x1a8f   :  { %25275 = vmatmul.mubr.msk.bf16.gmra.mrb[148].mxu0 %vm13937_vm6, %v28124_v25 }
0x1a90   :  { %25278 = vmatprep.mubr.msk.bf16.mxu0 %vm13937_vm6, %v28125_v63 }
0x1a97   :  { %25279 = vmatmul.mubr.msk.bf16.gmra.mrb[152].mxu0 %vm13937_vm6, %v28126_v16 }
0x1a98   :  { %25282 = vmatprep.mubr.msk.bf16.mxu0 %vm13937_vm6, %v28127_v21 }
0x1a9f   :  { %25283 = vmatmul.mubr.msk.bf16.gmra.mrb[156].mxu0 %vm13937_vm6, %v28128_v7 }
0x1aa0   :  { %25286 = vmatprep.mubr.msk.bf16.mxu0 %vm13937_vm6, %v28129_v35  ;;  %v28164_v35 = vld [vmem:[%s34703_s13 + $0x98] sm:$0xff]  }
0x1aa7   :  { %25287 = vmatmul.mubr.msk.bf16.gmra.mrb[160].mxu0 %vm13937_vm6, %v28130_v10 }
0x1aa8   :  { %25290 = vmatprep.mubr.msk.bf16.mxu0 %vm13937_vm6, %v28131_v27  ;;  %v28165_v27 = vld [vmem:[%s34703_s13 + $0xa0] sm:$0xff]  }
0x1aaf   :  { %25291 = vmatmul.mubr.msk.bf16.gmra.mrb[164].mxu0 %vm13937_vm6, %v28132_v18 }
0x1ab0   :  { %25294 = vmatprep.mubr.msk.bf16.mxu0 %vm13937_vm6, %v28133_v24 }
0x1ab7   :  { %25295 = vmatmul.mubr.msk.bf16.gmra.mrb[168].mxu0 %vm13937_vm6, %v28134_v23 }
0x1ab8   :  { %25298 = vmatprep.mubr.msk.bf16.mxu0 %vm13937_vm6, %v28135_v32 }
0x1abf   :  { %25299 = vmatmul.mubr.msk.bf16.gmra.mrb[172].mxu0 %vm13937_vm6, %v28136_v5 }
0x1ac0   :  { %25302 = vmatprep.mubr.msk.bf16.mxu0 %vm13937_vm6, %v28137_v61  ;;  %v28166_v61 = vld [vmem:[%s34703_s13 + $0xa8] sm:$0xff]  }
0x1ac7   :  { %25303 = vmatmul.mubr.msk.bf16.gmra.mrb[176].mxu0 %vm13937_vm6, %v28139_v13 }
0x1ac8   :  { %25306 = vmatprep.mubr.msk.bf16.mxu0 %vm13937_vm6, %v28141_v54 }
0x1acf   :  { %25307 = vmatmul.mubr.msk.bf16.gmra.mrb[180].mxu0 %vm13937_vm6, %v28143_v4 }
0x1ad0   :  { %25310 = vmatprep.mubr.msk.bf16.mxu0 %vm13937_vm6, %v28145_v34 }
0x1ad7   :  { %25311 = vmatmul.mubr.msk.bf16.gmra.mrb[184].mxu0 %vm13937_vm6, %v28147_v37 }
0x1ad8   :  { %25314 = vmatprep.mubr.msk.bf16.mxu0 %vm13937_vm6, %v28149_v59  ;;  %v28168_v59 = vld [vmem:[%s34703_s13 + $0xb8] sm:$0xff]  }
0x1adf   :  { %25315 = vmatmul.mubr.msk.bf16.gmra.mrb[188].mxu0 %vm13937_vm6, %v28151_v12 }
0x1b3a   :  { %v25256_v9 = vpop.f32.mrb[128].mxu0 }
0x1b3b   :  { %v18325_v2 = vpop.f32.mrb[129].mxu0 }
0x1b3c   :  { %v25257_v36 = vpop.f32.mrb[130].mxu0 }
0x1b3d   :  { %v18581_v19 = vpack.c.bf16 %v25257_v36, %v25256_v9  ;;  %v18328_v3 = vpop.f32.mrb[131].mxu0  ;;  %v28169_v9 = vld [vmem:[%s34703_s13 + $0xc0] sm:$0xff]  }
0x1b3e   :  { %v18580_v8 = vpack.c.bf16 %v18328_v3, %v18325_v2 }
0x1b40   :  { %25334 = vmatprep.mubr.bf16.mxu0 %v18580_v8 }
0x1b41   :  { %25335 = vmatmul.mubr.bf16.vlgmr.msra.gmra.mrb[192].mxu0 %v18581_v19 }
0x1b42   :  { %25339 = vmatpush3.bf16.msra.mxu0 %v28153_v1  ;;  %v25260_v57 = vpop.f32.mrb[132].mxu0  ;;  %v28167_v1 = vld [vmem:[%s34703_s13 + $0xb0] sm:$0xff]  }
0x1b43   :  { %25340 = vmatprep.subr.bf16.mxu0 %v28154_v30  ;;  %v18341_v26 = vpop.f32.mrb[133].mxu0 }
0x1b44   :  { %v25261_v42 = vpop.f32.mrb[134].mxu0 }
0x1b45   :  { %v18583_v20 = vpack.c.bf16 %v25261_v42, %v25260_v57  ;;  %v18344_v60 = vpop.f32.mrb[135].mxu0 }
0x1b46   :  { %25341 = vmatpush3.bf16.msra.mxu0 %v28154_v30  ;;  %v18582_v48 = vpack.c.bf16 %v18344_v60, %v18341_v26  ;;  %v28170_v30 = vld [vmem:[%s34703_s13 + $0xc8] sm:$0xff]  }
0x1b47   :  { %25342 = vmatprep.subr.bf16.mxu0 %v28155_v14 }
0x1b48   :  { %25354 = vmatprep.mubr.bf16.mxu0 %v18582_v48 }
0x1b4a   :  { %25343 = vmatpush3.bf16.msra.mxu0 %v28155_v14  ;;  %v34087_v52 = vpop.f32.mrb[136].mxu0  ;;  %v28171_v14 = vld [vmem:[%s34703_s13 + $0xd0] sm:$0xff]  }
0x1b4b   :  { %25344 = vmatprep.subr.bf16.mxu0 %v28156_v0  ;;  %v18357_v38 = vpop.f32.mrb[137].mxu0 }
0x1b4c   :  { %v34092_v50 = vpop.f32.mrb[138].mxu0 }
0x1b4d   :  { %v18585_v49 = vpack.c.bf16 %v34092_v50, %v34087_v52  ;;  %v18360_v15 = vpop.f32.mrb[139].mxu0 }
0x1b4e   :  { %25345 = vmatpush3.bf16.msra.mxu0 %v28156_v0  ;;  %v18584_v28 = vpack.c.bf16 %v18360_v15, %v18357_v38  ;;  %v28172_v0 = vld [vmem:[%s34703_s13 + $0xd8] sm:$0xff]  }
0x1b4f   :  { %25346 = vmatprep.subr.bf16.mxu0 %v28157_v17 }
0x1b52   :  { %25347 = vmatpush3.bf16.msra.mxu0 %v28157_v17  ;;  %v34099_v11 = vpop.f32.mrb[140].mxu0  ;;  %v28173_v17 = vld [vmem:[%s34703_s13 + $0xe0] sm:$0xff]  }
0x1b53   :  { %25348 = vmatprep.subr.bf16.mxu0 %v28158_v29  ;;  %v34104_v45 = vpop.f32.mrb[141].mxu0 }
0x1b54   :  { %v34106_v55 = vpop.f32.mrb[142].mxu0 }
0x1b55   :  { %v18587_v53 = vpack.c.bf16 %v34106_v55, %v34099_v11  ;;  %v34110_v40 = vpop.f32.mrb[143].mxu0 }
0x1b56   :  { %25349 = vmatpush3.bf16.msra.mxu0 %v28158_v29  ;;  %v18586_v6 = vpack.c.bf16 %v34110_v40, %v34104_v45  ;;  %v28174_v29 = vld [vmem:[%s34703_s13 + $0xe8] sm:$0xff]   ;;  %v28175_v45 = vld [vmem:[%s34703_s13 + $0xf0] sm:$0xff]  }
0x1b57   :  { %25350 = vmatprep.subr.bf16.mxu0 %v28159_v46 }
0x1b5a   :  { %25351 = vmatpush3.bf16.msra.mxu0 %v28159_v46  ;;  %v34117_v22 = vpop.f32.mrb[144].mxu0 }
0x1b5b   :  { %25352 = vmatprep.subr.bf16.mxu0 %v28160_v33  ;;  %v34122_v43 = vpop.f32.mrb[145].mxu0 }
0x1b5c   :  { %v34124_v56 = vpop.f32.mrb[146].mxu0 }
0x1b5d   :  { %v18589_v51 = vpack.c.bf16 %v34124_v56, %v34117_v22  ;;  %v34128_v62 = vpop.f32.mrb[147].mxu0  ;;  %v28189_v22 = vld [vmem:[%s34703_s13 + $0x160] sm:$0xff]   ;;  %v28190_v56 = vld [vmem:[%s34703_s13 + $0x168] sm:$0xff]  }
0x1b5e   :  { %25353 = vmatpush3.bf16.msra.mxu0 %v28160_v33  ;;  %v18588_v31 = vpack.c.bf16 %v34128_v62, %v34122_v43  ;;  %v28180_v43 = vld [vmem:[%s34703_s13 + $0x118] sm:$0xff]  }
0x1b5f   :  { %25358 = vmatprep.subr.bf16.mxu0 %v28161_v44 }
0x1b61   :  { %25355 = vmatmul.mubr.bf16.vlgmr.msra.gmra.mrb[192].mxu0 %v18583_v20 }
0x1b62   :  { %25359 = vmatpush3.bf16.msra.mxu0 %v28161_v44  ;;  %25374 = vmatprep.mubr.bf16.mxu0 %v18584_v28  ;;  %v34135_v58 = vpop.f32.mrb[148].mxu0 }
0x1b63   :  { %25360 = vmatprep.subr.bf16.mxu0 %v28162_v41  ;;  %v34140_v25 = vpop.f32.mrb[149].mxu0 }
0x1b64   :  { %v34142_v63 = vpop.f32.mrb[150].mxu0 }
0x1b65   :  { %v18591_v16 = vpack.c.bf16 %v34142_v63, %v34135_v58  ;;  %v34146_v21 = vpop.f32.mrb[151].mxu0  ;;  %v28197_v58 = vld [vmem:[%s34703_s13 + $0x1a0] sm:$0xff]   ;;  %v28198_v63 = vld [vmem:[%s34703_s13 + $0x1a8] sm:$0xff]  }
0x1b66   :  { %25361 = vmatpush3.bf16.msra.mxu0 %v28162_v41  ;;  %v18590_v7 = vpack.c.bf16 %v34146_v21, %v34140_v25  ;;  %v28184_v41 = vld [vmem:[%s34703_s13 + $0x138] sm:$0xff]   ;;  %v28193_v21 = vld [vmem:[%s34703_s13 + $0x180] sm:$0xff]  }
0x1b67   :  { %25362 = vmatprep.subr.bf16.mxu0 %v28163_v47  ;;  %v28192_v25 = vld [vmem:[%s34703_s13 + $0x178] sm:$0xff]  }
0x1b6a   :  { %25363 = vmatpush3.bf16.msra.mxu0 %v28163_v47  ;;  %v34153_v10 = vpop.f32.mrb[152].mxu0  ;;  %v28176_v47 = vld [vmem:[%s34703_s13 + $0xf8] sm:$0xff]  }
0x1b6b   :  { %25364 = vmatprep.subr.bf16.mxu0 %v28164_v35  ;;  %v34158_v18 = vpop.f32.mrb[153].mxu0 }
0x1b6c   :  { %v34160_v24 = vpop.f32.mrb[154].mxu0 }
0x1b6d   :  { %v18593_v23 = vpack.c.bf16 %v34160_v24, %v34153_v10  ;;  %v34164_v32 = vpop.f32.mrb[155].mxu0  ;;  %v28205_v10 = vld [vmem:[%s34703_s13 + $0x1e0] sm:$0xff]   ;;  %v28206_v24 = vld [vmem:[%s34703_s13 + $0x1e8] sm:$0xff]  }
0x1b6e   :  { %25365 = vmatpush3.bf16.msra.mxu0 %v28164_v35  ;;  %v18592_v5 = vpack.c.bf16 %v34164_v32, %v34158_v18  ;;  %v28200_v18 = vld [vmem:[%s34703_s13 + $0x1b8] sm:$0xff]   ;;  %v28201_v32 = vld [vmem:[%s34703_s13 + $0x1c0] sm:$0xff]  }
0x1b6f   :  { %25366 = vmatprep.subr.bf16.mxu0 %v28165_v27 }
0x1b72   :  { %25367 = vmatpush3.bf16.msra.mxu0 %v28165_v27  ;;  %v34171_v39 = vpop.f32.mrb[156].mxu0  ;;  %v28177_v27 = vld [vmem:[%s34703_s13 + $0x100] sm:$0xff]  }
0x1b73   :  { %25368 = vmatprep.subr.bf16.mxu0 %v28166_v61  ;;  %v34176_v13 = vpop.f32.mrb[157].mxu0 }
0x1b74   :  { %v34178_v54 = vpop.f32.mrb[158].mxu0 }
0x1b75   :  { %v18595_v4 = vpack.c.bf16 %v34178_v54, %v34171_v39  ;;  %v34182_v34 = vpop.f32.mrb[159].mxu0  ;;  %v28213_v39 = vld [vmem:[%s34703_s13 + $0x220] sm:$0xff]   ;;  %v28214_v54 = vld [vmem:[%s34703_s13 + $0x228] sm:$0xff]  }
0x1b76   :  { %25369 = vmatpush3.bf16.msra.mxu0 %v28166_v61  ;;  %v18594_v37 = vpack.c.bf16 %v34182_v34, %v34176_v13  ;;  %v28208_v13 = vld [vmem:[%s34703_s13 + $0x1f8] sm:$0xff]   ;;  %v28209_v34 = vld [vmem:[%s34703_s13 + $0x200] sm:$0xff]  }
0x1b77   :  { %25370 = vmatprep.subr.bf16.mxu0 %v28167_v1 }
0x1b7a   :  { %25371 = vmatpush3.bf16.msra.mxu0 %v28167_v1  ;;  %v34189_v12 = vpop.f32.mrb[160].mxu0 }
0x1b7b   :  { %25372 = vmatprep.subr.bf16.mxu0 %v28168_v59  ;;  %v34194_v2 = vpop.f32.mrb[161].mxu0 }
0x1b7c   :  { %v34196_v36 = vpop.f32.mrb[162].mxu0 }
0x1b7d   :  { %v18597_v19 = vpack.c.bf16 %v34196_v36, %v34189_v12  ;;  %v34200_v3 = vpop.f32.mrb[163].mxu0  ;;  %v28221_v12 = vld [vmem:[%s34703_s13 + $0x260] sm:$0xff]   ;;  %v28222_v36 = vld [vmem:[%s34703_s13 + $0x268] sm:$0xff]  }
0x1b7e   :  { %25373 = vmatpush3.bf16.msra.mxu0 %v28168_v59  ;;  %v18596_v8 = vpack.c.bf16 %v34200_v3, %v34194_v2  ;;  %v28216_v2 = vld [vmem:[%s34703_s13 + $0x238] sm:$0xff]   ;;  %v28217_v3 = vld [vmem:[%s34703_s13 + $0x240] sm:$0xff]  }
0x1b7f   :  { %25378 = vmatprep.subr.bf16.mxu0 %v28169_v9 }
0x1b81   :  { %25375 = vmatmul.mubr.bf16.vlgmr.msra.gmra.mrb[192].mxu0 %v18585_v49  ;;  %v28185_v49 = vld [vmem:[%s34703_s13 + $0x140] sm:$0xff]  }
0x1b82   :  { %25379 = vmatpush3.bf16.msra.mxu0 %v28169_v9  ;;  %25394 = vmatprep.mubr.bf16.mxu0 %v18586_v6  ;;  %v34213_v57 = vpop.f32.mrb[164].mxu0 }
0x1b83   :  { %25380 = vmatprep.subr.bf16.mxu0 %v28170_v30  ;;  %v34218_v26 = vpop.f32.mrb[165].mxu0 }
0x1b84   :  { %v34220_v42 = vpop.f32.mrb[166].mxu0 }
0x1b85   :  { %v18599_v20 = vpack.c.bf16 %v34220_v42, %v34213_v57  ;;  %v34224_v60 = vpop.f32.mrb[167].mxu0  ;;  %v28229_v57 = vld [vmem:[%s34703_s13 + $0x2a0] sm:$0xff]   ;;  %v28230_v42 = vld [vmem:[%s34703_s13 + $0x2a8] sm:$0xff]  }
0x1b86   :  { %25381 = vmatpush3.bf16.msra.mxu0 %v28170_v30  ;;  %v18598_v48 = vpack.c.bf16 %v34224_v60, %v34218_v26  ;;  %v28183_v30 = vld [vmem:[%s34703_s13 + $0x130] sm:$0xff]   ;;  %v28224_v26 = vld [vmem:[%s34703_s13 + $0x278] sm:$0xff]   ;;  %v28225_v60 = vld [vmem:[%s34703_s13 + $0x280] sm:$0xff]  }
0x1b87   :  { %25382 = vmatprep.subr.bf16.mxu0 %v28171_v14 }
0x1b8a   :  { %25383 = vmatpush3.bf16.msra.mxu0 %v28171_v14  ;;  %v34231_v52 = vpop.f32.mrb[168].mxu0  ;;  %v28178_v14 = vld [vmem:[%s34703_s13 + $0x108] sm:$0xff]  }
0x1b8b   :  { %25384 = vmatprep.subr.bf16.mxu0 %v28172_v0  ;;  %v34236_v38 = vpop.f32.mrb[169].mxu0 }
0x1b8c   :  { %v34238_v50 = vpop.f32.mrb[170].mxu0 }
0x1b8d   :  { %v34242_v15 = vpop.f32.mrb[171].mxu0 }
0x1b8e   :  { %25385 = vmatpush3.bf16.msra.mxu0 %v28172_v0  ;;  %v18600_v28 = vpack.c.bf16 %v34242_v15, %v34236_v38  ;;  %v28232_v38 = vld [vmem:[%s34703_s13 + $0x2b8] sm:$0xff]   ;;  %v28233_v15 = vld [vmem:[%s34703_s13 + $0x2c0] sm:$0xff]  }
0x1b8f   :  { %25386 = vmatprep.subr.bf16.mxu0 %v28173_v17 }
0x1b92   :  { %25387 = vmatpush3.bf16.msra.mxu0 %v28173_v17  ;;  %v34249_v46 = vpop.f32.mrb[172].mxu0  ;;  %v28179_v17 = vld [vmem:[%s34703_s13 + $0x110] sm:$0xff]  }
0x1b93   :  { %25388 = vmatprep.subr.bf16.mxu0 %v28174_v29  ;;  %v34254_v40 = vpop.f32.mrb[173].mxu0 }
0x1b94   :  { %v34256_v6 = vpop.f32.mrb[174].mxu0 }
0x1b95   :  { %v34260_v44 = vpop.f32.mrb[175].mxu0 }
0x1b96   :  { %25389 = vmatpush3.bf16.msra.mxu0 %v28174_v29 }
0x1b97   :  { %25390 = vmatprep.subr.bf16.mxu0 %v28175_v45 }
0x1b9a   :  { %25391 = vmatpush3.bf16.msra.mxu0 %v28175_v45  ;;  %v34267_v35 = vpop.f32.mrb[176].mxu0 }
0x1b9b   :  { %25392 = vmatprep.subr.bf16.mxu0 %v28176_v47  ;;  %v34272_v61 = vpop.f32.mrb[177].mxu0 }
0x1b9c   :  { %v34274_v1 = vpop.f32.mrb[178].mxu0 }
0x1b9d   :  { %v34278_v9 = vpop.f32.mrb[179].mxu0 }
0x1b9e   :  { %25393 = vmatpush3.bf16.msra.mxu0 %v28176_v47 }
0x1b9f   :  { %25398 = vmatprep.subr.bf16.mxu0 %v28177_v27 }
0x1ba1   :  { %25395 = vmatmul.mubr.bf16.vlgmr.msra.gmra.mrb[192].mxu0 %v18587_v53  ;;  %v28182_v53 = vld [vmem:[%s34703_s13 + $0x128] sm:$0xff]  }
0x1ba2   :  { %25399 = vmatpush3.bf16.msra.mxu0 %v28177_v27  ;;  %25414 = vmatprep.mubr.bf16.mxu0 %v18588_v31  ;;  %v34291_v0 = vpop.f32.mrb[180].mxu0  ;;  %v28181_v31 = vld [vmem:[%s34703_s13 + $0x120] sm:$0xff]  }
0x1ba3   :  { %25400 = vmatprep.subr.bf16.mxu0 %v28178_v14  ;;  %v34296_v29 = vpop.f32.mrb[181].mxu0 }
0x1ba4   :  { %v34298_v45 = vpop.f32.mrb[182].mxu0 }
0x1ba5   :  { %v34302_v55 = vpop.f32.mrb[183].mxu0 }
0x1ba6   :  { %25401 = vmatpush3.bf16.msra.mxu0 %v28178_v14 }
0x1ba7   :  { %25402 = vmatprep.subr.bf16.mxu0 %v28179_v17 }
0x1baa   :  { %25403 = vmatpush3.bf16.msra.mxu0 %v28179_v17  ;;  %v34309_v62 = vpop.f32.mrb[184].mxu0 }
0x1bab   :  { %25404 = vmatprep.subr.bf16.mxu0 %v28180_v43  ;;  %v34314_v47 = vpop.f32.mrb[185].mxu0 }
0x1bac   :  { %v34316_v27 = vpop.f32.mrb[186].mxu0 }
0x1bad   :  { %v34320_v11 = vpop.f32.mrb[187].mxu0 }
0x1bae   :  { %25405 = vmatpush3.bf16.msra.mxu0 %v28180_v43 }
0x1baf   :  { %25406 = vmatprep.subr.bf16.mxu0 %v28181_v31 }
0x1bb2   :  { %25407 = vmatpush3.bf16.msra.mxu0 %v28181_v31  ;;  %v34327_v59 = vpop.f32.mrb[188].mxu0 }
0x1bb3   :  { %25408 = vmatprep.subr.bf16.mxu0 %v28182_v53  ;;  %v34332_v14 = vpop.f32.mrb[189].mxu0 }
0x1bb4   :  { %v34334_v33 = vpop.f32.mrb[190].mxu0 }
0x1bb5   :  { %v18611_v43 = vpack.c.bf16 %v34334_v33, %v34327_v59  ;;  %v34338_v17 = vpop.f32.mrb[191].mxu0 }
0x1bb6   :  { %25409 = vmatpush3.bf16.msra.mxu0 %v28182_v53  ;;  %v18610_v31 = vpack.c.bf16 %v34338_v17, %v34332_v14  ;;  %v28186_v53 = vld [vmem:[%s34703_s13 + $0x148] sm:$0xff]   ;;  %v28271_v14 = vld [vmem:[%s34703_s13 + $0x3f0] sm:$0xff]   ;;  %v28272_v17 = vld [vmem:[%s34703_s13 + $0x3f8] sm:$0xff]  }
0x1bb7   :  { %25410 = vmatprep.subr.bf16.mxu0 %v28183_v30 }
0x1bba   :  { %25411 = vmatpush3.bf16.msra.mxu0 %v28183_v30  ;;  %v28187_v30 = vld [vmem:[%s34703_s13 + $0x150] sm:$0xff]  }
0x1bbb   :  { %25412 = vmatprep.subr.bf16.mxu0 %v28184_v41 }
0x1bbe   :  { %25413 = vmatpush3.bf16.msra.mxu0 %v28184_v41  ;;  %v28188_v41 = vld [vmem:[%s34703_s13 + $0x158] sm:$0xff]  }
0x1bbf   :  { %25418 = vmatprep.subr.bf16.mxu0 %v28185_v49 }
0x1bc1   :  { %25415 = vmatmul.mubr.bf16.vlgmr.msra.gmra.mrb[192].mxu0 %v18589_v51  ;;  %v28191_v51 = vld [vmem:[%s34703_s13 + $0x170] sm:$0xff]  }
0x1bc2   :  { %25419 = vmatpush3.bf16.msra.mxu0 %v28185_v49  ;;  %25434 = vmatprep.mubr.bf16.mxu0 %v18590_v7  ;;  %v28194_v7 = vld [vmem:[%s34703_s13 + $0x188] sm:$0xff]   ;;  %v28195_v49 = vld [vmem:[%s34703_s13 + $0x190] sm:$0xff]  }
0x1bc3   :  { %25420 = vmatprep.subr.bf16.mxu0 %v28186_v53 }
0x1bc6   :  { %25421 = vmatpush3.bf16.msra.mxu0 %v28186_v53  ;;  %v28196_v53 = vld [vmem:[%s34703_s13 + $0x198] sm:$0xff]  }
0x1bc7   :  { %25422 = vmatprep.subr.bf16.mxu0 %v28187_v30 }
0x1bca   :  { %25423 = vmatpush3.bf16.msra.mxu0 %v28187_v30  ;;  %v28203_v30 = vld [vmem:[%s34703_s13 + $0x1d0] sm:$0xff]  }
0x1bcb   :  { %25424 = vmatprep.subr.bf16.mxu0 %v28188_v41 }
0x1bce   :  { %25425 = vmatpush3.bf16.msra.mxu0 %v28188_v41  ;;  %v28204_v41 = vld [vmem:[%s34703_s13 + $0x1d8] sm:$0xff]  }
0x1bcf   :  { %25426 = vmatprep.subr.bf16.mxu0 %v28189_v22 }
0x1bd2   :  { %25427 = vmatpush3.bf16.msra.mxu0 %v28189_v22  ;;  %v28211_v22 = vld [vmem:[%s34703_s13 + $0x210] sm:$0xff]  }
0x1bd3   :  { %25428 = vmatprep.subr.bf16.mxu0 %v28190_v56 }
0x1bd6   :  { %25429 = vmatpush3.bf16.msra.mxu0 %v28190_v56  ;;  %v28212_v56 = vld [vmem:[%s34703_s13 + $0x218] sm:$0xff]  }
0x1bd7   :  { %25430 = vmatprep.subr.bf16.mxu0 %v28191_v51 }
0x1bda   :  { %25431 = vmatpush3.bf16.msra.mxu0 %v28191_v51  ;;  %v28219_v51 = vld [vmem:[%s34703_s13 + $0x250] sm:$0xff]  }
0x1bdb   :  { %25432 = vmatprep.subr.bf16.mxu0 %v28192_v25 }
0x1bde   :  { %25433 = vmatpush3.bf16.msra.mxu0 %v28192_v25  ;;  %v28220_v25 = vld [vmem:[%s34703_s13 + $0x258] sm:$0xff]  }
0x1bdf   :  { %25438 = vmatprep.subr.bf16.mxu0 %v28193_v21 }
0x1be1   :  { %25435 = vmatmul.mubr.bf16.vlgmr.msra.gmra.mrb[192].mxu0 %v18591_v16  ;;  %v28199_v16 = vld [vmem:[%s34703_s13 + $0x1b0] sm:$0xff]  }
0x1be2   :  { %25439 = vmatpush3.bf16.msra.mxu0 %v28193_v21  ;;  %25454 = vmatprep.mubr.bf16.mxu0 %v18592_v5  ;;  %v28202_v5 = vld [vmem:[%s34703_s13 + $0x1c8] sm:$0xff]   ;;  %v28227_v21 = vld [vmem:[%s34703_s13 + $0x290] sm:$0xff]  }
0x1be3   :  { %25440 = vmatprep.subr.bf16.mxu0 %v28194_v7 }
0x1be6   :  { %25441 = vmatpush3.bf16.msra.mxu0 %v28194_v7  ;;  %v28228_v7 = vld [vmem:[%s34703_s13 + $0x298] sm:$0xff]  }
0x1be7   :  { %25442 = vmatprep.subr.bf16.mxu0 %v28195_v49 }
0x1bea   :  { %25443 = vmatpush3.bf16.msra.mxu0 %v28195_v49  ;;  %v34868_v49 = vpack.c.bf16 %v34238_v50, %v34231_v52  ;;  %v28237_v52 = vld [vmem:[%s34703_s13 + $0x2e0] sm:$0xff]   ;;  %v28238_v50 = vld [vmem:[%s34703_s13 + $0x2e8] sm:$0xff]  }
0x1beb   :  { %25444 = vmatprep.subr.bf16.mxu0 %v28196_v53 }
0x1bee   :  { %25445 = vmatpush3.bf16.msra.mxu0 %v28196_v53  ;;  %v34869_v53 = vpack.c.bf16 %v34260_v44, %v34254_v40  ;;  %v28239_v40 = vld [vmem:[%s34703_s13 + $0x2f0] sm:$0xff]   ;;  %v28240_v44 = vld [vmem:[%s34703_s13 + $0x2f8] sm:$0xff]  }
0x1bef   :  { %25446 = vmatprep.subr.bf16.mxu0 %v28197_v58 }
0x1bf2   :  { %25447 = vmatpush3.bf16.msra.mxu0 %v28197_v58  ;;  %v28235_v58 = vld [vmem:[%s34703_s13 + $0x2d0] sm:$0xff]  }
0x1bf3   :  { %25448 = vmatprep.subr.bf16.mxu0 %v28198_v63 }
0x1bf6   :  { %25449 = vmatpush3.bf16.msra.mxu0 %v28198_v63  ;;  %v28236_v63 = vld [vmem:[%s34703_s13 + $0x2d8] sm:$0xff]  }
0x1bf7   :  { %25450 = vmatprep.subr.bf16.mxu0 %v28199_v16 }
0x1bfa   :  { %25451 = vmatpush3.bf16.msra.mxu0 %v28199_v16  ;;  %v28241_v16 = vld [vmem:[%s34703_s13 + $0x300] sm:$0xff]  }
0x1bfb   :  { %25452 = vmatprep.subr.bf16.mxu0 %v28200_v18 }
0x1bfe   :  { %25453 = vmatpush3.bf16.msra.mxu0 %v28200_v18  ;;  %v28242_v18 = vld [vmem:[%s34703_s13 + $0x308] sm:$0xff]  }
0x1bff   :  { %25458 = vmatprep.subr.bf16.mxu0 %v28201_v32 }
0x1c01   :  { %25455 = vmatmul.mubr.bf16.vlgmr.msra.gmra.mrb[192].mxu0 %v18593_v23  ;;  %v28207_v23 = vld [vmem:[%s34703_s13 + $0x1f0] sm:$0xff]  }
0x1c02   :  { %25459 = vmatpush3.bf16.msra.mxu0 %v28201_v32  ;;  %25474 = vmatprep.mubr.bf16.mxu0 %v18594_v37  ;;  %v28210_v37 = vld [vmem:[%s34703_s13 + $0x208] sm:$0xff]   ;;  %v34870_v32 = vpack.c.bf16 %v34256_v6, %v34249_v46  ;;  %v28245_v46 = vld [vmem:[%s34703_s13 + $0x320] sm:$0xff]  }
0x1c03   :  { %25460 = vmatprep.subr.bf16.mxu0 %v28202_v5  ;;  %v28246_v6 = vld [vmem:[%s34703_s13 + $0x328] sm:$0xff]  }
0x1c06   :  { %25461 = vmatpush3.bf16.msra.mxu0 %v28202_v5  ;;  %v34871_v5 = vpack.c.bf16 %v34278_v9, %v34272_v61  ;;  %v28247_v61 = vld [vmem:[%s34703_s13 + $0x330] sm:$0xff]   ;;  %v28248_v9 = vld [vmem:[%s34703_s13 + $0x338] sm:$0xff]  }
0x1c07   :  { %25462 = vmatprep.subr.bf16.mxu0 %v28203_v30 }
0x1c0a   :  { %25463 = vmatpush3.bf16.msra.mxu0 %v28203_v30  ;;  %v28243_v30 = vld [vmem:[%s34703_s13 + $0x310] sm:$0xff]  }
0x1c0b   :  { %25464 = vmatprep.subr.bf16.mxu0 %v28204_v41 }
0x1c0e   :  { %25465 = vmatpush3.bf16.msra.mxu0 %v28204_v41  ;;  %v28244_v41 = vld [vmem:[%s34703_s13 + $0x318] sm:$0xff]  }
0x1c0f   :  { %25466 = vmatprep.subr.bf16.mxu0 %v28205_v10 }
0x1c12   :  { %25467 = vmatpush3.bf16.msra.mxu0 %v28205_v10  ;;  %v28249_v10 = vld [vmem:[%s34703_s13 + $0x340] sm:$0xff]  }
0x1c13   :  { %25468 = vmatprep.subr.bf16.mxu0 %v28206_v24 }
0x1c16   :  { %25469 = vmatpush3.bf16.msra.mxu0 %v28206_v24  ;;  %v28250_v24 = vld [vmem:[%s34703_s13 + $0x348] sm:$0xff]  }
0x1c17   :  { %25470 = vmatprep.subr.bf16.mxu0 %v28207_v23 }
0x1c1a   :  { %25471 = vmatpush3.bf16.msra.mxu0 %v28207_v23  ;;  %v34872_v23 = vpack.c.bf16 %v34274_v1, %v34267_v35  ;;  %v28253_v35 = vld [vmem:[%s34703_s13 + $0x360] sm:$0xff]   ;;  %v28254_v1 = vld [vmem:[%s34703_s13 + $0x368] sm:$0xff]  }
0x1c1b   :  { %25472 = vmatprep.subr.bf16.mxu0 %v28208_v13 }
0x1c1e   :  { %25473 = vmatpush3.bf16.msra.mxu0 %v28208_v13  ;;  %v34873_v13 = vpack.c.bf16 %v34302_v55, %v34296_v29  ;;  %v28255_v29 = vld [vmem:[%s34703_s13 + $0x370] sm:$0xff]   ;;  %v28256_v55 = vld [vmem:[%s34703_s13 + $0x378] sm:$0xff]  }
0x1c1f   :  { %25478 = vmatprep.subr.bf16.mxu0 %v28209_v34 }
0x1c21   :  { %25475 = vmatmul.mubr.bf16.vlgmr.msra.gmra.mrb[192].mxu0 %v18595_v4  ;;  %v28215_v4 = vld [vmem:[%s34703_s13 + $0x230] sm:$0xff]  }
0x1c22   :  { %25479 = vmatpush3.bf16.msra.mxu0 %v28209_v34  ;;  %25494 = vmatprep.mubr.bf16.mxu0 %v18596_v8  ;;  %v28218_v8 = vld [vmem:[%s34703_s13 + $0x248] sm:$0xff]   ;;  %v28251_v34 = vld [vmem:[%s34703_s13 + $0x350] sm:$0xff]  }
0x1c23   :  { %25480 = vmatprep.subr.bf16.mxu0 %v28210_v37 }
0x1c26   :  { %25481 = vmatpush3.bf16.msra.mxu0 %v28210_v37  ;;  %v28252_v37 = vld [vmem:[%s34703_s13 + $0x358] sm:$0xff]  }
0x1c27   :  { %25482 = vmatprep.subr.bf16.mxu0 %v28211_v22 }
0x1c2a   :  { %25483 = vmatpush3.bf16.msra.mxu0 %v28211_v22  ;;  %v28257_v22 = vld [vmem:[%s34703_s13 + $0x380] sm:$0xff]  }
0x1c2b   :  { %25484 = vmatprep.subr.bf16.mxu0 %v28212_v56 }
0x1c2e   :  { %25485 = vmatpush3.bf16.msra.mxu0 %v28212_v56  ;;  %v28258_v56 = vld [vmem:[%s34703_s13 + $0x388] sm:$0xff]  }
0x1c2f   :  { %25486 = vmatprep.subr.bf16.mxu0 %v28213_v39 }
0x1c32   :  { %25487 = vmatpush3.bf16.msra.mxu0 %v28213_v39  ;;  %v34874_v39 = vpack.c.bf16 %v34298_v45, %v34291_v0  ;;  %v28261_v0 = vld [vmem:[%s34703_s13 + $0x3a0] sm:$0xff]   ;;  %v28262_v45 = vld [vmem:[%s34703_s13 + $0x3a8] sm:$0xff]  }
0x1c33   :  { %25488 = vmatprep.subr.bf16.mxu0 %v28214_v54 }
0x1c36   :  { %25489 = vmatpush3.bf16.msra.mxu0 %v28214_v54  ;;  %v34875_v54 = vpack.c.bf16 %v34320_v11, %v34314_v47  ;;  %v28263_v11 = vld [vmem:[%s34703_s13 + $0x3b0] sm:$0xff]   ;;  %v28264_v47 = vld [vmem:[%s34703_s13 + $0x3b8] sm:$0xff]  }
0x1c37   :  { %25490 = vmatprep.subr.bf16.mxu0 %v28215_v4 }
0x1c3a   :  { %25491 = vmatpush3.bf16.msra.mxu0 %v28215_v4  ;;  %v28259_v4 = vld [vmem:[%s34703_s13 + $0x390] sm:$0xff]  }
0x1c3b   :  { %25492 = vmatprep.subr.bf16.mxu0 %v28216_v2 }
0x1c3e   :  { %25493 = vmatpush3.bf16.msra.mxu0 %v28216_v2  ;;  %v28260_v2 = vld [vmem:[%s34703_s13 + $0x398] sm:$0xff]  }
0x1c3f   :  { %25498 = vmatprep.subr.bf16.mxu0 %v28217_v3 }
0x1c41   :  { %25495 = vmatmul.mubr.bf16.vlgmr.msra.gmra.mrb[192].mxu0 %v18597_v19  ;;  %v28223_v19 = vld [vmem:[%s34703_s13 + $0x270] sm:$0xff]  }
0x1c42   :  { %25499 = vmatpush3.bf16.msra.mxu0 %v28217_v3  ;;  %25514 = vmatprep.mubr.bf16.mxu0 %v18598_v48  ;;  %v28226_v48 = vld [vmem:[%s34703_s13 + $0x288] sm:$0xff]   ;;  %v28265_v3 = vld [vmem:[%s34703_s13 + $0x3c0] sm:$0xff]  }
0x1c43   :  { %25500 = vmatprep.subr.bf16.mxu0 %v28218_v8 }
0x1c46   :  { %25501 = vmatpush3.bf16.msra.mxu0 %v28218_v8  ;;  %v28266_v8 = vld [vmem:[%s34703_s13 + $0x3c8] sm:$0xff]  }
0x1c47   :  { %25502 = vmatprep.subr.bf16.mxu0 %v28219_v51 }
0x1c4a   :  { %25503 = vmatpush3.bf16.msra.mxu0 %v28219_v51  ;;  %v34876_v51 = vpack.c.bf16 %v34316_v27, %v34309_v62  ;;  %v28269_v62 = vld [vmem:[%s34703_s13 + $0x3e0] sm:$0xff]   ;;  %v28270_v27 = vld [vmem:[%s34703_s13 + $0x3e8] sm:$0xff]  }
0x1c4b   :  { %25504 = vmatprep.subr.bf16.mxu0 %v28220_v25 }
0x1c4e   :  { %25505 = vmatpush3.bf16.msra.mxu0 %v28220_v25  ;;  %v28267_v25 = vld [vmem:[%s34703_s13 + $0x3d0] sm:$0xff]  }
0x1c4f   :  { %25506 = vmatprep.subr.bf16.mxu0 %v28221_v12 }
0x1c52   :  { %25507 = vmatpush3.bf16.msra.mxu0 %v28221_v12  ;;  %v28268_v12 = vld [vmem:[%s34703_s13 + $0x3d8] sm:$0xff]  }
0x1c53   :  { %25508 = vmatprep.subr.bf16.mxu0 %v28222_v36 }
0x1c56   :  { %25509 = vmatpush3.bf16.msra.mxu0 %v28222_v36 }
0x1c57   :  { %25510 = vmatprep.subr.bf16.mxu0 %v28223_v19 }
0x1c5a   :  { %25511 = vmatpush3.bf16.msra.mxu0 %v28223_v19 }
0x1c5b   :  { %25512 = vmatprep.subr.bf16.mxu0 %v28224_v26 }
0x1c5e   :  { %25513 = vmatpush3.bf16.msra.mxu0 %v28224_v26 }
0x1c5f   :  { %25518 = vmatprep.subr.bf16.mxu0 %v28225_v60 }
0x1c61   :  { %25515 = vmatmul.mubr.bf16.vlgmr.msra.gmra.mrb[192].mxu0 %v18599_v20  ;;  %v28231_v20 = vld [vmem:[%s34703_s13 + $0x2b0] sm:$0xff]  }
0x1c62   :  { %25519 = vmatpush3.bf16.msra.mxu0 %v28225_v60  ;;  %25534 = vmatprep.mubr.bf16.mxu0 %v18600_v28  ;;  %v28234_v28 = vld [vmem:[%s34703_s13 + $0x2c8] sm:$0xff]  }
0x1c63   :  { %25520 = vmatprep.subr.bf16.mxu0 %v28226_v48 }
0x1c66   :  { %25521 = vmatpush3.bf16.msra.mxu0 %v28226_v48 }
0x1c67   :  { %25522 = vmatprep.subr.bf16.mxu0 %v28227_v21 }
0x1c6a   :  { %25523 = vmatpush3.bf16.msra.mxu0 %v28227_v21 }
0x1c6b   :  { %25524 = vmatprep.subr.bf16.mxu0 %v28228_v7 }
0x1c6e   :  { %25525 = vmatpush3.bf16.msra.mxu0 %v28228_v7 }
0x1c6f   :  { %25526 = vmatprep.subr.bf16.mxu0 %v28229_v57 }
0x1c72   :  { %25527 = vmatpush3.bf16.msra.mxu0 %v28229_v57 }
0x1c73   :  { %25528 = vmatprep.subr.bf16.mxu0 %v28230_v42 }
0x1c76   :  { %25529 = vmatpush3.bf16.msra.mxu0 %v28230_v42 }
0x1c77   :  { %25530 = vmatprep.subr.bf16.mxu0 %v28231_v20 }
0x1c7a   :  { %25531 = vmatpush3.bf16.msra.mxu0 %v28231_v20 }
0x1c7b   :  { %25532 = vmatprep.subr.bf16.mxu0 %v28232_v38 }
0x1c7e   :  { %25533 = vmatpush3.bf16.msra.mxu0 %v28232_v38 }
0x1c7f   :  { %25538 = vmatprep.subr.bf16.mxu0 %v28233_v15 }
0x1c81   :  { %25535 = vmatmul.mubr.bf16.vlgmr.msra.gmra.mrb[192].mxu0 %v34868_v49 }
0x1c82   :  { %25539 = vmatpush3.bf16.msra.mxu0 %v28233_v15  ;;  %25554 = vmatprep.mubr.bf16.mxu0 %v34869_v53 }
0x1c83   :  { %25540 = vmatprep.subr.bf16.mxu0 %v28234_v28 }
0x1c86   :  { %25541 = vmatpush3.bf16.msra.mxu0 %v28234_v28 }
0x1c87   :  { %25542 = vmatprep.subr.bf16.mxu0 %v28235_v58 }
0x1c8a   :  { %25543 = vmatpush3.bf16.msra.mxu0 %v28235_v58 }
0x1c8b   :  { %25544 = vmatprep.subr.bf16.mxu0 %v28236_v63 }
0x1c8e   :  { %25545 = vmatpush3.bf16.msra.mxu0 %v28236_v63 }
0x1c8f   :  { %25546 = vmatprep.subr.bf16.mxu0 %v28237_v52 }
0x1c92   :  { %25547 = vmatpush3.bf16.msra.mxu0 %v28237_v52 }
0x1c93   :  { %25548 = vmatprep.subr.bf16.mxu0 %v28238_v50 }
0x1c96   :  { %25549 = vmatpush3.bf16.msra.mxu0 %v28238_v50 }
0x1c97   :  { %25550 = vmatprep.subr.bf16.mxu0 %v28239_v40 }
0x1c9a   :  { %25551 = vmatpush3.bf16.msra.mxu0 %v28239_v40 }
0x1c9b   :  { %25552 = vmatprep.subr.bf16.mxu0 %v28240_v44 }
0x1c9e   :  { %25553 = vmatpush3.bf16.msra.mxu0 %v28240_v44 }
0x1c9f   :  { %25558 = vmatprep.subr.bf16.mxu0 %v28241_v16 }
0x1ca1   :  { %25555 = vmatmul.mubr.bf16.vlgmr.msra.gmra.mrb[192].mxu0 %v34870_v32 }
0x1ca2   :  { %25559 = vmatpush3.bf16.msra.mxu0 %v28241_v16  ;;  %25574 = vmatprep.mubr.bf16.mxu0 %v34871_v5 }
0x1ca3   :  { %25560 = vmatprep.subr.bf16.mxu0 %v28242_v18 }
0x1ca6   :  { %25561 = vmatpush3.bf16.msra.mxu0 %v28242_v18 }
0x1ca7   :  { %25562 = vmatprep.subr.bf16.mxu0 %v28243_v30 }
0x1caa   :  { %25563 = vmatpush3.bf16.msra.mxu0 %v28243_v30 }
0x1cab   :  { %25564 = vmatprep.subr.bf16.mxu0 %v28244_v41 }
0x1cae   :  { %25565 = vmatpush3.bf16.msra.mxu0 %v28244_v41 }
0x1caf   :  { %25566 = vmatprep.subr.bf16.mxu0 %v28245_v46 }
0x1cb2   :  { %25567 = vmatpush3.bf16.msra.mxu0 %v28245_v46 }
0x1cb3   :  { %25568 = vmatprep.subr.bf16.mxu0 %v28246_v6 }
0x1cb6   :  { %25569 = vmatpush3.bf16.msra.mxu0 %v28246_v6 }
0x1cb7   :  { %25570 = vmatprep.subr.bf16.mxu0 %v28247_v61 }
0x1cba   :  { %25571 = vmatpush3.bf16.msra.mxu0 %v28247_v61 }
0x1cbb   :  { %25572 = vmatprep.subr.bf16.mxu0 %v28248_v9 }
0x1cbe   :  { %25573 = vmatpush3.bf16.msra.mxu0 %v28248_v9 }
0x1cbf   :  { %25578 = vmatprep.subr.bf16.mxu0 %v28249_v10 }
0x1cc1   :  { %25575 = vmatmul.mubr.bf16.vlgmr.msra.gmra.mrb[192].mxu0 %v34872_v23 }
0x1cc2   :  { %25579 = vmatpush3.bf16.msra.mxu0 %v28249_v10  ;;  %25594 = vmatprep.mubr.bf16.mxu0 %v34873_v13 }
0x1cc3   :  { %25580 = vmatprep.subr.bf16.mxu0 %v28250_v24 }
0x1cc6   :  { %25581 = vmatpush3.bf16.msra.mxu0 %v28250_v24 }
0x1cc7   :  { %25582 = vmatprep.subr.bf16.mxu0 %v28251_v34 }
0x1cca   :  { %25583 = vmatpush3.bf16.msra.mxu0 %v28251_v34 }
0x1ccb   :  { %25584 = vmatprep.subr.bf16.mxu0 %v28252_v37 }
0x1cce   :  { %25585 = vmatpush3.bf16.msra.mxu0 %v28252_v37 }
0x1ccf   :  { %25586 = vmatprep.subr.bf16.mxu0 %v28253_v35 }
0x1cd2   :  { %25587 = vmatpush3.bf16.msra.mxu0 %v28253_v35 }
0x1cd3   :  { %25588 = vmatprep.subr.bf16.mxu0 %v28254_v1 }
0x1cd6   :  { %25589 = vmatpush3.bf16.msra.mxu0 %v28254_v1 }
0x1cd7   :  { %25590 = vmatprep.subr.bf16.mxu0 %v28255_v29 }
0x1cda   :  { %25591 = vmatpush3.bf16.msra.mxu0 %v28255_v29 }
0x1cdb   :  { %25592 = vmatprep.subr.bf16.mxu0 %v28256_v55 }
0x1cde   :  { %25593 = vmatpush3.bf16.msra.mxu0 %v28256_v55 }
0x1cdf   :  { %25598 = vmatprep.subr.bf16.mxu0 %v28257_v22 }
0x1ce1   :  { %25595 = vmatmul.mubr.bf16.vlgmr.msra.gmra.mrb[192].mxu0 %v34874_v39 }
0x1ce2   :  { %25599 = vmatpush3.bf16.msra.mxu0 %v28257_v22  ;;  %25614 = vmatprep.mubr.bf16.mxu0 %v34875_v54 }
0x1ce3   :  { %25600 = vmatprep.subr.bf16.mxu0 %v28258_v56 }
0x1ce6   :  { %25601 = vmatpush3.bf16.msra.mxu0 %v28258_v56 }
0x1ce7   :  { %25602 = vmatprep.subr.bf16.mxu0 %v28259_v4 }
0x1cea   :  { %25603 = vmatpush3.bf16.msra.mxu0 %v28259_v4 }
0x1ceb   :  { %25604 = vmatprep.subr.bf16.mxu0 %v28260_v2 }
0x1cee   :  { %25605 = vmatpush3.bf16.msra.mxu0 %v28260_v2 }
0x1cef   :  { %25606 = vmatprep.subr.bf16.mxu0 %v28261_v0 }
0x1cf2   :  { %25607 = vmatpush3.bf16.msra.mxu0 %v28261_v0 }
0x1cf3   :  { %25608 = vmatprep.subr.bf16.mxu0 %v28262_v45 }
0x1cf6   :  { %25609 = vmatpush3.bf16.msra.mxu0 %v28262_v45 }
0x1cf7   :  { %25610 = vmatprep.subr.bf16.mxu0 %v28263_v11 }
0x1cfa   :  { %25611 = vmatpush3.bf16.msra.mxu0 %v28263_v11 }
0x1cfb   :  { %25612 = vmatprep.subr.bf16.mxu0 %v28264_v47 }
0x1cfe   :  { %25613 = vmatpush3.bf16.msra.mxu0 %v28264_v47 }
0x1cff   :  { %25618 = vmatprep.subr.bf16.mxu0 %v28265_v3 }
0x1d01   :  { %25615 = vmatmul.mubr.bf16.vlgmr.msra.gmra.mrb[192].mxu0 %v34876_v51 }
0x1d02   :  { %25619 = vmatpush3.bf16.msra.mxu0 %v28265_v3  ;;  %25634 = vmatprep.mubr.bf16.mxu0 %v18610_v31 }
0x1d03   :  { %25620 = vmatprep.subr.bf16.mxu0 %v28266_v8 }
0x1d06   :  { %25621 = vmatpush3.bf16.msra.mxu0 %v28266_v8 }
0x1d07   :  { %25622 = vmatprep.subr.bf16.mxu0 %v28267_v25 }
0x1d0a   :  { %25623 = vmatpush3.bf16.msra.mxu0 %v28267_v25 }
0x1d0b   :  { %25624 = vmatprep.subr.bf16.mxu0 %v28268_v12 }
0x1d0e   :  { %25625 = vmatpush3.bf16.msra.mxu0 %v28268_v12 }
0x1d0f   :  { %25626 = vmatprep.subr.bf16.mxu0 %v28269_v62 }
0x1d12   :  { %25627 = vmatpush3.bf16.msra.mxu0 %v28269_v62 }
0x1d13   :  { %25628 = vmatprep.subr.bf16.mxu0 %v28270_v27 }
0x1d16   :  { %25629 = vmatpush3.bf16.msra.mxu0 %v28270_v27 }
0x1d17   :  { %25630 = vmatprep.subr.bf16.mxu0 %v28271_v14 }
0x1d1a   :  { %25631 = vmatpush3.bf16.msra.mxu0 %v28271_v14 }
0x1d1b   :  { %25632 = vmatprep.subr.bf16.mxu0 %v28272_v17 }
0x1d1e   :  { %25633 = vmatpush3.bf16.msra.mxu0 %v28272_v17 }
0x1d21   :  { %25635 = vmatmul.mubr.bf16.vlgmr.msra.gmra.mrb[192].mxu0 %v18611_v43 }
0x1df4   :  { %v25636_v31 = vpop.f32.mrb[192].mxu0 }
0x1df5   :  { %20482 = vst [vmem:[#allocation2 + $0x10] sm:$0xff] %v25636_v31  ;;  %v20405_v36 = vpop.f32.mrb[193].mxu0 }
0x1df6   :  { %20480 = vst [vmem:[#allocation2] sm:$0xff] %v20405_v36  ;;  %v25637_v19 = vpop.f32.mrb[194].mxu0 }
0x1df7   :  { %20483 = vst [vmem:[#allocation2 + $0x18] sm:$0xff] %v25637_v19  ;;  %v20408_v26 = vpop.f32.mrb[195].mxu0 }
0x1df8   :  { %20481 = vst [vmem:[#allocation2 + $0x8] sm:$0xff] %v20408_v26 }
0x1df9   :  { %28292 = shalt.err (!%p28289_p4)
}
0x1dfa   :  { %s28293_s2 = scalar_lea.hbm %s34706_s16, 512 }
0x1dfb   :  { %p28294_p5 = scmp.ne.s32.totalorder %s34706_s16, %s28293_s2  ;;  %p28297_p6 = scmp.lt.u32.totalorder %s28293_s2, %s34706_s16 }
0x1dfd   :  { %p28299_p7 = pnand %p28297_p6, %p28294_p5 }
0x1dff   :  { %28302 = shalt.err (!%p28299_p7)
}
0x1e00   :  { %s28310_s11 = smov 128   ;;  %s28311_s0 = smov 8  }
0x1e01   :  { %20495 = dma.vmem_to_hbm [thread:$0]  %s20490_s4, 512, %s34706_s16, [#allocation3], %s28310_s11, %s28310_s11, %s28311_s0  }
0x1e02   :  { %28303 = dma.done.wait [#allocation3], 512  }
0x1e03   :  { %28304 = vsyncadd [#allocation3], 4294966784 }
0x1e04   :  { %20499 = vsyncpa [#allocation3], 1 }

</bundles_post_ra>
